<compile_context>
chip_gen: v7x
topology: tpu7x:2x2x1
jax: 0.10.0
libtpu: 0.0.40
codegen_flags: <defaults>
</compile_context>

<pallas_src>
import numpy as np

import jax
import jax.numpy as jnp
from jax.experimental import pallas as pl
from jax.experimental.pallas import tpu as pltpu


# ------------------------- static geometry (from the PyTorch module) -----------

_H0, _W0 = 32, 32          # input spatial (implied by fc1 = 16*5*5)
_CIN = 3
_CINP = 8                  # input channels padded 3 -> 8 (clean matmul K)
_K = 5                     # conv kernel size
_H1, _W1 = 28, 28          # conv1 output spatial
_HP1, _WP1 = 14, 14        # pool1 output spatial
_H2, _W2 = 10, 10          # conv2 output spatial
_HP2, _WP2 = 5, 5          # pool2 output spatial
_C1M = 16                  # merged conv1 out channels (2*6, padded to 16)
_C2M = 32                  # merged conv2 out channels (2*16)

# shifted-slab lengths (spatial flattened into the lane dim)
_L1 = (_H1 - 1) * _W0 + _W1                     # 892  conv1 output columns
_LP1 = 2 * (_HP1 - 1) * _W0 + 2 * (_WP1 - 1) + 1  # 859  pool1 pre-select width
_L2 = (_H2 - 1) * _WP1 + _W2                    # 136  conv2 output columns
_LP2 = 2 * (_HP2 - 1) * _WP1 + 2 * (_WP2 - 1) + 1  # 121  pool2 pre-select width


# ------------------------- fused kernel ----------------------------------------

def _conv_accum(act, wp_ref, width, length):
    """Valid conv over a (C, H*W)-flattened activation via 25 shifted matmuls."""
    acc = None
    for idx in range(_K * _K):
        off = (idx // _K) * width + (idx % _K)
        term = jnp.dot(wp_ref[idx], act[:, off:off + length],
                       preferred_element_type=jnp.float32)
        acc = term if acc is None else acc + term
    return acc


def _pool2x2(act, width, length, sel_ref):
    """2x2/2 max pool: max of 4 lane-shifted views, then column-select matmul."""
    m = jnp.maximum(
        jnp.maximum(act[:, 0:length], act[:, 1:1 + length]),
        jnp.maximum(act[:, width:width + length],
                    act[:, width + 1:width + 1 + length]))
    return jnp.dot(m, sel_ref[...], preferred_element_type=jnp.float32)


def _masternet_kernel(x_ref, w1p_ref, b1_ref, w2p_ref, b2_ref,
                      sel1_ref, sel2_ref,
                      wfc1_ref, bfc1_ref, wfc2_ref, bfc2_ref,
                      wfc3_ref, bfc3_ref, wfin_ref, bfin_ref, o_ref):
    f32 = jnp.float32
    a0 = x_ref[0]                                            # (8, 1024)

    # conv1 (both sub-models stacked in output channels) + bias + ReLU
    c1 = _conv_accum(a0, w1p_ref, _W0, _L1)                  # (16, 892)
    c1 = jnp.maximum(c1 + b1_ref[...], 0.0)

    # pool1 -> (16, 196) with lanes = h*14 + w
    p1 = _pool2x2(c1, _W0, _LP1, sel1_ref)

    # conv2 (block-diagonal over sub-models) + bias + ReLU
    c2 = _conv_accum(p1, w2p_ref, _WP1, _L2)                 # (32, 136)
    c2 = jnp.maximum(c2 + b2_ref[...], 0.0)

    # pool2 -> (32, 25) with lanes = h*5 + w
    p2 = _pool2x2(c2, _WP1, _LP2, sel2_ref)

    # fc1 (block-diagonal 800 -> 240): contraction unrolled over merged channels
    h = bfc1_ref[...]                                        # (1, 240)
    for c in range(wfc1_ref.shape[0]):
        h = h + jnp.dot(p2[c:c + 1, :], wfc1_ref[c],
                        preferred_element_type=f32)
    h = jnp.maximum(h, 0.0)

    # fc2, fc3 (block-diagonal) and the final Linear, all in-kernel
    h = jnp.maximum(jnp.dot(h, wfc2_ref[...], preferred_element_type=f32)
                    + bfc2_ref[...], 0.0)                    # (1, 168)
    h = jnp.dot(h, wfc3_ref[...], preferred_element_type=f32) + bfc3_ref[...]
    y = jnp.dot(h, wfin_ref[...], preferred_element_type=f32) + bfin_ref[...]
    o_ref[0] = y                                             # (1, class_num)


# ------------------------- host-side wrappers -----------------------------------

_WEIGHT_ORDER = ["w1p", "b1", "w2p", "b2", "sel1", "sel2",
                 "wfc1", "bfc1", "wfc2", "bfc2", "wfc3", "bfc3", "wfin", "bfin"]


def _const_block_spec(arr):
    shape = arr.shape
    return pl.BlockSpec(shape, lambda n: (0,) * len(shape))


def masternet_v0_forward(x, prep):
    """x: (N, 3, 32, 32) f32; prep: output of prepare_kernel_params."""
    N = x.shape[0]
    cls = prep["bfin"].shape[-1]
    # Only wrapper-side glue: flatten spatial into lanes and zero-pad Cin 3 -> 8.
    x_r = jnp.pad(x.astype(jnp.float32).reshape(N, _CIN, _H0 * _W0),
                  ((0, 0), (0, _CINP - _CIN), (0, 0)))

    weights = [prep[k] for k in _WEIGHT_ORDER]
    in_specs = [pl.BlockSpec((1, _CINP, _H0 * _W0), lambda n: (n, 0, 0))]
    in_specs += [_const_block_spec(w) for w in weights]
    out_spec = pl.BlockSpec((1, 1, cls), lambda n: (n, 0, 0))

    out = pl.pallas_call(
        _masternet_kernel,
        out_shape=jax.ShapeDtypeStruct((N, 1, cls), jnp.float32),
        grid_spec=pltpu.PrefetchScalarGridSpec(
            num_scalar_prefetch=0,
            grid=(N,),
            in_specs=in_specs,
            out_specs=out_spec),
        compiler_params=pltpu.CompilerParams(
            dimension_semantics=("parallel",)),
    )(x_r, *weights)
    return out.reshape(N, cls)


def prepare_kernel_params(params):
    """Merge the two sub-models + final Linear into the fused-kernel layout
    (done once; pre-transposed, block-diagonal, zero-padded)."""
    assert len(params["sub_models"]) == 2
    sa, sb = params["sub_models"]
    cls = params["final_b"].shape[0]
    f32 = jnp.float32

    # conv1: stack output channels (6+6 -> 12, pad to 16), pad Cin 3 -> 8.
    w1 = jnp.zeros((_C1M, _CINP, _K, _K), f32)
    w1 = w1.at[0:6, 0:3].set(sa["conv1_w"]).at[6:12, 0:3].set(sb["conv1_w"])
    w1p = jnp.transpose(w1, (2, 3, 0, 1)).reshape(_K * _K, _C1M, _CINP)
    b1 = jnp.zeros((_C1M, 1), f32)
    b1 = b1.at[0:6, 0].set(sa["conv1_b"]).at[6:12, 0].set(sb["conv1_b"])

    # conv2: block-diagonal in (out, in) channels.
    w2 = jnp.zeros((_C2M, _C1M, _K, _K), f32)
    w2 = w2.at[0:16, 0:6].set(sa["conv2_w"]).at[16:32, 6:12].set(sb["conv2_w"])
    w2p = jnp.transpose(w2, (2, 3, 0, 1)).reshape(_K * _K, _C2M, _C1M)
    b2 = jnp.concatenate([sa["conv2_b"], sb["conv2_b"]]).reshape(_C2M, 1)

    # constant 0/1 column-selection matrices for the fused 2x2 max-pools.
    sel1 = np.zeros((_LP1, _HP1 * _WP1), np.float32)
    for i in range(_HP1):
        for j in range(_WP1):
            sel1[2 * i * _W0 + 2 * j, i * _WP1 + j] = 1.0
    sel2 = np.zeros((_LP2, _HP2 * _WP2), np.float32)
    for i in range(_HP2):
        for j in range(_WP2):
            sel2[2 * i * _WP1 + 2 * j, i * _WP2 + j] = 1.0

    # fc1 (120, 400) per sub-model -> per-merged-channel (25, 240) block-diag.
    fa = jnp.transpose(sa["fc1_w"].reshape(120, 16, 25), (1, 2, 0))  # (16,25,120)
    fb = jnp.transpose(sb["fc1_w"].reshape(120, 16, 25), (1, 2, 0))
    wfc1 = jnp.zeros((_C2M, 25, 240), f32)
    wfc1 = wfc1.at[0:16, :, 0:120].set(fa).at[16:32, :, 120:240].set(fb)
    bfc1 = jnp.concatenate([sa["fc1_b"], sb["fc1_b"]]).reshape(1, 240)

    # fc2 / fc3: block-diagonal, pre-transposed to (K, O).
    wfc2 = jnp.zeros((240, 168), f32)
    wfc2 = wfc2.at[0:120, 0:84].set(sa["fc2_w"].T).at[120:240, 84:168].set(sb["fc2_w"].T)
    bfc2 = jnp.concatenate([sa["fc2_b"], sb["fc2_b"]]).reshape(1, 168)

    wfc3 = jnp.zeros((168, 2 * cls), f32)
    wfc3 = wfc3.at[0:84, 0:cls].set(sa["fc3_w"].T).at[84:168, cls:2 * cls].set(sb["fc3_w"].T)
    bfc3 = jnp.concatenate([sa["fc3_b"], sb["fc3_b"]]).reshape(1, 2 * cls)

    wfin = params["final_w"].T                                # (2*cls, cls)
    bfin = params["final_b"].reshape(1, cls)

    return {"w1p": w1p, "b1": b1, "w2p": w2p, "b2": b2,
            "sel1": jnp.asarray(sel1), "sel2": jnp.asarray(sel2),
            "wfc1": wfc1, "bfc1": bfc1, "wfc2": wfc2, "bfc2": bfc2,
            "wfc3": wfc3, "bfc3": bfc3, "wfin": wfin, "bfin": bfin}


# ------------------------- parameter init (PyTorch layout) ----------------------

def init_simplenet_params(key, class_num):
    ks = jax.random.split(key, 10)
    s = 0.05
    return {
        "conv1_w": s * jax.random.normal(ks[0], (6, 3, 5, 5), jnp.float32),
        "conv1_b": s * jax.random.normal(ks[1], (6,), jnp.float32),
        "conv2_w": s * jax.random.normal(ks[2], (16, 6, 5, 5), jnp.float32),
        "conv2_b": s * jax.random.normal(ks[3], (16,), jnp.float32),
        "fc1_w": s * jax.random.normal(ks[4], (120, 16 * 5 * 5), jnp.float32),
        "fc1_b": s * jax.random.normal(ks[5], (120,), jnp.float32),
        "fc2_w": s * jax.random.normal(ks[6], (84, 120), jnp.float32),
        "fc2_b": s * jax.random.normal(ks[7], (84,), jnp.float32),
        "fc3_w": s * jax.random.normal(ks[8], (class_num, 84), jnp.float32),
        "fc3_b": s * jax.random.normal(ks[9], (class_num,), jnp.float32),
    }


def init_masternet_params(key, class_num, n_sub=2):
    keys = jax.random.split(key, n_sub + 2)
    subs = [init_simplenet_params(keys[i], class_num) for i in range(n_sub)]
    s = 0.05
    return {
        "sub_models": subs,
        "final_w": s * jax.random.normal(keys[n_sub], (class_num, class_num * n_sub), jnp.float32),
        "final_b": s * jax.random.normal(keys[n_sub + 1], (class_num,), jnp.float32),
    }


# ------------------------- pure-JAX reference (mirrors the PyTorch module) ------

def _ref_simplenet(x, p):
    hi = jax.lax.Precision.HIGHEST

    def conv(x, w, b):
        out = jax.lax.conv_general_dilated(
            x, w, (1, 1), "VALID",
            dimension_numbers=("NCHW", "OIHW", "NCHW"), precision=hi)
        return out + b[None, :, None, None]

    def pool(x):
        return jax.lax.reduce_window(x, -jnp.inf, jax.lax.max,
                                     (1, 1, 2, 2), (1, 1, 2, 2), "VALID")

    x = pool(jax.nn.relu(conv(x, p["conv1_w"], p["conv1_b"])))
    x = pool(jax.nn.relu(conv(x, p["conv2_w"], p["conv2_b"])))
    x = x.reshape(x.shape[0], -1)
    x = jax.nn.relu(jnp.dot(x, p["fc1_w"].T, precision=hi) + p["fc1_b"])
    x = jax.nn.relu(jnp.dot(x, p["fc2_w"].T, precision=hi) + p["fc2_b"])
    return jnp.dot(x, p["fc3_w"].T, precision=hi) + p["fc3_b"]


def _ref_masternet(x, params):
    hi = jax.lax.Precision.HIGHEST
    outs = [_ref_simplenet(x, sp) for sp in params["sub_models"]]
    out = jnp.concatenate(outs, axis=1)
    return jnp.dot(out, params["final_w"].T, precision=hi) + params["final_b"]


# ------------------------- main --------------------------------------------------

if __name__ == "__main__":
    class_num = 10
    key = jax.random.PRNGKey(0)
    k_param, k_x = jax.random.split(key)

    params = init_masternet_params(k_param, class_num, n_sub=2)
    prep = prepare_kernel_params(params)            # one-time weight re-layout

    # SimpleNet's fc1 (16*5*5) implies 32x32 spatial input with 3 channels.
    x = jax.random.normal(k_x, (2, 3, 32, 32), jnp.float32)

    fwd = jax.jit(masternet_v0_forward)
    out = jax.block_until_ready(fwd(x, prep))

    assert out.shape == (2, class_num), out.shape
    assert bool(jnp.all(jnp.isfinite(out)))

    # Sanity check against a pure-JAX reference of the PyTorch forward.
    ref = _ref_masternet(x, params)
    err = float(jnp.max(jnp.abs(out - ref)))
    assert err < 2e-3, f"kernel/reference mismatch: max abs err = {err}"

    print("KERNEL_OK")
</pallas_src>

<mosaic_0001>
module attributes {stable_mosaic.version = 11 : i64} {
  func.func @_masternet_kernel(%arg0: i32, %arg1: memref<1x8x1024xf32, #tpu.memory_space<vmem>>, %arg2: memref<25x16x8xf32, #tpu.memory_space<vmem>>, %arg3: memref<16x1xf32, #tpu.memory_space<vmem>>, %arg4: memref<25x32x16xf32, #tpu.memory_space<vmem>>, %arg5: memref<32x1xf32, #tpu.memory_space<vmem>>, %arg6: memref<859x196xf32, #tpu.memory_space<vmem>>, %arg7: memref<121x25xf32, #tpu.memory_space<vmem>>, %arg8: memref<32x25x240xf32, #tpu.memory_space<vmem>>, %arg9: memref<1x240xf32, #tpu.memory_space<vmem>>, %arg10: memref<240x168xf32, #tpu.memory_space<vmem>>, %arg11: memref<1x168xf32, #tpu.memory_space<vmem>>, %arg12: memref<168x20xf32, #tpu.memory_space<vmem>>, %arg13: memref<1x20xf32, #tpu.memory_space<vmem>>, %arg14: memref<20x10xf32, #tpu.memory_space<vmem>>, %arg15: memref<1x10xf32, #tpu.memory_space<vmem>>, %arg16: memref<1x1x10xf32, #tpu.memory_space<vmem>>) attributes {dimension_semantics = [#tpu.dimension_semantics<parallel>], iteration_bounds = array<i64: 2>, scalar_prefetch = 0 : i64, scratch_operands = 0 : i64, tpu.core_type = #tpu.core_type<tc>, window_params = [{transform_indices = @transform_0, window_bounds = array<i64: 1, 8, 1024>}, {pipeline_mode = #tpu.pipeline_mode<synchronous>, transform_indices = @transform_1, window_bounds = array<i64: 25, 16, 8>}, {pipeline_mode = #tpu.pipeline_mode<synchronous>, transform_indices = @transform_2, window_bounds = array<i64: 16, 1>}, {pipeline_mode = #tpu.pipeline_mode<synchronous>, transform_indices = @transform_3, window_bounds = array<i64: 25, 32, 16>}, {pipeline_mode = #tpu.pipeline_mode<synchronous>, transform_indices = @transform_4, window_bounds = array<i64: 32, 1>}, {pipeline_mode = #tpu.pipeline_mode<synchronous>, transform_indices = @transform_5, window_bounds = array<i64: 859, 196>}, {pipeline_mode = #tpu.pipeline_mode<synchronous>, transform_indices = @transform_6, window_bounds = array<i64: 121, 25>}, {pipeline_mode = #tpu.pipeline_mode<synchronous>, transform_indices = @transform_7, window_bounds = array<i64: 32, 25, 240>}, {pipeline_mode = #tpu.pipeline_mode<synchronous>, transform_indices = @transform_8, window_bounds = array<i64: 1, 240>}, {pipeline_mode = #tpu.pipeline_mode<synchronous>, transform_indices = @transform_9, window_bounds = array<i64: 240, 168>}, {pipeline_mode = #tpu.pipeline_mode<synchronous>, transform_indices = @transform_10, window_bounds = array<i64: 1, 168>}, {pipeline_mode = #tpu.pipeline_mode<synchronous>, transform_indices = @transform_11, window_bounds = array<i64: 168, 20>}, {pipeline_mode = #tpu.pipeline_mode<synchronous>, transform_indices = @transform_12, window_bounds = array<i64: 1, 20>}, {pipeline_mode = #tpu.pipeline_mode<synchronous>, transform_indices = @transform_13, window_bounds = array<i64: 20, 10>}, {pipeline_mode = #tpu.pipeline_mode<synchronous>, transform_indices = @transform_14, window_bounds = array<i64: 1, 10>}, {transform_indices = @transform_15, window_bounds = array<i64: 1, 1, 10>}]} {
    %c0 = arith.constant 0 : index
    %c0_0 = arith.constant 0 : index
    %c0_1 = arith.constant 0 : index
    %0 = vector.load %arg1[%c0, %c0_0, %c0_1] : memref<1x8x1024xf32, #tpu.memory_space<vmem>>, vector<1x8x1024xf32>
    %1 = vector.shape_cast %0 : vector<1x8x1024xf32> to vector<8x1024xf32>
    %c0_2 = arith.constant 0 : index
    %c0_3 = arith.constant 0 : index
    %c0_4 = arith.constant 0 : index
    %2 = vector.load %arg2[%c0_2, %c0_3, %c0_4] : memref<25x16x8xf32, #tpu.memory_space<vmem>>, vector<1x16x8xf32>
    %3 = vector.shape_cast %2 : vector<1x16x8xf32> to vector<16x8xf32>
    %4 = vector.extract_strided_slice %1 {offsets = [0, 0], sizes = [8, 892], strides = [1, 1]} : vector<8x1024xf32> to vector<8x892xf32>
    %cst = arith.constant dense<0.000000e+00> : vector<16x892xf32>
    %5 = tpu.matmul %3, %4, %cst {dimension_numbers = #tpu.dot_dimension_numbers<[1], [0], [0], [1], [0, 0, 1, 1], [], []>} : vector<16x8xf32>, vector<8x892xf32>, vector<16x892xf32> -> vector<16x892xf32>
    %c1 = arith.constant 1 : index
    %c0_5 = arith.constant 0 : index
    %c0_6 = arith.constant 0 : index
    %6 = vector.load %arg2[%c1, %c0_5, %c0_6] : memref<25x16x8xf32, #tpu.memory_space<vmem>>, vector<1x16x8xf32>
    %7 = vector.shape_cast %6 : vector<1x16x8xf32> to vector<16x8xf32>
    %8 = vector.extract_strided_slice %1 {offsets = [0, 1], sizes = [8, 892], strides = [1, 1]} : vector<8x1024xf32> to vector<8x892xf32>
    %cst_7 = arith.constant dense<0.000000e+00> : vector<16x892xf32>
    %9 = tpu.matmul %7, %8, %cst_7 {dimension_numbers = #tpu.dot_dimension_numbers<[1], [0], [0], [1], [0, 0, 1, 1], [], []>} : vector<16x8xf32>, vector<8x892xf32>, vector<16x892xf32> -> vector<16x892xf32>
    %10 = arith.addf %5, %9 : vector<16x892xf32>
    %c2 = arith.constant 2 : index
    %c0_8 = arith.constant 0 : index
    %c0_9 = arith.constant 0 : index
    %11 = vector.load %arg2[%c2, %c0_8, %c0_9] : memref<25x16x8xf32, #tpu.memory_space<vmem>>, vector<1x16x8xf32>
    %12 = vector.shape_cast %11 : vector<1x16x8xf32> to vector<16x8xf32>
    %13 = vector.extract_strided_slice %1 {offsets = [0, 2], sizes = [8, 892], strides = [1, 1]} : vector<8x1024xf32> to vector<8x892xf32>
    %cst_10 = arith.constant dense<0.000000e+00> : vector<16x892xf32>
    %14 = tpu.matmul %12, %13, %cst_10 {dimension_numbers = #tpu.dot_dimension_numbers<[1], [0], [0], [1], [0, 0, 1, 1], [], []>} : vector<16x8xf32>, vector<8x892xf32>, vector<16x892xf32> -> vector<16x892xf32>
    %15 = arith.addf %10, %14 : vector<16x892xf32>
    %c3 = arith.constant 3 : index
    %c0_11 = arith.constant 0 : index
    %c0_12 = arith.constant 0 : index
    %16 = vector.load %arg2[%c3, %c0_11, %c0_12] : memref<25x16x8xf32, #tpu.memory_space<vmem>>, vector<1x16x8xf32>
    %17 = vector.shape_cast %16 : vector<1x16x8xf32> to vector<16x8xf32>
    %18 = vector.extract_strided_slice %1 {offsets = [0, 3], sizes = [8, 892], strides = [1, 1]} : vector<8x1024xf32> to vector<8x892xf32>
    %cst_13 = arith.constant dense<0.000000e+00> : vector<16x892xf32>
    %19 = tpu.matmul %17, %18, %cst_13 {dimension_numbers = #tpu.dot_dimension_numbers<[1], [0], [0], [1], [0, 0, 1, 1], [], []>} : vector<16x8xf32>, vector<8x892xf32>, vector<16x892xf32> -> vector<16x892xf32>
    %20 = arith.addf %15, %19 : vector<16x892xf32>
    %c4 = arith.constant 4 : index
    %c0_14 = arith.constant 0 : index
    %c0_15 = arith.constant 0 : index
    %21 = vector.load %arg2[%c4, %c0_14, %c0_15] : memref<25x16x8xf32, #tpu.memory_space<vmem>>, vector<1x16x8xf32>
    %22 = vector.shape_cast %21 : vector<1x16x8xf32> to vector<16x8xf32>
    %23 = vector.extract_strided_slice %1 {offsets = [0, 4], sizes = [8, 892], strides = [1, 1]} : vector<8x1024xf32> to vector<8x892xf32>
    %cst_16 = arith.constant dense<0.000000e+00> : vector<16x892xf32>
    %24 = tpu.matmul %22, %23, %cst_16 {dimension_numbers = #tpu.dot_dimension_numbers<[1], [0], [0], [1], [0, 0, 1, 1], [], []>} : vector<16x8xf32>, vector<8x892xf32>, vector<16x892xf32> -> vector<16x892xf32>
    %25 = arith.addf %20, %24 : vector<16x892xf32>
    %c5 = arith.constant 5 : index
    %c0_17 = arith.constant 0 : index
    %c0_18 = arith.constant 0 : index
    %26 = vector.load %arg2[%c5, %c0_17, %c0_18] : memref<25x16x8xf32, #tpu.memory_space<vmem>>, vector<1x16x8xf32>
    %27 = vector.shape_cast %26 : vector<1x16x8xf32> to vector<16x8xf32>
    %28 = vector.extract_strided_slice %1 {offsets = [0, 32], sizes = [8, 892], strides = [1, 1]} : vector<8x1024xf32> to vector<8x892xf32>
    %cst_19 = arith.constant dense<0.000000e+00> : vector<16x892xf32>
    %29 = tpu.matmul %27, %28, %cst_19 {dimension_numbers = #tpu.dot_dimension_numbers<[1], [0], [0], [1], [0, 0, 1, 1], [], []>} : vector<16x8xf32>, vector<8x892xf32>, vector<16x892xf32> -> vector<16x892xf32>
    %30 = arith.addf %25, %29 : vector<16x892xf32>
    %c6 = arith.constant 6 : index
    %c0_20 = arith.constant 0 : index
    %c0_21 = arith.constant 0 : index
    %31 = vector.load %arg2[%c6, %c0_20, %c0_21] : memref<25x16x8xf32, #tpu.memory_space<vmem>>, vector<1x16x8xf32>
    %32 = vector.shape_cast %31 : vector<1x16x8xf32> to vector<16x8xf32>
    %33 = vector.extract_strided_slice %1 {offsets = [0, 33], sizes = [8, 892], strides = [1, 1]} : vector<8x1024xf32> to vector<8x892xf32>
    %cst_22 = arith.constant dense<0.000000e+00> : vector<16x892xf32>
    %34 = tpu.matmul %32, %33, %cst_22 {dimension_numbers = #tpu.dot_dimension_numbers<[1], [0], [0], [1], [0, 0, 1, 1], [], []>} : vector<16x8xf32>, vector<8x892xf32>, vector<16x892xf32> -> vector<16x892xf32>
    %35 = arith.addf %30, %34 : vector<16x892xf32>
    %c7 = arith.constant 7 : index
    %c0_23 = arith.constant 0 : index
    %c0_24 = arith.constant 0 : index
    %36 = vector.load %arg2[%c7, %c0_23, %c0_24] : memref<25x16x8xf32, #tpu.memory_space<vmem>>, vector<1x16x8xf32>
    %37 = vector.shape_cast %36 : vector<1x16x8xf32> to vector<16x8xf32>
    %38 = vector.extract_strided_slice %1 {offsets = [0, 34], sizes = [8, 892], strides = [1, 1]} : vector<8x1024xf32> to vector<8x892xf32>
    %cst_25 = arith.constant dense<0.000000e+00> : vector<16x892xf32>
    %39 = tpu.matmul %37, %38, %cst_25 {dimension_numbers = #tpu.dot_dimension_numbers<[1], [0], [0], [1], [0, 0, 1, 1], [], []>} : vector<16x8xf32>, vector<8x892xf32>, vector<16x892xf32> -> vector<16x892xf32>
    %40 = arith.addf %35, %39 : vector<16x892xf32>
    %c8 = arith.constant 8 : index
    %c0_26 = arith.constant 0 : index
    %c0_27 = arith.constant 0 : index
    %41 = vector.load %arg2[%c8, %c0_26, %c0_27] : memref<25x16x8xf32, #tpu.memory_space<vmem>>, vector<1x16x8xf32>
    %42 = vector.shape_cast %41 : vector<1x16x8xf32> to vector<16x8xf32>
    %43 = vector.extract_strided_slice %1 {offsets = [0, 35], sizes = [8, 892], strides = [1, 1]} : vector<8x1024xf32> to vector<8x892xf32>
    %cst_28 = arith.constant dense<0.000000e+00> : vector<16x892xf32>
    %44 = tpu.matmul %42, %43, %cst_28 {dimension_numbers = #tpu.dot_dimension_numbers<[1], [0], [0], [1], [0, 0, 1, 1], [], []>} : vector<16x8xf32>, vector<8x892xf32>, vector<16x892xf32> -> vector<16x892xf32>
    %45 = arith.addf %40, %44 : vector<16x892xf32>
    %c9 = arith.constant 9 : index
    %c0_29 = arith.constant 0 : index
    %c0_30 = arith.constant 0 : index
    %46 = vector.load %arg2[%c9, %c0_29, %c0_30] : memref<25x16x8xf32, #tpu.memory_space<vmem>>, vector<1x16x8xf32>
    %47 = vector.shape_cast %46 : vector<1x16x8xf32> to vector<16x8xf32>
    %48 = vector.extract_strided_slice %1 {offsets = [0, 36], sizes = [8, 892], strides = [1, 1]} : vector<8x1024xf32> to vector<8x892xf32>
    %cst_31 = arith.constant dense<0.000000e+00> : vector<16x892xf32>
    %49 = tpu.matmul %47, %48, %cst_31 {dimension_numbers = #tpu.dot_dimension_numbers<[1], [0], [0], [1], [0, 0, 1, 1], [], []>} : vector<16x8xf32>, vector<8x892xf32>, vector<16x892xf32> -> vector<16x892xf32>
    %50 = arith.addf %45, %49 : vector<16x892xf32>
    %c10 = arith.constant 10 : index
    %c0_32 = arith.constant 0 : index
    %c0_33 = arith.constant 0 : index
    %51 = vector.load %arg2[%c10, %c0_32, %c0_33] : memref<25x16x8xf32, #tpu.memory_space<vmem>>, vector<1x16x8xf32>
    %52 = vector.shape_cast %51 : vector<1x16x8xf32> to vector<16x8xf32>
    %53 = vector.extract_strided_slice %1 {offsets = [0, 64], sizes = [8, 892], strides = [1, 1]} : vector<8x1024xf32> to vector<8x892xf32>
    %cst_34 = arith.constant dense<0.000000e+00> : vector<16x892xf32>
    %54 = tpu.matmul %52, %53, %cst_34 {dimension_numbers = #tpu.dot_dimension_numbers<[1], [0], [0], [1], [0, 0, 1, 1], [], []>} : vector<16x8xf32>, vector<8x892xf32>, vector<16x892xf32> -> vector<16x892xf32>
    %55 = arith.addf %50, %54 : vector<16x892xf32>
    %c11 = arith.constant 11 : index
    %c0_35 = arith.constant 0 : index
    %c0_36 = arith.constant 0 : index
    %56 = vector.load %arg2[%c11, %c0_35, %c0_36] : memref<25x16x8xf32, #tpu.memory_space<vmem>>, vector<1x16x8xf32>
    %57 = vector.shape_cast %56 : vector<1x16x8xf32> to vector<16x8xf32>
    %58 = vector.extract_strided_slice %1 {offsets = [0, 65], sizes = [8, 892], strides = [1, 1]} : vector<8x1024xf32> to vector<8x892xf32>
    %cst_37 = arith.constant dense<0.000000e+00> : vector<16x892xf32>
    %59 = tpu.matmul %57, %58, %cst_37 {dimension_numbers = #tpu.dot_dimension_numbers<[1], [0], [0], [1], [0, 0, 1, 1], [], []>} : vector<16x8xf32>, vector<8x892xf32>, vector<16x892xf32> -> vector<16x892xf32>
    %60 = arith.addf %55, %59 : vector<16x892xf32>
    %c12 = arith.constant 12 : index
    %c0_38 = arith.constant 0 : index
    %c0_39 = arith.constant 0 : index
    %61 = vector.load %arg2[%c12, %c0_38, %c0_39] : memref<25x16x8xf32, #tpu.memory_space<vmem>>, vector<1x16x8xf32>
    %62 = vector.shape_cast %61 : vector<1x16x8xf32> to vector<16x8xf32>
    %63 = vector.extract_strided_slice %1 {offsets = [0, 66], sizes = [8, 892], strides = [1, 1]} : vector<8x1024xf32> to vector<8x892xf32>
    %cst_40 = arith.constant dense<0.000000e+00> : vector<16x892xf32>
    %64 = tpu.matmul %62, %63, %cst_40 {dimension_numbers = #tpu.dot_dimension_numbers<[1], [0], [0], [1], [0, 0, 1, 1], [], []>} : vector<16x8xf32>, vector<8x892xf32>, vector<16x892xf32> -> vector<16x892xf32>
    %65 = arith.addf %60, %64 : vector<16x892xf32>
    %c13 = arith.constant 13 : index
    %c0_41 = arith.constant 0 : index
    %c0_42 = arith.constant 0 : index
    %66 = vector.load %arg2[%c13, %c0_41, %c0_42] : memref<25x16x8xf32, #tpu.memory_space<vmem>>, vector<1x16x8xf32>
    %67 = vector.shape_cast %66 : vector<1x16x8xf32> to vector<16x8xf32>
    %68 = vector.extract_strided_slice %1 {offsets = [0, 67], sizes = [8, 892], strides = [1, 1]} : vector<8x1024xf32> to vector<8x892xf32>
    %cst_43 = arith.constant dense<0.000000e+00> : vector<16x892xf32>
    %69 = tpu.matmul %67, %68, %cst_43 {dimension_numbers = #tpu.dot_dimension_numbers<[1], [0], [0], [1], [0, 0, 1, 1], [], []>} : vector<16x8xf32>, vector<8x892xf32>, vector<16x892xf32> -> vector<16x892xf32>
    %70 = arith.addf %65, %69 : vector<16x892xf32>
    %c14 = arith.constant 14 : index
    %c0_44 = arith.constant 0 : index
    %c0_45 = arith.constant 0 : index
    %71 = vector.load %arg2[%c14, %c0_44, %c0_45] : memref<25x16x8xf32, #tpu.memory_space<vmem>>, vector<1x16x8xf32>
    %72 = vector.shape_cast %71 : vector<1x16x8xf32> to vector<16x8xf32>
    %73 = vector.extract_strided_slice %1 {offsets = [0, 68], sizes = [8, 892], strides = [1, 1]} : vector<8x1024xf32> to vector<8x892xf32>
    %cst_46 = arith.constant dense<0.000000e+00> : vector<16x892xf32>
    %74 = tpu.matmul %72, %73, %cst_46 {dimension_numbers = #tpu.dot_dimension_numbers<[1], [0], [0], [1], [0, 0, 1, 1], [], []>} : vector<16x8xf32>, vector<8x892xf32>, vector<16x892xf32> -> vector<16x892xf32>
    %75 = arith.addf %70, %74 : vector<16x892xf32>
    %c15 = arith.constant 15 : index
    %c0_47 = arith.constant 0 : index
    %c0_48 = arith.constant 0 : index
    %76 = vector.load %arg2[%c15, %c0_47, %c0_48] : memref<25x16x8xf32, #tpu.memory_space<vmem>>, vector<1x16x8xf32>
    %77 = vector.shape_cast %76 : vector<1x16x8xf32> to vector<16x8xf32>
    %78 = vector.extract_strided_slice %1 {offsets = [0, 96], sizes = [8, 892], strides = [1, 1]} : vector<8x1024xf32> to vector<8x892xf32>
    %cst_49 = arith.constant dense<0.000000e+00> : vector<16x892xf32>
    %79 = tpu.matmul %77, %78, %cst_49 {dimension_numbers = #tpu.dot_dimension_numbers<[1], [0], [0], [1], [0, 0, 1, 1], [], []>} : vector<16x8xf32>, vector<8x892xf32>, vector<16x892xf32> -> vector<16x892xf32>
    %80 = arith.addf %75, %79 : vector<16x892xf32>
    %c16 = arith.constant 16 : index
    %c0_50 = arith.constant 0 : index
    %c0_51 = arith.constant 0 : index
    %81 = vector.load %arg2[%c16, %c0_50, %c0_51] : memref<25x16x8xf32, #tpu.memory_space<vmem>>, vector<1x16x8xf32>
    %82 = vector.shape_cast %81 : vector<1x16x8xf32> to vector<16x8xf32>
    %83 = vector.extract_strided_slice %1 {offsets = [0, 97], sizes = [8, 892], strides = [1, 1]} : vector<8x1024xf32> to vector<8x892xf32>
    %cst_52 = arith.constant dense<0.000000e+00> : vector<16x892xf32>
    %84 = tpu.matmul %82, %83, %cst_52 {dimension_numbers = #tpu.dot_dimension_numbers<[1], [0], [0], [1], [0, 0, 1, 1], [], []>} : vector<16x8xf32>, vector<8x892xf32>, vector<16x892xf32> -> vector<16x892xf32>
    %85 = arith.addf %80, %84 : vector<16x892xf32>
    %c17 = arith.constant 17 : index
    %c0_53 = arith.constant 0 : index
    %c0_54 = arith.constant 0 : index
    %86 = vector.load %arg2[%c17, %c0_53, %c0_54] : memref<25x16x8xf32, #tpu.memory_space<vmem>>, vector<1x16x8xf32>
    %87 = vector.shape_cast %86 : vector<1x16x8xf32> to vector<16x8xf32>
    %88 = vector.extract_strided_slice %1 {offsets = [0, 98], sizes = [8, 892], strides = [1, 1]} : vector<8x1024xf32> to vector<8x892xf32>
    %cst_55 = arith.constant dense<0.000000e+00> : vector<16x892xf32>
    %89 = tpu.matmul %87, %88, %cst_55 {dimension_numbers = #tpu.dot_dimension_numbers<[1], [0], [0], [1], [0, 0, 1, 1], [], []>} : vector<16x8xf32>, vector<8x892xf32>, vector<16x892xf32> -> vector<16x892xf32>
    %90 = arith.addf %85, %89 : vector<16x892xf32>
    %c18 = arith.constant 18 : index
    %c0_56 = arith.constant 0 : index
    %c0_57 = arith.constant 0 : index
    %91 = vector.load %arg2[%c18, %c0_56, %c0_57] : memref<25x16x8xf32, #tpu.memory_space<vmem>>, vector<1x16x8xf32>
    %92 = vector.shape_cast %91 : vector<1x16x8xf32> to vector<16x8xf32>
    %93 = vector.extract_strided_slice %1 {offsets = [0, 99], sizes = [8, 892], strides = [1, 1]} : vector<8x1024xf32> to vector<8x892xf32>
    %cst_58 = arith.constant dense<0.000000e+00> : vector<16x892xf32>
    %94 = tpu.matmul %92, %93, %cst_58 {dimension_numbers = #tpu.dot_dimension_numbers<[1], [0], [0], [1], [0, 0, 1, 1], [], []>} : vector<16x8xf32>, vector<8x892xf32>, vector<16x892xf32> -> vector<16x892xf32>
    %95 = arith.addf %90, %94 : vector<16x892xf32>
    %c19 = arith.constant 19 : index
    %c0_59 = arith.constant 0 : index
    %c0_60 = arith.constant 0 : index
    %96 = vector.load %arg2[%c19, %c0_59, %c0_60] : memref<25x16x8xf32, #tpu.memory_space<vmem>>, vector<1x16x8xf32>
    %97 = vector.shape_cast %96 : vector<1x16x8xf32> to vector<16x8xf32>
    %98 = vector.extract_strided_slice %1 {offsets = [0, 100], sizes = [8, 892], strides = [1, 1]} : vector<8x1024xf32> to vector<8x892xf32>
    %cst_61 = arith.constant dense<0.000000e+00> : vector<16x892xf32>
    %99 = tpu.matmul %97, %98, %cst_61 {dimension_numbers = #tpu.dot_dimension_numbers<[1], [0], [0], [1], [0, 0, 1, 1], [], []>} : vector<16x8xf32>, vector<8x892xf32>, vector<16x892xf32> -> vector<16x892xf32>
    %100 = arith.addf %95, %99 : vector<16x892xf32>
    %c20 = arith.constant 20 : index
    %c0_62 = arith.constant 0 : index
    %c0_63 = arith.constant 0 : index
    %101 = vector.load %arg2[%c20, %c0_62, %c0_63] : memref<25x16x8xf32, #tpu.memory_space<vmem>>, vector<1x16x8xf32>
    %102 = vector.shape_cast %101 : vector<1x16x8xf32> to vector<16x8xf32>
    %103 = vector.extract_strided_slice %1 {offsets = [0, 128], sizes = [8, 892], strides = [1, 1]} : vector<8x1024xf32> to vector<8x892xf32>
    %cst_64 = arith.constant dense<0.000000e+00> : vector<16x892xf32>
    %104 = tpu.matmul %102, %103, %cst_64 {dimension_numbers = #tpu.dot_dimension_numbers<[1], [0], [0], [1], [0, 0, 1, 1], [], []>} : vector<16x8xf32>, vector<8x892xf32>, vector<16x892xf32> -> vector<16x892xf32>
    %105 = arith.addf %100, %104 : vector<16x892xf32>
    %c21 = arith.constant 21 : index
    %c0_65 = arith.constant 0 : index
    %c0_66 = arith.constant 0 : index
    %106 = vector.load %arg2[%c21, %c0_65, %c0_66] : memref<25x16x8xf32, #tpu.memory_space<vmem>>, vector<1x16x8xf32>
    %107 = vector.shape_cast %106 : vector<1x16x8xf32> to vector<16x8xf32>
    %108 = vector.extract_strided_slice %1 {offsets = [0, 129], sizes = [8, 892], strides = [1, 1]} : vector<8x1024xf32> to vector<8x892xf32>
    %cst_67 = arith.constant dense<0.000000e+00> : vector<16x892xf32>
    %109 = tpu.matmul %107, %108, %cst_67 {dimension_numbers = #tpu.dot_dimension_numbers<[1], [0], [0], [1], [0, 0, 1, 1], [], []>} : vector<16x8xf32>, vector<8x892xf32>, vector<16x892xf32> -> vector<16x892xf32>
    %110 = arith.addf %105, %109 : vector<16x892xf32>
    %c22 = arith.constant 22 : index
    %c0_68 = arith.constant 0 : index
    %c0_69 = arith.constant 0 : index
    %111 = vector.load %arg2[%c22, %c0_68, %c0_69] : memref<25x16x8xf32, #tpu.memory_space<vmem>>, vector<1x16x8xf32>
    %112 = vector.shape_cast %111 : vector<1x16x8xf32> to vector<16x8xf32>
    %113 = vector.extract_strided_slice %1 {offsets = [0, 130], sizes = [8, 892], strides = [1, 1]} : vector<8x1024xf32> to vector<8x892xf32>
    %cst_70 = arith.constant dense<0.000000e+00> : vector<16x892xf32>
    %114 = tpu.matmul %112, %113, %cst_70 {dimension_numbers = #tpu.dot_dimension_numbers<[1], [0], [0], [1], [0, 0, 1, 1], [], []>} : vector<16x8xf32>, vector<8x892xf32>, vector<16x892xf32> -> vector<16x892xf32>
    %115 = arith.addf %110, %114 : vector<16x892xf32>
    %c23 = arith.constant 23 : index
    %c0_71 = arith.constant 0 : index
    %c0_72 = arith.constant 0 : index
    %116 = vector.load %arg2[%c23, %c0_71, %c0_72] : memref<25x16x8xf32, #tpu.memory_space<vmem>>, vector<1x16x8xf32>
    %117 = vector.shape_cast %116 : vector<1x16x8xf32> to vector<16x8xf32>
    %118 = vector.extract_strided_slice %1 {offsets = [0, 131], sizes = [8, 892], strides = [1, 1]} : vector<8x1024xf32> to vector<8x892xf32>
    %cst_73 = arith.constant dense<0.000000e+00> : vector<16x892xf32>
    %119 = tpu.matmul %117, %118, %cst_73 {dimension_numbers = #tpu.dot_dimension_numbers<[1], [0], [0], [1], [0, 0, 1, 1], [], []>} : vector<16x8xf32>, vector<8x892xf32>, vector<16x892xf32> -> vector<16x892xf32>
    %120 = arith.addf %115, %119 : vector<16x892xf32>
    %c24 = arith.constant 24 : index
    %c0_74 = arith.constant 0 : index
    %c0_75 = arith.constant 0 : index
    %121 = vector.load %arg2[%c24, %c0_74, %c0_75] : memref<25x16x8xf32, #tpu.memory_space<vmem>>, vector<1x16x8xf32>
    %122 = vector.shape_cast %121 : vector<1x16x8xf32> to vector<16x8xf32>
    %123 = vector.extract_strided_slice %1 {offsets = [0, 132], sizes = [8, 892], strides = [1, 1]} : vector<8x1024xf32> to vector<8x892xf32>
    %cst_76 = arith.constant dense<0.000000e+00> : vector<16x892xf32>
    %124 = tpu.matmul %122, %123, %cst_76 {dimension_numbers = #tpu.dot_dimension_numbers<[1], [0], [0], [1], [0, 0, 1, 1], [], []>} : vector<16x8xf32>, vector<8x892xf32>, vector<16x892xf32> -> vector<16x892xf32>
    %125 = arith.addf %120, %124 : vector<16x892xf32>
    %c0_77 = arith.constant 0 : index
    %c0_78 = arith.constant 0 : index
    %126 = vector.load %arg3[%c0_77, %c0_78] : memref<16x1xf32, #tpu.memory_space<vmem>>, vector<16x1xf32>
    %127 = vector.broadcast %126 : vector<16x1xf32> to vector<16x892xf32>
    %128 = arith.addf %125, %127 : vector<16x892xf32>
    %cst_79 = arith.constant 0.000000e+00 : f32
    %129 = vector.broadcast %cst_79 : f32 to vector<16x892xf32>
    %130 = arith.maximumf %128, %129 : vector<16x892xf32>
    %131 = vector.extract_strided_slice %130 {offsets = [0, 0], sizes = [16, 859], strides = [1, 1]} : vector<16x892xf32> to vector<16x859xf32>
    %132 = vector.extract_strided_slice %130 {offsets = [0, 1], sizes = [16, 859], strides = [1, 1]} : vector<16x892xf32> to vector<16x859xf32>
    %133 = arith.maximumf %131, %132 : vector<16x859xf32>
    %134 = vector.extract_strided_slice %130 {offsets = [0, 32], sizes = [16, 859], strides = [1, 1]} : vector<16x892xf32> to vector<16x859xf32>
    %135 = vector.extract_strided_slice %130 {offsets = [0, 33], sizes = [16, 859], strides = [1, 1]} : vector<16x892xf32> to vector<16x859xf32>
    %136 = arith.maximumf %134, %135 : vector<16x859xf32>
    %137 = arith.maximumf %133, %136 : vector<16x859xf32>
    %c0_80 = arith.constant 0 : index
    %c0_81 = arith.constant 0 : index
    %138 = vector.load %arg6[%c0_80, %c0_81] : memref<859x196xf32, #tpu.memory_space<vmem>>, vector<859x196xf32>
    %cst_82 = arith.constant dense<0.000000e+00> : vector<16x196xf32>
    %139 = tpu.matmul %137, %138, %cst_82 {dimension_numbers = #tpu.dot_dimension_numbers<[1], [0], [0], [1], [0, 0, 1, 1], [], []>} : vector<16x859xf32>, vector<859x196xf32>, vector<16x196xf32> -> vector<16x196xf32>
    %c0_83 = arith.constant 0 : index
    %c0_84 = arith.constant 0 : index
    %c0_85 = arith.constant 0 : index
    %140 = vector.load %arg4[%c0_83, %c0_84, %c0_85] : memref<25x32x16xf32, #tpu.memory_space<vmem>>, vector<1x32x16xf32>
    %141 = vector.shape_cast %140 : vector<1x32x16xf32> to vector<32x16xf32>
    %142 = vector.extract_strided_slice %139 {offsets = [0, 0], sizes = [16, 136], strides = [1, 1]} : vector<16x196xf32> to vector<16x136xf32>
    %cst_86 = arith.constant dense<0.000000e+00> : vector<32x136xf32>
    %143 = tpu.matmul %141, %142, %cst_86 {dimension_numbers = #tpu.dot_dimension_numbers<[1], [0], [0], [1], [0, 0, 1, 1], [], []>} : vector<32x16xf32>, vector<16x136xf32>, vector<32x136xf32> -> vector<32x136xf32>
    %c1_87 = arith.constant 1 : index
    %c0_88 = arith.constant 0 : index
    %c0_89 = arith.constant 0 : index
    %144 = vector.load %arg4[%c1_87, %c0_88, %c0_89] : memref<25x32x16xf32, #tpu.memory_space<vmem>>, vector<1x32x16xf32>
    %145 = vector.shape_cast %144 : vector<1x32x16xf32> to vector<32x16xf32>
    %146 = vector.extract_strided_slice %139 {offsets = [0, 1], sizes = [16, 136], strides = [1, 1]} : vector<16x196xf32> to vector<16x136xf32>
    %cst_90 = arith.constant dense<0.000000e+00> : vector<32x136xf32>
    %147 = tpu.matmul %145, %146, %cst_90 {dimension_numbers = #tpu.dot_dimension_numbers<[1], [0], [0], [1], [0, 0, 1, 1], [], []>} : vector<32x16xf32>, vector<16x136xf32>, vector<32x136xf32> -> vector<32x136xf32>
    %148 = arith.addf %143, %147 : vector<32x136xf32>
    %c2_91 = arith.constant 2 : index
    %c0_92 = arith.constant 0 : index
    %c0_93 = arith.constant 0 : index
    %149 = vector.load %arg4[%c2_91, %c0_92, %c0_93] : memref<25x32x16xf32, #tpu.memory_space<vmem>>, vector<1x32x16xf32>
    %150 = vector.shape_cast %149 : vector<1x32x16xf32> to vector<32x16xf32>
    %151 = vector.extract_strided_slice %139 {offsets = [0, 2], sizes = [16, 136], strides = [1, 1]} : vector<16x196xf32> to vector<16x136xf32>
    %cst_94 = arith.constant dense<0.000000e+00> : vector<32x136xf32>
    %152 = tpu.matmul %150, %151, %cst_94 {dimension_numbers = #tpu.dot_dimension_numbers<[1], [0], [0], [1], [0, 0, 1, 1], [], []>} : vector<32x16xf32>, vector<16x136xf32>, vector<32x136xf32> -> vector<32x136xf32>
    %153 = arith.addf %148, %152 : vector<32x136xf32>
    %c3_95 = arith.constant 3 : index
    %c0_96 = arith.constant 0 : index
    %c0_97 = arith.constant 0 : index
    %154 = vector.load %arg4[%c3_95, %c0_96, %c0_97] : memref<25x32x16xf32, #tpu.memory_space<vmem>>, vector<1x32x16xf32>
    %155 = vector.shape_cast %154 : vector<1x32x16xf32> to vector<32x16xf32>
    %156 = vector.extract_strided_slice %139 {offsets = [0, 3], sizes = [16, 136], strides = [1, 1]} : vector<16x196xf32> to vector<16x136xf32>
    %cst_98 = arith.constant dense<0.000000e+00> : vector<32x136xf32>
    %157 = tpu.matmul %155, %156, %cst_98 {dimension_numbers = #tpu.dot_dimension_numbers<[1], [0], [0], [1], [0, 0, 1, 1], [], []>} : vector<32x16xf32>, vector<16x136xf32>, vector<32x136xf32> -> vector<32x136xf32>
    %158 = arith.addf %153, %157 : vector<32x136xf32>
    %c4_99 = arith.constant 4 : index
    %c0_100 = arith.constant 0 : index
    %c0_101 = arith.constant 0 : index
    %159 = vector.load %arg4[%c4_99, %c0_100, %c0_101] : memref<25x32x16xf32, #tpu.memory_space<vmem>>, vector<1x32x16xf32>
    %160 = vector.shape_cast %159 : vector<1x32x16xf32> to vector<32x16xf32>
    %161 = vector.extract_strided_slice %139 {offsets = [0, 4], sizes = [16, 136], strides = [1, 1]} : vector<16x196xf32> to vector<16x136xf32>
    %cst_102 = arith.constant dense<0.000000e+00> : vector<32x136xf32>
    %162 = tpu.matmul %160, %161, %cst_102 {dimension_numbers = #tpu.dot_dimension_numbers<[1], [0], [0], [1], [0, 0, 1, 1], [], []>} : vector<32x16xf32>, vector<16x136xf32>, vector<32x136xf32> -> vector<32x136xf32>
    %163 = arith.addf %158, %162 : vector<32x136xf32>
    %c5_103 = arith.constant 5 : index
    %c0_104 = arith.constant 0 : index
    %c0_105 = arith.constant 0 : index
    %164 = vector.load %arg4[%c5_103, %c0_104, %c0_105] : memref<25x32x16xf32, #tpu.memory_space<vmem>>, vector<1x32x16xf32>
    %165 = vector.shape_cast %164 : vector<1x32x16xf32> to vector<32x16xf32>
    %166 = vector.extract_strided_slice %139 {offsets = [0, 14], sizes = [16, 136], strides = [1, 1]} : vector<16x196xf32> to vector<16x136xf32>
    %cst_106 = arith.constant dense<0.000000e+00> : vector<32x136xf32>
    %167 = tpu.matmul %165, %166, %cst_106 {dimension_numbers = #tpu.dot_dimension_numbers<[1], [0], [0], [1], [0, 0, 1, 1], [], []>} : vector<32x16xf32>, vector<16x136xf32>, vector<32x136xf32> -> vector<32x136xf32>
    %168 = arith.addf %163, %167 : vector<32x136xf32>
    %c6_107 = arith.constant 6 : index
    %c0_108 = arith.constant 0 : index
    %c0_109 = arith.constant 0 : index
    %169 = vector.load %arg4[%c6_107, %c0_108, %c0_109] : memref<25x32x16xf32, #tpu.memory_space<vmem>>, vector<1x32x16xf32>
    %170 = vector.shape_cast %169 : vector<1x32x16xf32> to vector<32x16xf32>
    %171 = vector.extract_strided_slice %139 {offsets = [0, 15], sizes = [16, 136], strides = [1, 1]} : vector<16x196xf32> to vector<16x136xf32>
    %cst_110 = arith.constant dense<0.000000e+00> : vector<32x136xf32>
    %172 = tpu.matmul %170, %171, %cst_110 {dimension_numbers = #tpu.dot_dimension_numbers<[1], [0], [0], [1], [0, 0, 1, 1], [], []>} : vector<32x16xf32>, vector<16x136xf32>, vector<32x136xf32> -> vector<32x136xf32>
    %173 = arith.addf %168, %172 : vector<32x136xf32>
    %c7_111 = arith.constant 7 : index
    %c0_112 = arith.constant 0 : index
    %c0_113 = arith.constant 0 : index
    %174 = vector.load %arg4[%c7_111, %c0_112, %c0_113] : memref<25x32x16xf32, #tpu.memory_space<vmem>>, vector<1x32x16xf32>
    %175 = vector.shape_cast %174 : vector<1x32x16xf32> to vector<32x16xf32>
    %176 = vector.extract_strided_slice %139 {offsets = [0, 16], sizes = [16, 136], strides = [1, 1]} : vector<16x196xf32> to vector<16x136xf32>
    %cst_114 = arith.constant dense<0.000000e+00> : vector<32x136xf32>
    %177 = tpu.matmul %175, %176, %cst_114 {dimension_numbers = #tpu.dot_dimension_numbers<[1], [0], [0], [1], [0, 0, 1, 1], [], []>} : vector<32x16xf32>, vector<16x136xf32>, vector<32x136xf32> -> vector<32x136xf32>
    %178 = arith.addf %173, %177 : vector<32x136xf32>
    %c8_115 = arith.constant 8 : index
    %c0_116 = arith.constant 0 : index
    %c0_117 = arith.constant 0 : index
    %179 = vector.load %arg4[%c8_115, %c0_116, %c0_117] : memref<25x32x16xf32, #tpu.memory_space<vmem>>, vector<1x32x16xf32>
    %180 = vector.shape_cast %179 : vector<1x32x16xf32> to vector<32x16xf32>
    %181 = vector.extract_strided_slice %139 {offsets = [0, 17], sizes = [16, 136], strides = [1, 1]} : vector<16x196xf32> to vector<16x136xf32>
    %cst_118 = arith.constant dense<0.000000e+00> : vector<32x136xf32>
    %182 = tpu.matmul %180, %181, %cst_118 {dimension_numbers = #tpu.dot_dimension_numbers<[1], [0], [0], [1], [0, 0, 1, 1], [], []>} : vector<32x16xf32>, vector<16x136xf32>, vector<32x136xf32> -> vector<32x136xf32>
    %183 = arith.addf %178, %182 : vector<32x136xf32>
    %c9_119 = arith.constant 9 : index
    %c0_120 = arith.constant 0 : index
    %c0_121 = arith.constant 0 : index
    %184 = vector.load %arg4[%c9_119, %c0_120, %c0_121] : memref<25x32x16xf32, #tpu.memory_space<vmem>>, vector<1x32x16xf32>
    %185 = vector.shape_cast %184 : vector<1x32x16xf32> to vector<32x16xf32>
    %186 = vector.extract_strided_slice %139 {offsets = [0, 18], sizes = [16, 136], strides = [1, 1]} : vector<16x196xf32> to vector<16x136xf32>
    %cst_122 = arith.constant dense<0.000000e+00> : vector<32x136xf32>
    %187 = tpu.matmul %185, %186, %cst_122 {dimension_numbers = #tpu.dot_dimension_numbers<[1], [0], [0], [1], [0, 0, 1, 1], [], []>} : vector<32x16xf32>, vector<16x136xf32>, vector<32x136xf32> -> vector<32x136xf32>
    %188 = arith.addf %183, %187 : vector<32x136xf32>
    %c10_123 = arith.constant 10 : index
    %c0_124 = arith.constant 0 : index
    %c0_125 = arith.constant 0 : index
    %189 = vector.load %arg4[%c10_123, %c0_124, %c0_125] : memref<25x32x16xf32, #tpu.memory_space<vmem>>, vector<1x32x16xf32>
    %190 = vector.shape_cast %189 : vector<1x32x16xf32> to vector<32x16xf32>
    %191 = vector.extract_strided_slice %139 {offsets = [0, 28], sizes = [16, 136], strides = [1, 1]} : vector<16x196xf32> to vector<16x136xf32>
    %cst_126 = arith.constant dense<0.000000e+00> : vector<32x136xf32>
    %192 = tpu.matmul %190, %191, %cst_126 {dimension_numbers = #tpu.dot_dimension_numbers<[1], [0], [0], [1], [0, 0, 1, 1], [], []>} : vector<32x16xf32>, vector<16x136xf32>, vector<32x136xf32> -> vector<32x136xf32>
    %193 = arith.addf %188, %192 : vector<32x136xf32>
    %c11_127 = arith.constant 11 : index
    %c0_128 = arith.constant 0 : index
    %c0_129 = arith.constant 0 : index
    %194 = vector.load %arg4[%c11_127, %c0_128, %c0_129] : memref<25x32x16xf32, #tpu.memory_space<vmem>>, vector<1x32x16xf32>
    %195 = vector.shape_cast %194 : vector<1x32x16xf32> to vector<32x16xf32>
    %196 = vector.extract_strided_slice %139 {offsets = [0, 29], sizes = [16, 136], strides = [1, 1]} : vector<16x196xf32> to vector<16x136xf32>
    %cst_130 = arith.constant dense<0.000000e+00> : vector<32x136xf32>
    %197 = tpu.matmul %195, %196, %cst_130 {dimension_numbers = #tpu.dot_dimension_numbers<[1], [0], [0], [1], [0, 0, 1, 1], [], []>} : vector<32x16xf32>, vector<16x136xf32>, vector<32x136xf32> -> vector<32x136xf32>
    %198 = arith.addf %193, %197 : vector<32x136xf32>
    %c12_131 = arith.constant 12 : index
    %c0_132 = arith.constant 0 : index
    %c0_133 = arith.constant 0 : index
    %199 = vector.load %arg4[%c12_131, %c0_132, %c0_133] : memref<25x32x16xf32, #tpu.memory_space<vmem>>, vector<1x32x16xf32>
    %200 = vector.shape_cast %199 : vector<1x32x16xf32> to vector<32x16xf32>
    %201 = vector.extract_strided_slice %139 {offsets = [0, 30], sizes = [16, 136], strides = [1, 1]} : vector<16x196xf32> to vector<16x136xf32>
    %cst_134 = arith.constant dense<0.000000e+00> : vector<32x136xf32>
    %202 = tpu.matmul %200, %201, %cst_134 {dimension_numbers = #tpu.dot_dimension_numbers<[1], [0], [0], [1], [0, 0, 1, 1], [], []>} : vector<32x16xf32>, vector<16x136xf32>, vector<32x136xf32> -> vector<32x136xf32>
    %203 = arith.addf %198, %202 : vector<32x136xf32>
    %c13_135 = arith.constant 13 : index
    %c0_136 = arith.constant 0 : index
    %c0_137 = arith.constant 0 : index
    %204 = vector.load %arg4[%c13_135, %c0_136, %c0_137] : memref<25x32x16xf32, #tpu.memory_space<vmem>>, vector<1x32x16xf32>
    %205 = vector.shape_cast %204 : vector<1x32x16xf32> to vector<32x16xf32>
    %206 = vector.extract_strided_slice %139 {offsets = [0, 31], sizes = [16, 136], strides = [1, 1]} : vector<16x196xf32> to vector<16x136xf32>
    %cst_138 = arith.constant dense<0.000000e+00> : vector<32x136xf32>
    %207 = tpu.matmul %205, %206, %cst_138 {dimension_numbers = #tpu.dot_dimension_numbers<[1], [0], [0], [1], [0, 0, 1, 1], [], []>} : vector<32x16xf32>, vector<16x136xf32>, vector<32x136xf32> -> vector<32x136xf32>
    %208 = arith.addf %203, %207 : vector<32x136xf32>
    %c14_139 = arith.constant 14 : index
    %c0_140 = arith.constant 0 : index
    %c0_141 = arith.constant 0 : index
    %209 = vector.load %arg4[%c14_139, %c0_140, %c0_141] : memref<25x32x16xf32, #tpu.memory_space<vmem>>, vector<1x32x16xf32>
    %210 = vector.shape_cast %209 : vector<1x32x16xf32> to vector<32x16xf32>
    %211 = vector.extract_strided_slice %139 {offsets = [0, 32], sizes = [16, 136], strides = [1, 1]} : vector<16x196xf32> to vector<16x136xf32>
    %cst_142 = arith.constant dense<0.000000e+00> : vector<32x136xf32>
    %212 = tpu.matmul %210, %211, %cst_142 {dimension_numbers = #tpu.dot_dimension_numbers<[1], [0], [0], [1], [0, 0, 1, 1], [], []>} : vector<32x16xf32>, vector<16x136xf32>, vector<32x136xf32> -> vector<32x136xf32>
    %213 = arith.addf %208, %212 : vector<32x136xf32>
    %c15_143 = arith.constant 15 : index
    %c0_144 = arith.constant 0 : index
    %c0_145 = arith.constant 0 : index
    %214 = vector.load %arg4[%c15_143, %c0_144, %c0_145] : memref<25x32x16xf32, #tpu.memory_space<vmem>>, vector<1x32x16xf32>
    %215 = vector.shape_cast %214 : vector<1x32x16xf32> to vector<32x16xf32>
    %216 = vector.extract_strided_slice %139 {offsets = [0, 42], sizes = [16, 136], strides = [1, 1]} : vector<16x196xf32> to vector<16x136xf32>
    %cst_146 = arith.constant dense<0.000000e+00> : vector<32x136xf32>
    %217 = tpu.matmul %215, %216, %cst_146 {dimension_numbers = #tpu.dot_dimension_numbers<[1], [0], [0], [1], [0, 0, 1, 1], [], []>} : vector<32x16xf32>, vector<16x136xf32>, vector<32x136xf32> -> vector<32x136xf32>
    %218 = arith.addf %213, %217 : vector<32x136xf32>
    %c16_147 = arith.constant 16 : index
    %c0_148 = arith.constant 0 : index
    %c0_149 = arith.constant 0 : index
    %219 = vector.load %arg4[%c16_147, %c0_148, %c0_149] : memref<25x32x16xf32, #tpu.memory_space<vmem>>, vector<1x32x16xf32>
    %220 = vector.shape_cast %219 : vector<1x32x16xf32> to vector<32x16xf32>
    %221 = vector.extract_strided_slice %139 {offsets = [0, 43], sizes = [16, 136], strides = [1, 1]} : vector<16x196xf32> to vector<16x136xf32>
    %cst_150 = arith.constant dense<0.000000e+00> : vector<32x136xf32>
    %222 = tpu.matmul %220, %221, %cst_150 {dimension_numbers = #tpu.dot_dimension_numbers<[1], [0], [0], [1], [0, 0, 1, 1], [], []>} : vector<32x16xf32>, vector<16x136xf32>, vector<32x136xf32> -> vector<32x136xf32>
    %223 = arith.addf %218, %222 : vector<32x136xf32>
    %c17_151 = arith.constant 17 : index
    %c0_152 = arith.constant 0 : index
    %c0_153 = arith.constant 0 : index
    %224 = vector.load %arg4[%c17_151, %c0_152, %c0_153] : memref<25x32x16xf32, #tpu.memory_space<vmem>>, vector<1x32x16xf32>
    %225 = vector.shape_cast %224 : vector<1x32x16xf32> to vector<32x16xf32>
    %226 = vector.extract_strided_slice %139 {offsets = [0, 44], sizes = [16, 136], strides = [1, 1]} : vector<16x196xf32> to vector<16x136xf32>
    %cst_154 = arith.constant dense<0.000000e+00> : vector<32x136xf32>
    %227 = tpu.matmul %225, %226, %cst_154 {dimension_numbers = #tpu.dot_dimension_numbers<[1], [0], [0], [1], [0, 0, 1, 1], [], []>} : vector<32x16xf32>, vector<16x136xf32>, vector<32x136xf32> -> vector<32x136xf32>
    %228 = arith.addf %223, %227 : vector<32x136xf32>
    %c18_155 = arith.constant 18 : index
    %c0_156 = arith.constant 0 : index
    %c0_157 = arith.constant 0 : index
    %229 = vector.load %arg4[%c18_155, %c0_156, %c0_157] : memref<25x32x16xf32, #tpu.memory_space<vmem>>, vector<1x32x16xf32>
    %230 = vector.shape_cast %229 : vector<1x32x16xf32> to vector<32x16xf32>
    %231 = vector.extract_strided_slice %139 {offsets = [0, 45], sizes = [16, 136], strides = [1, 1]} : vector<16x196xf32> to vector<16x136xf32>
    %cst_158 = arith.constant dense<0.000000e+00> : vector<32x136xf32>
    %232 = tpu.matmul %230, %231, %cst_158 {dimension_numbers = #tpu.dot_dimension_numbers<[1], [0], [0], [1], [0, 0, 1, 1], [], []>} : vector<32x16xf32>, vector<16x136xf32>, vector<32x136xf32> -> vector<32x136xf32>
    %233 = arith.addf %228, %232 : vector<32x136xf32>
    %c19_159 = arith.constant 19 : index
    %c0_160 = arith.constant 0 : index
    %c0_161 = arith.constant 0 : index
    %234 = vector.load %arg4[%c19_159, %c0_160, %c0_161] : memref<25x32x16xf32, #tpu.memory_space<vmem>>, vector<1x32x16xf32>
    %235 = vector.shape_cast %234 : vector<1x32x16xf32> to vector<32x16xf32>
    %236 = vector.extract_strided_slice %139 {offsets = [0, 46], sizes = [16, 136], strides = [1, 1]} : vector<16x196xf32> to vector<16x136xf32>
    %cst_162 = arith.constant dense<0.000000e+00> : vector<32x136xf32>
    %237 = tpu.matmul %235, %236, %cst_162 {dimension_numbers = #tpu.dot_dimension_numbers<[1], [0], [0], [1], [0, 0, 1, 1], [], []>} : vector<32x16xf32>, vector<16x136xf32>, vector<32x136xf32> -> vector<32x136xf32>
    %238 = arith.addf %233, %237 : vector<32x136xf32>
    %c20_163 = arith.constant 20 : index
    %c0_164 = arith.constant 0 : index
    %c0_165 = arith.constant 0 : index
    %239 = vector.load %arg4[%c20_163, %c0_164, %c0_165] : memref<25x32x16xf32, #tpu.memory_space<vmem>>, vector<1x32x16xf32>
    %240 = vector.shape_cast %239 : vector<1x32x16xf32> to vector<32x16xf32>
    %241 = vector.extract_strided_slice %139 {offsets = [0, 56], sizes = [16, 136], strides = [1, 1]} : vector<16x196xf32> to vector<16x136xf32>
    %cst_166 = arith.constant dense<0.000000e+00> : vector<32x136xf32>
    %242 = tpu.matmul %240, %241, %cst_166 {dimension_numbers = #tpu.dot_dimension_numbers<[1], [0], [0], [1], [0, 0, 1, 1], [], []>} : vector<32x16xf32>, vector<16x136xf32>, vector<32x136xf32> -> vector<32x136xf32>
    %243 = arith.addf %238, %242 : vector<32x136xf32>
    %c21_167 = arith.constant 21 : index
    %c0_168 = arith.constant 0 : index
    %c0_169 = arith.constant 0 : index
    %244 = vector.load %arg4[%c21_167, %c0_168, %c0_169] : memref<25x32x16xf32, #tpu.memory_space<vmem>>, vector<1x32x16xf32>
    %245 = vector.shape_cast %244 : vector<1x32x16xf32> to vector<32x16xf32>
    %246 = vector.extract_strided_slice %139 {offsets = [0, 57], sizes = [16, 136], strides = [1, 1]} : vector<16x196xf32> to vector<16x136xf32>
    %cst_170 = arith.constant dense<0.000000e+00> : vector<32x136xf32>
    %247 = tpu.matmul %245, %246, %cst_170 {dimension_numbers = #tpu.dot_dimension_numbers<[1], [0], [0], [1], [0, 0, 1, 1], [], []>} : vector<32x16xf32>, vector<16x136xf32>, vector<32x136xf32> -> vector<32x136xf32>
    %248 = arith.addf %243, %247 : vector<32x136xf32>
    %c22_171 = arith.constant 22 : index
    %c0_172 = arith.constant 0 : index
    %c0_173 = arith.constant 0 : index
    %249 = vector.load %arg4[%c22_171, %c0_172, %c0_173] : memref<25x32x16xf32, #tpu.memory_space<vmem>>, vector<1x32x16xf32>
    %250 = vector.shape_cast %249 : vector<1x32x16xf32> to vector<32x16xf32>
    %251 = vector.extract_strided_slice %139 {offsets = [0, 58], sizes = [16, 136], strides = [1, 1]} : vector<16x196xf32> to vector<16x136xf32>
    %cst_174 = arith.constant dense<0.000000e+00> : vector<32x136xf32>
    %252 = tpu.matmul %250, %251, %cst_174 {dimension_numbers = #tpu.dot_dimension_numbers<[1], [0], [0], [1], [0, 0, 1, 1], [], []>} : vector<32x16xf32>, vector<16x136xf32>, vector<32x136xf32> -> vector<32x136xf32>
    %253 = arith.addf %248, %252 : vector<32x136xf32>
    %c23_175 = arith.constant 23 : index
    %c0_176 = arith.constant 0 : index
    %c0_177 = arith.constant 0 : index
    %254 = vector.load %arg4[%c23_175, %c0_176, %c0_177] : memref<25x32x16xf32, #tpu.memory_space<vmem>>, vector<1x32x16xf32>
    %255 = vector.shape_cast %254 : vector<1x32x16xf32> to vector<32x16xf32>
    %256 = vector.extract_strided_slice %139 {offsets = [0, 59], sizes = [16, 136], strides = [1, 1]} : vector<16x196xf32> to vector<16x136xf32>
    %cst_178 = arith.constant dense<0.000000e+00> : vector<32x136xf32>
    %257 = tpu.matmul %255, %256, %cst_178 {dimension_numbers = #tpu.dot_dimension_numbers<[1], [0], [0], [1], [0, 0, 1, 1], [], []>} : vector<32x16xf32>, vector<16x136xf32>, vector<32x136xf32> -> vector<32x136xf32>
    %258 = arith.addf %253, %257 : vector<32x136xf32>
    %c24_179 = arith.constant 24 : index
    %c0_180 = arith.constant 0 : index
    %c0_181 = arith.constant 0 : index
    %259 = vector.load %arg4[%c24_179, %c0_180, %c0_181] : memref<25x32x16xf32, #tpu.memory_space<vmem>>, vector<1x32x16xf32>
    %260 = vector.shape_cast %259 : vector<1x32x16xf32> to vector<32x16xf32>
    %261 = vector.extract_strided_slice %139 {offsets = [0, 60], sizes = [16, 136], strides = [1, 1]} : vector<16x196xf32> to vector<16x136xf32>
    %cst_182 = arith.constant dense<0.000000e+00> : vector<32x136xf32>
    %262 = tpu.matmul %260, %261, %cst_182 {dimension_numbers = #tpu.dot_dimension_numbers<[1], [0], [0], [1], [0, 0, 1, 1], [], []>} : vector<32x16xf32>, vector<16x136xf32>, vector<32x136xf32> -> vector<32x136xf32>
    %263 = arith.addf %258, %262 : vector<32x136xf32>
    %c0_183 = arith.constant 0 : index
    %c0_184 = arith.constant 0 : index
    %264 = vector.load %arg5[%c0_183, %c0_184] : memref<32x1xf32, #tpu.memory_space<vmem>>, vector<32x1xf32>
    %265 = vector.broadcast %264 : vector<32x1xf32> to vector<32x136xf32>
    %266 = arith.addf %263, %265 : vector<32x136xf32>
    %cst_185 = arith.constant 0.000000e+00 : f32
    %267 = vector.broadcast %cst_185 : f32 to vector<32x136xf32>
    %268 = arith.maximumf %266, %267 : vector<32x136xf32>
    %269 = vector.extract_strided_slice %268 {offsets = [0, 0], sizes = [32, 121], strides = [1, 1]} : vector<32x136xf32> to vector<32x121xf32>
    %270 = vector.extract_strided_slice %268 {offsets = [0, 1], sizes = [32, 121], strides = [1, 1]} : vector<32x136xf32> to vector<32x121xf32>
    %271 = arith.maximumf %269, %270 : vector<32x121xf32>
    %272 = vector.extract_strided_slice %268 {offsets = [0, 14], sizes = [32, 121], strides = [1, 1]} : vector<32x136xf32> to vector<32x121xf32>
    %273 = vector.extract_strided_slice %268 {offsets = [0, 15], sizes = [32, 121], strides = [1, 1]} : vector<32x136xf32> to vector<32x121xf32>
    %274 = arith.maximumf %272, %273 : vector<32x121xf32>
    %275 = arith.maximumf %271, %274 : vector<32x121xf32>
    %c0_186 = arith.constant 0 : index
    %c0_187 = arith.constant 0 : index
    %276 = vector.load %arg7[%c0_186, %c0_187] : memref<121x25xf32, #tpu.memory_space<vmem>>, vector<121x25xf32>
    %cst_188 = arith.constant dense<0.000000e+00> : vector<32x25xf32>
    %277 = tpu.matmul %275, %276, %cst_188 {dimension_numbers = #tpu.dot_dimension_numbers<[1], [0], [0], [1], [0, 0, 1, 1], [], []>} : vector<32x121xf32>, vector<121x25xf32>, vector<32x25xf32> -> vector<32x25xf32>
    %c0_189 = arith.constant 0 : index
    %c0_190 = arith.constant 0 : index
    %278 = vector.load %arg9[%c0_189, %c0_190] : memref<1x240xf32, #tpu.memory_space<vmem>>, vector<1x240xf32>
    %279 = vector.extract_strided_slice %277 {offsets = [0, 0], sizes = [1, 25], strides = [1, 1]} : vector<32x25xf32> to vector<1x25xf32>
    %c0_191 = arith.constant 0 : index
    %c0_192 = arith.constant 0 : index
    %c0_193 = arith.constant 0 : index
    %280 = vector.load %arg8[%c0_191, %c0_192, %c0_193] : memref<32x25x240xf32, #tpu.memory_space<vmem>>, vector<1x25x240xf32>
    %281 = vector.shape_cast %280 : vector<1x25x240xf32> to vector<25x240xf32>
    %cst_194 = arith.constant dense<0.000000e+00> : vector<1x240xf32>
    %282 = tpu.matmul %279, %281, %cst_194 {dimension_numbers = #tpu.dot_dimension_numbers<[1], [0], [0], [1], [0, 0, 1, 1], [], []>} : vector<1x25xf32>, vector<25x240xf32>, vector<1x240xf32> -> vector<1x240xf32>
    %283 = arith.addf %278, %282 : vector<1x240xf32>
    %284 = vector.extract_strided_slice %277 {offsets = [1, 0], sizes = [1, 25], strides = [1, 1]} : vector<32x25xf32> to vector<1x25xf32>
    %c1_195 = arith.constant 1 : index
    %c0_196 = arith.constant 0 : index
    %c0_197 = arith.constant 0 : index
    %285 = vector.load %arg8[%c1_195, %c0_196, %c0_197] : memref<32x25x240xf32, #tpu.memory_space<vmem>>, vector<1x25x240xf32>
    %286 = vector.shape_cast %285 : vector<1x25x240xf32> to vector<25x240xf32>
    %cst_198 = arith.constant dense<0.000000e+00> : vector<1x240xf32>
    %287 = tpu.matmul %284, %286, %cst_198 {dimension_numbers = #tpu.dot_dimension_numbers<[1], [0], [0], [1], [0, 0, 1, 1], [], []>} : vector<1x25xf32>, vector<25x240xf32>, vector<1x240xf32> -> vector<1x240xf32>
    %288 = arith.addf %283, %287 : vector<1x240xf32>
    %289 = vector.extract_strided_slice %277 {offsets = [2, 0], sizes = [1, 25], strides = [1, 1]} : vector<32x25xf32> to vector<1x25xf32>
    %c2_199 = arith.constant 2 : index
    %c0_200 = arith.constant 0 : index
    %c0_201 = arith.constant 0 : index
    %290 = vector.load %arg8[%c2_199, %c0_200, %c0_201] : memref<32x25x240xf32, #tpu.memory_space<vmem>>, vector<1x25x240xf32>
    %291 = vector.shape_cast %290 : vector<1x25x240xf32> to vector<25x240xf32>
    %cst_202 = arith.constant dense<0.000000e+00> : vector<1x240xf32>
    %292 = tpu.matmul %289, %291, %cst_202 {dimension_numbers = #tpu.dot_dimension_numbers<[1], [0], [0], [1], [0, 0, 1, 1], [], []>} : vector<1x25xf32>, vector<25x240xf32>, vector<1x240xf32> -> vector<1x240xf32>
    %293 = arith.addf %288, %292 : vector<1x240xf32>
    %294 = vector.extract_strided_slice %277 {offsets = [3, 0], sizes = [1, 25], strides = [1, 1]} : vector<32x25xf32> to vector<1x25xf32>
    %c3_203 = arith.constant 3 : index
    %c0_204 = arith.constant 0 : index
    %c0_205 = arith.constant 0 : index
    %295 = vector.load %arg8[%c3_203, %c0_204, %c0_205] : memref<32x25x240xf32, #tpu.memory_space<vmem>>, vector<1x25x240xf32>
    %296 = vector.shape_cast %295 : vector<1x25x240xf32> to vector<25x240xf32>
    %cst_206 = arith.constant dense<0.000000e+00> : vector<1x240xf32>
    %297 = tpu.matmul %294, %296, %cst_206 {dimension_numbers = #tpu.dot_dimension_numbers<[1], [0], [0], [1], [0, 0, 1, 1], [], []>} : vector<1x25xf32>, vector<25x240xf32>, vector<1x240xf32> -> vector<1x240xf32>
    %298 = arith.addf %293, %297 : vector<1x240xf32>
    %299 = vector.extract_strided_slice %277 {offsets = [4, 0], sizes = [1, 25], strides = [1, 1]} : vector<32x25xf32> to vector<1x25xf32>
    %c4_207 = arith.constant 4 : index
    %c0_208 = arith.constant 0 : index
    %c0_209 = arith.constant 0 : index
    %300 = vector.load %arg8[%c4_207, %c0_208, %c0_209] : memref<32x25x240xf32, #tpu.memory_space<vmem>>, vector<1x25x240xf32>
    %301 = vector.shape_cast %300 : vector<1x25x240xf32> to vector<25x240xf32>
    %cst_210 = arith.constant dense<0.000000e+00> : vector<1x240xf32>
    %302 = tpu.matmul %299, %301, %cst_210 {dimension_numbers = #tpu.dot_dimension_numbers<[1], [0], [0], [1], [0, 0, 1, 1], [], []>} : vector<1x25xf32>, vector<25x240xf32>, vector<1x240xf32> -> vector<1x240xf32>
    %303 = arith.addf %298, %302 : vector<1x240xf32>
    %304 = vector.extract_strided_slice %277 {offsets = [5, 0], sizes = [1, 25], strides = [1, 1]} : vector<32x25xf32> to vector<1x25xf32>
    %c5_211 = arith.constant 5 : index
    %c0_212 = arith.constant 0 : index
    %c0_213 = arith.constant 0 : index
    %305 = vector.load %arg8[%c5_211, %c0_212, %c0_213] : memref<32x25x240xf32, #tpu.memory_space<vmem>>, vector<1x25x240xf32>
    %306 = vector.shape_cast %305 : vector<1x25x240xf32> to vector<25x240xf32>
    %cst_214 = arith.constant dense<0.000000e+00> : vector<1x240xf32>
    %307 = tpu.matmul %304, %306, %cst_214 {dimension_numbers = #tpu.dot_dimension_numbers<[1], [0], [0], [1], [0, 0, 1, 1], [], []>} : vector<1x25xf32>, vector<25x240xf32>, vector<1x240xf32> -> vector<1x240xf32>
    %308 = arith.addf %303, %307 : vector<1x240xf32>
    %309 = vector.extract_strided_slice %277 {offsets = [6, 0], sizes = [1, 25], strides = [1, 1]} : vector<32x25xf32> to vector<1x25xf32>
    %c6_215 = arith.constant 6 : index
    %c0_216 = arith.constant 0 : index
    %c0_217 = arith.constant 0 : index
    %310 = vector.load %arg8[%c6_215, %c0_216, %c0_217] : memref<32x25x240xf32, #tpu.memory_space<vmem>>, vector<1x25x240xf32>
    %311 = vector.shape_cast %310 : vector<1x25x240xf32> to vector<25x240xf32>
    %cst_218 = arith.constant dense<0.000000e+00> : vector<1x240xf32>
    %312 = tpu.matmul %309, %311, %cst_218 {dimension_numbers = #tpu.dot_dimension_numbers<[1], [0], [0], [1], [0, 0, 1, 1], [], []>} : vector<1x25xf32>, vector<25x240xf32>, vector<1x240xf32> -> vector<1x240xf32>
    %313 = arith.addf %308, %312 : vector<1x240xf32>
    %314 = vector.extract_strided_slice %277 {offsets = [7, 0], sizes = [1, 25], strides = [1, 1]} : vector<32x25xf32> to vector<1x25xf32>
    %c7_219 = arith.constant 7 : index
    %c0_220 = arith.constant 0 : index
    %c0_221 = arith.constant 0 : index
    %315 = vector.load %arg8[%c7_219, %c0_220, %c0_221] : memref<32x25x240xf32, #tpu.memory_space<vmem>>, vector<1x25x240xf32>
    %316 = vector.shape_cast %315 : vector<1x25x240xf32> to vector<25x240xf32>
    %cst_222 = arith.constant dense<0.000000e+00> : vector<1x240xf32>
    %317 = tpu.matmul %314, %316, %cst_222 {dimension_numbers = #tpu.dot_dimension_numbers<[1], [0], [0], [1], [0, 0, 1, 1], [], []>} : vector<1x25xf32>, vector<25x240xf32>, vector<1x240xf32> -> vector<1x240xf32>
    %318 = arith.addf %313, %317 : vector<1x240xf32>
    %319 = vector.extract_strided_slice %277 {offsets = [8, 0], sizes = [1, 25], strides = [1, 1]} : vector<32x25xf32> to vector<1x25xf32>
    %c8_223 = arith.constant 8 : index
    %c0_224 = arith.constant 0 : index
    %c0_225 = arith.constant 0 : index
    %320 = vector.load %arg8[%c8_223, %c0_224, %c0_225] : memref<32x25x240xf32, #tpu.memory_space<vmem>>, vector<1x25x240xf32>
    %321 = vector.shape_cast %320 : vector<1x25x240xf32> to vector<25x240xf32>
    %cst_226 = arith.constant dense<0.000000e+00> : vector<1x240xf32>
    %322 = tpu.matmul %319, %321, %cst_226 {dimension_numbers = #tpu.dot_dimension_numbers<[1], [0], [0], [1], [0, 0, 1, 1], [], []>} : vector<1x25xf32>, vector<25x240xf32>, vector<1x240xf32> -> vector<1x240xf32>
    %323 = arith.addf %318, %322 : vector<1x240xf32>
    %324 = vector.extract_strided_slice %277 {offsets = [9, 0], sizes = [1, 25], strides = [1, 1]} : vector<32x25xf32> to vector<1x25xf32>
    %c9_227 = arith.constant 9 : index
    %c0_228 = arith.constant 0 : index
    %c0_229 = arith.constant 0 : index
    %325 = vector.load %arg8[%c9_227, %c0_228, %c0_229] : memref<32x25x240xf32, #tpu.memory_space<vmem>>, vector<1x25x240xf32>
    %326 = vector.shape_cast %325 : vector<1x25x240xf32> to vector<25x240xf32>
    %cst_230 = arith.constant dense<0.000000e+00> : vector<1x240xf32>
    %327 = tpu.matmul %324, %326, %cst_230 {dimension_numbers = #tpu.dot_dimension_numbers<[1], [0], [0], [1], [0, 0, 1, 1], [], []>} : vector<1x25xf32>, vector<25x240xf32>, vector<1x240xf32> -> vector<1x240xf32>
    %328 = arith.addf %323, %327 : vector<1x240xf32>
    %329 = vector.extract_strided_slice %277 {offsets = [10, 0], sizes = [1, 25], strides = [1, 1]} : vector<32x25xf32> to vector<1x25xf32>
    %c10_231 = arith.constant 10 : index
    %c0_232 = arith.constant 0 : index
    %c0_233 = arith.constant 0 : index
    %330 = vector.load %arg8[%c10_231, %c0_232, %c0_233] : memref<32x25x240xf32, #tpu.memory_space<vmem>>, vector<1x25x240xf32>
    %331 = vector.shape_cast %330 : vector<1x25x240xf32> to vector<25x240xf32>
    %cst_234 = arith.constant dense<0.000000e+00> : vector<1x240xf32>
    %332 = tpu.matmul %329, %331, %cst_234 {dimension_numbers = #tpu.dot_dimension_numbers<[1], [0], [0], [1], [0, 0, 1, 1], [], []>} : vector<1x25xf32>, vector<25x240xf32>, vector<1x240xf32> -> vector<1x240xf32>
    %333 = arith.addf %328, %332 : vector<1x240xf32>
    %334 = vector.extract_strided_slice %277 {offsets = [11, 0], sizes = [1, 25], strides = [1, 1]} : vector<32x25xf32> to vector<1x25xf32>
    %c11_235 = arith.constant 11 : index
    %c0_236 = arith.constant 0 : index
    %c0_237 = arith.constant 0 : index
    %335 = vector.load %arg8[%c11_235, %c0_236, %c0_237] : memref<32x25x240xf32, #tpu.memory_space<vmem>>, vector<1x25x240xf32>
    %336 = vector.shape_cast %335 : vector<1x25x240xf32> to vector<25x240xf32>
    %cst_238 = arith.constant dense<0.000000e+00> : vector<1x240xf32>
    %337 = tpu.matmul %334, %336, %cst_238 {dimension_numbers = #tpu.dot_dimension_numbers<[1], [0], [0], [1], [0, 0, 1, 1], [], []>} : vector<1x25xf32>, vector<25x240xf32>, vector<1x240xf32> -> vector<1x240xf32>
    %338 = arith.addf %333, %337 : vector<1x240xf32>
    %339 = vector.extract_strided_slice %277 {offsets = [12, 0], sizes = [1, 25], strides = [1, 1]} : vector<32x25xf32> to vector<1x25xf32>
    %c12_239 = arith.constant 12 : index
    %c0_240 = arith.constant 0 : index
    %c0_241 = arith.constant 0 : index
    %340 = vector.load %arg8[%c12_239, %c0_240, %c0_241] : memref<32x25x240xf32, #tpu.memory_space<vmem>>, vector<1x25x240xf32>
    %341 = vector.shape_cast %340 : vector<1x25x240xf32> to vector<25x240xf32>
    %cst_242 = arith.constant dense<0.000000e+00> : vector<1x240xf32>
    %342 = tpu.matmul %339, %341, %cst_242 {dimension_numbers = #tpu.dot_dimension_numbers<[1], [0], [0], [1], [0, 0, 1, 1], [], []>} : vector<1x25xf32>, vector<25x240xf32>, vector<1x240xf32> -> vector<1x240xf32>
    %343 = arith.addf %338, %342 : vector<1x240xf32>
    %344 = vector.extract_strided_slice %277 {offsets = [13, 0], sizes = [1, 25], strides = [1, 1]} : vector<32x25xf32> to vector<1x25xf32>
    %c13_243 = arith.constant 13 : index
    %c0_244 = arith.constant 0 : index
    %c0_245 = arith.constant 0 : index
    %345 = vector.load %arg8[%c13_243, %c0_244, %c0_245] : memref<32x25x240xf32, #tpu.memory_space<vmem>>, vector<1x25x240xf32>
    %346 = vector.shape_cast %345 : vector<1x25x240xf32> to vector<25x240xf32>
    %cst_246 = arith.constant dense<0.000000e+00> : vector<1x240xf32>
    %347 = tpu.matmul %344, %346, %cst_246 {dimension_numbers = #tpu.dot_dimension_numbers<[1], [0], [0], [1], [0, 0, 1, 1], [], []>} : vector<1x25xf32>, vector<25x240xf32>, vector<1x240xf32> -> vector<1x240xf32>
    %348 = arith.addf %343, %347 : vector<1x240xf32>
    %349 = vector.extract_strided_slice %277 {offsets = [14, 0], sizes = [1, 25], strides = [1, 1]} : vector<32x25xf32> to vector<1x25xf32>
    %c14_247 = arith.constant 14 : index
    %c0_248 = arith.constant 0 : index
    %c0_249 = arith.constant 0 : index
    %350 = vector.load %arg8[%c14_247, %c0_248, %c0_249] : memref<32x25x240xf32, #tpu.memory_space<vmem>>, vector<1x25x240xf32>
    %351 = vector.shape_cast %350 : vector<1x25x240xf32> to vector<25x240xf32>
    %cst_250 = arith.constant dense<0.000000e+00> : vector<1x240xf32>
    %352 = tpu.matmul %349, %351, %cst_250 {dimension_numbers = #tpu.dot_dimension_numbers<[1], [0], [0], [1], [0, 0, 1, 1], [], []>} : vector<1x25xf32>, vector<25x240xf32>, vector<1x240xf32> -> vector<1x240xf32>
    %353 = arith.addf %348, %352 : vector<1x240xf32>
    %354 = vector.extract_strided_slice %277 {offsets = [15, 0], sizes = [1, 25], strides = [1, 1]} : vector<32x25xf32> to vector<1x25xf32>
    %c15_251 = arith.constant 15 : index
    %c0_252 = arith.constant 0 : index
    %c0_253 = arith.constant 0 : index
    %355 = vector.load %arg8[%c15_251, %c0_252, %c0_253] : memref<32x25x240xf32, #tpu.memory_space<vmem>>, vector<1x25x240xf32>
    %356 = vector.shape_cast %355 : vector<1x25x240xf32> to vector<25x240xf32>
    %cst_254 = arith.constant dense<0.000000e+00> : vector<1x240xf32>
    %357 = tpu.matmul %354, %356, %cst_254 {dimension_numbers = #tpu.dot_dimension_numbers<[1], [0], [0], [1], [0, 0, 1, 1], [], []>} : vector<1x25xf32>, vector<25x240xf32>, vector<1x240xf32> -> vector<1x240xf32>
    %358 = arith.addf %353, %357 : vector<1x240xf32>
    %359 = vector.extract_strided_slice %277 {offsets = [16, 0], sizes = [1, 25], strides = [1, 1]} : vector<32x25xf32> to vector<1x25xf32>
    %c16_255 = arith.constant 16 : index
    %c0_256 = arith.constant 0 : index
    %c0_257 = arith.constant 0 : index
    %360 = vector.load %arg8[%c16_255, %c0_256, %c0_257] : memref<32x25x240xf32, #tpu.memory_space<vmem>>, vector<1x25x240xf32>
    %361 = vector.shape_cast %360 : vector<1x25x240xf32> to vector<25x240xf32>
    %cst_258 = arith.constant dense<0.000000e+00> : vector<1x240xf32>
    %362 = tpu.matmul %359, %361, %cst_258 {dimension_numbers = #tpu.dot_dimension_numbers<[1], [0], [0], [1], [0, 0, 1, 1], [], []>} : vector<1x25xf32>, vector<25x240xf32>, vector<1x240xf32> -> vector<1x240xf32>
    %363 = arith.addf %358, %362 : vector<1x240xf32>
    %364 = vector.extract_strided_slice %277 {offsets = [17, 0], sizes = [1, 25], strides = [1, 1]} : vector<32x25xf32> to vector<1x25xf32>
    %c17_259 = arith.constant 17 : index
    %c0_260 = arith.constant 0 : index
    %c0_261 = arith.constant 0 : index
    %365 = vector.load %arg8[%c17_259, %c0_260, %c0_261] : memref<32x25x240xf32, #tpu.memory_space<vmem>>, vector<1x25x240xf32>
    %366 = vector.shape_cast %365 : vector<1x25x240xf32> to vector<25x240xf32>
    %cst_262 = arith.constant dense<0.000000e+00> : vector<1x240xf32>
    %367 = tpu.matmul %364, %366, %cst_262 {dimension_numbers = #tpu.dot_dimension_numbers<[1], [0], [0], [1], [0, 0, 1, 1], [], []>} : vector<1x25xf32>, vector<25x240xf32>, vector<1x240xf32> -> vector<1x240xf32>
    %368 = arith.addf %363, %367 : vector<1x240xf32>
    %369 = vector.extract_strided_slice %277 {offsets = [18, 0], sizes = [1, 25], strides = [1, 1]} : vector<32x25xf32> to vector<1x25xf32>
    %c18_263 = arith.constant 18 : index
    %c0_264 = arith.constant 0 : index
    %c0_265 = arith.constant 0 : index
    %370 = vector.load %arg8[%c18_263, %c0_264, %c0_265] : memref<32x25x240xf32, #tpu.memory_space<vmem>>, vector<1x25x240xf32>
    %371 = vector.shape_cast %370 : vector<1x25x240xf32> to vector<25x240xf32>
    %cst_266 = arith.constant dense<0.000000e+00> : vector<1x240xf32>
    %372 = tpu.matmul %369, %371, %cst_266 {dimension_numbers = #tpu.dot_dimension_numbers<[1], [0], [0], [1], [0, 0, 1, 1], [], []>} : vector<1x25xf32>, vector<25x240xf32>, vector<1x240xf32> -> vector<1x240xf32>
    %373 = arith.addf %368, %372 : vector<1x240xf32>
    %374 = vector.extract_strided_slice %277 {offsets = [19, 0], sizes = [1, 25], strides = [1, 1]} : vector<32x25xf32> to vector<1x25xf32>
    %c19_267 = arith.constant 19 : index
    %c0_268 = arith.constant 0 : index
    %c0_269 = arith.constant 0 : index
    %375 = vector.load %arg8[%c19_267, %c0_268, %c0_269] : memref<32x25x240xf32, #tpu.memory_space<vmem>>, vector<1x25x240xf32>
    %376 = vector.shape_cast %375 : vector<1x25x240xf32> to vector<25x240xf32>
    %cst_270 = arith.constant dense<0.000000e+00> : vector<1x240xf32>
    %377 = tpu.matmul %374, %376, %cst_270 {dimension_numbers = #tpu.dot_dimension_numbers<[1], [0], [0], [1], [0, 0, 1, 1], [], []>} : vector<1x25xf32>, vector<25x240xf32>, vector<1x240xf32> -> vector<1x240xf32>
    %378 = arith.addf %373, %377 : vector<1x240xf32>
    %379 = vector.extract_strided_slice %277 {offsets = [20, 0], sizes = [1, 25], strides = [1, 1]} : vector<32x25xf32> to vector<1x25xf32>
    %c20_271 = arith.constant 20 : index
    %c0_272 = arith.constant 0 : index
    %c0_273 = arith.constant 0 : index
    %380 = vector.load %arg8[%c20_271, %c0_272, %c0_273] : memref<32x25x240xf32, #tpu.memory_space<vmem>>, vector<1x25x240xf32>
    %381 = vector.shape_cast %380 : vector<1x25x240xf32> to vector<25x240xf32>
    %cst_274 = arith.constant dense<0.000000e+00> : vector<1x240xf32>
    %382 = tpu.matmul %379, %381, %cst_274 {dimension_numbers = #tpu.dot_dimension_numbers<[1], [0], [0], [1], [0, 0, 1, 1], [], []>} : vector<1x25xf32>, vector<25x240xf32>, vector<1x240xf32> -> vector<1x240xf32>
    %383 = arith.addf %378, %382 : vector<1x240xf32>
    %384 = vector.extract_strided_slice %277 {offsets = [21, 0], sizes = [1, 25], strides = [1, 1]} : vector<32x25xf32> to vector<1x25xf32>
    %c21_275 = arith.constant 21 : index
    %c0_276 = arith.constant 0 : index
    %c0_277 = arith.constant 0 : index
    %385 = vector.load %arg8[%c21_275, %c0_276, %c0_277] : memref<32x25x240xf32, #tpu.memory_space<vmem>>, vector<1x25x240xf32>
    %386 = vector.shape_cast %385 : vector<1x25x240xf32> to vector<25x240xf32>
    %cst_278 = arith.constant dense<0.000000e+00> : vector<1x240xf32>
    %387 = tpu.matmul %384, %386, %cst_278 {dimension_numbers = #tpu.dot_dimension_numbers<[1], [0], [0], [1], [0, 0, 1, 1], [], []>} : vector<1x25xf32>, vector<25x240xf32>, vector<1x240xf32> -> vector<1x240xf32>
    %388 = arith.addf %383, %387 : vector<1x240xf32>
    %389 = vector.extract_strided_slice %277 {offsets = [22, 0], sizes = [1, 25], strides = [1, 1]} : vector<32x25xf32> to vector<1x25xf32>
    %c22_279 = arith.constant 22 : index
    %c0_280 = arith.constant 0 : index
    %c0_281 = arith.constant 0 : index
    %390 = vector.load %arg8[%c22_279, %c0_280, %c0_281] : memref<32x25x240xf32, #tpu.memory_space<vmem>>, vector<1x25x240xf32>
    %391 = vector.shape_cast %390 : vector<1x25x240xf32> to vector<25x240xf32>
    %cst_282 = arith.constant dense<0.000000e+00> : vector<1x240xf32>
    %392 = tpu.matmul %389, %391, %cst_282 {dimension_numbers = #tpu.dot_dimension_numbers<[1], [0], [0], [1], [0, 0, 1, 1], [], []>} : vector<1x25xf32>, vector<25x240xf32>, vector<1x240xf32> -> vector<1x240xf32>
    %393 = arith.addf %388, %392 : vector<1x240xf32>
    %394 = vector.extract_strided_slice %277 {offsets = [23, 0], sizes = [1, 25], strides = [1, 1]} : vector<32x25xf32> to vector<1x25xf32>
    %c23_283 = arith.constant 23 : index
    %c0_284 = arith.constant 0 : index
    %c0_285 = arith.constant 0 : index
    %395 = vector.load %arg8[%c23_283, %c0_284, %c0_285] : memref<32x25x240xf32, #tpu.memory_space<vmem>>, vector<1x25x240xf32>
    %396 = vector.shape_cast %395 : vector<1x25x240xf32> to vector<25x240xf32>
    %cst_286 = arith.constant dense<0.000000e+00> : vector<1x240xf32>
    %397 = tpu.matmul %394, %396, %cst_286 {dimension_numbers = #tpu.dot_dimension_numbers<[1], [0], [0], [1], [0, 0, 1, 1], [], []>} : vector<1x25xf32>, vector<25x240xf32>, vector<1x240xf32> -> vector<1x240xf32>
    %398 = arith.addf %393, %397 : vector<1x240xf32>
    %399 = vector.extract_strided_slice %277 {offsets = [24, 0], sizes = [1, 25], strides = [1, 1]} : vector<32x25xf32> to vector<1x25xf32>
    %c24_287 = arith.constant 24 : index
    %c0_288 = arith.constant 0 : index
    %c0_289 = arith.constant 0 : index
    %400 = vector.load %arg8[%c24_287, %c0_288, %c0_289] : memref<32x25x240xf32, #tpu.memory_space<vmem>>, vector<1x25x240xf32>
    %401 = vector.shape_cast %400 : vector<1x25x240xf32> to vector<25x240xf32>
    %cst_290 = arith.constant dense<0.000000e+00> : vector<1x240xf32>
    %402 = tpu.matmul %399, %401, %cst_290 {dimension_numbers = #tpu.dot_dimension_numbers<[1], [0], [0], [1], [0, 0, 1, 1], [], []>} : vector<1x25xf32>, vector<25x240xf32>, vector<1x240xf32> -> vector<1x240xf32>
    %403 = arith.addf %398, %402 : vector<1x240xf32>
    %404 = vector.extract_strided_slice %277 {offsets = [25, 0], sizes = [1, 25], strides = [1, 1]} : vector<32x25xf32> to vector<1x25xf32>
    %c25 = arith.constant 25 : index
    %c0_291 = arith.constant 0 : index
    %c0_292 = arith.constant 0 : index
    %405 = vector.load %arg8[%c25, %c0_291, %c0_292] : memref<32x25x240xf32, #tpu.memory_space<vmem>>, vector<1x25x240xf32>
    %406 = vector.shape_cast %405 : vector<1x25x240xf32> to vector<25x240xf32>
    %cst_293 = arith.constant dense<0.000000e+00> : vector<1x240xf32>
    %407 = tpu.matmul %404, %406, %cst_293 {dimension_numbers = #tpu.dot_dimension_numbers<[1], [0], [0], [1], [0, 0, 1, 1], [], []>} : vector<1x25xf32>, vector<25x240xf32>, vector<1x240xf32> -> vector<1x240xf32>
    %408 = arith.addf %403, %407 : vector<1x240xf32>
    %409 = vector.extract_strided_slice %277 {offsets = [26, 0], sizes = [1, 25], strides = [1, 1]} : vector<32x25xf32> to vector<1x25xf32>
    %c26 = arith.constant 26 : index
    %c0_294 = arith.constant 0 : index
    %c0_295 = arith.constant 0 : index
    %410 = vector.load %arg8[%c26, %c0_294, %c0_295] : memref<32x25x240xf32, #tpu.memory_space<vmem>>, vector<1x25x240xf32>
    %411 = vector.shape_cast %410 : vector<1x25x240xf32> to vector<25x240xf32>
    %cst_296 = arith.constant dense<0.000000e+00> : vector<1x240xf32>
    %412 = tpu.matmul %409, %411, %cst_296 {dimension_numbers = #tpu.dot_dimension_numbers<[1], [0], [0], [1], [0, 0, 1, 1], [], []>} : vector<1x25xf32>, vector<25x240xf32>, vector<1x240xf32> -> vector<1x240xf32>
    %413 = arith.addf %408, %412 : vector<1x240xf32>
    %414 = vector.extract_strided_slice %277 {offsets = [27, 0], sizes = [1, 25], strides = [1, 1]} : vector<32x25xf32> to vector<1x25xf32>
    %c27 = arith.constant 27 : index
    %c0_297 = arith.constant 0 : index
    %c0_298 = arith.constant 0 : index
    %415 = vector.load %arg8[%c27, %c0_297, %c0_298] : memref<32x25x240xf32, #tpu.memory_space<vmem>>, vector<1x25x240xf32>
    %416 = vector.shape_cast %415 : vector<1x25x240xf32> to vector<25x240xf32>
    %cst_299 = arith.constant dense<0.000000e+00> : vector<1x240xf32>
    %417 = tpu.matmul %414, %416, %cst_299 {dimension_numbers = #tpu.dot_dimension_numbers<[1], [0], [0], [1], [0, 0, 1, 1], [], []>} : vector<1x25xf32>, vector<25x240xf32>, vector<1x240xf32> -> vector<1x240xf32>
    %418 = arith.addf %413, %417 : vector<1x240xf32>
    %419 = vector.extract_strided_slice %277 {offsets = [28, 0], sizes = [1, 25], strides = [1, 1]} : vector<32x25xf32> to vector<1x25xf32>
    %c28 = arith.constant 28 : index
    %c0_300 = arith.constant 0 : index
    %c0_301 = arith.constant 0 : index
    %420 = vector.load %arg8[%c28, %c0_300, %c0_301] : memref<32x25x240xf32, #tpu.memory_space<vmem>>, vector<1x25x240xf32>
    %421 = vector.shape_cast %420 : vector<1x25x240xf32> to vector<25x240xf32>
    %cst_302 = arith.constant dense<0.000000e+00> : vector<1x240xf32>
    %422 = tpu.matmul %419, %421, %cst_302 {dimension_numbers = #tpu.dot_dimension_numbers<[1], [0], [0], [1], [0, 0, 1, 1], [], []>} : vector<1x25xf32>, vector<25x240xf32>, vector<1x240xf32> -> vector<1x240xf32>
    %423 = arith.addf %418, %422 : vector<1x240xf32>
    %424 = vector.extract_strided_slice %277 {offsets = [29, 0], sizes = [1, 25], strides = [1, 1]} : vector<32x25xf32> to vector<1x25xf32>
    %c29 = arith.constant 29 : index
    %c0_303 = arith.constant 0 : index
    %c0_304 = arith.constant 0 : index
    %425 = vector.load %arg8[%c29, %c0_303, %c0_304] : memref<32x25x240xf32, #tpu.memory_space<vmem>>, vector<1x25x240xf32>
    %426 = vector.shape_cast %425 : vector<1x25x240xf32> to vector<25x240xf32>
    %cst_305 = arith.constant dense<0.000000e+00> : vector<1x240xf32>
    %427 = tpu.matmul %424, %426, %cst_305 {dimension_numbers = #tpu.dot_dimension_numbers<[1], [0], [0], [1], [0, 0, 1, 1], [], []>} : vector<1x25xf32>, vector<25x240xf32>, vector<1x240xf32> -> vector<1x240xf32>
    %428 = arith.addf %423, %427 : vector<1x240xf32>
    %429 = vector.extract_strided_slice %277 {offsets = [30, 0], sizes = [1, 25], strides = [1, 1]} : vector<32x25xf32> to vector<1x25xf32>
    %c30 = arith.constant 30 : index
    %c0_306 = arith.constant 0 : index
    %c0_307 = arith.constant 0 : index
    %430 = vector.load %arg8[%c30, %c0_306, %c0_307] : memref<32x25x240xf32, #tpu.memory_space<vmem>>, vector<1x25x240xf32>
    %431 = vector.shape_cast %430 : vector<1x25x240xf32> to vector<25x240xf32>
    %cst_308 = arith.constant dense<0.000000e+00> : vector<1x240xf32>
    %432 = tpu.matmul %429, %431, %cst_308 {dimension_numbers = #tpu.dot_dimension_numbers<[1], [0], [0], [1], [0, 0, 1, 1], [], []>} : vector<1x25xf32>, vector<25x240xf32>, vector<1x240xf32> -> vector<1x240xf32>
    %433 = arith.addf %428, %432 : vector<1x240xf32>
    %434 = vector.extract_strided_slice %277 {offsets = [31, 0], sizes = [1, 25], strides = [1, 1]} : vector<32x25xf32> to vector<1x25xf32>
    %c31 = arith.constant 31 : index
    %c0_309 = arith.constant 0 : index
    %c0_310 = arith.constant 0 : index
    %435 = vector.load %arg8[%c31, %c0_309, %c0_310] : memref<32x25x240xf32, #tpu.memory_space<vmem>>, vector<1x25x240xf32>
    %436 = vector.shape_cast %435 : vector<1x25x240xf32> to vector<25x240xf32>
    %cst_311 = arith.constant dense<0.000000e+00> : vector<1x240xf32>
    %437 = tpu.matmul %434, %436, %cst_311 {dimension_numbers = #tpu.dot_dimension_numbers<[1], [0], [0], [1], [0, 0, 1, 1], [], []>} : vector<1x25xf32>, vector<25x240xf32>, vector<1x240xf32> -> vector<1x240xf32>
    %438 = arith.addf %433, %437 : vector<1x240xf32>
    %cst_312 = arith.constant 0.000000e+00 : f32
    %439 = vector.broadcast %cst_312 : f32 to vector<1x240xf32>
    %440 = arith.maximumf %438, %439 : vector<1x240xf32>
    %c0_313 = arith.constant 0 : index
    %c0_314 = arith.constant 0 : index
    %441 = vector.load %arg10[%c0_313, %c0_314] : memref<240x168xf32, #tpu.memory_space<vmem>>, vector<240x168xf32>
    %cst_315 = arith.constant dense<0.000000e+00> : vector<1x168xf32>
    %442 = tpu.matmul %440, %441, %cst_315 {dimension_numbers = #tpu.dot_dimension_numbers<[1], [0], [0], [1], [0, 0, 1, 1], [], []>} : vector<1x240xf32>, vector<240x168xf32>, vector<1x168xf32> -> vector<1x168xf32>
    %c0_316 = arith.constant 0 : index
    %c0_317 = arith.constant 0 : index
    %443 = vector.load %arg11[%c0_316, %c0_317] : memref<1x168xf32, #tpu.memory_space<vmem>>, vector<1x168xf32>
    %444 = arith.addf %442, %443 : vector<1x168xf32>
    %cst_318 = arith.constant 0.000000e+00 : f32
    %445 = vector.broadcast %cst_318 : f32 to vector<1x168xf32>
    %446 = arith.maximumf %444, %445 : vector<1x168xf32>
    %c0_319 = arith.constant 0 : index
    %c0_320 = arith.constant 0 : index
    %447 = vector.load %arg12[%c0_319, %c0_320] : memref<168x20xf32, #tpu.memory_space<vmem>>, vector<168x20xf32>
    %cst_321 = arith.constant dense<0.000000e+00> : vector<1x20xf32>
    %448 = tpu.matmul %446, %447, %cst_321 {dimension_numbers = #tpu.dot_dimension_numbers<[1], [0], [0], [1], [0, 0, 1, 1], [], []>} : vector<1x168xf32>, vector<168x20xf32>, vector<1x20xf32> -> vector<1x20xf32>
    %c0_322 = arith.constant 0 : index
    %c0_323 = arith.constant 0 : index
    %449 = vector.load %arg13[%c0_322, %c0_323] : memref<1x20xf32, #tpu.memory_space<vmem>>, vector<1x20xf32>
    %450 = arith.addf %448, %449 : vector<1x20xf32>
    %c0_324 = arith.constant 0 : index
    %c0_325 = arith.constant 0 : index
    %451 = vector.load %arg14[%c0_324, %c0_325] : memref<20x10xf32, #tpu.memory_space<vmem>>, vector<20x10xf32>
    %cst_326 = arith.constant dense<0.000000e+00> : vector<1x10xf32>
    %452 = tpu.matmul %450, %451, %cst_326 {dimension_numbers = #tpu.dot_dimension_numbers<[1], [0], [0], [1], [0, 0, 1, 1], [], []>} : vector<1x20xf32>, vector<20x10xf32>, vector<1x10xf32> -> vector<1x10xf32>
    %c0_327 = arith.constant 0 : index
    %c0_328 = arith.constant 0 : index
    %453 = vector.load %arg15[%c0_327, %c0_328] : memref<1x10xf32, #tpu.memory_space<vmem>>, vector<1x10xf32>
    %454 = arith.addf %452, %453 : vector<1x10xf32>
    %c0_329 = arith.constant 0 : index
    %c0_330 = arith.constant 0 : index
    %c0_331 = arith.constant 0 : index
    %455 = vector.load %arg16[%c0_329, %c0_330, %c0_331] : memref<1x1x10xf32, #tpu.memory_space<vmem>>, vector<1x1x10xf32>
    %456 = vector.shape_cast %455 : vector<1x1x10xf32> to vector<1x10xf32>
    %457 = vector.shape_cast %454 : vector<1x10xf32> to vector<1x1x10xf32>
    tpu.vector_store %arg16[%c0_329, %c0_330, %c0_331], %457 {strides = array<i32>} : memref<1x1x10xf32, #tpu.memory_space<vmem>>, vector<1x1x10xf32>,
    return
  }
  func.func @transform_0(%arg0: i32) -> (i32, i32, i32) {
    %c0_i32 = arith.constant 0 : i32
    %c0_i32_0 = arith.constant 0 : i32
    %c0_i32_1 = arith.constant 0 : i32
    return %arg0, %c0_i32, %c0_i32_0 : i32, i32, i32
  }
  func.func @transform_1(%arg0: i32) -> (i32, i32, i32) {
    %c0_i32 = arith.constant 0 : i32
    %c0_i32_0 = arith.constant 0 : i32
    %c0_i32_1 = arith.constant 0 : i32
    %c0_i32_2 = arith.constant 0 : i32
    return %c0_i32, %c0_i32_0, %c0_i32_1 : i32, i32, i32
  }
  func.func @transform_2(%arg0: i32) -> (i32, i32) {
    %c0_i32 = arith.constant 0 : i32
    %c0_i32_0 = arith.constant 0 : i32
    %c0_i32_1 = arith.constant 0 : i32
    return %c0_i32, %c0_i32_0 : i32, i32
  }
  func.func @transform_3(%arg0: i32) -> (i32, i32, i32) {
    %c0_i32 = arith.constant 0 : i32
    %c0_i32_0 = arith.constant 0 : i32
    %c0_i32_1 = arith.constant 0 : i32
    %c0_i32_2 = arith.constant 0 : i32
    return %c0_i32, %c0_i32_0, %c0_i32_1 : i32, i32, i32
  }
  func.func @transform_4(%arg0: i32) -> (i32, i32) {
    %c0_i32 = arith.constant 0 : i32
    %c0_i32_0 = arith.constant 0 : i32
    %c0_i32_1 = arith.constant 0 : i32
    return %c0_i32, %c0_i32_0 : i32, i32
  }
  func.func @transform_5(%arg0: i32) -> (i32, i32) {
    %c0_i32 = arith.constant 0 : i32
    %c0_i32_0 = arith.constant 0 : i32
    %c0_i32_1 = arith.constant 0 : i32
    return %c0_i32, %c0_i32_0 : i32, i32
  }
  func.func @transform_6(%arg0: i32) -> (i32, i32) {
    %c0_i32 = arith.constant 0 : i32
    %c0_i32_0 = arith.constant 0 : i32
    %c0_i32_1 = arith.constant 0 : i32
    return %c0_i32, %c0_i32_0 : i32, i32
  }
  func.func @transform_7(%arg0: i32) -> (i32, i32, i32) {
    %c0_i32 = arith.constant 0 : i32
    %c0_i32_0 = arith.constant 0 : i32
    %c0_i32_1 = arith.constant 0 : i32
    %c0_i32_2 = arith.constant 0 : i32
    return %c0_i32, %c0_i32_0, %c0_i32_1 : i32, i32, i32
  }
  func.func @transform_8(%arg0: i32) -> (i32, i32) {
    %c0_i32 = arith.constant 0 : i32
    %c0_i32_0 = arith.constant 0 : i32
    %c0_i32_1 = arith.constant 0 : i32
    return %c0_i32, %c0_i32_0 : i32, i32
  }
  func.func @transform_9(%arg0: i32) -> (i32, i32) {
    %c0_i32 = arith.constant 0 : i32
    %c0_i32_0 = arith.constant 0 : i32
    %c0_i32_1 = arith.constant 0 : i32
    return %c0_i32, %c0_i32_0 : i32, i32
  }
  func.func @transform_10(%arg0: i32) -> (i32, i32) {
    %c0_i32 = arith.constant 0 : i32
    %c0_i32_0 = arith.constant 0 : i32
    %c0_i32_1 = arith.constant 0 : i32
    return %c0_i32, %c0_i32_0 : i32, i32
  }
  func.func @transform_11(%arg0: i32) -> (i32, i32) {
    %c0_i32 = arith.constant 0 : i32
    %c0_i32_0 = arith.constant 0 : i32
    %c0_i32_1 = arith.constant 0 : i32
    return %c0_i32, %c0_i32_0 : i32, i32
  }
  func.func @transform_12(%arg0: i32) -> (i32, i32) {
    %c0_i32 = arith.constant 0 : i32
    %c0_i32_0 = arith.constant 0 : i32
    %c0_i32_1 = arith.constant 0 : i32
    return %c0_i32, %c0_i32_0 : i32, i32
  }
  func.func @transform_13(%arg0: i32) -> (i32, i32) {
    %c0_i32 = arith.constant 0 : i32
    %c0_i32_0 = arith.constant 0 : i32
    %c0_i32_1 = arith.constant 0 : i32
    return %c0_i32, %c0_i32_0 : i32, i32
  }
  func.func @transform_14(%arg0: i32) -> (i32, i32) {
    %c0_i32 = arith.constant 0 : i32
    %c0_i32_0 = arith.constant 0 : i32
    %c0_i32_1 = arith.constant 0 : i32
    return %c0_i32, %c0_i32_0 : i32, i32
  }
  func.func @transform_15(%arg0: i32) -> (i32, i32, i32) {
    %c0_i32 = arith.constant 0 : i32
    %c0_i32_0 = arith.constant 0 : i32
    %c0_i32_1 = arith.constant 0 : i32
    return %arg0, %c0_i32, %c0_i32_0 : i32, i32, i32
  }
}

</mosaic_0001>

<bundles_post_ra>
// kernel: masternet_v0_forward.1
= control target key start
LH: loop header
LB: loop body
LE: loop exit
PB: predicated region body
PF: predicated region fallthrough
CT: control target
= control target key end

     0   :  { %s25064_s0 = inlined_call_operand.vmem [shape: f32[2,8,1024], index: 0, kind: input, shape index: {}]   ;;  %s25065_s1 = inlined_call_operand.vmem [shape: f32[25,16,8], index: 1, kind: input, shape index: {}]   ;;  %s25066_s2 = inlined_call_operand.vmem [shape: f32[16,1], index: 2, kind: input, shape index: {}]   ;;  %s25067_s3 = inlined_call_operand.vmem [shape: f32[25,32,16], index: 3, kind: input, shape index: {}]   ;;  %s25068_s4 = inlined_call_operand.vmem [shape: f32[32,1], index: 4, kind: input, shape index: {}]   ;;  %s25069_s5 = inlined_call_operand.vmem [shape: f32[859,196], index: 5, kind: input, shape index: {}]   ;;  %s25070_s6 = inlined_call_operand.vmem [shape: f32[121,25], index: 6, kind: input, shape index: {}]   ;;  %s25071_s7 = inlined_call_operand.vmem [shape: f32[32,25,240], index: 7, kind: input, shape index: {}]   ;;  %s25072_s8 = inlined_call_operand.vmem [shape: f32[1,240], index: 8, kind: input, shape index: {}]   ;;  %s25073_s9 = inlined_call_operand.vmem [shape: f32[240,168], index: 9, kind: input, shape index: {}]   ;;  %s25074_s10 = inlined_call_operand.vmem [shape: f32[1,168], index: 10, kind: input, shape index: {}]   ;;  %s25075_s11 = inlined_call_operand.vmem [shape: f32[168,20], index: 11, kind: input, shape index: {}]   ;;  %s25076_s12 = inlined_call_operand.vmem [shape: f32[1,20], index: 12, kind: input, shape index: {}]   ;;  %s25077_s13 = inlined_call_operand.vmem [shape: f32[20,10], index: 13, kind: input, shape index: {}]   ;;  %s25078_s14 = inlined_call_operand.vmem [shape: f32[1,10], index: 14, kind: input, shape index: {}]   ;;  %s25079_s15 = inlined_call_operand.hbm [shape: f32[2,1,10], index: 15, kind: output, shape index: {}]  }
   0x1   :  { %25118 = sst [smem:[#allocation15_spill]] %s25064_s0 }
   0x2   :  { %25119 = sst [smem:[#allocation16_spill]] %s25065_s1 }
   0x3   :  { %25120 = sst [smem:[#allocation17_spill]] %s25066_s2 }
   0x4   :  { %20 = vsyncpa [#allocation3], 0 }
   0x5   :  { %22 = vsyncpa [#allocation3 + $0x1], 0  ;;  %s20305_s18 = smov 0   ;;  %s20307_s19 = smov 0  }
   0x6   :  { %s20309_s20 = smov 0   ;;  %s20311_s21 = smov 0  }
   0x7 LB: > { %25121 = sst [smem:[#allocation5_spill]] %s20166_s18  ;;  %s20326_s22 = sadd.s32 4294967295, %s20178_s21   ;;  %s20178_s21 = sphi %s20311_s21, %s25159_s21   ;;  %s20174_s20 = sphi %s20309_s20, %s25161_s20   ;;  %s20170_s19 = sphi %s20307_s19, %s25163_s19   ;;  %s20166_s18 = sphi %s20305_s18, %s25162_s18  }
   0x8   : > { %25122 = sst [smem:[#allocation6_spill]] %s20174_s20  ;;  %s17346_s23 = sadd.s32 4294967294, %s20178_s21  }
   0x9   : > { %25123 = sst [smem:[#allocation7_spill]] %s20178_s21  ;;  %s20330_s24 = sadd.s32 1, %s20178_s21  }
   0xa   : > { %25124 = sst [smem:[#allocation8_spill]] %s20330_s24  ;;  %s355_s25 = sadd.s32 1, %s20174_s20 }
   0xb   : > { %s352_s26 = ssub.s32 %s20178_s21, %s20330_s24  ;;  %p365_p0 = scmp.ne.s32.totalorder %s20174_s20, %s20170_s19 }
   0xc   : > { %p353_p1 = scmp.eq.s32.totalorder %s352_s26, 0  ;;  %p366_p2 = scmp.eq.s32.totalorder %s20326_s22, 1 }
   0xd   : > { %p371_p3 = scmp.ne.s32.totalorder %s20170_s19, %s20166_s18  ;;  %p372_p4 = scmp.eq.s32.totalorder %s17346_s23, 1 }
   0xe   : > { %s20341_s27 = scalar_select %p353_p1, %s20174_s20, %s355_s25  }
   0xf   : > { %p20343_p5 = por %p366_p2, %p365_p0  ;;  %p20347_p6 = por %p372_p4, %p371_p3 }
  0x10   : > { %25125 = sst [smem:[#allocation9_spill]] %s20341_s27  ;;  %p17349_p7 = scmp.ge.s32.totalorder %s20178_s21, 1 }
  0x11   : > { %s25127_s29 = scalar_select %p20347_p6, 1, 0 }
  0x12   : > { %p440_p8 = scmp.lt.s32.totalorder %s20178_s21, 3 }
  0x13   : > { %25128 = sst [smem:[#allocation10_spill]] %s25127_s29 }
  0x14   : > { %p441_p9 = pnand %p17349_p7, %p440_p8 }
  0x16   : > { %444 = sbr.rel (%p441_p9) target bundleno = 3801 (0xed9), region = 80 }
  0x1d   : > { %p487_p10 = scmp.lt.s32.totalorder %s20326_s22, 1  ;;  %v25106_v0 = vmov 0.0   ;;  %s25129_s0 = sld [smem:[#allocation15_spill]]  ;;  %vm526_vm0 = vcmask 1039360   ;;  %vm540_vm1 = vcmask 64512   ;;  %vm1182_vm2 = vcmask 1031168  }
  0x1e   : > { %611 = vmatprep.mubr.f32.mxu0 %v25106_v0  ;;  %688 = vmatprep.mubr.f32.mxu1 %v25106_v0  ;;  %s25082_s26 = smov 127   ;;  %s25080_s17 = smov 124   ;;  %vm1539_vm3 = vcmask 1022976   ;;  %vm1896_vm4 = vcmask 1014784   ;;  %vm2256_vm5 = vcmask 785408   ;;  %vm2616_vm6 = vcmask 777216  }
  0x1f   : > { %s488_s30 = scalar_select %p487_p10, %s20326_s22, 1  ;;  %vm2976_vm7 = vcmask 769024   ;;  %vm3336_vm8 = vcmask 760832   ;;  %vm3696_vm9 = vcmask 752640   ;;  %vm4056_vm10 = vcmask 523264  }
  0x20   : > { %s25098_s23 = smov 96   ;;  %s25131_s1 = sld [smem:[#allocation16_spill]]  ;;  %vm4416_vm11 = vcmask 515072   ;;  %vm4776_vm12 = vcmask 506880   ;;  %vm5136_vm13 = vcmask 498688   ;;  %vm5496_vm14 = vcmask 490496  }
  0x21   : > { %s18156_s16 = sshll.u32 %s488_s30, 6  ;;  %s25086_s30 = smov 126   ;;  %vm5856_vm15 = vcmask 261120  }
  0x22   : > { %s25148_s2 = sld [smem:[#allocation17_spill]]  ;;  %s25153_s18 = smov 96  }
  0x23   : > { %s20360_s25 = scalar_lea.vmem %s25129_s0, %s18156_s16  ;;  %s25090_s16 = smov 125  }
  0x24   : > { %v20363_v1 = vld [vmem:[%s20360_s25 + $0x8] sm:$0xff]  ;;  %v20366_v2 = vld [vmem:[%s20360_s25] sm:$0xff]  ;;  %v20373_v3 = vld [vmem:[%s20360_s25 + $0x10] sm:$0xff]  ;;  %s25100_s0 = smov 63   ;;  %s20204_s20 = smov 112  }
  0x25   : > { %514 = vrot.lane.b32.xlu0 %v20363_v1, %s25082_s26  ;;  %512 = vrot.lane.b32.xlu1 %v20366_v2, %s25082_s26  ;;  %v20376_v4 = vld [vmem:[%s20360_s25 + $0x28] sm:$0xff]  ;;  %v20383_v5 = vld [vmem:[%s20360_s25 + $0x30] sm:$0xff]  ;;  %s20205_s24 = smov 111   ;;  %s20208_s27 = smov 99  }
  0x26   : > { %v20386_v6 = vld [vmem:[%s20360_s25 + $0x20] sm:$0xff]  ;;  %v20441_v7 = vld [vmem:[%s20360_s25 + $0x18] sm:$0xff]  ;;  %v20512_v13 = vld [vmem:[%s25131_s1 + $0x10] sm:$0xff]  ;;  %s20211_s29 = smov 86   ;;  %s20212_s21 = smov 85  }
  0x27   : > { %v20521_v15 = vld [vmem:[%s20360_s25 + $0x38] sm:$0xff]  ;;  %v20578_v27 = vld [vmem:[%s25131_s1] sm:$0xff]  ;;  %v20596_v31 = vld [vmem:[%s25131_s1 + $0x8] sm:$0xff] }
  0x28   : > { %v20541_v20 = vld [vmem:[%s25131_s1 + $0x18] sm:$0xff]  ;;  %v20638_v40 = vld [vmem:[%s25131_s1 + $0x20] sm:$0xff]  ;;  %v20661_v45 = vld [vmem:[%s25131_s1 + $0x28] sm:$0xff] }
  0x29   : > { %516 = vrot.lane.b32.xlu0 %v20373_v3, %s25082_s26  ;;  %522 = vrot.lane.b32.xlu1 %v20376_v4, %s25082_s26  ;;  %v20706_v54 = vld [vmem:[%s25131_s1 + $0x30] sm:$0xff]  ;;  %v20732_v59 = vld [vmem:[%s25131_s1 + $0x38] sm:$0xff] }
  0x2d   : > { %524 = vrot.lane.b32.xlu0 %v20383_v5, %s25082_s26  ;;  %520 = vrot.lane.b32.xlu1 %v20386_v6, %s25082_s26 }
  0x31   : > { %1170 = vrot.lane.b32.xlu0 %v20363_v1, %s25086_s30  ;;  %1172 = vrot.lane.b32.xlu1 %v20373_v3, %s25086_s30 }
  0x35   : > { %1168 = vrot.lane.b32.xlu0 %v20366_v2, %s25086_s30  ;;  %1178 = vrot.lane.b32.xlu1 %v20376_v4, %s25086_s30 }
  0x39   : > { %1180 = vrot.lane.b32.xlu0 %v20383_v5, %s25086_s30  ;;  %1176 = vrot.lane.b32.xlu1 %v20386_v6, %s25086_s30 }
  0x3d   : > { %1527 = vrot.lane.b32.xlu0 %v20363_v1, %s25090_s16  ;;  %1529 = vrot.lane.b32.xlu1 %v20373_v3, %s25090_s16 }
  0x41   : > { %1525 = vrot.lane.b32.xlu0 %v20366_v2, %s25090_s16  ;;  %1535 = vrot.lane.b32.xlu1 %v20376_v4, %s25090_s16 }
  0x45   : > { %1537 = vrot.lane.b32.xlu0 %v20383_v5, %s25090_s16  ;;  %1533 = vrot.lane.b32.xlu1 %v20386_v6, %s25090_s16 }
  0x49   : > { %1884 = vrot.lane.b32.xlu0 %v20363_v1, %s25080_s17  ;;  %1886 = vrot.lane.b32.xlu1 %v20373_v3, %s25080_s17 }
  0x4d   : > { %1882 = vrot.lane.b32.xlu0 %v20366_v2, %s25080_s17  ;;  %1892 = vrot.lane.b32.xlu1 %v20376_v4, %s25080_s17 }
  0x51   : > { %1894 = vrot.lane.b32.xlu0 %v20383_v5, %s25080_s17  ;;  %1890 = vrot.lane.b32.xlu1 %v20386_v6, %s25080_s17  ;;  %s25084_s17 = smov 95  }
  0x55   : > { %2242 = vrot.lane.b32.xlu0 %v20363_v1, %s25098_s23  ;;  %2244 = vrot.lane.b32.xlu1 %v20373_v3, %s25098_s23 }
  0x59   : > { %2240 = vrot.lane.b32.xlu0 %v20366_v2, %s25098_s23  ;;  %2250 = vrot.lane.b32.xlu1 %v20376_v4, %s25098_s23 }
  0x5d   : > { %2252 = vrot.lane.b32.xlu0 %v20383_v5, %s25098_s23  ;;  %2248 = vrot.lane.b32.xlu1 %v20386_v6, %s25098_s23 }
  0x61   : > { %518 = vrot.lane.b32.xlu0 %v20441_v7, %s25082_s26  ;;  %2602 = vrot.lane.b32.xlu1 %v20363_v1, %s25084_s17  ;;  %s25088_s26 = smov 94  }
  0x65   : > { %2604 = vrot.lane.b32.xlu0 %v20373_v3, %s25084_s17  ;;  %2600 = vrot.lane.b32.xlu1 %v20366_v2, %s25084_s17 }
  0x69   : > { %2610 = vrot.lane.b32.xlu0 %v20376_v4, %s25084_s17  ;;  %2612 = vrot.lane.b32.xlu1 %v20383_v5, %s25084_s17 }
  0x6d   : > { %2608 = vrot.lane.b32.xlu0 %v20386_v6, %s25084_s17  ;;  %2962 = vrot.lane.b32.xlu1 %v20363_v1, %s25088_s26  ;;  %s25092_s17 = smov 93  }
  0x71   : > { %2964 = vrot.lane.b32.xlu0 %v20373_v3, %s25088_s26  ;;  %2960 = vrot.lane.b32.xlu1 %v20366_v2, %s25088_s26 }
  0x75   : > { %1174 = vrot.lane.b32.xlu0 %v20441_v7, %s25086_s30  ;;  %2970 = vrot.lane.b32.xlu1 %v20376_v4, %s25088_s26  ;;  %s25130_s30 = smov 124  }
  0x79   : > { %2972 = vrot.lane.b32.xlu0 %v20383_v5, %s25088_s26  ;;  %2968 = vrot.lane.b32.xlu1 %v20386_v6, %s25088_s26  ;;  %s25094_s26 = smov 92  }
  0x7d   : > { %3322 = vrot.lane.b32.xlu0 %v20363_v1, %s25092_s17  ;;  %3324 = vrot.lane.b32.xlu1 %v20373_v3, %s25092_s17 }
  0x81   : > { %3320 = vrot.lane.b32.xlu0 %v20366_v2, %s25092_s17  ;;  %1531 = vrot.lane.b32.xlu1 %v20441_v7, %s25090_s16  ;;  %s25096_s16 = smov 64  }
  0x85   : > { %3330 = vrot.lane.b32.xlu0 %v20376_v4, %s25092_s17  ;;  %3332 = vrot.lane.b32.xlu1 %v20383_v5, %s25092_s17 }
  0x89   : > { %3328 = vrot.lane.b32.xlu0 %v20386_v6, %s25092_s17  ;;  %1888 = vrot.lane.b32.xlu1 %v20441_v7, %s25130_s30  ;;  %s25134_s17 = smov 94  }
  0x8d   : > { %3682 = vrot.lane.b32.xlu0 %v20363_v1, %s25094_s26  ;;  %3684 = vrot.lane.b32.xlu1 %v20373_v3, %s25094_s26 }
  0x91   : > { %3680 = vrot.lane.b32.xlu0 %v20366_v2, %s25094_s26  ;;  %3690 = vrot.lane.b32.xlu1 %v20376_v4, %s25094_s26 }
  0x95   : > { %3692 = vrot.lane.b32.xlu0 %v20383_v5, %s25094_s26  ;;  %3688 = vrot.lane.b32.xlu1 %v20386_v6, %s25094_s26  ;;  %s25133_s26 = smov 64  }
  0x97   : > { %v515_v8 = vpop.permute.xlu0 %514  ;;  %v513_v9 = vpop.permute.xlu1 %512 }
  0x98   : > { %v527_v14 = vsel %vm526_vm0, %v513_v9, %v515_v8 }
  0x99   : > { %2246 = vrot.lane.b32.xlu0 %v20441_v7, %s25098_s23  ;;  %4042 = vrot.lane.b32.xlu1 %v20363_v1, %s25096_s16 }
  0x9b   : > { %v20503_v10 = vpop.permute.xlu0 %516  ;;  %v523_v11 = vpop.permute.xlu1 %522 }
  0x9c   : > { %v20507_v12 = vsel %vm526_vm0, %v515_v8, %v20503_v10 }
  0x9d   : > { %547 = vmatprep.subr.mxu0 %v20507_v12  ;;  %4044 = vrot.lane.b32.xlu0 %v20373_v3, %s25096_s16 }
  0x9e   : > { %4040 = vrot.lane.b32.xlu1 %v20366_v2, %s25096_s16  ;;  %548 = vmatpush1.msra.mxu0 %v527_v14  ;;  %s25132_s16 = smov 95  }
  0x9f   : > { %v20523_v16 = vpop.permute.xlu0 %524  ;;  %17354 = vmatmul.mubr.msk.f32.vlgmr.msra.gmra.mrb[0].mxu0 %vm540_vm1, %v20512_v13  ;;  %v20527_v17 = vpop.permute.xlu1 %520 }
  0xa0   : > { %v20531_v18 = vsel %vm526_vm0, %v523_v11, %v20523_v16  ;;  %617 = vmatprep.mubr.f32.mxu0 %v25106_v0  ;;  %v20536_v19 = vsel %vm526_vm0, %v20527_v17, %v523_v11 }
  0xa1   : > { %2254 = vrot.lane.b32.xlu0 %v20521_v15, %s25098_s23  ;;  %701 = vmatprep.subr.mxu0 %v20531_v18  ;;  %s25137_s23 = smov 92  }
  0xa2   : > { %2606 = vrot.lane.b32.xlu1 %v20441_v7, %s25132_s16  ;;  %702 = vmatpush1.msra.mxu0 %v20536_v19 }
  0xa3   : > { %v1171_v21 = vpop.permute.xlu0 %1170  ;;  %17355 = vmatmul.mubr.msk.f32.gmra.mrb[2].mxu0 %vm540_vm1, %v20541_v20  ;;  %v20551_v22 = vpop.permute.xlu1 %1172  ;;  %859 = vmatprep.subr.mxu0 %v20363_v1 }
  0xa4   : > { %765 = vmatprep.mubr.f32.mxu0 %v25106_v0  ;;  %v20586_v28 = vsel %vm1182_vm2, %v1171_v21, %v20551_v22 }
  0xa5   : > { %4050 = vrot.lane.b32.xlu0 %v20376_v4, %s25133_s26 }
  0xa6   : > { %4052 = vrot.lane.b32.xlu1 %v20383_v5, %s25133_s26 }
  0xa7   : > { %v1169_v23 = vpop.permute.xlu0 %1168  ;;  %17358 = vmatmul.mubr.msk.f32.vlgmr.msra.gmra.mrb[4].mxu0 %vm540_vm1, %v20512_v13  ;;  %v1179_v24 = vpop.permute.xlu1 %1178 }
  0xa8   : > { %771 = vmatprep.mubr.f32.mxu0 %v25106_v0  ;;  %860 = vmatpush1.msra.mxu0 %v20366_v2  ;;  %v1183_v34 = vsel %vm1182_vm2, %v1169_v23, %v1171_v21  ;;  %v20797_v21 = vld [vmem:[%s25131_s1 + $0x40] sm:$0xff] }
  0xa9   : > { %4048 = vrot.lane.b32.xlu0 %v20386_v6, %s25133_s26  ;;  %1013 = vmatprep.subr.mxu0 %v20376_v4 }
  0xaa   : > { %2614 = vrot.lane.b32.xlu1 %v20521_v15, %s25132_s16  ;;  %s20196_s16 = smov 31  }
  0xab   : > { %v20568_v25 = vpop.permute.xlu0 %1180  ;;  %17359 = vmatmul.mubr.msk.f32.gmra.mrb[6].mxu0 %vm540_vm1, %v20541_v20  ;;  %v20572_v26 = vpop.permute.xlu1 %1176 }
  0xac   : > { %923 = vmatprep.mubr.f32.mxu0 %v25106_v0  ;;  %v20614_v35 = vsel %vm1182_vm2, %v1179_v24, %v20568_v25  ;;  %v20644_v41 = vsel %vm1182_vm2, %v20572_v26, %v1179_v24 }
  0xad   : > { %4402 = vrot.lane.b32.xlu0 %v20363_v1, %s25100_s0 }
  0xae   : > { %4404 = vrot.lane.b32.xlu1 %v20373_v3, %s25100_s0 }
  0xaf   : > { %v1528_v29 = vpop.permute.xlu0 %1527  ;;  %17362 = vmatmul.mubr.msk.f32.vlgmr.msra.gmra.mrb[0].mxu0 %vm540_vm1, %v20578_v27  ;;  %v20590_v30 = vpop.permute.xlu1 %1529 }
  0xb0   : > { %929 = vmatprep.mubr.f32.mxu0 %v25106_v0  ;;  %1014 = vmatpush1.msra.mxu0 %v20386_v6  ;;  %v20650_v42 = vsel %vm1539_vm3, %v1528_v29, %v20590_v30 }
  0xb1   : > { %4400 = vrot.lane.b32.xlu0 %v20366_v2, %s25100_s0  ;;  %1202 = vmatprep.subr.mxu0 %v20586_v28 }
  0xb2   : > { %2966 = vrot.lane.b32.xlu1 %v20441_v7, %s25134_s17 }
  0xb3   : > { %v1526_v32 = vpop.permute.xlu0 %1525  ;;  %17363 = vmatmul.mubr.msk.f32.gmra.mrb[2].mxu0 %vm540_vm1, %v20596_v31  ;;  %v1536_v33 = vpop.permute.xlu1 %1535 }
  0xb4   : > { %1077 = vmatprep.mubr.f32.mxu0 %v25106_v0  ;;  %v1540_v48 = vsel %vm1539_vm3, %v1526_v32, %v1528_v29  ;;  %v20823_v29 = vld [vmem:[%s25131_s1 + $0x48] sm:$0xff] }
  0xb5   : > { %4410 = vrot.lane.b32.xlu0 %v20376_v4, %s25100_s0 }
  0xb6   : > { %4412 = vrot.lane.b32.xlu1 %v20383_v5, %s25100_s0 }
  0xb7   : > { %v20616_v36 = vpop.permute.xlu0 %1537  ;;  %17366 = vmatmul.mubr.msk.f32.vlgmr.msra.gmra.mrb[4].mxu0 %vm540_vm1, %v20578_v27  ;;  %v20620_v37 = vpop.permute.xlu1 %1533 }
  0xb8   : > { %1203 = vmatpush1.msra.mxu0 %v1183_v34  ;;  %1083 = vmatprep.mubr.f32.mxu0 %v25106_v0  ;;  %v20682_v49 = vsel %vm1539_vm3, %v1536_v33, %v20616_v36  ;;  %v20712_v55 = vsel %vm1539_vm3, %v20620_v37, %v1536_v33 }
  0xb9   : > { %4408 = vrot.lane.b32.xlu0 %v20386_v6, %s25100_s0  ;;  %1356 = vmatprep.subr.mxu0 %v20614_v35  ;;  %s25135_s0 = smov 93   ;;  %25136 = vst [vmem:[#allocation11_spill] sm:$0xff] %v20682_v49 }
  0xba   : > { %2974 = vrot.lane.b32.xlu1 %v20521_v15, %s25134_s17  ;;  %s25102_s17 = smov 62  }
  0xbb   : > { %v20628_v38 = vpop.permute.xlu0 %1884  ;;  %17367 = vmatmul.mubr.msk.f32.gmra.mrb[6].mxu0 %vm540_vm1, %v20596_v31  ;;  %v20632_v39 = vpop.permute.xlu1 %1886 }
  0xbc   : > { %1266 = vmatprep.mubr.f32.mxu0 %v25106_v0  ;;  %v20719_v56 = vsel %vm1896_vm4, %v20628_v38, %v20632_v39 }
  0xbd   : > { %3326 = vrot.lane.b32.xlu0 %v20441_v7, %s25135_s0  ;;  %25138 = vst [vmem:[#allocation12_spill] sm:$0xff] %v20719_v56 }
  0xbe   : > { %4762 = vrot.lane.b32.xlu1 %v20363_v1, %s25102_s17 }
  0xbf   : > { %v1883_v43 = vpop.permute.xlu0 %1882  ;;  %17372 = vmatmul.mubr.msk.f32.vlgmr.msra.gmra.mrb[0].mxu0 %vm540_vm1, %v20638_v40  ;;  %v20654_v44 = vpop.permute.xlu1 %1892 }
  0xc0   : > { %1357 = vmatpush1.msra.mxu0 %v20644_v41  ;;  %1272 = vmatprep.mubr.f32.mxu0 %v25106_v0  ;;  %v1897_v8 = vsel %vm1896_vm4, %v1883_v43, %v20628_v38 }
  0xc1   : > { %4764 = vrot.lane.b32.xlu0 %v20373_v3, %s25102_s17  ;;  %1559 = vmatprep.subr.mxu0 %v20650_v42 }
  0xc2   : > { %4760 = vrot.lane.b32.xlu1 %v20366_v2, %s25102_s17 }
  0xc3   : > { %v20668_v46 = vpop.permute.xlu0 %1894  ;;  %17373 = vmatmul.mubr.msk.f32.gmra.mrb[2].mxu0 %vm540_vm1, %v20661_v45  ;;  %v20672_v47 = vpop.permute.xlu1 %1890 }
  0xc4   : > { %1420 = vmatprep.mubr.f32.mxu0 %v25106_v0 }
  0xc5   : > { %3334 = vrot.lane.b32.xlu0 %v20521_v15, %s25135_s0  ;;  %s25140_s0 = smov 63  }
  0xc6   : > { %4770 = vrot.lane.b32.xlu1 %v20376_v4, %s25102_s17 }
  0xc7   : > { %v20684_v50 = vpop.permute.xlu0 %2242  ;;  %17376 = vmatmul.mubr.msk.f32.vlgmr.msra.gmra.mrb[4].mxu0 %vm540_vm1, %v20638_v40  ;;  %v20688_v51 = vpop.permute.xlu1 %2244 }
  0xc8   : > { %1560 = vmatpush1.msra.mxu0 %v1540_v48  ;;  %1426 = vmatprep.mubr.f32.mxu0 %v25106_v0 }
  0xc9   : > { %4772 = vrot.lane.b32.xlu0 %v20383_v5, %s25102_s17  ;;  %1713 = vmatprep.subr.mxu0 %v20682_v49 }
  0xca   : > { %4768 = vrot.lane.b32.xlu1 %v20386_v6, %s25102_s17  ;;  %s20193_s17 = smov 61  }
  0xcb   : > { %v20696_v52 = vpop.permute.xlu0 %2240  ;;  %17377 = vmatmul.mubr.msk.f32.gmra.mrb[6].mxu0 %vm540_vm1, %v20661_v45  ;;  %v20700_v53 = vpop.permute.xlu1 %2250 }
  0xcc   : > { %1623 = vmatprep.mubr.f32.mxu0 %v25106_v0  ;;  %v2257_v34 = vsel %vm2256_vm5, %v20696_v52, %v20684_v50 }
  0xcd   : > { %3686 = vrot.lane.b32.xlu0 %v20441_v7, %s25137_s23 }
  0xce   : > { %5122 = vrot.lane.b32.xlu1 %v20363_v1, %s20193_s17 }
  0xcf   : > { %v20721_v57 = vpop.permute.xlu0 %2252  ;;  %17382 = vmatmul.mubr.msk.f32.vlgmr.msra.gmra.mrb[0].mxu0 %vm540_vm1, %v20706_v54  ;;  %v20725_v58 = vpop.permute.xlu1 %2248 }
  0xd0   : > { %1714 = vmatpush1.msra.mxu0 %v20712_v55  ;;  %1629 = vmatprep.mubr.f32.mxu0 %v25106_v0  ;;  %v2262_v48 = vsel %vm2256_vm5, %v20700_v53, %v20721_v57 }
  0xd1   : > { %5124 = vrot.lane.b32.xlu0 %v20373_v3, %s20193_s17  ;;  %1916 = vmatprep.subr.mxu0 %v20719_v56 }
  0xd2   : > { %5120 = vrot.lane.b32.xlu1 %v20366_v2, %s20193_s17 }
  0xd3   : > { %v519_v60 = vpop.permute.xlu0 %518  ;;  %17383 = vmatmul.mubr.msk.f32.gmra.mrb[2].mxu0 %vm540_vm1, %v20732_v59  ;;  %v20741_v61 = vpop.permute.xlu1 %2602 }
  0xd4   : > { %v20745_v62 = vsel %vm526_vm0, %v519_v60, %v20527_v17  ;;  %v20749_v63 = vsel %vm526_vm0, %v20503_v10, %v519_v60  ;;  %1777 = vmatprep.mubr.f32.mxu0 %v25106_v0  ;;  %v20785_v17 = vsel %vm1896_vm4, %v20654_v44, %v20668_v46  ;;  %v2261_v60 = vsel %vm2256_vm5, %v20725_v58, %v20700_v53 }
  0xd5   : > { %3694 = vrot.lane.b32.xlu0 %v20521_v15, %s25137_s23  ;;  %624 = vmatprep.subr.mxu1 %v20745_v62  ;;  %25139 = vst [vmem:[#allocation13_spill] sm:$0xff] %v20785_v17  ;;  %s25144_s23 = smov 60  }
  0xd6   : > { %4046 = vrot.lane.b32.xlu1 %v20441_v7, %s25133_s26  ;;  %625 = vmatpush1.msra.mxu1 %v20749_v63 }
  0xd7   : > { %v20760_v9 = vpop.permute.xlu0 %2604  ;;  %17356 = vmatmul.mubr.msk.f32.vlgmr.msra.gmra.mrb[0].mxu1 %vm540_vm1, %v20512_v13  ;;  %18256 = vmatprep.subr.mxu1 %v20523_v16  ;;  %v20765_v10 = vpop.permute.xlu1 %2600 }
  0xd8   : > { %17386 = vmatmul.mubr.msk.f32.vlgmr.msra.gmra.mrb[4].mxu0 %vm540_vm1, %v20706_v54  ;;  %18257 = vmatpush3.msra.mxu1 %v20523_v16 }
  0xd9   : > { %1917 = vmatpush1.msra.mxu0 %v1897_v8  ;;  %5130 = vrot.lane.b32.xlu0 %v20376_v4, %s20193_s17  ;;  %v20914_v8 = vld [vmem:[%s25131_s1 + $0x58] sm:$0xff] }
  0xda   : > { %5132 = vrot.lane.b32.xlu1 %v20383_v5, %s20193_s17  ;;  %694 = vmatprep.mubr.f32.mxu1 %v25106_v0 }
  0xdb   : > { %1783 = vmatprep.mubr.f32.mxu0 %v25106_v0  ;;  %v20776_v11 = vpop.permute.xlu0 %2610  ;;  %17357 = vmatmul.mubr.msk.f32.gmra.mrb[2].mxu1 %vm540_vm1, %v20541_v20  ;;  %v20780_v14 = vpop.permute.xlu1 %2612 }
  0xdc   : > { %17387 = vmatmul.mubr.msk.f32.gmra.mrb[6].mxu0 %vm540_vm1, %v20732_v59  ;;  %18258 = vmatprep.mubr.msk.f32.mxu1 %vm540_vm1, %v20512_v13  ;;  %v20805_v13 = vsel %vm1896_vm4, %v20672_v47, %v20654_v44 }
  0xdd   : > { %5128 = vrot.lane.b32.xlu0 %v20386_v6, %s20193_s17  ;;  %1980 = vmatprep.mubr.f32.mxu0 %v25106_v0 }
  0xde   : > { %4054 = vrot.lane.b32.xlu1 %v20521_v15, %s25133_s26  ;;  %2070 = vmatprep.subr.mxu0 %v20785_v17  ;;  %s25104_s26 = smov 60   ;;  %v21013_v17 = vld [vmem:[%s25131_s1 + $0x68] sm:$0xff] }
  0xdf   : > { %v20807_v23 = vpop.permute.xlu0 %2608  ;;  %18259 = vmatmul.mubr.msk.f32.vlgmr.msra.gmra.mrb[4].mxu1 %vm540_vm1, %v20541_v20  ;;  %v20811_v24 = vpop.permute.xlu1 %2962  ;;  %936 = vmatprep.subr.mxu1 %v20441_v7  ;;  %v2258_v20 = vsel %vm2256_vm5, %v20684_v50, %v20688_v51 }
  0xe0   : > { %17392 = vmatmul.mubr.msk.f32.vlgmr.msra.gmra.mrb[0].mxu0 %vm540_vm1, %v20797_v21  ;;  %937 = vmatpush1.msra.mxu1 %v20373_v3 }
  0xe1   : > { %2071 = vmatpush1.msra.mxu0 %v20805_v13  ;;  %5482 = vrot.lane.b32.xlu0 %v20363_v1, %s25104_s26 }
  0xe2   : > { %5484 = vrot.lane.b32.xlu1 %v20373_v3, %s25104_s26  ;;  %1000 = vmatprep.mubr.f32.mxu1 %v25106_v0 }
  0xe3   : > { %1986 = vmatprep.mubr.f32.mxu0 %v25106_v0  ;;  %v20832_v32 = vpop.permute.xlu0 %2964  ;;  %17364 = vmatmul.mubr.msk.f32.vlgmr.msra.gmra.mrb[0].mxu1 %vm540_vm1, %v20578_v27  ;;  %v20836_v33 = vpop.permute.xlu1 %2960 }
  0xe4   : > { %17393 = vmatmul.mubr.msk.f32.gmra.mrb[2].mxu0 %vm540_vm1, %v20823_v29  ;;  %2277 = vmatprep.subr.mxu0 %v2258_v20  ;;  %v2618_v20 = vsel %vm2616_vm6, %v20741_v61, %v20760_v9 }
  0xe5   : > { %5480 = vrot.lane.b32.xlu0 %v20366_v2, %s25104_s26  ;;  %1006 = vmatprep.mubr.f32.mxu1 %v25106_v0 }
  0xe6   : > { %4406 = vrot.lane.b32.xlu1 %v20441_v7, %s25140_s0  ;;  %2134 = vmatprep.mubr.f32.mxu0 %v25106_v0 }
  0xe7   : > { %v1175_v38 = vpop.permute.xlu0 %1174  ;;  %17365 = vmatmul.mubr.msk.f32.gmra.mrb[2].mxu1 %vm540_vm1, %v20596_v31  ;;  %18261 = vmatprep.subr.mxu1 %v20383_v5  ;;  %v20852_v43 = vpop.permute.xlu1 %2970 }
  0xe8   : > { %17396 = vmatmul.mubr.msk.f32.vlgmr.msra.gmra.mrb[4].mxu0 %vm540_vm1, %v20797_v21  ;;  %18262 = vmatpush3.msra.mxu1 %v20383_v5  ;;  %v20859_v44 = vsel %vm1182_vm2, %v1175_v38, %v20572_v26  ;;  %v20880_v52 = vsel %vm1182_vm2, %v20551_v22, %v1175_v38 }
  0xe9   : > { %2278 = vmatpush1.msra.mxu0 %v2257_v34  ;;  %5490 = vrot.lane.b32.xlu0 %v20376_v4, %s25104_s26 }
  0xea   : > { %5492 = vrot.lane.b32.xlu1 %v20383_v5, %s25104_s26  ;;  %1279 = vmatprep.subr.mxu1 %v20859_v44 }
  0xeb   : > { %18263 = vmatprep.mubr.msk.f32.mxu1 %vm540_vm1, %v20578_v27  ;;  %2140 = vmatprep.mubr.f32.mxu0 %v25106_v0  ;;  %v20872_v26 = vpop.permute.xlu0 %2972  ;;  %v20874_v50 = vpop.permute.xlu1 %2968  ;;  %v20891_v27 = vld [vmem:[%s25131_s1 + $0x50] sm:$0xff] }
  0xec   : > { %18264 = vmatmul.mubr.msk.f32.vlgmr.msra.gmra.mrb[4].mxu1 %vm540_vm1, %v20596_v31  ;;  %17397 = vmatmul.mubr.msk.f32.gmra.mrb[6].mxu0 %vm540_vm1, %v20823_v29 }
  0xed   : > { %1280 = vmatpush1.msra.mxu1 %v20880_v52  ;;  %2431 = vmatprep.subr.mxu0 %v2262_v48 }
  0xee   : > { %18266 = vmatprep.subr.mxu1 %v20568_v25  ;;  %5488 = vrot.lane.b32.xlu0 %v20386_v6, %s25104_s26  ;;  %s20195_s26 = smov 32  }
  0xef   : > { %4414 = vrot.lane.b32.xlu1 %v20521_v15, %s25140_s0  ;;  %1343 = vmatprep.mubr.f32.mxu1 %v25106_v0  ;;  %v20896_v22 = vpop.permute.xlu0 %3322  ;;  %v20898_v31 = vpop.permute.xlu1 %3324  ;;  %s25141_s0 = smov 62  }
  0xf0   : > { %2341 = vmatprep.mubr.f32.mxu0 %v25106_v0  ;;  %17374 = vmatmul.mubr.msk.f32.vlgmr.msra.gmra.mrb[0].mxu1 %vm540_vm1, %v20638_v40 }
  0xf1   : > { %18267 = vmatpush3.msra.mxu1 %v20568_v25  ;;  %17402 = vmatmul.mubr.msk.f32.vlgmr.msra.gmra.mrb[0].mxu0 %vm540_vm1, %v20891_v27 }
  0xf2   : > { %2432 = vmatpush1.msra.mxu0 %v2261_v60  ;;  %4766 = vrot.lane.b32.xlu0 %v20441_v7, %s25141_s0 }
  0xf3   : > { %5842 = vrot.lane.b32.xlu1 %v20363_v1, %s20195_s26  ;;  %1349 = vmatprep.mubr.f32.mxu1 %v25106_v0  ;;  %v20922_v53 = vpop.permute.xlu0 %3320  ;;  %v1532_v34 = vpop.permute.xlu1 %1531 }
  0xf4   : > { %2347 = vmatprep.mubr.f32.mxu0 %v25106_v0  ;;  %17375 = vmatmul.mubr.msk.f32.gmra.mrb[2].mxu1 %vm540_vm1, %v20661_v45  ;;  %v20929_v38 = vsel %vm1539_vm3, %v1532_v34, %v20620_v37  ;;  %v20949_v37 = vsel %vm1539_vm3, %v20590_v30, %v1532_v34 }
  0xf5   : > { %17403 = vmatmul.mubr.msk.f32.gmra.mrb[2].mxu0 %vm540_vm1, %v20914_v8  ;;  %2637 = vmatprep.subr.mxu0 %v2618_v20  ;;  %v2622_v20 = vsel %vm2616_vm6, %v20776_v11, %v20780_v14 }
  0xf6   : > { %5844 = vrot.lane.b32.xlu0 %v20373_v3, %s20195_s26  ;;  %1636 = vmatprep.subr.mxu1 %v20929_v38 }
  0xf7   : > { %5840 = vrot.lane.b32.xlu1 %v20366_v2, %s20195_s26  ;;  %18268 = vmatprep.mubr.msk.f32.mxu1 %vm540_vm1, %v20638_v40  ;;  %v20940_v48 = vpop.permute.xlu0 %3330  ;;  %v20942_v60 = vpop.permute.xlu1 %3332  ;;  %v2617_v40 = vsel %vm2616_vm6, %v20765_v10, %v20741_v61 }
  0xf8   : > { %2495 = vmatprep.mubr.f32.mxu0 %v25106_v0  ;;  %18269 = vmatmul.mubr.msk.f32.vlgmr.msra.gmra.mrb[4].mxu1 %vm540_vm1, %v20661_v45 }
  0xf9   : > { %1637 = vmatpush1.msra.mxu1 %v20949_v37  ;;  %17406 = vmatmul.mubr.msk.f32.vlgmr.msra.gmra.mrb[4].mxu0 %vm540_vm1, %v20891_v27 }
  0xfa   : > { %2638 = vmatpush1.msra.mxu0 %v2617_v40  ;;  %18271 = vmatprep.subr.mxu1 %v20616_v36  ;;  %v2621_v40 = vsel %vm2616_vm6, %v20807_v23, %v20776_v11  ;;  %v25142_v11 = vmov 0.0  }
  0xfb   : > { %2791 = vmatprep.subr.mxu0 %v2622_v20  ;;  %4774 = vrot.lane.b32.xlu0 %v20521_v15, %s25141_s0  ;;  %v20963_v30 = vpop.permute.xlu0 %3328  ;;  %v1889_v45 = vpop.permute.xlu1 %1888  ;;  %v2978_v20 = vsel %vm2976_vm7, %v20811_v24, %v20832_v32  ;;  %s20199_s0 = smov 28  }
  0xfc   : > { %5850 = vrot.lane.b32.xlu1 %v20376_v4, %s20195_s26  ;;  %1700 = vmatprep.mubr.f32.mxu1 %v25106_v0  ;;  %v20970_v61 = vsel %vm1896_vm4, %v1889_v45, %v20672_v47  ;;  %v20986_v47 = vld [vmem:[%s25131_s1 + $0x60] sm:$0xff] }
  0xfd   : > { %2501 = vmatprep.mubr.f32.mxu0 %v25106_v0  ;;  %17384 = vmatmul.mubr.msk.f32.vlgmr.msra.gmra.mrb[0].mxu1 %vm540_vm1, %v20706_v54 }
  0xfe   : > { %18272 = vmatpush3.msra.mxu1 %v20616_v36  ;;  %17407 = vmatmul.mubr.msk.f32.gmra.mrb[6].mxu0 %vm540_vm1, %v20914_v8 }
  0xff   : > { %5852 = vrot.lane.b32.xlu0 %v20383_v5, %s20195_s26  ;;  %1993 = vmatprep.subr.mxu1 %v20970_v61  ;;  %v20981_v10 = vpop.permute.xlu0 %3682  ;;  %v20988_v34 = vpop.permute.xlu1 %3684 }
 0x100   : > { %5848 = vrot.lane.b32.xlu1 %v20386_v6, %s20195_s26  ;;  %1706 = vmatprep.mubr.f32.mxu1 %v25106_v0 }
 0x101   : > { %2701 = vmatprep.mubr.f32.mxu0 %v25106_v0  ;;  %17385 = vmatmul.mubr.msk.f32.gmra.mrb[2].mxu1 %vm540_vm1, %v20732_v59 }
 0x102   : > { %17412 = vmatmul.mubr.msk.f32.vlgmr.msra.gmra.mrb[0].mxu0 %vm540_vm1, %v20986_v47  ;;  %18273 = vmatprep.mubr.msk.f32.mxu1 %vm540_vm1, %v20706_v54  ;;  %v21024_v54 = vsel %vm1896_vm4, %v20632_v39, %v1889_v45  ;;  %v2982_v39 = vsel %vm2976_vm7, %v20852_v43, %v20872_v26 }
 0x103   : > { %2792 = vmatpush1.msra.mxu0 %v2621_v40  ;;  %5126 = vrot.lane.b32.xlu0 %v20441_v7, %s20193_s17  ;;  %v21008_v0 = vpop.permute.xlu0 %3680  ;;  %v21015_v56 = vpop.permute.xlu1 %3690  ;;  %25143 = vst [vmem:[#allocation14_spill] sm:$0xff] %v21024_v54 }
 0x104   : > { %2997 = vmatprep.subr.mxu0 %v2978_v20  ;;  %6202 = vrot.lane.b32.xlu1 %v20363_v1, %s20196_s16 }
 0x105   : > { %2707 = vmatprep.mubr.f32.mxu0 %v25142_v11  ;;  %18274 = vmatmul.mubr.msk.f32.vlgmr.msra.gmra.mrb[4].mxu1 %vm540_vm1, %v20732_v59  ;;  %v2977_v59 = vsel %vm2976_vm7, %v20836_v33, %v20811_v24 }
 0x106   : > { %1994 = vmatpush1.msra.mxu1 %v21024_v54  ;;  %17413 = vmatmul.mubr.msk.f32.gmra.mrb[2].mxu0 %vm540_vm1, %v21013_v17 }
 0x107   : > { %18276 = vmatprep.subr.mxu1 %v20668_v46  ;;  %6204 = vrot.lane.b32.xlu0 %v20373_v3, %s20196_s16  ;;  %v21032_v20 = vpop.permute.xlu0 %3692  ;;  %v21034_v40 = vpop.permute.xlu1 %3688 }
 0x108   : > { %6200 = vrot.lane.b32.xlu1 %v20366_v2, %s20196_s16  ;;  %2057 = vmatprep.mubr.f32.mxu1 %v25142_v11 }
 0x109   : > { %2855 = vmatprep.mubr.f32.mxu0 %v25142_v11  ;;  %17394 = vmatmul.mubr.msk.f32.vlgmr.msra.gmra.mrb[0].mxu1 %vm540_vm1, %v20797_v21 }
 0x10a   : > { %18277 = vmatpush3.msra.mxu1 %v20668_v46  ;;  %17416 = vmatmul.mubr.msk.f32.vlgmr.msra.gmra.mrb[4].mxu0 %vm540_vm1, %v20986_v47 }
 0x10b   : > { %2998 = vmatpush1.msra.mxu0 %v2977_v59  ;;  %5134 = vrot.lane.b32.xlu0 %v20521_v15, %s20193_s17  ;;  %v2247_v45 = vpop.permute.xlu0 %2246  ;;  %v21053_v54 = vpop.permute.xlu1 %4042  ;;  %s20197_s17 = smov 30  }
 0x10c   : > { %3151 = vmatprep.subr.mxu0 %v2982_v39  ;;  %5486 = vrot.lane.b32.xlu1 %v20441_v7, %s25144_s23  ;;  %v2260_v49 = vsel %vm2256_vm5, %v2247_v45, %v20725_v58  ;;  %v21072_v58 = vld [vmem:[%s25131_s1 + $0x70] sm:$0xff]  ;;  %v2981_v39 = vsel %vm2976_vm7, %v20874_v50, %v20852_v43 }
 0x10d   : > { %2063 = vmatprep.mubr.f32.mxu1 %v25142_v11  ;;  %2861 = vmatprep.mubr.f32.mxu0 %v25142_v11 }
 0x10e   : > { %17395 = vmatmul.mubr.msk.f32.gmra.mrb[2].mxu1 %vm540_vm1, %v20823_v29  ;;  %17417 = vmatmul.mubr.msk.f32.gmra.mrb[6].mxu0 %vm540_vm1, %v21013_v17 }
 0x10f   : > { %6210 = vrot.lane.b32.xlu0 %v20376_v4, %s20196_s16  ;;  %2354 = vmatprep.subr.mxu1 %v2260_v49  ;;  %v21067_v24 = vpop.permute.xlu0 %4044  ;;  %v2259_v49 = vsel %vm2256_vm5, %v20688_v51, %v2247_v45  ;;  %v21098_v51 = vld [vmem:[%s25131_s1 + $0x78] sm:$0xff] }
 0x110   : > { %6212 = vrot.lane.b32.xlu1 %v20383_v5, %s20196_s16  ;;  %18278 = vmatprep.mubr.msk.f32.mxu1 %vm540_vm1, %v20797_v21  ;;  %v21078_v33 = vpop.permute.xlu1 %4040  ;;  %v3338_v21 = vsel %vm3336_vm8, %v20896_v22, %v20898_v31 }
 0x111   : > { %3061 = vmatprep.mubr.f32.mxu0 %v25142_v11 }
 0x112   : > { %18279 = vmatmul.mubr.msk.f32.vlgmr.msra.gmra.mrb[4].mxu1 %vm540_vm1, %v20823_v29  ;;  %17422 = vmatmul.mubr.msk.f32.vlgmr.msra.gmra.mrb[0].mxu0 %vm540_vm1, %v21072_v58 }
 0x113   : > { %2355 = vmatpush1.msra.mxu1 %v2259_v49  ;;  %3152 = vmatpush1.msra.mxu0 %v2981_v39  ;;  %v2255_v59 = vpop.permute.xlu0 %2254  ;;  %v3337_v39 = vsel %vm3336_vm8, %v20922_v53, %v20896_v22 }
 0x114   : > { %3357 = vmatprep.subr.mxu0 %v3338_v21  ;;  %6208 = vrot.lane.b32.xlu0 %v20386_v6, %s20196_s16  ;;  %v2607_v29 = vpop.permute.xlu1 %2606  ;;  %v2263_v43 = vsel %vm2256_vm5, %v20721_v57, %v2255_v59  ;;  %v3342_v59 = vsel %vm3336_vm8, %v20940_v48, %v20942_v60 }
 0x115   : > { %5494 = vrot.lane.b32.xlu1 %v20521_v15, %s25144_s23  ;;  %2418 = vmatprep.mubr.f32.mxu1 %v25142_v11  ;;  %v2620_v49 = vsel %vm2616_vm6, %v2607_v29, %v20807_v23  ;;  %v2619_v22 = vsel %vm2616_vm6, %v20760_v9, %v2607_v29  ;;  %v3341_v9 = vsel %vm3336_vm8, %v20963_v30, %v20940_v48  ;;  %s20202_s23 = smov 114  }
 0x116   : > { %3067 = vmatprep.mubr.f32.mxu0 %v25142_v11  ;;  %17404 = vmatmul.mubr.msk.f32.vlgmr.msra.gmra.mrb[0].mxu1 %vm540_vm1, %v20891_v27  ;;  %v3698_v29 = vsel %vm3696_vm9, %v20981_v10, %v20988_v34 }
 0x117   : > { %17423 = vmatmul.mubr.msk.f32.gmra.mrb[2].mxu0 %vm540_vm1, %v21098_v51  ;;  %18281 = vmatprep.subr.mxu1 %v2263_v43  ;;  %v21110_v45 = vpop.permute.xlu0 %4050 }
 0x118   : > { %6562 = vrot.lane.b32.xlu0 %v20363_v1, %s20197_s17  ;;  %2424 = vmatprep.mubr.f32.mxu1 %v25142_v11  ;;  %v21115_v57 = vpop.permute.xlu1 %4052 }
 0x119   : > { %6564 = vrot.lane.b32.xlu1 %v20373_v3, %s20197_s17  ;;  %18282 = vmatpush3.msra.mxu1 %v2263_v43 }
 0x11a   : > { %3215 = vmatprep.mubr.f32.mxu0 %v25142_v11  ;;  %17405 = vmatmul.mubr.msk.f32.gmra.mrb[2].mxu1 %vm540_vm1, %v20914_v8 }
 0x11b   : > { %2714 = vmatprep.subr.mxu1 %v2620_v49  ;;  %17426 = vmatmul.mubr.msk.f32.vlgmr.msra.gmra.mrb[4].mxu0 %vm540_vm1, %v21072_v58  ;;  %v21129_v21 = vpop.permute.xlu0 %4048 }
 0x11c   : > { %3358 = vmatpush1.msra.mxu0 %v3337_v39  ;;  %6560 = vrot.lane.b32.xlu0 %v20366_v2, %s20197_s17  ;;  %v2615_v43 = vpop.permute.xlu1 %2614  ;;  %v21181_v39 = vld [vmem:[%s25131_s1 + $0x88] sm:$0xff] }
 0x11d   : > { %3511 = vmatprep.subr.mxu0 %v3342_v59  ;;  %5846 = vrot.lane.b32.xlu1 %v20441_v7, %s20195_s26  ;;  %v2623_v23 = vsel %vm2616_vm6, %v20780_v14, %v2615_v43  ;;  %vm6216_vm6 = vcmask 252928  }
 0x11e   : > { %18283 = vmatprep.mubr.msk.f32.mxu1 %vm540_vm1, %v20891_v27  ;;  %3221 = vmatprep.mubr.f32.mxu0 %v25142_v11  ;;  %v21156_v27 = vld [vmem:[%s25131_s1 + $0x80] sm:$0xff] }
 0x11f   : > { %18284 = vmatmul.mubr.msk.f32.vlgmr.msra.gmra.mrb[4].mxu1 %vm540_vm1, %v20914_v8  ;;  %17427 = vmatmul.mubr.msk.f32.gmra.mrb[6].mxu0 %vm540_vm1, %v21098_v51  ;;  %v21149_v53 = vpop.permute.xlu0 %4402 }
 0x120   : > { %2715 = vmatpush1.msra.mxu1 %v2619_v22  ;;  %6570 = vrot.lane.b32.xlu0 %v20376_v4, %s20197_s17  ;;  %v21158_v14 = vpop.permute.xlu1 %4404  ;;  %v3697_v22 = vsel %vm3696_vm9, %v21008_v0, %v20981_v10 }
 0x121   : > { %6572 = vrot.lane.b32.xlu1 %v20383_v5, %s20197_s17  ;;  %18286 = vmatprep.subr.mxu1 %v2623_v23 }
 0x122   : > { %2778 = vmatprep.mubr.f32.mxu1 %v25142_v11  ;;  %3421 = vmatprep.mubr.f32.mxu0 %v25142_v11 }
 0x123   : > { %17414 = vmatmul.mubr.msk.f32.vlgmr.msra.gmra.mrb[0].mxu1 %vm540_vm1, %v20986_v47  ;;  %17432 = vmatmul.mubr.msk.f32.vlgmr.msra.gmra.mrb[0].mxu0 %vm540_vm1, %v21156_v27  ;;  %v21171_v8 = vpop.permute.xlu0 %4400 }
 0x124   : > { %18287 = vmatpush3.msra.mxu1 %v2623_v23  ;;  %3512 = vmatpush1.msra.mxu0 %v3341_v9  ;;  %v2967_v49 = vpop.permute.xlu1 %2966  ;;  %v4058_v9 = vsel %vm4056_vm10, %v21053_v54, %v21067_v24 }
 0x125   : > { %3717 = vmatprep.subr.mxu0 %v3698_v29  ;;  %6568 = vrot.lane.b32.xlu0 %v20386_v6, %s20197_s17  ;;  %v2980_v48 = vsel %vm2976_vm7, %v2967_v49, %v20874_v50  ;;  %v2979_v50 = vsel %vm2976_vm7, %v20832_v32, %v2967_v49  ;;  %v21305_v49 = vld [vmem:[%s20360_s25 + $0x10] sm:$0xff] }
 0x126   : > { %5854 = vrot.lane.b32.xlu1 %v20521_v15, %s20195_s26  ;;  %2784 = vmatprep.mubr.f32.mxu1 %v25142_v11  ;;  %s20198_s26 = smov 29  }
 0x127   : > { %3427 = vmatprep.mubr.f32.mxu0 %v25142_v11  ;;  %17415 = vmatmul.mubr.msk.f32.gmra.mrb[2].mxu1 %vm540_vm1, %v21013_v17  ;;  %v21191_v59 = vpop.permute.xlu0 %4410 }
 0x128   : > { %17433 = vmatmul.mubr.msk.f32.gmra.mrb[2].mxu0 %vm540_vm1, %v21181_v39  ;;  %3074 = vmatprep.subr.mxu1 %v2980_v48  ;;  %v21195_v43 = vpop.permute.xlu1 %4412  ;;  %v20110_v48 = vld [vmem:[%s20360_s25] sm:$0xff] }
 0x129   : > { %6206 = vrot.lane.b32.xlu0 %v20441_v7, %s20196_s16  ;;  %18288 = vmatprep.mubr.msk.f32.mxu1 %vm540_vm1, %v20986_v47 }
 0x12a   : > { %6922 = vrot.lane.b32.xlu1 %v20363_v1, %s20198_s26  ;;  %3575 = vmatprep.mubr.f32.mxu0 %v25142_v11  ;;  %v3702_v1 = vsel %vm3696_vm9, %v21015_v56, %v21032_v20 }
 0x12b   : > { %18289 = vmatmul.mubr.msk.f32.vlgmr.msra.gmra.mrb[4].mxu1 %vm540_vm1, %v21013_v17  ;;  %v21208_v23 = vpop.permute.xlu0 %4408 }
 0x12c   : > { %3075 = vmatpush1.msra.mxu1 %v2979_v50  ;;  %17436 = vmatmul.mubr.msk.f32.vlgmr.msra.gmra.mrb[4].mxu0 %vm540_vm1, %v21156_v27  ;;  %v2975_v47 = vpop.permute.xlu1 %2974 }
 0x12d   : > { %3718 = vmatpush1.msra.mxu0 %v3697_v22  ;;  %6924 = vrot.lane.b32.xlu0 %v20373_v3, %s20198_s26  ;;  %v2983_v0 = vsel %vm2976_vm7, %v20872_v26, %v2975_v47  ;;  %v3701_v26 = vsel %vm3696_vm9, %v21034_v40, %v21015_v56  ;;  %v21266_v56 = vld [vmem:[%s25131_s1 + $0x98] sm:$0xff]  ;;  %v21327_v22 = vld [vmem:[%s25131_s1 + $0xa0] sm:$0xff]  ;;  %vm6576_vm7 = vcmask 244736  }
 0x12e   : > { %3871 = vmatprep.subr.mxu0 %v3702_v1  ;;  %6920 = vrot.lane.b32.xlu1 %v20366_v2, %s20198_s26  ;;  %v21237_v2 = vld [vmem:[%s25131_s1 + $0x90] sm:$0xff]  ;;  %v21330_v47 = vld [vmem:[%s20360_s25 + $0x18] sm:$0xff] }
 0x12f   : > { %3138 = vmatprep.mubr.f32.mxu1 %v25142_v11  ;;  %3581 = vmatprep.mubr.f32.mxu0 %v25142_v11  ;;  %v3327_v17 = vpop.permute.xlu0 %3326 }
 0x130   : > { %17424 = vmatmul.mubr.msk.f32.vlgmr.msra.gmra.mrb[0].mxu1 %vm540_vm1, %v21072_v58  ;;  %17437 = vmatmul.mubr.msk.f32.gmra.mrb[6].mxu0 %vm540_vm1, %v21181_v39  ;;  %v21230_v32 = vpop.permute.xlu1 %4762 }
 0x131   : > { %6214 = vrot.lane.b32.xlu0 %v20521_v15, %s20196_s16  ;;  %18291 = vmatprep.subr.mxu1 %v2983_v0  ;;  %s20213_s16 = smov 84  }
 0x132   : > { %6930 = vrot.lane.b32.xlu1 %v20376_v4, %s20198_s26  ;;  %3144 = vmatprep.mubr.f32.mxu1 %v25142_v11  ;;  %v3340_v4 = vsel %vm3336_vm8, %v3327_v17, %v20963_v30 }
 0x133   : > { %18292 = vmatpush3.msra.mxu1 %v2983_v0  ;;  %3781 = vmatprep.mubr.f32.mxu0 %v25142_v11  ;;  %v21243_v3 = vpop.permute.xlu0 %4764  ;;  %v4061_v0 = vsel %vm4056_vm10, %v21129_v21, %v21110_v45 }
 0x134   : > { %17425 = vmatmul.mubr.msk.f32.gmra.mrb[2].mxu1 %vm540_vm1, %v21098_v51  ;;  %17442 = vmatmul.mubr.msk.f32.vlgmr.msra.gmra.mrb[0].mxu0 %vm540_vm1, %v21237_v2  ;;  %v21254_v10 = vpop.permute.xlu1 %4760 }
 0x135   : > { %3872 = vmatpush1.msra.mxu0 %v3701_v26  ;;  %6932 = vrot.lane.b32.xlu0 %v20383_v5, %s20198_s26  ;;  %v3339_v5 = vsel %vm3336_vm8, %v20898_v31, %v3327_v17  ;;  %v21353_v26 = vld [vmem:[%s20360_s25 + $0x28] sm:$0xff] }
 0x136   : > { %4077 = vmatprep.subr.mxu0 %v4058_v9  ;;  %6928 = vrot.lane.b32.xlu1 %v20386_v6, %s20198_s26 }
 0x137   : > { %3434 = vmatprep.subr.mxu1 %v3340_v4  ;;  %18293 = vmatprep.mubr.msk.f32.mxu1 %vm540_vm1, %v21072_v58  ;;  %v3335_v30 = vpop.permute.xlu0 %3334  ;;  %v21284_v58 = vld [vmem:[%s20360_s25 + $0x8] sm:$0xff] }
 0x138   : > { %3787 = vmatprep.mubr.f32.mxu0 %v25142_v11  ;;  %18294 = vmatmul.mubr.msk.f32.vlgmr.msra.gmra.mrb[4].mxu1 %vm540_vm1, %v21098_v51  ;;  %v21275_v29 = vpop.permute.xlu1 %4770  ;;  %v3343_v6 = vsel %vm3336_vm8, %v20942_v60, %v3335_v30  ;;  %v4062_v51 = vsel %vm4056_vm10, %v21110_v45, %v21115_v57  ;;  %v21360_v45 = vld [vmem:[%s25131_s1 + $0xa8] sm:$0xff]  ;;  %v21376_v30 = vld [vmem:[%s20360_s25 + $0x20] sm:$0xff]  ;;  %vm6936_vm8 = vcmask 236544  }
 0x139   : > { %3435 = vmatpush1.msra.mxu1 %v3339_v5  ;;  %17443 = vmatmul.mubr.msk.f32.gmra.mrb[2].mxu0 %vm540_vm1, %v21266_v56 }
 0x13a   : > { %6566 = vrot.lane.b32.xlu0 %v20441_v7, %s20197_s17  ;;  %7282 = vrot.lane.b32.xlu1 %v21284_v58, %s20199_s0  ;;  %v4057_v7 = vsel %vm4056_vm10, %v21078_v33, %v21053_v54 }
 0x13b   : > { %3935 = vmatprep.mubr.f32.mxu0 %v25142_v11  ;;  %3498 = vmatprep.mubr.f32.mxu1 %v25142_v11  ;;  %v21290_v31 = vpop.permute.xlu0 %4772 }
 0x13c   : > { %17434 = vmatmul.mubr.msk.f32.vlgmr.msra.gmra.mrb[0].mxu1 %vm540_vm1, %v21156_v27  ;;  %18296 = vmatprep.subr.mxu1 %v3343_v6  ;;  %v21294_v60 = vpop.permute.xlu1 %4768 }
 0x13d   : > { %17446 = vmatmul.mubr.msk.f32.vlgmr.msra.gmra.mrb[4].mxu0 %vm540_vm1, %v21237_v2  ;;  %18297 = vmatpush3.msra.mxu1 %v3343_v6 }
 0x13e   : > { %4078 = vmatpush1.msra.mxu0 %v4057_v7  ;;  %7284 = vrot.lane.b32.xlu0 %v21305_v49, %s20199_s0  ;;  %v4422_v7 = vsel %vm4416_vm11, %v21191_v59, %v21195_v43 }
 0x13f   : > { %4231 = vmatprep.subr.mxu0 %v4062_v51  ;;  %7280 = vrot.lane.b32.xlu1 %v20110_v48, %s20199_s0  ;;  %v3687_v54 = vpop.permute.xlu0 %3686 }
 0x140   : > { %3941 = vmatprep.mubr.f32.mxu0 %v25142_v11  ;;  %3504 = vmatprep.mubr.f32.mxu1 %v25142_v11  ;;  %v21313_v33 = vpop.permute.xlu1 %5122  ;;  %v3700_v50 = vsel %vm3696_vm9, %v3687_v54, %v21034_v40  ;;  %v3699_v17 = vsel %vm3696_vm9, %v20988_v34, %v3687_v54 }
 0x141   : > { %17447 = vmatmul.mubr.msk.f32.gmra.mrb[6].mxu0 %vm540_vm1, %v21266_v56  ;;  %17435 = vmatmul.mubr.msk.f32.gmra.mrb[2].mxu1 %vm540_vm1, %v21181_v39 }
 0x142   : > { %6574 = vrot.lane.b32.xlu0 %v20521_v15, %s20197_s17  ;;  %4141 = vmatprep.mubr.f32.mxu0 %v25142_v11  ;;  %s25146_s17 = smov 126  }
 0x143   : > { %6926 = vrot.lane.b32.xlu1 %v21330_v47, %s20198_s26  ;;  %18298 = vmatprep.mubr.msk.f32.mxu1 %vm540_vm1, %v21156_v27  ;;  %v21336_v40 = vpop.permute.xlu0 %5124  ;;  %v4418_v27 = vsel %vm4416_vm11, %v21149_v53, %v21158_v14 }
 0x144   : > { %3794 = vmatprep.subr.mxu1 %v3700_v50  ;;  %v21338_v1 = vpop.permute.xlu1 %5120  ;;  %v17461_v50 = vld [vmem:[%s25131_s1 + $0xb8] sm:$0xff] }
 0x145   : > { %17452 = vmatmul.mubr.msk.f32.vlgmr.msra.gmra.mrb[0].mxu0 %vm540_vm1, %v21327_v22  ;;  %18299 = vmatmul.mubr.msk.f32.vlgmr.msra.gmra.mrb[4].mxu1 %vm540_vm1, %v21181_v39  ;;  %v21363_v39 = vld [vmem:[%s20360_s25 + $0x30] sm:$0xff] }
 0x146   : > { %4232 = vmatpush1.msra.mxu0 %v4061_v0  ;;  %7290 = vrot.lane.b32.xlu0 %v21353_v26, %s20199_s0 }
 0x147   : > { %4437 = vmatprep.subr.mxu0 %v4418_v27  ;;  %7292 = vrot.lane.b32.xlu1 %v21363_v39, %s20199_s0  ;;  %v3695_v34 = vpop.permute.xlu0 %3694 }
 0x148   : > { %3795 = vmatpush1.msra.mxu1 %v3699_v17  ;;  %4147 = vmatprep.mubr.f32.mxu0 %v25142_v11  ;;  %v4047_v4 = vpop.permute.xlu1 %4046  ;;  %v3703_v9 = vsel %vm3696_vm9, %v21032_v20, %v3695_v34  ;;  %v4417_v20 = vsel %vm4416_vm11, %v21171_v8, %v21149_v53  ;;  %vm7296_vm9 = vcmask 228352  }
 0x149   : > { %3858 = vmatprep.mubr.f32.mxu1 %v25142_v11  ;;  %17453 = vmatmul.mubr.msk.f32.gmra.mrb[2].mxu0 %vm540_vm1, %v21360_v45  ;;  %v4060_v53 = vsel %vm4056_vm10, %v4047_v4, %v21129_v21  ;;  %v21418_v21 = vld [vmem:[%s20360_s25 + $0x38] sm:$0xff]  ;;  %s25147_s25 = smov 125  }
 0x14a   : > { %17444 = vmatmul.mubr.msk.f32.vlgmr.msra.gmra.mrb[0].mxu1 %vm540_vm1, %v21237_v2  ;;  %7288 = vrot.lane.b32.xlu0 %v21376_v30, %s20199_s0 }
 0x14b   : > { %6934 = vrot.lane.b32.xlu1 %v20521_v15, %s20198_s26  ;;  %4295 = vmatprep.mubr.f32.mxu0 %v25142_v11  ;;  %v21383_v5 = vpop.permute.xlu0 %5130  ;;  %s25145_s26 = smov 127  }
 0x14c   : > { %3864 = vmatprep.mubr.f32.mxu1 %v25142_v11  ;;  %18301 = vmatprep.subr.mxu1 %v3703_v9  ;;  %v21386_v6 = vpop.permute.xlu1 %5132 }
 0x14d   : > { %17456 = vmatmul.mubr.msk.f32.vlgmr.msra.gmra.mrb[4].mxu0 %vm540_vm1, %v21327_v22  ;;  %18302 = vmatpush3.msra.mxu1 %v3703_v9  ;;  %v4777_v9 = vsel %vm4776_vm12, %v21254_v10, %v21230_v32  ;;  %v17470_v10 = vld [vmem:[%s25131_s1 + $0xc0] sm:$0xff] }
 0x14e   : > { %4438 = vmatpush1.msra.mxu0 %v4417_v20  ;;  %17445 = vmatmul.mubr.msk.f32.gmra.mrb[2].mxu1 %vm540_vm1, %v21266_v56  ;;  %v5138_v20 = vsel %vm5136_vm13, %v21313_v33, %v21336_v40 }
 0x14f   : > { %4591 = vmatprep.subr.mxu0 %v4422_v7  ;;  %7286 = vrot.lane.b32.xlu0 %v21330_v47, %s20199_s0  ;;  %v21400_v51 = vpop.permute.xlu0 %5128 }
 0x150   : > { %7294 = vrot.lane.b32.xlu1 %v20521_v15, %s20199_s0  ;;  %4301 = vmatprep.mubr.f32.mxu0 %v25142_v11  ;;  %v4055_v8 = vpop.permute.xlu1 %4054  ;;  %v4059_v15 = vsel %vm4056_vm10, %v21067_v24, %v4047_v4  ;;  %s20214_s0 = smov 83  }
 0x151   : > { %18303 = vmatprep.mubr.msk.f32.mxu1 %vm540_vm1, %v21237_v2  ;;  %4154 = vmatprep.subr.mxu1 %v4060_v53  ;;  %v4063_v48 = vsel %vm4056_vm10, %v21115_v57, %v4055_v8  ;;  %v21425_v2 = vld [vmem:[%s25131_s1 + $0xb0] sm:$0xff]  ;;  %v4778_v57 = vsel %vm4776_vm12, %v21230_v32, %v21243_v3  ;;  %v4781_v53 = vsel %vm4776_vm12, %v21294_v60, %v21275_v29  ;;  %v17471_v8 = vld [vmem:[%s25131_s1 + $0xc8] sm:$0xff]  ;;  %vm20201_vm10 = vmmov 1  }
 0x152   : > { %17457 = vmatmul.mubr.msk.f32.gmra.mrb[6].mxu0 %vm540_vm1, %v21360_v45  ;;  %18304 = vmatmul.mubr.msk.f32.vlgmr.msra.gmra.mrb[4].mxu1 %vm540_vm1, %v21266_v56  ;;  %v4421_v56 = vsel %vm4416_vm11, %v21208_v23, %v21191_v59 }
 0x153   : > { %4155 = vmatpush1.msra.mxu1 %v4059_v15  ;;  %7969 = vrot.lane.b32.xlu0 %v21418_v21, %s25145_s26  ;;  %v21427_v54 = vpop.permute.xlu0 %5482 }
 0x154   : > { %8303 = vrot.lane.b32.xlu1 %v21418_v21, %s25146_s17  ;;  %4501 = vmatprep.mubr.f32.mxu0 %v25142_v11  ;;  %v21432_v24 = vpop.permute.xlu1 %5484 }
 0x155   : > { %4218 = vmatprep.mubr.f32.mxu1 %v25142_v11  ;;  %18306 = vmatprep.subr.mxu1 %v4063_v48 }
 0x156   : > { %17462 = vmatmul.mubr.msk.f32.vlgmr.msra.gmra.mrb[0].mxu0 %vm540_vm1, %v21425_v2  ;;  %17454 = vmatmul.mubr.msk.f32.vlgmr.msra.gmra.mrb[0].mxu1 %vm540_vm1, %v21327_v22 }
 0x157   : > { %4592 = vmatpush1.msra.mxu0 %v4421_v56  ;;  %8637 = vrot.lane.b32.xlu0 %v21418_v21, %s25147_s25  ;;  %v21450_v0 = vpop.permute.xlu0 %5480 }
 0x158   : > { %4797 = vmatprep.subr.mxu0 %v4778_v57  ;;  %8971 = vrot.lane.b32.xlu1 %v21418_v21, %s25130_s30  ;;  %v4407_v17 = vpop.permute.xlu1 %4406 }
 0x159   : > { %18307 = vmatpush3.msra.mxu1 %v4063_v48  ;;  %4507 = vmatprep.mubr.f32.mxu0 %v25142_v11  ;;  %v4420_v59 = vsel %vm4416_vm11, %v4407_v17, %v21208_v23  ;;  %v4782_v23 = vsel %vm4776_vm12, %v21275_v29, %v21290_v31  ;;  %v4419_v4 = vsel %vm4416_vm11, %v21158_v14, %v4407_v17 }
 0x15a   : > { %17463 = vmatmul.mubr.msk.f32.gmra.mrb[2].mxu0 %vm540_vm1, %v17461_v50  ;;  %4224 = vmatprep.mubr.f32.mxu1 %v25142_v11 }
 0x15b   : > { %17455 = vmatmul.mubr.msk.f32.gmra.mrb[2].mxu1 %vm540_vm1, %v21360_v45  ;;  %4655 = vmatprep.mubr.f32.mxu0 %v25142_v11  ;;  %v21462_v27 = vpop.permute.xlu0 %5490 }
 0x15c   : > { %18308 = vmatprep.mubr.msk.f32.mxu1 %vm540_vm1, %v21327_v22  ;;  %4514 = vmatprep.subr.mxu1 %v4420_v59  ;;  %v21466_v34 = vpop.permute.xlu1 %5492  ;;  %v5141_v59 = vsel %vm5136_vm13, %v21400_v51, %v21383_v5 }
 0x15e   : > { %17466 = vmatmul.mubr.msk.f32.vlgmr.msra.gmra.mrb[4].mxu0 %vm540_vm1, %v21425_v2 }
 0x15f   : > { %4798 = vmatpush1.msra.mxu0 %v4777_v9  ;;  %18309 = vmatmul.mubr.msk.f32.vlgmr.msra.gmra.mrb[4].mxu1 %vm540_vm1, %v21360_v45  ;;  %v17481_v9 = vld [vmem:[%s25131_s1 + $0xd8] sm:$0xff] }
 0x160   : > { %4951 = vmatprep.subr.mxu0 %v4782_v23  ;;  %4515 = vmatpush1.msra.mxu1 %v4419_v4  ;;  %v21480_v22 = vpop.permute.xlu0 %5488 }
 0x161   : > { %4661 = vmatprep.mubr.f32.mxu0 %v25142_v11  ;;  %4578 = vmatprep.mubr.f32.mxu1 %v25142_v11  ;;  %v4415_v14 = vpop.permute.xlu1 %4414 }
 0x162   : > { %17467 = vmatmul.mubr.msk.f32.gmra.mrb[6].mxu0 %vm540_vm1, %v17461_v50  ;;  %v4423_v32 = vsel %vm4416_vm11, %v21195_v43, %v4415_v14 }
 0x163   : > { %17464 = vmatmul.mubr.msk.f32.vlgmr.msra.gmra.mrb[0].mxu1 %vm540_vm1, %v21425_v2  ;;  %4861 = vmatprep.mubr.f32.mxu0 %v25142_v11 }
 0x164   : > { %4584 = vmatprep.mubr.f32.mxu1 %v25142_v11  ;;  %18311 = vmatprep.subr.mxu1 %v4423_v32  ;;  %v4767_v45 = vpop.permute.xlu0 %4766 }
 0x165   : > { %18312 = vmatpush3.msra.mxu1 %v4423_v32  ;;  %v21497_v7 = vpop.permute.xlu1 %5842  ;;  %v4780_v43 = vsel %vm4776_vm12, %v4767_v45, %v21294_v60  ;;  %v4779_v48 = vsel %vm4776_vm12, %v21243_v3, %v4767_v45  ;;  %v5142_v60 = vsel %vm5136_vm13, %v21383_v5, %v21386_v6  ;;  %v5137_v3 = vsel %vm5136_vm13, %v21338_v1, %v21313_v33 }
 0x166   : > { %17472 = vmatmul.mubr.msk.f32.vlgmr.msra.gmra.mrb[0].mxu0 %vm540_vm1, %v17470_v10  ;;  %4874 = vmatprep.subr.mxu1 %v4780_v43  ;;  %v5498_v1 = vsel %vm5496_vm14, %v21427_v54, %v21432_v24 }
 0x167   : > { %4952 = vmatpush1.msra.mxu0 %v4781_v53  ;;  %17465 = vmatmul.mubr.msk.f32.gmra.mrb[2].mxu1 %vm540_vm1, %v17461_v50 }
 0x168   : > { %5157 = vmatprep.subr.mxu0 %v5138_v20  ;;  %4867 = vmatprep.mubr.f32.mxu0 %v25142_v11  ;;  %v21510_v15 = vpop.permute.xlu0 %5844 }
 0x169   : > { %18313 = vmatprep.mubr.msk.f32.mxu1 %vm540_vm1, %v21425_v2  ;;  %v21516_v29 = vpop.permute.xlu1 %5840 }
 0x16a   : > { %17473 = vmatmul.mubr.msk.f32.gmra.mrb[2].mxu0 %vm540_vm1, %v17471_v8 }
 0x16b   : > { %18314 = vmatmul.mubr.msk.f32.vlgmr.msra.gmra.mrb[4].mxu1 %vm540_vm1, %v17461_v50  ;;  %5015 = vmatprep.mubr.f32.mxu0 %v25142_v11 }
 0x16c   : > { %4875 = vmatpush1.msra.mxu1 %v4779_v48  ;;  %4938 = vmatprep.mubr.f32.mxu1 %v25142_v11  ;;  %v5501_v48 = vsel %vm5496_vm14, %v21480_v22, %v21462_v27 }
 0x16d   : > { %v4775_v57 = vpop.permute.xlu0 %4774 }
 0x16e   : > { %17476 = vmatmul.mubr.msk.f32.vlgmr.msra.gmra.mrb[4].mxu0 %vm540_vm1, %v17470_v10  ;;  %v21529_v2 = vpop.permute.xlu1 %5850  ;;  %v4783_v56 = vsel %vm4776_vm12, %v21290_v31, %v4775_v57  ;;  %v17480_v31 = vld [vmem:[%s25131_s1 + $0xd0] sm:$0xff]  ;;  %vm9722_vm12 = vcmask 744448  }
 0x16f   : > { %5158 = vmatpush1.msra.mxu0 %v5137_v3  ;;  %5021 = vmatprep.mubr.f32.mxu0 %v25142_v11 }
 0x170   : > { %5311 = vmatprep.subr.mxu0 %v5142_v60  ;;  %17474 = vmatmul.mubr.msk.f32.vlgmr.msra.gmra.mrb[0].mxu1 %vm540_vm1, %v17470_v10 }
 0x171   : > { %18316 = vmatprep.subr.mxu1 %v4783_v56  ;;  %v21535_v50 = vpop.permute.xlu0 %5852  ;;  %4944 = vmatprep.mubr.f32.mxu1 %v25142_v11 }
 0x172   : > { %17477 = vmatmul.mubr.msk.f32.gmra.mrb[6].mxu0 %vm540_vm1, %v17471_v8  ;;  %18317 = vmatpush3.msra.mxu1 %v4783_v56  ;;  %v21539_v33 = vpop.permute.xlu1 %5848  ;;  %v5857_v56 = vsel %vm5856_vm15, %v21516_v29, %v21497_v7  ;;  %v17500_v29 = vld [vmem:[%s25131_s1 + $0xf0] sm:$0xff] }
 0x173   : > { %5221 = vmatprep.mubr.f32.mxu0 %v25142_v11 }
 0x174   : > { %17475 = vmatmul.mubr.msk.f32.gmra.mrb[2].mxu1 %vm540_vm1, %v17471_v8 }
 0x175   : > { %v5127_v17 = vpop.permute.xlu0 %5126  ;;  %18318 = vmatprep.mubr.msk.f32.mxu1 %vm540_vm1, %v17470_v10  ;;  %v5497_v10 = vsel %vm5496_vm14, %v21450_v0, %v21427_v54 }
 0x176   : > { %17482 = vmatmul.mubr.msk.f32.vlgmr.msra.gmra.mrb[0].mxu0 %vm540_vm1, %v17480_v31  ;;  %v21554_v23 = vpop.permute.xlu1 %6202  ;;  %v5140_v4 = vsel %vm5136_vm13, %v5127_v17, %v21400_v51  ;;  %v5139_v14 = vsel %vm5136_vm13, %v21336_v40, %v5127_v17  ;;  %v5502_v40 = vsel %vm5496_vm14, %v21462_v27, %v21466_v34 }
 0x177   : > { %5312 = vmatpush1.msra.mxu0 %v5141_v59  ;;  %5227 = vmatprep.mubr.f32.mxu0 %v25142_v11 }
 0x178   : > { %5517 = vmatprep.subr.mxu0 %v5498_v1  ;;  %18319 = vmatmul.mubr.msk.f32.vlgmr.msra.gmra.mrb[4].mxu1 %vm540_vm1, %v17471_v8  ;;  %v5858_v8 = vsel %vm5856_vm15, %v21497_v7, %v21510_v15 }
 0x179   : > { %5234 = vmatprep.subr.mxu1 %v5140_v4  ;;  %v21565_v5 = vpop.permute.xlu0 %6204  ;;  %5298 = vmatprep.mubr.f32.mxu1 %v25142_v11 }
 0x17a   : > { %17483 = vmatmul.mubr.msk.f32.gmra.mrb[2].mxu0 %vm540_vm1, %v17481_v9  ;;  %5235 = vmatpush1.msra.mxu1 %v5139_v14  ;;  %v21569_v51 = vpop.permute.xlu1 %6200 }
 0x17b   : > { %5375 = vmatprep.mubr.f32.mxu0 %v25142_v11 }
 0x17c   : > { %17484 = vmatmul.mubr.msk.f32.vlgmr.msra.gmra.mrb[0].mxu1 %vm540_vm1, %v17480_v31 }
 0x17d   : > { %v5135_v32 = vpop.permute.xlu0 %5134  ;;  %5304 = vmatprep.mubr.f32.mxu1 %v25142_v11 }
 0x17e   : > { %17486 = vmatmul.mubr.msk.f32.vlgmr.msra.gmra.mrb[4].mxu0 %vm540_vm1, %v17480_v31  ;;  %v5487_v45 = vpop.permute.xlu1 %5486  ;;  %v5143_v20 = vsel %vm5136_vm13, %v21386_v6, %v5135_v32  ;;  %v17490_v6 = vld [vmem:[%s25131_s1 + $0xe0] sm:$0xff]  ;;  %vm10071_vm13 = vcmask 130048  }
 0x17f   : > { %5518 = vmatpush1.msra.mxu0 %v5497_v10  ;;  %5381 = vmatprep.mubr.f32.mxu0 %v25142_v11  ;;  %v5500_v43 = vsel %vm5496_vm14, %v5487_v45, %v21480_v22  ;;  %v5499_v0 = vsel %vm5496_vm14, %v21432_v24, %v5487_v45  ;;  %v17491_v24 = vld [vmem:[%s25131_s1 + $0xe8] sm:$0xff] }
 0x180   : > { %5671 = vmatprep.subr.mxu0 %v5502_v40  ;;  %17485 = vmatmul.mubr.msk.f32.gmra.mrb[2].mxu1 %vm540_vm1, %v17481_v9  ;;  %v17501_v40 = vld [vmem:[%s25131_s1 + $0xf8] sm:$0xff] }
 0x181   : > { %18321 = vmatprep.subr.mxu1 %v5143_v20  ;;  %v21587_v53 = vpop.permute.xlu0 %6210  ;;  %18323 = vmatprep.mubr.msk.f32.mxu1 %vm540_vm1, %v17480_v31 }
 0x182   : > { %17487 = vmatmul.mubr.msk.f32.gmra.mrb[6].mxu0 %vm540_vm1, %v17481_v9  ;;  %18322 = vmatpush3.msra.mxu1 %v5143_v20  ;;  %v21591_v54 = vpop.permute.xlu1 %6212 }
 0x183   : > { %5581 = vmatprep.mubr.f32.mxu0 %v25142_v11  ;;  %5594 = vmatprep.subr.mxu1 %v5500_v43  ;;  %v17510_v43 = vld [vmem:[%s25131_s1 + $0x100] sm:$0xff] }
 0x184   : > { %18324 = vmatmul.mubr.msk.f32.vlgmr.msra.gmra.mrb[4].mxu1 %vm540_vm1, %v17481_v9  ;;  %v5861_v9 = vsel %vm5856_vm15, %v21539_v33, %v21529_v2 }
 0x185   : > { %5595 = vmatpush1.msra.mxu1 %v5499_v0  ;;  %5658 = vmatprep.mubr.f32.mxu1 %v25142_v11 }
 0x186   : > { %17492 = vmatmul.mubr.msk.f32.vlgmr.msra.gmra.mrb[0].mxu0 %vm540_vm1, %v17490_v6  ;;  %v21608_v60 = vpop.permute.xlu0 %6208 }
 0x187   : > { %5672 = vmatpush1.msra.mxu0 %v5501_v48  ;;  %5587 = vmatprep.mubr.f32.mxu0 %v25142_v11  ;;  %v5495_v57 = vpop.permute.xlu1 %5494 }
 0x188   : > { %5877 = vmatprep.subr.mxu0 %v5858_v8  ;;  %v5503_v3 = vsel %vm5496_vm14, %v21466_v34, %v5495_v57  ;;  %17494 = vmatmul.mubr.msk.f32.vlgmr.msra.gmra.mrb[0].mxu1 %vm540_vm1, %v17490_v6  ;;  %v5862_v34 = vsel %vm5856_vm15, %v21529_v2, %v21535_v50  ;;  %v17511_v8 = vld [vmem:[%s25131_s1 + $0x108] sm:$0xff]  ;;  %vm11058_vm14 = vcmask 908288  }
 0x189   : > { %18326 = vmatprep.subr.mxu1 %v5503_v3  ;;  %5664 = vmatprep.mubr.f32.mxu1 %v25142_v11 }
 0x18a   : > { %17493 = vmatmul.mubr.msk.f32.gmra.mrb[2].mxu0 %vm540_vm1, %v17491_v24  ;;  %18327 = vmatpush3.msra.mxu1 %v5503_v3  ;;  %v21619_v27 = vpop.permute.xlu0 %6562 }
 0x18b   : > { %5735 = vmatprep.mubr.f32.mxu0 %v25142_v11  ;;  %v21622_v22 = vpop.permute.xlu1 %6564 }
 0x18c   : > { %17495 = vmatmul.mubr.msk.f32.gmra.mrb[2].mxu1 %vm540_vm1, %v17491_v24  ;;  %v6578_v57 = vsel %vm6576_vm7, %v21619_v27, %v21622_v22 }
 0x18d   : > { %18328 = vmatprep.mubr.msk.f32.mxu1 %vm540_vm1, %v17490_v6 }
 0x18e   : > { %17496 = vmatmul.mubr.msk.f32.vlgmr.msra.gmra.mrb[4].mxu0 %vm540_vm1, %v17490_v6  ;;  %v21633_v31 = vpop.permute.xlu0 %6560  ;;  %v6217_v6 = vsel %vm6216_vm6, %v21569_v51, %v21554_v23  ;;  %v6221_v51 = vsel %vm6216_vm6, %v21608_v60, %v21587_v53 }
 0x18f   : > { %5878 = vmatpush1.msra.mxu0 %v5857_v56  ;;  %5741 = vmatprep.mubr.f32.mxu0 %v25142_v11  ;;  %v5847_v1 = vpop.permute.xlu1 %5846 }
 0x190   : > { %6031 = vmatprep.subr.mxu0 %v5862_v34  ;;  %v5860_v17 = vsel %vm5856_vm15, %v5847_v1, %v21539_v33  ;;  %18329 = vmatmul.mubr.msk.f32.vlgmr.msra.gmra.mrb[4].mxu1 %vm540_vm1, %v17491_v24  ;;  %v5859_v59 = vsel %vm5856_vm15, %v21510_v15, %v5847_v1  ;;  %v6218_v15 = vsel %vm6216_vm6, %v21554_v23, %v21565_v5 }
 0x191   : > { %5954 = vmatprep.subr.mxu1 %v5860_v17  ;;  %6018 = vmatprep.mubr.f32.mxu1 %v25142_v11 }
 0x192   : > { %17497 = vmatmul.mubr.msk.f32.gmra.mrb[6].mxu0 %vm540_vm1, %v17491_v24  ;;  %5955 = vmatpush1.msra.mxu1 %v5859_v59  ;;  %v21643_v7 = vpop.permute.xlu0 %6570  ;;  %v17521_v59 = vld [vmem:[%s25131_s1 + $0x118] sm:$0xff] }
 0x193   : > { %5941 = vmatprep.mubr.f32.mxu0 %v25142_v11  ;;  %v21649_v4 = vpop.permute.xlu1 %6572 }
 0x194   : > { %17504 = vmatmul.mubr.msk.f32.vlgmr.msra.gmra.mrb[0].mxu1 %vm540_vm1, %v17500_v29  ;;  %v6582_v17 = vsel %vm6576_vm7, %v21643_v7, %v21649_v4 }
 0x195   : > { %6024 = vmatprep.mubr.f32.mxu1 %v25142_v11 }
 0x196   : > { %17502 = vmatmul.mubr.msk.f32.vlgmr.msra.gmra.mrb[0].mxu0 %vm540_vm1, %v17500_v29 }
 0x197   : > { %6032 = vmatpush1.msra.mxu0 %v5861_v9  ;;  %5947 = vmatprep.mubr.f32.mxu0 %v25142_v11  ;;  %v21661_v14 = vpop.permute.xlu0 %6568  ;;  %v20200_v9 = vmov 0  }
 0x198   : > { %6237 = vmatprep.subr.mxu0 %v6218_v15  ;;  %v5855_v32 = vpop.permute.xlu1 %5854  ;;  %17505 = vmatmul.mubr.msk.f32.gmra.mrb[2].mxu1 %vm540_vm1, %v17501_v40  ;;  %v9303_v15 = vld [vmem:[%s25148_s2 + $0x8] sm:$0xff] }
 0x199   : > { %v5863_v10 = vsel %vm5856_vm15, %v21535_v50, %v5855_v32  ;;  %18333 = vmatprep.mubr.msk.f32.mxu1 %vm540_vm1, %v17500_v29  ;;  %v6222_v50 = vsel %vm6216_vm6, %v21587_v53, %v21591_v54  ;;  %19816 = vset.pattern.permute.xlu0 %v20200_v9  ;;  %v6581_v32 = vsel %vm6576_vm7, %v21661_v14, %v21643_v7  ;;  %vm11187_vm15 = vcmask 900096  }
 0x19a   : > { %17503 = vmatmul.mubr.msk.f32.gmra.mrb[2].mxu0 %vm540_vm1, %v17501_v40  ;;  %18331 = vmatprep.subr.mxu1 %v5863_v10 }
 0x19b   : > { %6095 = vmatprep.mubr.f32.mxu0 %v25142_v11  ;;  %18332 = vmatpush3.msra.mxu1 %v5863_v10  ;;  %v6207_v2 = vpop.permute.xlu0 %6206 }
 0x19c   : > { %v21672_v33 = vpop.permute.xlu1 %6922  ;;  %v6220_v45 = vsel %vm6216_vm6, %v6207_v2, %v21608_v60  ;;  %18334 = vmatmul.mubr.msk.f32.vlgmr.msra.gmra.mrb[4].mxu1 %vm540_vm1, %v17501_v40  ;;  %v6219_v20 = vsel %vm6216_vm6, %v21565_v5, %v6207_v2  ;;  %19817 = vset.pattern.permute.xlu1 %v20200_v9 }
 0x19d   : > { %6314 = vmatprep.subr.mxu1 %v6220_v45  ;;  %6378 = vmatprep.mubr.f32.mxu1 %v25142_v11 }
 0x19e   : > { %17506 = vmatmul.mubr.msk.f32.vlgmr.msra.gmra.mrb[4].mxu0 %vm540_vm1, %v17500_v29  ;;  %6315 = vmatpush1.msra.mxu1 %v6219_v20  ;;  %v9302_v29 = vld [vmem:[%s25148_s2] sm:$0xff]  ;;  %s20210_s2 = smov 97  }
 0x19f   : > { %6238 = vmatpush1.msra.mxu0 %v6217_v6  ;;  %6101 = vmatprep.mubr.f32.mxu0 %v25142_v11  ;;  %v21691_v5 = vpop.permute.xlu0 %6924 }
 0x1a0   : > { %v21693_v0 = vpop.permute.xlu1 %6920  ;;  %6391 = vmatprep.subr.mxu0 %v6222_v50  ;;  %17514 = vmatmul.mubr.msk.f32.vlgmr.msra.gmra.mrb[0].mxu1 %vm540_vm1, %v17510_v43  ;;  %v6938_v7 = vsel %vm6936_vm8, %v21672_v33, %v21691_v5  ;;  %v17530_v50 = vld [vmem:[%s25131_s1 + $0x120] sm:$0xff] }
 0x1a1   : > { %6384 = vmatprep.mubr.f32.mxu1 %v25142_v11  ;;  %9306 = vperm.xlu0 %19816, %v9302_v29  }
 0x1a2   : > { %17507 = vmatmul.mubr.msk.f32.gmra.mrb[6].mxu0 %vm540_vm1, %v17501_v40  ;;  %9311 = vperm.xlu1 %19817, %v9303_v15  }
 0x1a3   : > { %6301 = vmatprep.mubr.f32.mxu0 %v25142_v11  ;;  %v6215_v23 = vpop.permute.xlu0 %6214 }
 0x1a4   : > { %v21705_v48 = vpop.permute.xlu1 %6930  ;;  %v6223_v24 = vsel %vm6216_vm6, %v21591_v54, %v6215_v23  ;;  %17515 = vmatmul.mubr.msk.f32.gmra.mrb[2].mxu1 %vm540_vm1, %v17511_v8  ;;  %v6577_v54 = vsel %vm6576_vm7, %v21633_v31, %v21619_v27  ;;  %v17520_v27 = vld [vmem:[%s25131_s1 + $0x110] sm:$0xff]  ;;  %v17531_v23 = vld [vmem:[%s25131_s1 + $0x128] sm:$0xff]  ;;  %vm11316_vm6 = vcmask 818176  }
 0x1a5   : > { %18336 = vmatprep.subr.mxu1 %v6223_v24  ;;  %18338 = vmatprep.mubr.msk.f32.mxu1 %vm540_vm1, %v17510_v43 }
 0x1a6   : > { %17512 = vmatmul.mubr.msk.f32.vlgmr.msra.gmra.mrb[0].mxu0 %vm540_vm1, %v17510_v43  ;;  %18337 = vmatpush3.msra.mxu1 %v6223_v24 }
 0x1a7   : > { %6392 = vmatpush1.msra.mxu0 %v6221_v51  ;;  %6307 = vmatprep.mubr.f32.mxu0 %v25142_v11  ;;  %v21716_v53 = vpop.permute.xlu0 %6932 }
 0x1a8   : > { %v21718_v60 = vpop.permute.xlu1 %6928  ;;  %6597 = vmatprep.subr.mxu0 %v6578_v57  ;;  %18339 = vmatmul.mubr.msk.f32.vlgmr.msra.gmra.mrb[4].mxu1 %vm540_vm1, %v17511_v8 }
 0x1a9   : > { %6738 = vmatprep.mubr.f32.mxu1 %v25142_v11  ;;  %v6941_v57 = vsel %vm6936_vm8, %v21718_v60, %v21705_v48 }
 0x1aa   : > { %17513 = vmatmul.mubr.msk.f32.gmra.mrb[2].mxu0 %vm540_vm1, %v17511_v8 }
 0x1ab   : > { %6455 = vmatprep.mubr.f32.mxu0 %v25142_v11 }
 0x1ac   : > { %v6567_v3 = vpop.permute.xlu0 %6566  ;;  %v21727_v34 = vpop.permute.xlu1 %7282 }
 0x1ad   : > { %v6580_v56 = vsel %vm6576_vm7, %v6567_v3, %v21661_v14  ;;  %v6579_v1 = vsel %vm6576_vm7, %v21622_v22, %v6567_v3  ;;  %v17540_v3 = vld [vmem:[%s25131_s1 + $0x130] sm:$0xff] }
 0x1ae   : > { %17516 = vmatmul.mubr.msk.f32.vlgmr.msra.gmra.mrb[4].mxu0 %vm540_vm1, %v17510_v43  ;;  %6674 = vmatprep.subr.mxu1 %v6580_v56  ;;  %v6937_v43 = vsel %vm6936_vm8, %v21693_v0, %v21672_v33 }
 0x1af   : > { %6598 = vmatpush1.msra.mxu0 %v6577_v54  ;;  %6461 = vmatprep.mubr.f32.mxu0 %v25142_v11 }
 0x1b0   : > { %6675 = vmatpush1.msra.mxu1 %v6579_v1  ;;  %v21741_v31 = vpop.permute.xlu0 %7284  ;;  %6751 = vmatprep.subr.mxu0 %v6582_v17 }
 0x1b1   : > { %17524 = vmatmul.mubr.msk.f32.vlgmr.msra.gmra.mrb[0].mxu1 %vm540_vm1, %v17520_v27  ;;  %v21744_v22 = vpop.permute.xlu1 %7280  ;;  %v7298_v54 = vsel %vm7296_vm9, %v21727_v34, %v21741_v31 }
 0x1b2   : > { %17517 = vmatmul.mubr.msk.f32.gmra.mrb[6].mxu0 %vm540_vm1, %v17511_v8  ;;  %6744 = vmatprep.mubr.f32.mxu1 %v25142_v11  ;;  %v6942_v8 = vsel %vm6936_vm8, %v21705_v48, %v21716_v53  ;;  %v17541_v48 = vld [vmem:[%s25131_s1 + $0x138] sm:$0xff] }
 0x1b3   : > { %6661 = vmatprep.mubr.f32.mxu0 %v25142_v11 }
 0x1b4   : > { %v6575_v40 = vpop.permute.xlu0 %6574 }
 0x1b5   : > { %17525 = vmatmul.mubr.msk.f32.gmra.mrb[2].mxu1 %vm540_vm1, %v17521_v59  ;;  %v6927_v10 = vpop.permute.xlu1 %6926  ;;  %v6583_v2 = vsel %vm6576_vm7, %v21649_v4, %v6575_v40  ;;  %vm11445_vm7 = vcmask 809984  }
 0x1b6   : > { %17522 = vmatmul.mubr.msk.f32.vlgmr.msra.gmra.mrb[0].mxu0 %vm540_vm1, %v17520_v27  ;;  %18341 = vmatprep.subr.mxu1 %v6583_v2  ;;  %v6940_v45 = vsel %vm6936_vm8, %v6927_v10, %v21718_v60  ;;  %v6939_v4 = vsel %vm6936_vm8, %v21691_v5, %v6927_v10  ;;  %v7297_v60 = vsel %vm7296_vm9, %v21744_v22, %v21727_v34 }
 0x1b7   : > { %6752 = vmatpush1.msra.mxu0 %v6581_v32  ;;  %6667 = vmatprep.mubr.f32.mxu0 %v25142_v11 }
 0x1b8   : > { %18342 = vmatpush3.msra.mxu1 %v6583_v2  ;;  %18343 = vmatprep.mubr.msk.f32.mxu1 %vm540_vm1, %v17520_v27  ;;  %v21772_v14 = vpop.permute.xlu0 %7290 }
 0x1b9   : > { %18344 = vmatmul.mubr.msk.f32.vlgmr.msra.gmra.mrb[4].mxu1 %vm540_vm1, %v17521_v59  ;;  %v7293_v20 = vpop.permute.xlu1 %7292  ;;  %7034 = vmatprep.subr.mxu1 %v6940_v45 }
 0x1ba   : > { %17523 = vmatmul.mubr.msk.f32.gmra.mrb[2].mxu0 %vm540_vm1, %v17521_v59  ;;  %6957 = vmatprep.subr.mxu0 %v6938_v7  ;;  %v7302_v1 = vsel %vm7296_vm9, %v21772_v14, %v7293_v20 }
 0x1bb   : > { %6815 = vmatprep.mubr.f32.mxu0 %v25142_v11  ;;  %7035 = vmatpush1.msra.mxu1 %v6939_v4 }
 0x1bc   : > { %7098 = vmatprep.mubr.f32.mxu1 %v25142_v11  ;;  %v7289_v6 = vpop.permute.xlu0 %7288 }
 0x1bd   : > { %17534 = vmatmul.mubr.msk.f32.vlgmr.msra.gmra.mrb[0].mxu1 %vm540_vm1, %v17530_v50  ;;  %v6935_v5 = vpop.permute.xlu1 %6934  ;;  %v7301_v34 = vsel %vm7296_vm9, %v7289_v6, %v21772_v14 }
 0x1be   : > { %17526 = vmatmul.mubr.msk.f32.vlgmr.msra.gmra.mrb[4].mxu0 %vm540_vm1, %v17520_v27  ;;  %7104 = vmatprep.mubr.f32.mxu1 %v25142_v11  ;;  %v6943_v33 = vsel %vm6936_vm8, %v21716_v53, %v6935_v5  ;;  %vm11574_vm8 = vcmask 801792  }
 0x1bf   : > { %6958 = vmatpush1.msra.mxu0 %v6937_v43  ;;  %6821 = vmatprep.mubr.f32.mxu0 %v25142_v11 }
 0x1c0   : > { %18346 = vmatprep.subr.mxu1 %v6943_v33  ;;  %7111 = vmatprep.subr.mxu0 %v6942_v8 }
 0x1c1   : > { %v7287_v0 = vpop.permute.xlu0 %7286  ;;  %17535 = vmatmul.mubr.msk.f32.gmra.mrb[2].mxu1 %vm540_vm1, %v17531_v23 }
 0x1c2   : > { %17527 = vmatmul.mubr.msk.f32.gmra.mrb[6].mxu0 %vm540_vm1, %v17521_v59  ;;  %18347 = vmatpush3.msra.mxu1 %v6943_v33  ;;  %v7300_v51 = vsel %vm7296_vm9, %v7287_v0, %v7289_v6  ;;  %v7299_v24 = vsel %vm7296_vm9, %v21741_v31, %v7287_v0  ;;  %v7295_v53 = vpop.permute.xlu1 %7294 }
 0x1c3   : > { %7021 = vmatprep.mubr.f32.mxu0 %v25142_v11  ;;  %18348 = vmatprep.mubr.msk.f32.mxu1 %vm540_vm1, %v17530_v50  ;;  %v7303_v56 = vsel %vm7296_vm9, %v7293_v20, %v7295_v53  ;;  %vm11703_vm9 = vcmask 793600  }
 0x1c4   : > { %7394 = vmatprep.subr.mxu1 %v7300_v51 }
 0x1c5   : > { %18349 = vmatmul.mubr.msk.f32.vlgmr.msra.gmra.mrb[4].mxu1 %vm540_vm1, %v17531_v23 }
 0x1c6   : > { %17532 = vmatmul.mubr.msk.f32.vlgmr.msra.gmra.mrb[0].mxu0 %vm540_vm1, %v17530_v50  ;;  %7395 = vmatpush1.msra.mxu1 %v7299_v24 }
 0x1c7   : > { %7112 = vmatpush1.msra.mxu0 %v6941_v57  ;;  %7027 = vmatprep.mubr.f32.mxu0 %v25142_v11 }
 0x1c8   : > { %7458 = vmatprep.mubr.f32.mxu1 %v25142_v11  ;;  %7317 = vmatprep.subr.mxu0 %v7298_v54 }
 0x1c9   : > { %17544 = vmatmul.mubr.msk.f32.vlgmr.msra.gmra.mrb[0].mxu1 %vm540_vm1, %v17540_v3  ;;  %18351 = vmatprep.subr.mxu1 %v7303_v56 }
 0x1ca   : > { %17533 = vmatmul.mubr.msk.f32.gmra.mrb[2].mxu0 %vm540_vm1, %v17531_v23  ;;  %7464 = vmatprep.mubr.f32.mxu1 %v25142_v11 }
 0x1cb   : > { %7175 = vmatprep.mubr.f32.mxu0 %v25142_v11  ;;  %18352 = vmatpush3.msra.mxu1 %v7303_v56  ;;  %v9507_v56 = vld [vmem:[%s25069_s5 + $0x8] sm:$0xff] }
 0x1cc   : > { %7723 = vmatprep.subr.mxu1 %v21376_v30  ;;  %v17550_v30 = vld [vmem:[%s25131_s1 + $0x140] sm:$0xff] }
 0x1cd   : > { %17545 = vmatmul.mubr.msk.f32.gmra.mrb[2].mxu1 %vm540_vm1, %v17541_v48 }
 0x1ce   : > { %17536 = vmatmul.mubr.msk.f32.vlgmr.msra.gmra.mrb[4].mxu0 %vm540_vm1, %v17530_v50  ;;  %18353 = vmatprep.mubr.msk.f32.mxu1 %vm540_vm1, %v17540_v3 }
 0x1cf   : > { %7318 = vmatpush1.msra.mxu0 %v7297_v60  ;;  %7181 = vmatprep.mubr.f32.mxu0 %v25142_v11  ;;  %v9506_v60 = vld [vmem:[%s25069_s5] sm:$0xff] }
 0x1d0   : > { %7471 = vmatprep.subr.mxu0 %v7302_v1 }
 0x1d1   : > { %18354 = vmatmul.mubr.msk.f32.vlgmr.msra.gmra.mrb[4].mxu1 %vm540_vm1, %v17541_v48 }
 0x1d2   : > { %17537 = vmatmul.mubr.msk.f32.gmra.mrb[6].mxu0 %vm540_vm1, %v17531_v23  ;;  %7724 = vmatpush1.msra.mxu1 %v21330_v47  ;;  %v17551_v47 = vld [vmem:[%s25131_s1 + $0x148] sm:$0xff] }
 0x1d3   : > { %7381 = vmatprep.mubr.f32.mxu0 %v25142_v11  ;;  %7787 = vmatprep.mubr.f32.mxu1 %v25142_v11 }
 0x1d4   : > { %18356 = vmatprep.subr.mxu1 %v21418_v21 }
 0x1d5   : > { %17554 = vmatmul.mubr.msk.f32.vlgmr.msra.gmra.mrb[0].mxu1 %vm540_vm1, %v17550_v30 }
 0x1d6   : > { %17542 = vmatmul.mubr.msk.f32.vlgmr.msra.gmra.mrb[0].mxu0 %vm540_vm1, %v17540_v3  ;;  %18357 = vmatpush3.msra.mxu1 %v21418_v21  ;;  %v7970_v21 = vpop.permute.xlu0 %7969 }
 0x1d7   : > { %7472 = vmatpush1.msra.mxu0 %v7301_v34  ;;  %8057 = vmatprep.subr.mxu1 %v20536_v19  ;;  %v17560_v19 = vld [vmem:[%s25131_s1 + $0x150] sm:$0xff]  ;;  %v9511_v34 = vld [vmem:[%s25069_s5 + $0x28] sm:$0xff] }
 0x1d8   : > { %7387 = vmatprep.mubr.f32.mxu0 %v25142_v11  ;;  %7793 = vmatprep.mubr.f32.mxu1 %v25142_v11 }
 0x1d9   : > { %17555 = vmatmul.mubr.msk.f32.gmra.mrb[2].mxu1 %vm540_vm1, %v17551_v47  ;;  %7646 = vmatprep.subr.mxu0 %v21305_v49 }
 0x1da   : > { %17543 = vmatmul.mubr.msk.f32.gmra.mrb[2].mxu0 %vm540_vm1, %v17541_v48  ;;  %18358 = vmatprep.mubr.msk.f32.mxu1 %vm540_vm1, %v17550_v30 }
 0x1db   : > { %7535 = vmatprep.mubr.f32.mxu0 %v25142_v11 }
 0x1dd   : > { %18359 = vmatmul.mubr.msk.f32.vlgmr.msra.gmra.mrb[4].mxu1 %vm540_vm1, %v17551_v47 }
 0x1de   : > { %17546 = vmatmul.mubr.msk.f32.vlgmr.msra.gmra.mrb[4].mxu0 %vm540_vm1, %v17540_v3  ;;  %8058 = vmatpush1.msra.mxu1 %v20745_v62  ;;  %v17561_v62 = vld [vmem:[%s25131_s1 + $0x158] sm:$0xff] }
 0x1df   : > { %7541 = vmatprep.mubr.f32.mxu0 %v25142_v11  ;;  %8121 = vmatprep.mubr.f32.mxu1 %v25142_v11 }
 0x1e0   : > { %18361 = vmatprep.subr.mxu1 %v7970_v21  ;;  %7647 = vmatpush1.msra.mxu0 %v21284_v58  ;;  %v8304_v58 = vpop.permute.xlu1 %8303 }
 0x1e1   : > { %17564 = vmatmul.mubr.msk.f32.vlgmr.msra.gmra.mrb[0].mxu1 %vm540_vm1, %v17560_v19  ;;  %7800 = vmatprep.subr.mxu0 %v21363_v39 }
 0x1e2   : > { %17547 = vmatmul.mubr.msk.f32.gmra.mrb[6].mxu0 %vm540_vm1, %v17541_v48  ;;  %18362 = vmatpush3.msra.mxu1 %v7970_v21  ;;  %v9509_v48 = vld [vmem:[%s25069_s5 + $0x18] sm:$0xff] }
 0x1e3   : > { %8391 = vmatprep.subr.mxu1 %v20644_v41  ;;  %7710 = vmatprep.mubr.f32.mxu0 %v25142_v11  ;;  %v21891_v41 = vld [vmem:[%s25131_s1 + $0x160] sm:$0xff]  ;;  %v18428_v1 = vpack.c.bf16 %v9509_v48, %v9507_v56  ;;  %v9532_v48 = vld [vmem:[%s25069_s5 + $0xd0] sm:$0xff] }
 0x1e4   : > { %8127 = vmatprep.mubr.f32.mxu1 %v25142_v11  ;;  %v9530_v56 = vld [vmem:[%s25069_s5 + $0xc0] sm:$0xff] }
 0x1e5   : > { %17565 = vmatmul.mubr.msk.f32.gmra.mrb[2].mxu1 %vm540_vm1, %v17561_v62 }
 0x1e6   : > { %17552 = vmatmul.mubr.msk.f32.vlgmr.msra.gmra.mrb[0].mxu0 %vm540_vm1, %v17550_v30  ;;  %18363 = vmatprep.mubr.msk.f32.mxu1 %vm540_vm1, %v17560_v19 }
 0x1e7   : > { %7801 = vmatpush1.msra.mxu0 %v21353_v26  ;;  %7716 = vmatprep.mubr.f32.mxu0 %v25142_v11 }
 0x1e8   : > { %7980 = vmatprep.subr.mxu0 %v20749_v63  ;;  %v7971_v63 = vsel %vm526_vm0, %v20523_v16, %v7970_v21  ;;  %v8638_v16 = vpop.permute.xlu0 %8637 }
 0x1e9   : > { %18364 = vmatmul.mubr.msk.f32.vlgmr.msra.gmra.mrb[4].mxu1 %vm540_vm1, %v17561_v62 }
 0x1ea   : > { %17553 = vmatmul.mubr.msk.f32.gmra.mrb[2].mxu0 %vm540_vm1, %v17551_v47  ;;  %8392 = vmatpush1.msra.mxu1 %v20859_v44  ;;  %v17571_v44 = vld [vmem:[%s25131_s1 + $0x168] sm:$0xff] }
 0x1eb   : > { %7864 = vmatprep.mubr.f32.mxu0 %v25142_v11  ;;  %8455 = vmatprep.mubr.f32.mxu1 %v25142_v11 }
 0x1ec   : > { %18366 = vmatprep.subr.mxu1 %v8304_v58 }
 0x1ed   : > { %17574 = vmatmul.mubr.msk.f32.vlgmr.msra.gmra.mrb[0].mxu1 %vm540_vm1, %v21891_v41 }
 0x1ee   : > { %17556 = vmatmul.mubr.msk.f32.vlgmr.msra.gmra.mrb[4].mxu0 %vm540_vm1, %v17550_v30  ;;  %18367 = vmatpush3.msra.mxu1 %v8304_v58  ;;  %v9508_v30 = vld [vmem:[%s25069_s5 + $0x10] sm:$0xff] }
 0x1ef   : > { %7981 = vmatpush1.msra.mxu0 %v20507_v12  ;;  %8725 = vmatprep.subr.mxu1 %v20712_v55  ;;  %v17580_v12 = vld [vmem:[%s25131_s1 + $0x170] sm:$0xff]  ;;  %v8305_v55 = vsel %vm1182_vm2, %v20568_v25, %v8304_v58  ;;  %v17591_v25 = vld [vmem:[%s25131_s1 + $0x188] sm:$0xff] }
 0x1f0   : > { %8134 = vmatprep.subr.mxu0 %v7971_v63  ;;  %7870 = vmatprep.mubr.f32.mxu0 %v25142_v11  ;;  %v9515_v58 = vld [vmem:[%s25069_s5 + $0x48] sm:$0xff]  ;;  %v9517_v63 = vld [vmem:[%s25069_s5 + $0x58] sm:$0xff] }
 0x1f1   : > { %8461 = vmatprep.mubr.f32.mxu1 %v25142_v11 }
 0x1f2   : > { %17557 = vmatmul.mubr.msk.f32.gmra.mrb[6].mxu0 %vm540_vm1, %v17551_v47  ;;  %17575 = vmatmul.mubr.msk.f32.gmra.mrb[2].mxu1 %vm540_vm1, %v17571_v44  ;;  %v9513_v47 = vld [vmem:[%s25069_s5 + $0x38] sm:$0xff] }
 0x1f3   : > { %8044 = vmatprep.mubr.f32.mxu0 %v25142_v11  ;;  %18368 = vmatprep.mubr.msk.f32.mxu1 %vm540_vm1, %v21891_v41  ;;  %v18432_v21 = vpack.c.bf16 %v9513_v47, %v9511_v34  ;;  %v9534_v47 = vld [vmem:[%s25069_s5 + $0xe0] sm:$0xff] }
 0x1f6   : > { %17562 = vmatmul.mubr.msk.f32.vlgmr.msra.gmra.mrb[0].mxu0 %vm540_vm1, %v17560_v19  ;;  %18369 = vmatmul.mubr.msk.f32.vlgmr.msra.gmra.mrb[4].mxu1 %vm540_vm1, %v17571_v44 }
 0x1f7   : > { %8135 = vmatpush1.msra.mxu0 %v20531_v18  ;;  %8726 = vmatpush1.msra.mxu1 %v20929_v38  ;;  %v17581_v18 = vld [vmem:[%s25131_s1 + $0x178] sm:$0xff] }
 0x1f8   : > { %8314 = vmatprep.subr.mxu0 %v20880_v52  ;;  %8050 = vmatprep.mubr.f32.mxu0 %v25142_v11  ;;  %v25149_v52 = vld [vmem:[#allocation11_spill] sm:$0xff]  ;;  %v25150_v38 = vld [vmem:[#allocation14_spill] sm:$0xff] }
 0x1f9   : > { %8789 = vmatprep.mubr.f32.mxu1 %v25142_v11  ;;  %18371 = vmatprep.subr.mxu1 %v8638_v16 }
 0x1fa   : > { %17563 = vmatmul.mubr.msk.f32.gmra.mrb[2].mxu0 %vm540_vm1, %v17561_v62  ;;  %17584 = vmatmul.mubr.msk.f32.vlgmr.msra.gmra.mrb[0].mxu1 %vm540_vm1, %v17580_v12 }
 0x1fb   : > { %18372 = vmatpush3.msra.mxu1 %v8638_v16  ;;  %8198 = vmatprep.mubr.f32.mxu0 %v25142_v11 }
 0x1fc   : > { %9059 = vmatprep.subr.mxu1 %v20805_v13  ;;  %8795 = vmatprep.mubr.f32.mxu1 %v25142_v11  ;;  %v8972_v13 = vpop.permute.xlu1 %8971 }
 0x1fe   : > { %17566 = vmatmul.mubr.msk.f32.vlgmr.msra.gmra.mrb[4].mxu0 %vm540_vm1, %v17560_v19  ;;  %17585 = vmatmul.mubr.msk.f32.gmra.mrb[2].mxu1 %vm540_vm1, %v17581_v18  ;;  %v18430_v19 = vpack.c.bf16 %v9508_v30, %v9506_v60  ;;  %v9535_v60 = vld [vmem:[%s25069_s5 + $0xe8] sm:$0xff]  ;;  %v18454_v30 = vpack.c.bf16 %v9532_v48, %v9530_v56  ;;  %v9561_v56 = vld [vmem:[%s25069_s5 + $0x1b8] sm:$0xff] }
 0x1ff   : > { %8315 = vmatpush1.msra.mxu0 %v20586_v28  ;;  %8204 = vmatprep.mubr.f32.mxu0 %v25142_v11  ;;  %v17590_v28 = vld [vmem:[%s25131_s1 + $0x180] sm:$0xff]  ;;  %s20209_s1 = smov 98  }
 0x200   : > { %8468 = vmatprep.subr.mxu0 %v8305_v55  ;;  %18373 = vmatprep.mubr.msk.f32.mxu1 %vm540_vm1, %v17580_v12  ;;  %v9519_v55 = vld [vmem:[%s25069_s5 + $0x68] sm:$0xff] }
 0x202   : > { %17567 = vmatmul.mubr.msk.f32.gmra.mrb[6].mxu0 %vm540_vm1, %v17561_v62  ;;  %18374 = vmatmul.mubr.msk.f32.vlgmr.msra.gmra.mrb[4].mxu1 %vm540_vm1, %v17581_v18  ;;  %v9510_v62 = vld [vmem:[%s25069_s5 + $0x20] sm:$0xff] }
 0x203   : > { %9060 = vmatpush1.msra.mxu1 %v20970_v61  ;;  %8378 = vmatprep.mubr.f32.mxu0 %v25142_v11 }
 0x204   : > { %9123 = vmatprep.mubr.f32.mxu1 %v25142_v11  ;;  %18376 = vmatprep.subr.mxu1 %v8972_v13 }
 0x206   : > { %17572 = vmatmul.mubr.msk.f32.vlgmr.msra.gmra.mrb[0].mxu0 %vm540_vm1, %v21891_v41  ;;  %17594 = vmatmul.mubr.msk.f32.vlgmr.msra.gmra.mrb[0].mxu1 %vm540_vm1, %v17590_v28 }
 0x207   : > { %8469 = vmatpush1.msra.mxu0 %v20614_v35  ;;  %8384 = vmatprep.mubr.f32.mxu0 %v25142_v11  ;;  %v8639_v35 = vsel %vm1539_vm3, %v20616_v36, %v8638_v16  ;;  %v25151_v36 = vld [vmem:[#allocation12_spill] sm:$0xff]  ;;  %v9514_v16 = vld [vmem:[%s25069_s5 + $0x40] sm:$0xff] }
 0x208   : > { %8648 = vmatprep.subr.mxu0 %v20949_v37  ;;  %9129 = vmatprep.mubr.f32.mxu1 %v25142_v11  ;;  %v25152_v37 = vld [vmem:[#allocation13_spill] sm:$0xff] }
 0x209   : > { %18377 = vmatpush3.msra.mxu1 %v8972_v13 }
 0x20a   : > { %17573 = vmatmul.mubr.msk.f32.gmra.mrb[2].mxu0 %vm540_vm1, %v17571_v44  ;;  %17595 = vmatmul.mubr.msk.f32.gmra.mrb[2].mxu1 %vm540_vm1, %v17591_v25 }
 0x20b   : > { %8532 = vmatprep.mubr.f32.mxu0 %v25142_v11  ;;  %18378 = vmatprep.mubr.msk.f32.mxu1 %vm540_vm1, %v17590_v28 }
 0x20c   : > { %18429 = vmatprep.subr.bf16.mxu1 %v18428_v1  ;;  %v9537_v1 = vld [vmem:[%s25069_s5 + $0xf8] sm:$0xff] }
 0x20d   : > { %v18456_v34 = vpack.c.bf16 %v9537_v1, %v9535_v60  ;;  %v9558_v1 = vld [vmem:[%s25069_s5 + $0x1a0] sm:$0xff] }
 0x20e   : > { %17576 = vmatmul.mubr.msk.f32.vlgmr.msra.gmra.mrb[4].mxu0 %vm540_vm1, %v21891_v41  ;;  %18379 = vmatmul.mubr.msk.f32.vlgmr.msra.gmra.mrb[4].mxu1 %vm540_vm1, %v17591_v25  ;;  %v9512_v41 = vld [vmem:[%s25069_s5 + $0x30] sm:$0xff] }
 0x20f   : > { %8649 = vmatpush1.msra.mxu0 %v20650_v42  ;;  %8538 = vmatprep.mubr.f32.mxu0 %v25142_v11  ;;  %v8973_v42 = vsel %vm1896_vm4, %v20668_v46, %v8972_v13  ;;  %v9521_v13 = vld [vmem:[%s25069_s5 + $0x78] sm:$0xff] }
 0x210   : > { %8802 = vmatprep.subr.mxu0 %v8639_v35  ;;  %18431 = vmatpush1.bf16.msra.mxu1 %v18430_v19  ;;  %v9518_v35 = vld [vmem:[%s25069_s5 + $0x60] sm:$0xff]  ;;  %v9536_v19 = vld [vmem:[%s25069_s5 + $0xf0] sm:$0xff] }
 0x211   : > { %18433 = vmatprep.subr.bf16.mxu1 %v18432_v21  ;;  %v9539_v21 = vld [vmem:[%s25069_s5 + $0x108] sm:$0xff] }
 0x212   : > { %17577 = vmatmul.mubr.msk.f32.gmra.mrb[6].mxu0 %vm540_vm1, %v17571_v44  ;;  %v18434_v44 = vpack.c.bf16 %v9512_v41, %v9510_v62  ;;  %v9541_v62 = vld [vmem:[%s25069_s5 + $0x118] sm:$0xff]  ;;  %v18458_v41 = vpack.c.bf16 %v9536_v19, %v9534_v47  ;;  %v9563_v47 = vld [vmem:[%s25069_s5 + $0x1c8] sm:$0xff] }
 0x213   : > { %8712 = vmatprep.mubr.f32.mxu0 %v25142_v11  ;;  %v9565_v19 = vld [vmem:[%s25069_s5 + $0x1d8] sm:$0xff] }
 0x214   : > { %18435 = vmatpush1.bf16.msra.mxu1 %v18434_v44  ;;  %v9540_v44 = vld [vmem:[%s25069_s5 + $0x110] sm:$0xff] }
 0x216   : > { %17582 = vmatmul.mubr.msk.f32.vlgmr.msra.gmra.mrb[0].mxu0 %vm540_vm1, %v17580_v12 }
 0x217   : > { %8803 = vmatpush1.msra.mxu0 %v25149_v52  ;;  %8718 = vmatprep.mubr.f32.mxu0 %v25142_v11  ;;  %v9520_v52 = vld [vmem:[%s25069_s5 + $0x70] sm:$0xff] }
 0x218   : > { %8982 = vmatprep.subr.mxu0 %v25150_v38  ;;  %v9523_v38 = vld [vmem:[%s25069_s5 + $0x88] sm:$0xff] }
 0x21a   : > { %17583 = vmatmul.mubr.msk.f32.gmra.mrb[2].mxu0 %vm540_vm1, %v17581_v18 }
 0x21b   : > { %8866 = vmatprep.mubr.f32.mxu0 %v25142_v11 }
 0x21e   : > { %17586 = vmatmul.mubr.msk.f32.vlgmr.msra.gmra.mrb[4].mxu0 %vm540_vm1, %v17580_v12  ;;  %v18436_v12 = vpack.c.bf16 %v9517_v63, %v9515_v58  ;;  %v18460_v58 = vpack.c.bf16 %v9541_v62, %v9539_v21  ;;  %v9538_v63 = vld [vmem:[%s25069_s5 + $0x100] sm:$0xff]  ;;  %v18484_v21 = vpack.c.bf16 %v9565_v19, %v9563_v47  ;;  %v9572_v19 = vld [vmem:[%s25069_s5 + $0x210] sm:$0xff] }
 0x21f   : > { %8983 = vmatpush1.msra.mxu0 %v25151_v36  ;;  %8872 = vmatprep.mubr.f32.mxu0 %v25142_v11  ;;  %v9525_v36 = vld [vmem:[%s25069_s5 + $0x98] sm:$0xff]  ;;  %v9562_v62 = vld [vmem:[%s25069_s5 + $0x1c0] sm:$0xff] }
 0x220   : > { %9136 = vmatprep.subr.mxu0 %v8973_v42  ;;  %v21994_v27 = vpop.permute.xlu0 %9306  ;;  %18437 = vmatprep.subr.bf16.mxu1 %v18436_v12  ;;  %v18442_v42 = vpack.c.bf16 %v9520_v52, %v9518_v35  ;;  %v9543_v12 = vld [vmem:[%s25069_s5 + $0x128] sm:$0xff]  ;;  %v9549_v35 = vld [vmem:[%s25069_s5 + $0x158] sm:$0xff]  ;;  %v9570_v47 = vld [vmem:[%s25069_s5 + $0x200] sm:$0xff] }
 0x221   : > { %v22002_v59 = vpop.permute.xlu1 %9311 }
 0x222   : > { %17587 = vmatmul.mubr.msk.f32.gmra.mrb[6].mxu0 %vm540_vm1, %v17581_v18  ;;  %v9516_v18 = vld [vmem:[%s25069_s5 + $0x50] sm:$0xff] }
 0x223   : > { %9046 = vmatprep.mubr.f32.mxu0 %v25142_v11 }
 0x226   : > { %17592 = vmatmul.mubr.msk.f32.vlgmr.msra.gmra.mrb[0].mxu0 %vm540_vm1, %v17590_v28 }
 0x227   : > { %9137 = vmatpush1.msra.mxu0 %v25152_v37  ;;  %9052 = vmatprep.mubr.f32.mxu0 %v25142_v11  ;;  %v18444_v37 = vpack.c.bf16 %v9525_v36, %v9523_v38  ;;  %v9546_v36 = vld [vmem:[%s25069_s5 + $0x140] sm:$0xff] }
 0x22a   : > { %17593 = vmatmul.mubr.msk.f32.gmra.mrb[2].mxu0 %vm540_vm1, %v17591_v25 }
 0x22b   : > { %9200 = vmatprep.mubr.f32.mxu0 %v25142_v11 }
 0x22e   : > { %17596 = vmatmul.mubr.msk.f32.vlgmr.msra.gmra.mrb[4].mxu0 %vm540_vm1, %v17590_v28  ;;  %v18438_v28 = vpack.c.bf16 %v9516_v18, %v9514_v16  ;;  %v9545_v16 = vld [vmem:[%s25069_s5 + $0x138] sm:$0xff]  ;;  %v18462_v18 = vpack.c.bf16 %v9540_v44, %v9538_v63  ;;  %v9567_v63 = vld [vmem:[%s25069_s5 + $0x1e8] sm:$0xff] }
 0x22f   : > { %9206 = vmatprep.mubr.f32.mxu0 %v25142_v11  ;;  %v9569_v44 = vld [vmem:[%s25069_s5 + $0x1f8] sm:$0xff] }
 0x230   : > { %18439 = vmatpush1.bf16.msra.mxu1 %v18438_v28  ;;  %v9544_v28 = vld [vmem:[%s25069_s5 + $0x130] sm:$0xff] }
 0x232   : > { %17597 = vmatmul.mubr.msk.f32.gmra.mrb[6].mxu0 %vm540_vm1, %v17591_v25  ;;  %v18440_v25 = vpack.c.bf16 %v9521_v13, %v9519_v55  ;;  %v18464_v55 = vpack.c.bf16 %v9545_v16, %v9543_v12  ;;  %v9542_v13 = vld [vmem:[%s25069_s5 + $0x120] sm:$0xff]  ;;  %v18488_v12 = vpack.c.bf16 %v9569_v44, %v9567_v63  ;;  %vm9729_vm1 = vcmask 1042432  }
 0x233   : > { %10148 = vmatprep.mubr.f32.mxu0 %v25142_v11  ;;  %v18466_v52 = vpack.c.bf16 %v9544_v28, %v9542_v13  ;;  %v9566_v16 = vld [vmem:[%s25069_s5 + $0x1e0] sm:$0xff]  ;;  %vm18641_vm11 = vmpackc.low %vm9729_vm1, %vm20201_vm10  ;;  %vm12089_vm1 = vcmask 695296  }
 0x234   : > { %18441 = vmatprep.subr.bf16.mxu1 %v18440_v25  ;;  %v9547_v25 = vld [vmem:[%s25069_s5 + $0x148] sm:$0xff] }
 0x235   : > { %18443 = vmatpush1.bf16.msra.mxu1 %v18442_v42  ;;  %v18468_v38 = vpack.c.bf16 %v9549_v35, %v9547_v25  ;;  %v9548_v42 = vld [vmem:[%s25069_s5 + $0x150] sm:$0xff] }
 0x236   : > { %18445 = vmatprep.subr.bf16.mxu1 %v18444_v37  ;;  %v9551_v37 = vld [vmem:[%s25069_s5 + $0x168] sm:$0xff] }
 0x2d9   : > { %v9125_v46 = vpop.f32.mrb[0].mxu1 }
 0x2da   : > { %v9127_v61 = vpop.f32.mrb[1].mxu1  ;;  %v22000_v22 = vadd.f32 %v21994_v27, %v9125_v46  ;;  %v9522_v46 = vld [vmem:[%s25069_s5 + $0x80] sm:$0xff] }
 0x2db   : > { %v21997_v31 = vadd.f32 %v21994_v27, %v9127_v61  ;;  %v9524_v61 = vld [vmem:[%s25069_s5 + $0x90] sm:$0xff] }
 0x2dc   : > { %v9330_v45 = vmax.f32 %v22000_v22, 0.0 }
 0x2dd   : > { %v9131_v49 = vpop.f32.mrb[2].mxu1  ;;  %v9331_v32 = vmax.f32 %v21997_v31, 0.0  ;;  %v9578_v31 = vld [vmem:[%s25069_s5 + $0x240] sm:$0xff] }
 0x2de   : > { %v9133_v26 = vpop.f32.mrb[3].mxu1  ;;  %v22018_v4 = vadd.f32 %v22002_v59, %v9131_v49  ;;  %v9527_v49 = vld [vmem:[%s25069_s5 + $0xa8] sm:$0xff] }
 0x2df   : > { %v22012_v10 = vadd.f32 %v22002_v59, %v9133_v26  ;;  %v9529_v26 = vld [vmem:[%s25069_s5 + $0xb8] sm:$0xff] }
 0x2e0   : > { %v9337_v0 = vmax.f32 %v22018_v4, 0.0 }
 0x2e1   : > { %v21990_v39 = vpop.f32.mrb[4].mxu1  ;;  %v9338_v8 = vmax.f32 %v22012_v10, 0.0 }
 0x2e2   : > { %v21992_v17 = vpop.f32.mrb[5].mxu1 }
 0x2e3   : > { %v22312_v4 = vadd.f32 %v21994_v27, %v21992_v17 }
 0x2f9   : > { %v9048_v29 = vpop.f32.mrb[0].mxu0 }
 0x2fa   : > { %v22005_v15 = vadd.f32 %v21994_v27, %v9048_v29  ;;  %v9050_v9 = vpop.f32.mrb[1].mxu0  ;;  %v18446_v29 = vpack.c.bf16 %v9524_v61, %v9522_v46  ;;  %v9553_v46 = vld [vmem:[%s25069_s5 + $0x178] sm:$0xff]  ;;  %v18470_v61 = vpack.c.bf16 %v9548_v42, %v9546_v36 }
 0x2fb   : > { %v22008_v40 = vadd.f32 %v21994_v27, %v9050_v9  ;;  %v18448_v9 = vpack.c.bf16 %v9529_v26, %v9527_v49  ;;  %v18472_v49 = vpack.c.bf16 %v9553_v46, %v9551_v37  ;;  %v9550_v26 = vld [vmem:[%s25069_s5 + $0x160] sm:$0xff] }
 0x2fc   : > { %v9328_v2 = vmax.f32 %v22005_v15, 0.0  ;;  %18447 = vmatpush1.bf16.msra.mxu1 %v18446_v29  ;;  %v9552_v29 = vld [vmem:[%s25069_s5 + $0x170] sm:$0xff] }
 0x2fd   : > { %v9329_v7 = vmax.f32 %v22008_v40, 0.0  ;;  %v9054_v14 = vpop.f32.mrb[2].mxu0  ;;  %18449 = vmatprep.subr.bf16.mxu1 %v18448_v9  ;;  %v9555_v9 = vld [vmem:[%s25069_s5 + $0x188] sm:$0xff] }
 0x2fe   : > { %v19823_v20 = vpack.i.bf16 %v9328_v2, %v9331_v32  ;;  %v22025_v50 = vadd.f32 %v22002_v59, %v9054_v14  ;;  %v9056_v43 = vpop.f32.mrb[3].mxu0  ;;  %v9526_v14 = vld [vmem:[%s25069_s5 + $0xa0] sm:$0xff] }
 0x2ff   : > { %v19818_v6 = vpack.i.bf16 %v9330_v45, %v9329_v7  ;;  %v22032_v5 = vadd.f32 %v22002_v59, %v9056_v43  ;;  %v9531_v43 = vld [vmem:[%s25069_s5 + $0xc8] sm:$0xff] }
 0x300   : > { %v9335_v23 = vmax.f32 %v22025_v50, 0.0  ;;  %19824 = vrot.lane.b32.xlu0 %v19823_v20, %s25145_s26  ;;  %v9528_v20 = vld [vmem:[%s25069_s5 + $0xb0] sm:$0xff] }
 0x301   : > { %v9336_v33 = vmax.f32 %v22032_v5, 0.0  ;;  %19819 = vrot.lane.b32.xlu1 %v19818_v6, %s25145_s26  ;;  %v22040_v51 = vpop.f32.mrb[4].mxu0  ;;  %v9533_v6 = vld [vmem:[%s25069_s5 + $0xd8] sm:$0xff] }
 0x302   : > { %v19828_v24 = vpack.i.bf16 %v9335_v23, %v9338_v8  ;;  %v22046_v57 = vpop.f32.mrb[5].mxu0 }
 0x303   : > { %v19833_v53 = vpack.i.bf16 %v9337_v0, %v9336_v33  ;;  %v22260_v42 = vadd.f32 %v21994_v27, %v22046_v57 }
 0x304   : > { %19829 = vrot.lane.b32.xlu0 %v19828_v24, %s25145_s26  ;;  %v18450_v24 = vpack.c.bf16 %v9528_v20, %v9526_v14  ;;  %v9557_v14 = vld [vmem:[%s25069_s5 + $0x198] sm:$0xff]  ;;  %v18474_v20 = vpack.c.bf16 %v9552_v29, %v9550_v26 }
 0x305   : > { %v22053_v54 = vpop.f32.mrb[6].mxu0  ;;  %19834 = vrot.lane.b32.xlu1 %v19833_v53, %s25145_s26  ;;  %v18452_v53 = vpack.c.bf16 %v9533_v6, %v9531_v43  ;;  %v18476_v43 = vpack.c.bf16 %v9557_v14, %v9555_v9  ;;  %v9554_v6 = vld [vmem:[%s25069_s5 + $0x180] sm:$0xff] }
 0x306   : > { %v22056_v3 = vpop.f32.mrb[7].mxu0  ;;  %18451 = vmatpush1.bf16.msra.mxu1 %v18450_v24  ;;  %v9556_v24 = vld [vmem:[%s25069_s5 + $0x190] sm:$0xff]  ;;  %v22282_v22 = vadd.f32 %v22002_v59, %v22053_v54 }
 0x307   : > { %18453 = vmatprep.subr.bf16.mxu1 %v18452_v53  ;;  %v9559_v53 = vld [vmem:[%s25069_s5 + $0x1a8] sm:$0xff]  ;;  %v18478_v48 = vpack.c.bf16 %v9556_v24, %v9554_v6  ;;  %v9333_v6 = vmax.f32 %v22260_v42, 0.0  ;;  %v22286_v15 = vadd.f32 %v22002_v59, %v22056_v3  ;;  %v9597_v42 = vld [vmem:[%s25069_s5 + $0x2d8] sm:$0xff] }
 0x308   : > { %v18480_v60 = vpack.c.bf16 %v9561_v56, %v9559_v53  ;;  %v9339_v24 = vmax.f32 %v22282_v22, 0.0  ;;  %v9582_v22 = vld [vmem:[%s25069_s5 + $0x260] sm:$0xff] }
 0x309   : > { %v9340_v53 = vmax.f32 %v22286_v15, 0.0  ;;  %v9642_v15 = vld [vmem:[%s25069_s5 + $0x440] sm:$0xff] }
 0x30a   : > { %18455 = vmatpush1.bf16.msra.mxu1 %v18454_v30  ;;  %v9560_v30 = vld [vmem:[%s25069_s5 + $0x1b0] sm:$0xff] }
 0x30b   : > { %18457 = vmatprep.subr.bf16.mxu1 %v18456_v34  ;;  %v18482_v34 = vpack.c.bf16 %v9560_v30, %v9558_v1  ;;  %v19853_v5 = vpack.i.bf16 %v9340_v53, %v9339_v24 }
 0x30e   : > { %18459 = vmatpush1.bf16.msra.mxu1 %v18458_v41  ;;  %v9564_v41 = vld [vmem:[%s25069_s5 + $0x1d0] sm:$0xff] }
 0x30f   : > { %18461 = vmatprep.subr.bf16.mxu1 %v18460_v58  ;;  %v18486_v58 = vpack.c.bf16 %v9564_v41, %v9562_v62  ;;  %v9577_v62 = vld [vmem:[%s25069_s5 + $0x238] sm:$0xff] }
 0x312   : > { %18463 = vmatpush1.bf16.msra.mxu1 %v18462_v18  ;;  %v9568_v18 = vld [vmem:[%s25069_s5 + $0x1f0] sm:$0xff] }
 0x313   : > { %18465 = vmatprep.subr.bf16.mxu1 %v18464_v55  ;;  %v18490_v55 = vpack.c.bf16 %v9568_v18, %v9566_v16 }
 0x316   : > { %18467 = vmatpush1.bf16.msra.mxu1 %v18466_v52  ;;  %v22256_v52 = vadd.f32 %v21994_v27, %v22040_v51 }
 0x317   : > { %18469 = vmatprep.subr.bf16.mxu1 %v18468_v38 }
 0x318   : > { %v9332_v9 = vmax.f32 %v22256_v52, 0.0 }
 0x31a   : > { %18471 = vmatpush1.bf16.msra.mxu1 %v18470_v61  ;;  %v19843_v3 = vpack.i.bf16 %v9333_v6, %v9332_v9 }
 0x31b   : > { %18473 = vmatprep.subr.bf16.mxu1 %v18472_v49 }
 0x31e   : > { %18475 = vmatpush1.bf16.msra.mxu1 %v18474_v20 }
 0x31f   : > { %18477 = vmatprep.subr.bf16.mxu1 %v18476_v43 }
 0x322   : > { %18479 = vmatpush1.bf16.msra.mxu1 %v18478_v48  ;;  %v9573_v48 = vld [vmem:[%s25069_s5 + $0x218] sm:$0xff] }
 0x323   : > { %18481 = vmatprep.subr.bf16.mxu1 %v18480_v60 }
 0x326   : > { %18483 = vmatpush1.bf16.msra.mxu1 %v18482_v34 }
 0x327   : > { %18485 = vmatprep.subr.bf16.mxu1 %v18484_v21  ;;  %v9575_v21 = vld [vmem:[%s25069_s5 + $0x228] sm:$0xff] }
 0x32a   : > { %18487 = vmatpush1.bf16.msra.mxu1 %v18486_v58 }
 0x32b   : > { %18489 = vmatprep.subr.bf16.mxu1 %v18488_v12 }
 0x32e   : > { %18491 = vmatpush1.bf16.msra.mxu1 %v18490_v55  ;;  %v18494_v55 = vpack.c.bf16 %v9572_v19, %v9570_v47 }
 0x372   : > { %v22250_v13 = vpop.permute.xlu0 %19824 }
 0x373   : > { %v19827_v28 = vunpack.i.h.bf16 %v22250_v13  ;;  %v19826_v25 = vunpack.i.l.bf16 %v22250_v13  ;;  %v19820_v35 = vpop.permute.xlu1 %19819 }
 0x374   : > { %v19822_v38 = vunpack.i.h.bf16 %v19820_v35  ;;  %v19821_v36 = vunpack.i.l.bf16 %v19820_v35 }
 0x376   : > { %v9386_v37 = vsel %vm526_vm0, %v19822_v38, %v19826_v25  ;;  %v9384_v46 = vsel %vm526_vm0, %v19827_v28, %v19821_v36  ;;  %v9385_v61 = vsel %vm526_vm0, %v19821_v36, %v19822_v38  ;;  %v22267_v49 = vpop.permute.xlu0 %19829  ;;  %v18496_v36 = vpack.c.bf16 %v9577_v62, %v9575_v21  ;;  %v9586_v21 = vld [vmem:[%s25069_s5 + $0x280] sm:$0xff]  ;;  %v9588_v62 = vld [vmem:[%s25069_s5 + $0x290] sm:$0xff] }
 0x377   : > { %v22271_v51 = vmax.f32 %v9330_v45, %v9386_v37  ;;  %v9410_v26 = vmax.f32 %v9328_v2, %v9384_v46  ;;  %v9411_v57 = vmax.f32 %v9329_v7, %v9385_v61  ;;  %v19835_v29 = vpop.permute.xlu1 %19834  ;;  %v19831_v14 = vunpack.i.l.bf16 %v22267_v49  ;;  %v9574_v37 = vld [vmem:[%s25069_s5 + $0x220] sm:$0xff]  ;;  %v9576_v46 = vld [vmem:[%s25069_s5 + $0x230] sm:$0xff]  ;;  %v9579_v61 = vld [vmem:[%s25069_s5 + $0x248] sm:$0xff] }
 0x378   : > { %v19837_v20 = vunpack.i.h.bf16 %v19835_v29  ;;  %v19836_v43 = vunpack.i.l.bf16 %v19835_v29  ;;  %v19832_v17 = vunpack.i.h.bf16 %v22267_v49 }
 0x379   : > { %9438 = vrot.lane.b32.xlu0 %v9410_v26, %s25153_s18  ;;  %v19838_v40 = vpack.i.bf16 %v22271_v51, %v9411_v57 }
 0x37a   : > { %v9392_v2 = vsel %vm526_vm0, %v19837_v20, %v19831_v14  ;;  %v9391_v45 = vsel %vm526_vm0, %v19836_v43, %v19837_v20  ;;  %v9390_v63 = vsel %vm526_vm0, %v19832_v17, %v19836_v43  ;;  %v22423_v17 = vadd.f32 %v21990_v39, %v22002_v59  ;;  %v9587_v39 = vld [vmem:[%s25069_s5 + $0x288] sm:$0xff]  ;;  %v9589_v59 = vld [vmem:[%s25069_s5 + $0x298] sm:$0xff] }
 0x37b   : > { %v22296_v7 = vmax.f32 %v9337_v0, %v9392_v2  ;;  %v9418_v54 = vmax.f32 %v9336_v33, %v9391_v45  ;;  %19839 = vrot.lane.b32.xlu1 %v19838_v40, %s25153_s18  ;;  %v9334_v33 = vmax.f32 %v22312_v4, 0.0  ;;  %v9571_v0 = vld [vmem:[%s25069_s5 + $0x208] sm:$0xff]  ;;  %v22381_v43 = vmax.f32 %v9335_v23, %v9390_v63  ;;  %v9593_v4 = vld [vmem:[%s25069_s5 + $0x2b8] sm:$0xff] }
 0x37c   : > { %v18492_v60 = vpack.c.bf16 %v9573_v48, %v9571_v0  ;;  %v9583_v0 = vld [vmem:[%s25069_s5 + $0x268] sm:$0xff]  ;;  %v9585_v48 = vld [vmem:[%s25069_s5 + $0x278] sm:$0xff]  ;;  %v18508_v19 = vpack.c.bf16 %v9589_v59, %v9587_v39 }
 0x37d   : > { %v19848_v56 = vpack.i.bf16 %v22296_v7, %v9418_v54  ;;  %v9615_v39 = vld [vmem:[%s25069_s5 + $0x368] sm:$0xff]  ;;  %v9617_v59 = vld [vmem:[%s25069_s5 + $0x378] sm:$0xff] }
 0x37e   : > { %18493 = vmatprep.subr.bf16.mxu1 %v18492_v60 }
 0x37f   : > { %19844 = vrot.lane.b32.xlu1 %v19843_v3, %s25145_s26  ;;  %19849 = vrot.lane.b32.xlu0 %v19848_v56, %s25153_s18 }
 0x383   : > { %19854 = vrot.lane.b32.xlu0 %v19853_v5, %s25145_s26 }
 0x387   : > { %9368 = vrot.lane.b32.xlu0 %v9334_v33, %s25145_s26 }
 0x3eb   : > { %v9439_v27 = vpop.permute.xlu0 %9438 }
 0x3ed   : > { %v22330_v1 = vpop.permute.xlu1 %19839 }
 0x3ee   : > { %v19842_v30 = vunpack.i.h.bf16 %v22330_v1  ;;  %v19841_v34 = vunpack.i.l.bf16 %v22330_v1  ;;  %v9641_v1 = vld [vmem:[%s25069_s5 + $0x438] sm:$0xff] }
 0x3f0   : > { %v9466_v41 = vsel %vm2256_vm5, %v9439_v27, %v19841_v34  ;;  %v9467_v58 = vsel %vm2256_vm5, %v19841_v34, %v19842_v30 }
 0x3f1   : > { %v9492_v44 = vmax.f32 %v9410_v26, %v9466_v41  ;;  %v22351_v12 = vpop.permute.xlu1 %19844  ;;  %v22353_v16 = vpop.permute.xlu0 %19849  ;;  %v9493_v18 = vmax.f32 %v9411_v57, %v9467_v58  ;;  %v9581_v26 = vld [vmem:[%s25069_s5 + $0x258] sm:$0xff]  ;;  %v9591_v58 = vld [vmem:[%s25069_s5 + $0x2a8] sm:$0xff] }
 0x3f2   : > { %v19846_v28 = vunpack.i.l.bf16 %v22351_v12  ;;  %v19852_v35 = vunpack.i.h.bf16 %v22353_v16  ;;  %v19851_v38 = vunpack.i.l.bf16 %v22353_v16  ;;  %v19847_v57 = vunpack.i.h.bf16 %v22351_v12  ;;  %v9590_v12 = vld [vmem:[%s25069_s5 + $0x2a0] sm:$0xff] }
 0x3f3   : > { %9800 = vmatprep.mubr.f32.mxu1 %v9493_v18  ;;  %v18500_v56 = vpack.c.bf16 %v9581_v26, %v9579_v61  ;;  %v9592_v18 = vld [vmem:[%s25069_s5 + $0x2b0] sm:$0xff]  ;;  %v9601_v61 = vld [vmem:[%s25069_s5 + $0x2f8] sm:$0xff] }
 0x3f4   : > { %v9387_v29 = vsel %vm526_vm0, %v19826_v25, %v19846_v28  ;;  %9801 = vmatmul.mubr.f32.vlgmr.msra.gmra.mrb[6].mxu1 %v9492_v44  ;;  %v9473_v20 = vsel %vm2256_vm5, %v19851_v38, %v19852_v35  ;;  %v18498_v25 = vpack.c.bf16 %v9576_v46, %v9574_v37  ;;  %v9388_v23 = vsel %vm526_vm0, %v19846_v28, %v19847_v57  ;;  %v9596_v37 = vld [vmem:[%s25069_s5 + $0x2d0] sm:$0xff]  ;;  %v9599_v46 = vld [vmem:[%s25069_s5 + $0x2e8] sm:$0xff] }
 0x3f5   : > { %v22385_v40 = vmax.f32 %v9331_v32, %v9387_v29  ;;  %v22387_v2 = vpop.permute.xlu0 %19854  ;;  %v9500_v13 = vmax.f32 %v9418_v54, %v9473_v20  ;;  %18495 = vmatpush1.bf16.msra.mxu1 %v18494_v55  ;;  %v9580_v32 = vld [vmem:[%s25069_s5 + $0x250] sm:$0xff]  ;;  %v22427_v27 = vmax.f32 %v9332_v9, %v9388_v23  ;;  %v9341_v9 = vmax.f32 %v22423_v17, 0.0  ;;  %v9595_v55 = vld [vmem:[%s25069_s5 + $0x2c8] sm:$0xff]  ;;  %v9598_v29 = vld [vmem:[%s25069_s5 + $0x2e0] sm:$0xff] }
 0x3f6   : > { %v19857_v45 = vunpack.i.h.bf16 %v22387_v2  ;;  %v19856_v3 = vunpack.i.l.bf16 %v22387_v2  ;;  %18497 = vmatprep.subr.bf16.mxu1 %v18496_v36  ;;  %v18512_v44 = vpack.c.bf16 %v9593_v4, %v9591_v58  ;;  %v18516_v28 = vpack.c.bf16 %v9597_v42, %v9595_v55  ;;  %v9594_v36 = vld [vmem:[%s25069_s5 + $0x2c0] sm:$0xff]  ;;  %v9600_v20 = vld [vmem:[%s25069_s5 + $0x2f0] sm:$0xff]  ;;  %v9609_v23 = vld [vmem:[%s25069_s5 + $0x338] sm:$0xff] }
 0x3f7   : > { %9806 = vmatprep.mubr.f32.mxu1 %v9500_v13  ;;  %v19858_v50 = vpack.i.bf16 %v22385_v40, %v22381_v43  ;;  %v18518_v26 = vpack.c.bf16 %v9596_v37, %v9594_v36  ;;  %v9603_v13 = vld [vmem:[%s25069_s5 + $0x308] sm:$0xff]  ;;  %v9621_v58 = vld [vmem:[%s25069_s5 + $0x398] sm:$0xff]  ;;  %v9624_v36 = vld [vmem:[%s25069_s5 + $0x3b0] sm:$0xff] }
 0x3f8   : > { %v9393_v54 = vsel %vm526_vm0, %v19831_v14, %v19856_v3  ;;  %v9394_v5 = vsel %vm526_vm0, %v19856_v3, %v19857_v45  ;;  %v18502_v14 = vpack.c.bf16 %v9580_v32, %v9578_v31  ;;  %v18522_v3 = vpack.c.bf16 %v9600_v20, %v9598_v29  ;;  %v9604_v31 = vld [vmem:[%s25069_s5 + $0x310] sm:$0xff]  ;;  %v9607_v32 = vld [vmem:[%s25069_s5 + $0x328] sm:$0xff]  ;;  %v9625_v55 = vld [vmem:[%s25069_s5 + $0x3b8] sm:$0xff] }
 0x3f9   : > { %v22414_v60 = vmax.f32 %v9338_v8, %v9393_v54  ;;  %v22418_v49 = vmax.f32 %v9339_v24, %v9394_v5  ;;  %19859 = vrot.lane.b32.xlu1 %v19858_v50, %s25153_s18  ;;  %18499 = vmatpush1.bf16.msra.mxu1 %v18498_v25  ;;  %v18504_v8 = vpack.c.bf16 %v9585_v48, %v9583_v0  ;;  %v9584_v24 = vld [vmem:[%s25069_s5 + $0x270] sm:$0xff]  ;;  %v9369_v34 = vpop.permute.xlu0 %9368  ;;  %v9605_v25 = vld [vmem:[%s25069_s5 + $0x318] sm:$0xff]  ;;  %v9602_v50 = vld [vmem:[%s25069_s5 + $0x300] sm:$0xff] }
 0x3fa   : > { %18501 = vmatprep.subr.bf16.mxu1 %v18500_v56  ;;  %v18506_v52 = vpack.c.bf16 %v9584_v24, %v9582_v22  ;;  %v22449_v47 = vmax.f32 %v9334_v33, %v9369_v34  ;;  %v9389_v41 = vsel %vm526_vm0, %v19847_v57, %v9369_v34  ;;  %v18510_v33 = vpack.c.bf16 %v9588_v62, %v9586_v21  ;;  %v9606_v0 = vld [vmem:[%s25069_s5 + $0x320] sm:$0xff]  ;;  %v9608_v48 = vld [vmem:[%s25069_s5 + $0x330] sm:$0xff]  ;;  %v9627_v37 = vld [vmem:[%s25069_s5 + $0x3c8] sm:$0xff] }
 0x3fb   : > { %v19863_v10 = vpack.i.bf16 %v22418_v49, %v22414_v60  ;;  %v22471_v63 = vmax.f32 %v9333_v6, %v9389_v41  ;;  %v18514_v6 = vpack.c.bf16 %v9592_v18, %v9590_v12  ;;  %v18520_v57 = vpack.c.bf16 %v9601_v61, %v9599_v46  ;;  %v9610_v24 = vld [vmem:[%s25069_s5 + $0x340] sm:$0xff]  ;;  %v9612_v34 = vld [vmem:[%s25069_s5 + $0x350] sm:$0xff]  ;;  %v9619_v41 = vld [vmem:[%s25069_s5 + $0x388] sm:$0xff] }
 0x3fc   : > { %v18524_v56 = vpack.c.bf16 %v9605_v25, %v9603_v13  ;;  %v18526_v54 = vpack.c.bf16 %v9604_v31, %v9602_v50  ;;  %v18528_v5 = vpack.c.bf16 %v9609_v23, %v9607_v32  ;;  %v9614_v21 = vld [vmem:[%s25069_s5 + $0x360] sm:$0xff]  ;;  %v9616_v62 = vld [vmem:[%s25069_s5 + $0x370] sm:$0xff]  ;;  %v9623_v18 = vld [vmem:[%s25069_s5 + $0x3a8] sm:$0xff] }
 0x3fd   : > { %9446 = vrot.lane.b32.xlu1 %v22427_v27, %s25153_s18  ;;  %19864 = vrot.lane.b32.xlu0 %v19863_v10, %s25153_s18  ;;  %v9613_v10 = vld [vmem:[%s25069_s5 + $0x358] sm:$0xff]  ;;  %v18538_v4 = vpack.c.bf16 %v9616_v62, %v9614_v21  ;;  %v9620_v12 = vld [vmem:[%s25069_s5 + $0x390] sm:$0xff] }
 0x3fe   : > { %18503 = vmatpush1.bf16.msra.mxu1 %v18502_v14  ;;  %v9611_v14 = vld [vmem:[%s25069_s5 + $0x348] sm:$0xff]  ;;  %v9629_v46 = vld [vmem:[%s25069_s5 + $0x3d8] sm:$0xff]  ;;  %v9628_v29 = vld [vmem:[%s25069_s5 + $0x3d0] sm:$0xff] }
 0x3ff   : > { %18505 = vmatprep.subr.bf16.mxu1 %v18504_v8  ;;  %v18530_v8 = vpack.c.bf16 %v9608_v48, %v9606_v0  ;;  %v18532_v22 = vpack.c.bf16 %v9613_v10, %v9611_v14  ;;  %v9631_v20 = vld [vmem:[%s25069_s5 + $0x3e8] sm:$0xff]  ;;  %v9633_v13 = vld [vmem:[%s25069_s5 + $0x3f8] sm:$0xff]  ;;  %v9632_v50 = vld [vmem:[%s25069_s5 + $0x3f0] sm:$0xff] }
 0x400   : > { %v9635_v31 = vld [vmem:[%s25069_s5 + $0x408] sm:$0xff]  ;;  %v9637_v32 = vld [vmem:[%s25069_s5 + $0x418] sm:$0xff] }
 0x401   : > { %9382 = vrot.lane.b32.xlu1 %v9341_v9, %s25145_s26  ;;  %9450 = vrot.lane.b32.xlu0 %v22449_v47, %s25153_s18 }
 0x402   : > { %18507 = vmatpush1.bf16.msra.mxu1 %v18506_v52  ;;  %v18534_v52 = vpack.c.bf16 %v9612_v34, %v9610_v24  ;;  %v9634_v24 = vld [vmem:[%s25069_s5 + $0x400] sm:$0xff]  ;;  %v9636_v34 = vld [vmem:[%s25069_s5 + $0x410] sm:$0xff] }
 0x403   : > { %18509 = vmatprep.subr.bf16.mxu1 %v18508_v19  ;;  %v18536_v19 = vpack.c.bf16 %v9617_v59, %v9615_v39  ;;  %v18558_v21 = vpack.c.bf16 %v9636_v34, %v9634_v24 }
 0x405   : > { %9448 = vrot.lane.b32.xlu1 %v22471_v63, %s25153_s18 }
 0x406   : > { %18511 = vmatpush1.bf16.msra.mxu1 %v18510_v33  ;;  %v18540_v33 = vpack.c.bf16 %v9621_v58, %v9619_v41  ;;  %v9638_v58 = vld [vmem:[%s25069_s5 + $0x420] sm:$0xff] }
 0x407   : > { %18513 = vmatprep.subr.bf16.mxu1 %v18512_v44  ;;  %v9618_v44 = vld [vmem:[%s25069_s5 + $0x380] sm:$0xff] }
 0x408   : > { %v18542_v42 = vpack.c.bf16 %v9620_v12, %v9618_v44  ;;  %v9643_v12 = vld [vmem:[%s25069_s5 + $0x448] sm:$0xff] }
 0x40a   : > { %18515 = vmatpush1.bf16.msra.mxu1 %v18514_v6  ;;  %v18544_v6 = vpack.c.bf16 %v9625_v55, %v9623_v18  ;;  %v9645_v18 = vld [vmem:[%s25069_s5 + $0x458] sm:$0xff] }
 0x40b   : > { %18517 = vmatprep.subr.bf16.mxu1 %v18516_v28  ;;  %v9622_v28 = vld [vmem:[%s25069_s5 + $0x3a0] sm:$0xff] }
 0x40c   : > { %v18546_v61 = vpack.c.bf16 %v9624_v36, %v9622_v28 }
 0x40e   : > { %18519 = vmatpush1.bf16.msra.mxu1 %v18518_v26  ;;  %v18548_v26 = vpack.c.bf16 %v9629_v46, %v9627_v37  ;;  %v9646_v37 = vld [vmem:[%s25069_s5 + $0x460] sm:$0xff]  ;;  %v9648_v46 = vld [vmem:[%s25069_s5 + $0x470] sm:$0xff] }
 0x40f   : > { %18521 = vmatprep.subr.bf16.mxu1 %v18520_v57  ;;  %v9626_v57 = vld [vmem:[%s25069_s5 + $0x3c0] sm:$0xff] }
 0x410   : > { %v18550_v25 = vpack.c.bf16 %v9628_v29, %v9626_v57  ;;  %v9650_v29 = vld [vmem:[%s25069_s5 + $0x480] sm:$0xff] }
 0x412   : > { %18523 = vmatpush1.bf16.msra.mxu1 %v18522_v3  ;;  %v18552_v3 = vpack.c.bf16 %v9633_v13, %v9631_v20  ;;  %v9652_v20 = vld [vmem:[%s25069_s5 + $0x490] sm:$0xff]  ;;  %v9655_v13 = vld [vmem:[%s25069_s5 + $0x4a8] sm:$0xff] }
 0x413   : > { %18525 = vmatprep.subr.bf16.mxu1 %v18524_v56  ;;  %v9630_v56 = vld [vmem:[%s25069_s5 + $0x3e0] sm:$0xff] }
 0x414   : > { %v18554_v23 = vpack.c.bf16 %v9632_v50, %v9630_v56  ;;  %v9654_v50 = vld [vmem:[%s25069_s5 + $0x4a0] sm:$0xff] }
 0x416   : > { %18527 = vmatpush1.bf16.msra.mxu1 %v18526_v54  ;;  %v18556_v54 = vpack.c.bf16 %v9637_v32, %v9635_v31  ;;  %v9656_v31 = vld [vmem:[%s25069_s5 + $0x4b0] sm:$0xff]  ;;  %v9659_v32 = vld [vmem:[%s25069_s5 + $0x4c8] sm:$0xff] }
 0x417   : > { %18529 = vmatprep.subr.bf16.mxu1 %v18528_v5 }
 0x41a   : > { %18531 = vmatpush1.bf16.msra.mxu1 %v18530_v8 }
 0x41b   : > { %18533 = vmatprep.subr.bf16.mxu1 %v18532_v22 }
 0x41e   : > { %18535 = vmatpush1.bf16.msra.mxu1 %v18534_v52 }
 0x41f   : > { %18537 = vmatprep.subr.bf16.mxu1 %v18536_v19  ;;  %v9639_v19 = vld [vmem:[%s25069_s5 + $0x428] sm:$0xff] }
 0x422   : > { %18539 = vmatpush1.bf16.msra.mxu1 %v18538_v4  ;;  %v9640_v4 = vld [vmem:[%s25069_s5 + $0x430] sm:$0xff] }
 0x423   : > { %18541 = vmatprep.subr.bf16.mxu1 %v18540_v33  ;;  %v18562_v16 = vpack.c.bf16 %v9640_v4, %v9638_v58  ;;  %v9670_v4 = vld [vmem:[%s25069_s5 + $0x520] sm:$0xff] }
 0x426   : > { %18543 = vmatpush1.bf16.msra.mxu1 %v18542_v42  ;;  %v9647_v42 = vld [vmem:[%s25069_s5 + $0x468] sm:$0xff] }
 0x427   : > { %18545 = vmatprep.subr.bf16.mxu1 %v18544_v6 }
 0x42a   : > { %18547 = vmatpush1.bf16.msra.mxu1 %v18546_v61  ;;  %v9651_v61 = vld [vmem:[%s25069_s5 + $0x488] sm:$0xff] }
 0x42b   : > { %18549 = vmatprep.subr.bf16.mxu1 %v18548_v26  ;;  %v18570_v26 = vpack.c.bf16 %v9648_v46, %v9646_v37  ;;  %v9682_v46 = vld [vmem:[%s25069_s5 + $0x580] sm:$0xff] }
 0x42e   : > { %18551 = vmatpush1.bf16.msra.mxu1 %v18550_v25  ;;  %v9657_v25 = vld [vmem:[%s25069_s5 + $0x4b8] sm:$0xff] }
 0x42f   : > { %18553 = vmatprep.subr.bf16.mxu1 %v18552_v3  ;;  %v18574_v3 = vpack.c.bf16 %v9652_v20, %v9650_v29  ;;  %v18576_v56 = vpack.c.bf16 %v9657_v25, %v9655_v13  ;;  %v9686_v20 = vld [vmem:[%s25069_s5 + $0x5a0] sm:$0xff]  ;;  %v9688_v13 = vld [vmem:[%s25069_s5 + $0x5b0] sm:$0xff]  ;;  %v9691_v25 = vld [vmem:[%s25069_s5 + $0x5c8] sm:$0xff] }
 0x432   : > { %18555 = vmatpush1.bf16.msra.mxu1 %v18554_v23  ;;  %v9661_v23 = vld [vmem:[%s25069_s5 + $0x4d8] sm:$0xff] }
 0x433   : > { %18557 = vmatprep.subr.bf16.mxu1 %v18556_v54  ;;  %v18578_v54 = vpack.c.bf16 %v9656_v31, %v9654_v50  ;;  %v9690_v31 = vld [vmem:[%s25069_s5 + $0x5c0] sm:$0xff] }
 0x46b   : > { %v19860_v5 = vpop.permute.xlu1 %19859 }
 0x46c   : > { %v19862_v0 = vunpack.i.h.bf16 %v19860_v5  ;;  %v19861_v48 = vunpack.i.l.bf16 %v19860_v5  ;;  %v18580_v5 = vpack.c.bf16 %v9661_v23, %v9659_v32  ;;  %v9692_v32 = vld [vmem:[%s25069_s5 + $0x5d0] sm:$0xff]  ;;  %v9695_v23 = vld [vmem:[%s25069_s5 + $0x5e8] sm:$0xff] }
 0x46e   : > { %v9472_v14 = vsel %vm2256_vm5, %v19861_v48, %v19851_v38  ;;  %v9468_v39 = vsel %vm2256_vm5, %v19842_v30, %v19862_v0  ;;  %v9660_v48 = vld [vmem:[%s25069_s5 + $0x4d0] sm:$0xff] }
 0x46f   : > { %v22610_v10 = vpop.permute.xlu1 %9446  ;;  %v22612_v8 = vpop.permute.xlu0 %19864  ;;  %v9499_v22 = vmax.f32 %v22381_v43, %v9472_v14  ;;  %v9494_v62 = vmax.f32 %v22271_v51, %v9468_v39  ;;  %v18560_v51 = vpack.c.bf16 %v9641_v1, %v9639_v19  ;;  %v9663_v14 = vld [vmem:[%s25069_s5 + $0x4e8] sm:$0xff]  ;;  %v9662_v39 = vld [vmem:[%s25069_s5 + $0x4e0] sm:$0xff] }
 0x470   : > { %v9469_v38 = vsel %vm2256_vm5, %v19862_v0, %v22610_v10  ;;  %v19867_v59 = vunpack.i.h.bf16 %v22612_v8  ;;  %v19866_v52 = vunpack.i.l.bf16 %v22612_v8  ;;  %v9658_v0 = vld [vmem:[%s25069_s5 + $0x4c0] sm:$0xff] }
 0x471   : > { %v9495_v43 = vmax.f32 %v22385_v40, %v9469_v38  ;;  %9807 = vmatmul.mubr.f32.gmra.mrb[8].mxu1 %v9499_v22  ;;  %v9665_v22 = vld [vmem:[%s25069_s5 + $0x4f8] sm:$0xff]  ;;  %v18582_v24 = vpack.c.bf16 %v9660_v48, %v9658_v0  ;;  %v9664_v38 = vld [vmem:[%s25069_s5 + $0x4f0] sm:$0xff]  ;;  %v9694_v48 = vld [vmem:[%s25069_s5 + $0x5e0] sm:$0xff] }
 0x472   : > { %v9475_v30 = vsel %vm2256_vm5, %v19866_v52, %v19867_v59  ;;  %v18584_v34 = vpack.c.bf16 %v9665_v22, %v9663_v14  ;;  %v18586_v19 = vpack.c.bf16 %v9664_v38, %v9662_v39  ;;  %v9696_v14 = vld [vmem:[%s25069_s5 + $0x5f0] sm:$0xff]  ;;  %v9699_v22 = vld [vmem:[%s25069_s5 + $0x608] sm:$0xff]  ;;  %v9698_v38 = vld [vmem:[%s25069_s5 + $0x600] sm:$0xff] }
 0x473   : > { %v9383_v41 = vpop.permute.xlu1 %9382  ;;  %9877 = vmatprep.mubr.f32.mxu1 %v9495_v43  ;;  %v9502_v40 = vmax.f32 %v22414_v60, %v9475_v30  ;;  %v9474_v60 = vsel %vm2256_vm5, %v19852_v35, %v19866_v52  ;;  %v9667_v52 = vld [vmem:[%s25069_s5 + $0x508] sm:$0xff]  ;;  %v9669_v43 = vld [vmem:[%s25069_s5 + $0x518] sm:$0xff]  ;;  %v9668_v30 = vld [vmem:[%s25069_s5 + $0x510] sm:$0xff] }
 0x474   : > { %v9395_v33 = vsel %vm526_vm0, %v19857_v45, %v9383_v41  ;;  %v22651_v44 = vmax.f32 %v9341_v9, %v9383_v41  ;;  %v22668_v45 = vpop.permute.xlu0 %9450  ;;  %v9501_v17 = vmax.f32 %v22296_v7, %v9474_v60  ;;  %v18564_v9 = vpack.c.bf16 %v9645_v18, %v9643_v12  ;;  %v9649_v7 = vld [vmem:[%s25069_s5 + $0x478] sm:$0xff] }
 0x475   : > { %v22664_v2 = vmax.f32 %v9340_v53, %v9395_v33  ;;  %9878 = vmatmul.mubr.f32.vlgmr.msra.gmra.mrb[6].mxu1 %v9494_v62  ;;  %v9644_v53 = vld [vmem:[%s25069_s5 + $0x450] sm:$0xff]  ;;  %v18568_v36 = vpack.c.bf16 %v9649_v7, %v9647_v42  ;;  %v18588_v1 = vpack.c.bf16 %v9669_v43, %v9667_v52  ;;  %v9671_v62 = vld [vmem:[%s25069_s5 + $0x528] sm:$0xff]  ;;  %v9673_v41 = vld [vmem:[%s25069_s5 + $0x538] sm:$0xff] }
 0x476   : > { %18559 = vmatpush1.bf16.msra.mxu1 %v18558_v21  ;;  %9464 = vrot.lane.b32.xlu0 %v22651_v44, %s25153_s18  ;;  %v18566_v28 = vpack.c.bf16 %v9644_v53, %v9642_v15  ;;  %v9666_v21 = vld [vmem:[%s25069_s5 + $0x500] sm:$0xff]  ;;  %v18592_v58 = vpack.c.bf16 %v9673_v41, %v9671_v62  ;;  %v9672_v33 = vld [vmem:[%s25069_s5 + $0x530] sm:$0xff]  ;;  %v9677_v60 = vld [vmem:[%s25069_s5 + $0x558] sm:$0xff] }
 0x477   : > { %9883 = vmatprep.mubr.f32.mxu1 %v9502_v40  ;;  %v22670_v35 = vpop.permute.xlu1 %9448  ;;  %9462 = vrot.lane.b32.xlu1 %v22664_v2, %s25153_s18  ;;  %v18590_v40 = vpack.c.bf16 %v9668_v30, %v9666_v21  ;;  %v18594_v12 = vpack.c.bf16 %v9672_v33, %v9670_v4  ;;  %v9681_v15 = vld [vmem:[%s25069_s5 + $0x578] sm:$0xff]  ;;  %v9678_v42 = vld [vmem:[%s25069_s5 + $0x560] sm:$0xff]  ;;  %v9680_v7 = vld [vmem:[%s25069_s5 + $0x570] sm:$0xff] }
 0x478   : > { %v9471_v55 = vsel %vm2256_vm5, %v22670_v35, %v22668_v45  ;;  %18561 = vmatprep.subr.bf16.mxu1 %v18560_v51  ;;  %v9675_v51 = vld [vmem:[%s25069_s5 + $0x548] sm:$0xff]  ;;  %v9700_v52 = vld [vmem:[%s25069_s5 + $0x610] sm:$0xff]  ;;  %v9470_v43 = vsel %vm2256_vm5, %v22610_v10, %v22670_v35  ;;  %v9702_v41 = vld [vmem:[%s25069_s5 + $0x620] sm:$0xff] }
 0x479   : > { %v9497_v6 = vmax.f32 %v22471_v63, %v9471_v55  ;;  %9884 = vmatmul.mubr.f32.gmra.mrb[8].mxu1 %v9501_v17  ;;  %v9653_v63 = vld [vmem:[%s25069_s5 + $0x498] sm:$0xff]  ;;  %v18596_v18 = vpack.c.bf16 %v9677_v60, %v9675_v51  ;;  %v9676_v17 = vld [vmem:[%s25069_s5 + $0x550] sm:$0xff]  ;;  %v18622_v21 = vpack.c.bf16 %v9700_v52, %v9698_v38  ;;  %v9496_v30 = vmax.f32 %v22427_v27, %v9470_v43  ;;  %v9707_v35 = vld [vmem:[%s25069_s5 + $0x648] sm:$0xff] }
 0x47a   : > { %18563 = vmatpush1.bf16.msra.mxu1 %v18562_v16  ;;  %v18572_v57 = vpack.c.bf16 %v9653_v63, %v9651_v61  ;;  %v9674_v16 = vld [vmem:[%s25069_s5 + $0x540] sm:$0xff]  ;;  %v9684_v61 = vld [vmem:[%s25069_s5 + $0x590] sm:$0xff]  ;;  %v9687_v63 = vld [vmem:[%s25069_s5 + $0x5a8] sm:$0xff] }
 0x47b   : > { %9954 = vmatprep.mubr.f32.mxu1 %v9497_v6  ;;  %18565 = vmatprep.subr.bf16.mxu1 %v18564_v9  ;;  %v9679_v9 = vld [vmem:[%s25069_s5 + $0x568] sm:$0xff]  ;;  %v18598_v53 = vpack.c.bf16 %v9676_v17, %v9674_v16  ;;  %v9704_v10 = vld [vmem:[%s25069_s5 + $0x630] sm:$0xff]  ;;  %v9706_v4 = vld [vmem:[%s25069_s5 + $0x640] sm:$0xff] }
 0x47c   : > { %v18600_v55 = vpack.c.bf16 %v9681_v15, %v9679_v9  ;;  %v9683_v6 = vld [vmem:[%s25069_s5 + $0x588] sm:$0xff]  ;;  %v18626_v27 = vpack.c.bf16 %v9704_v10, %v9702_v41  ;;  %v9708_v33 = vld [vmem:[%s25069_s5 + $0x650] sm:$0xff]  ;;  %v9713_v60 = vld [vmem:[%s25069_s5 + $0x678] sm:$0xff] }
 0x47d   : > { %v9711_v51 = vld [vmem:[%s25069_s5 + $0x668] sm:$0xff]  ;;  %v9710_v16 = vld [vmem:[%s25069_s5 + $0x660] sm:$0xff]  ;;  %v9712_v17 = vld [vmem:[%s25069_s5 + $0x670] sm:$0xff] }
 0x47e   : > { %18567 = vmatpush1.bf16.msra.mxu1 %v18566_v28  ;;  %v9685_v28 = vld [vmem:[%s25069_s5 + $0x598] sm:$0xff]  ;;  %v9715_v9 = vld [vmem:[%s25069_s5 + $0x688] sm:$0xff] }
 0x47f   : > { %18569 = vmatprep.subr.bf16.mxu1 %v18568_v36  ;;  %v18602_v36 = vpack.c.bf16 %v9680_v7, %v9678_v42  ;;  %v18604_v37 = vpack.c.bf16 %v9685_v28, %v9683_v6  ;;  %v9717_v15 = vld [vmem:[%s25069_s5 + $0x698] sm:$0xff]  ;;  %v9714_v42 = vld [vmem:[%s25069_s5 + $0x680] sm:$0xff]  ;;  %v9716_v7 = vld [vmem:[%s25069_s5 + $0x690] sm:$0xff] }
 0x480   : > { %v9719_v6 = vld [vmem:[%s25069_s5 + $0x6a8] sm:$0xff]  ;;  %v9721_v28 = vld [vmem:[%s25069_s5 + $0x6b8] sm:$0x7] }
 0x482   : > { %18571 = vmatpush1.bf16.msra.mxu1 %v18570_v26  ;;  %v9689_v26 = vld [vmem:[%s25069_s5 + $0x5b8] sm:$0xff] }
 0x483   : > { %18573 = vmatprep.subr.bf16.mxu1 %v18572_v57  ;;  %v18606_v57 = vpack.c.bf16 %v9684_v61, %v9682_v46  ;;  %v18608_v29 = vpack.c.bf16 %v9689_v26, %v9687_v63  ;;  %v9718_v46 = vld [vmem:[%s25069_s5 + $0x6a0] sm:$0xff]  ;;  %v9720_v61 = vld [vmem:[%s25069_s5 + $0x6b0] sm:$0x7] }
 0x484   : > { %v18643_v63 = vpack.c.bf16 %v9720_v61, %v9718_v46 }
 0x486   : > { %18575 = vmatpush1.bf16.msra.mxu1 %v18574_v3  ;;  %v9693_v3 = vld [vmem:[%s25069_s5 + $0x5d8] sm:$0xff] }
 0x487   : > { %18577 = vmatprep.subr.bf16.mxu1 %v18576_v56  ;;  %v18610_v56 = vpack.c.bf16 %v9688_v13, %v9686_v20  ;;  %v18612_v50 = vpack.c.bf16 %v9693_v3, %v9691_v25  ;;  %v9498_v3 = vmax.f32 %v22449_v47, %v22668_v45 }
 0x48a   : > { %18579 = vmatpush1.bf16.msra.mxu1 %v18578_v54  ;;  %v9697_v54 = vld [vmem:[%s25069_s5 + $0x5f8] sm:$0xff] }
 0x48b   : > { %18581 = vmatprep.subr.bf16.mxu1 %v18580_v5  ;;  %v18614_v5 = vpack.c.bf16 %v9692_v32, %v9690_v31  ;;  %v18616_v0 = vpack.c.bf16 %v9697_v54, %v9695_v23  ;;  %v13237_v31 = vld [vmem:[%s25068_s4] sm:$0xff]  ;;  %v13238_v32 = vld [vmem:[%s25068_s4 + $0x8] sm:$0xff] }
 0x48e   : > { %18583 = vmatpush1.bf16.msra.mxu1 %v18582_v24  ;;  %v9701_v24 = vld [vmem:[%s25069_s5 + $0x618] sm:$0xff] }
 0x48f   : > { %18585 = vmatprep.subr.bf16.mxu1 %v18584_v34  ;;  %v18618_v34 = vpack.c.bf16 %v9696_v14, %v9694_v48  ;;  %v18620_v39 = vpack.c.bf16 %v9701_v24, %v9699_v22 }
 0x492   : > { %18587 = vmatpush1.bf16.msra.mxu1 %v18586_v19  ;;  %v9703_v19 = vld [vmem:[%s25069_s5 + $0x628] sm:$0xff] }
 0x493   : > { %18589 = vmatprep.subr.bf16.mxu1 %v18588_v1  ;;  %v9705_v1 = vld [vmem:[%s25069_s5 + $0x638] sm:$0xff] }
 0x494   : > { %v18624_v62 = vpack.c.bf16 %v9705_v1, %v9703_v19  ;;  %v17604_v19 = vld [vmem:[%s25067_s3 + $0x20] sm:$0xff] }
 0x496   : > { %18591 = vmatpush1.bf16.msra.mxu1 %v18590_v40  ;;  %v9709_v40 = vld [vmem:[%s25069_s5 + $0x658] sm:$0xff] }
 0x497   : > { %18593 = vmatprep.subr.bf16.mxu1 %v18592_v58  ;;  %v18628_v58 = vpack.c.bf16 %v9709_v40, %v9707_v35  ;;  %v17607_v35 = vld [vmem:[%s25067_s3 + $0x38] sm:$0xff] }
 0x49a   : > { %18595 = vmatpush1.bf16.msra.mxu1 %v18594_v12  ;;  %v18630_v12 = vpack.c.bf16 %v9708_v33, %v9706_v4  ;;  %v10044_v33 = vld [vmem:[%s25067_s3] sm:$0xff] }
 0x49b   : > { %18597 = vmatprep.subr.bf16.mxu1 %v18596_v18  ;;  %v18632_v18 = vpack.c.bf16 %v9713_v60, %v9711_v51 }
 0x49e   : > { %18599 = vmatpush1.bf16.msra.mxu1 %v18598_v53  ;;  %v18634_v53 = vpack.c.bf16 %v9712_v17, %v9710_v16  ;;  %v10045_v16 = vld [vmem:[%s25067_s3 + $0x8] sm:$0xff]  ;;  %v10046_v17 = vld [vmem:[%s25067_s3 + $0x10] sm:$0xff] }
 0x49f   : > { %18601 = vmatprep.subr.bf16.mxu1 %v18600_v55  ;;  %v18636_v55 = vpack.c.bf16 %v9717_v15, %v9715_v9 }
 0x4a2   : > { %18603 = vmatpush1.bf16.msra.mxu1 %v18602_v36  ;;  %v18638_v36 = vpack.c.bf16 %v9716_v7, %v9714_v42 }
 0x4a3   : > { %18605 = vmatprep.subr.bf16.mxu1 %v18604_v37  ;;  %v18640_v37 = vpack.c.bf16 %v9721_v28, %v9719_v6  ;;  %v17616_v28 = vld [vmem:[%s25067_s3 + $0x40] sm:$0xff] }
 0x4a6   : > { %18607 = vmatpush1.bf16.msra.mxu1 %v18606_v57 }
 0x4a7   : > { %18609 = vmatprep.subr.bf16.mxu1 %v18608_v29 }
 0x4aa   : > { %18611 = vmatpush1.bf16.msra.mxu1 %v18610_v56 }
 0x4ab   : > { %18613 = vmatprep.subr.bf16.mxu1 %v18612_v50 }
 0x4ae   : > { %18615 = vmatpush1.bf16.msra.mxu1 %v18614_v5 }
 0x4af   : > { %18617 = vmatprep.subr.bf16.mxu1 %v18616_v0 }
 0x4b2   : > { %18619 = vmatpush1.bf16.msra.mxu1 %v18618_v34 }
 0x4b3   : > { %18621 = vmatprep.subr.bf16.mxu1 %v18620_v39 }
 0x4b5   : > { %9955 = vmatmul.mubr.f32.vlgmr.msra.gmra.mrb[6].mxu1 %v9496_v30  ;;  %v17605_v30 = vld [vmem:[%s25067_s3 + $0x28] sm:$0xff] }
 0x4b6   : > { %18623 = vmatpush1.bf16.msra.mxu1 %v18622_v21 }
 0x4b7   : > { %18625 = vmatprep.subr.bf16.mxu1 %v18624_v62  ;;  %v17606_v62 = vld [vmem:[%s25067_s3 + $0x30] sm:$0xff] }
 0x4ba   : > { %18627 = vmatpush1.bf16.msra.mxu1 %v18626_v27 }
 0x4bb   : > { %18629 = vmatprep.subr.bf16.mxu1 %v18628_v58 }
 0x4be   : > { %18631 = vmatpush1.bf16.msra.mxu1 %v18630_v12 }
 0x4bf   : > { %18633 = vmatprep.subr.bf16.mxu1 %v18632_v18 }
 0x4c2   : > { %18635 = vmatpush1.bf16.msra.mxu1 %v18634_v53  ;;  %v10047_v53 = vld [vmem:[%s25067_s3 + $0x18] sm:$0xff] }
 0x4c3   : > { %18637 = vmatprep.subr.bf16.mxu1 %v18636_v55 }
 0x4c6   : > { %18639 = vmatpush1.bf16.msra.mxu1 %v18638_v36 }
 0x4c7   : > { %18642 = vmatprep.subr.msk.bf16.mxu1 %vm18641_vm11, %v18640_v37 }
 0x4ca   : > { %18645 = vmatpush1.bf16.msk.msra.mxu1 %vm18641_vm11, %v18643_v63  ;;  %v17617_v63 = vld [vmem:[%s25067_s3 + $0x48] sm:$0xff]  ;;  %vm12218_vm11 = vcmask 687104  }
 0x4e8   : > { %v9465_v26 = vpop.permute.xlu0 %9464 }
 0x4e9   : > { %v9463_v57 = vpop.permute.xlu1 %9462  ;;  %v9505_v8 = vmax.f32 %v22651_v44, %v9465_v26 }
 0x4ea   : > { %v9476_v29 = vsel %vm2256_vm5, %v19867_v59, %v9463_v57  ;;  %v9477_v20 = vsel %vm2256_vm5, %v9463_v57, %v9465_v26  ;;  %v17618_v26 = vld [vmem:[%s25067_s3 + $0x50] sm:$0xff] }
 0x4eb   : > { %v9503_v13 = vmax.f32 %v22418_v49, %v9476_v29  ;;  %v9504_v25 = vmax.f32 %v22664_v2, %v9477_v20  ;;  %v17619_v20 = vld [vmem:[%s25067_s3 + $0x58] sm:$0xff] }
 0x4ed   : > { %9960 = vmatprep.mubr.f32.mxu1 %v9504_v25 }
 0x4ee   : > { %9961 = vmatmul.mubr.f32.gmra.mrb[8].mxu1 %v9503_v13 }
 0x4ef   : > { %10031 = vmatprep.mubr.f32.mxu1 %v25142_v11 }
 0x4f2   : > { %17602 = vmatmul.mubr.msk.f32.vlgmr.msra.gmra.mrb[6].mxu1 %vm9722_vm12, %v9498_v3 }
 0x4f3   : > { %10037 = vmatprep.mubr.f32.mxu1 %v25142_v11 }
 0x4f6   : > { %17603 = vmatmul.mubr.msk.f32.gmra.mrb[8].mxu1 %vm9722_vm12, %v9505_v8  ;;  %vm12347_vm12 = vcmask 678912  }
 0x5c5   : > { %v22929_v59 = vpop.f32.mrb[6].mxu1 }
 0x5c6   : > { %v22931_v56 = vpop.f32.mrb[7].mxu1 }
 0x5c7   : > { %v22935_v49 = vpack.i.bf16 %v22931_v56, %v22929_v59 }
 0x5c9   : > { %19869 = vrot.lane.b32.xlu1 %v22935_v49, %s25145_s26  ;;  %v22939_v2 = vpop.f32.mrb[8].mxu1 }
 0x5ca   : > { %v22941_v47 = vpop.f32.mrb[9].mxu1  ;;  %v18652_v50 = vpack.c.bf16 %v22939_v2, %v22929_v59  ;;  %v17624_v59 = vld [vmem:[%s25067_s3 + $0x60] sm:$0xff] }
 0x5cb   : > { %v22945_v45 = vpack.i.bf16 %v22941_v47, %v22939_v2  ;;  %v18650_v44 = vpack.c.bf16 %v22941_v47, %v22931_v56 }
 0x5cd   : > { %19879 = vrot.lane.b32.xlu1 %v22935_v49, %s25146_s17  ;;  %19874 = vrot.lane.b32.xlu0 %v22945_v45, %s25145_s26 }
 0x5d1   : > { %19889 = vrot.lane.b32.xlu1 %v22935_v49, %s25147_s25  ;;  %19884 = vrot.lane.b32.xlu0 %v22945_v45, %s25146_s17  ;;  %s20203_s17 = smov 113  }
 0x5d5   : > { %19899 = vrot.lane.b32.xlu1 %v22935_v49, %s25130_s30  ;;  %19894 = vrot.lane.b32.xlu0 %v22945_v45, %s25147_s25  ;;  %s20206_s25 = smov 110  }
 0x5d9   : > { %19909 = vrot.lane.b32.xlu1 %v22935_v49, %s20202_s23  ;;  %19904 = vrot.lane.b32.xlu0 %v22945_v45, %s25130_s30  ;;  %s20207_s30 = smov 100  }
 0x5dd   : > { %19919 = vrot.lane.b32.xlu1 %v22935_v49, %s20203_s17  ;;  %19914 = vrot.lane.b32.xlu0 %v22945_v45, %s20202_s23 }
 0x5e1   : > { %19929 = vrot.lane.b32.xlu1 %v22935_v49, %s20204_s20  ;;  %19924 = vrot.lane.b32.xlu0 %v22945_v45, %s20203_s17  ;;  %s20215_s17 = smov 82  }
 0x5e5   : > { %19939 = vrot.lane.b32.xlu1 %v22935_v49, %s20205_s24  ;;  %19934 = vrot.lane.b32.xlu0 %v22945_v45, %s20204_s20  ;;  %s20217_s20 = smov 71  }
 0x5e9   : > { %19949 = vrot.lane.b32.xlu1 %v22935_v49, %s20206_s25  ;;  %19944 = vrot.lane.b32.xlu0 %v22945_v45, %s20205_s24  ;;  %s20218_s24 = smov 70  }
 0x5ed   : > { %19959 = vrot.lane.b32.xlu1 %v22935_v49, %s20207_s30  ;;  %19954 = vrot.lane.b32.xlu0 %v22945_v45, %s20206_s25  ;;  %s20219_s25 = smov 69  }
 0x5f1   : > { %19969 = vrot.lane.b32.xlu1 %v22935_v49, %s20208_s27  ;;  %19964 = vrot.lane.b32.xlu0 %v22945_v45, %s20207_s30  ;;  %s20220_s30 = smov 68  }
 0x5f5   : > { %19979 = vrot.lane.b32.xlu1 %v22935_v49, %s20209_s1  ;;  %19974 = vrot.lane.b32.xlu0 %v22945_v45, %s20208_s27 }
 0x5f9   : > { %19989 = vrot.lane.b32.xlu1 %v22935_v49, %s20210_s2  ;;  %19984 = vrot.lane.b32.xlu0 %v22945_v45, %s20209_s1 }
 0x5fd   : > { %19999 = vrot.lane.b32.xlu1 %v22935_v49, %s25153_s18  ;;  %19994 = vrot.lane.b32.xlu0 %v22945_v45, %s20210_s2 }
 0x601   : > { %20009 = vrot.lane.b32.xlu1 %v22935_v49, %s20211_s29  ;;  %20004 = vrot.lane.b32.xlu0 %v22945_v45, %s25153_s18  ;;  %s20216_s18 = smov 72  }
 0x605   : > { %20019 = vrot.lane.b32.xlu1 %v22935_v49, %s20212_s21  ;;  %20014 = vrot.lane.b32.xlu0 %v22945_v45, %s20211_s29  ;;  %s485_s29 = sand.u32 1, %s20170_s19  }
 0x609   : > { %20029 = vrot.lane.b32.xlu1 %v22935_v49, %s20213_s16  ;;  %20024 = vrot.lane.b32.xlu0 %v22945_v45, %s20212_s21 }
 0x60d   : > { %20039 = vrot.lane.b32.xlu1 %v22935_v49, %s20214_s0  ;;  %20034 = vrot.lane.b32.xlu0 %v22945_v45, %s20213_s16 }
 0x611   : > { %20049 = vrot.lane.b32.xlu1 %v22935_v49, %s20215_s17  ;;  %20044 = vrot.lane.b32.xlu0 %v22945_v45, %s20214_s0  ;;  %s486_s0 = scalar_lea.vmem [#allocation2], %s485_s29 }
 0x615   : > { %20059 = vrot.lane.b32.xlu1 %v22935_v49, %s20216_s18  ;;  %20054 = vrot.lane.b32.xlu0 %v22945_v45, %s20215_s17  ;;  %s17291_s17 = sshll.u32 %s486_s0, 4  ;;  %s25024_s17 = int_to_ptr.vmem [resolvable:$true] %s17291_s17 }
 0x619   : > { %20069 = vrot.lane.b32.xlu1 %v22935_v49, %s20217_s20  ;;  %20064 = vrot.lane.b32.xlu0 %v22945_v45, %s20216_s18 }
 0x61d   : > { %20079 = vrot.lane.b32.xlu1 %v22935_v49, %s20218_s24  ;;  %20074 = vrot.lane.b32.xlu0 %v22945_v45, %s20217_s20 }
 0x621   : > { %20089 = vrot.lane.b32.xlu1 %v22935_v49, %s20219_s25  ;;  %20084 = vrot.lane.b32.xlu0 %v22945_v45, %s20218_s24 }
 0x625   : > { %20099 = vrot.lane.b32.xlu1 %v22935_v49, %s20220_s30  ;;  %20094 = vrot.lane.b32.xlu0 %v22945_v45, %s20219_s25  ;;  %s20116_s25 = scalar_lea.vmem %s25024_s17, 16 }
 0x626   : > { %p20117_p11 = scmp.ne.s32.totalorder %s25024_s17, %s20116_s25 }
 0x628   : > { %p20118_p12 = pnand %p20117_p11, %p20343_p5 }
 0x629   : > { %13243 = vperm.xlu1 %19817, %v13237_v31   ;;  %20104 = vrot.lane.b32.xlu0 %v22945_v45, %s20220_s30  ;;  %v17625_v45 = vld [vmem:[%s25067_s3 + $0x68] sm:$0xff] }
 0x62a   : > { %p20119_p13 = pneg %p20118_p12 }
 0x62d   : > { %13248 = vperm.xlu0 %19816, %v13238_v32   ;;  %v17627_v32 = vld [vmem:[%s25067_s3 + $0x78] sm:$0xff] }
 0x63b   : > { %v19870_v23 = vpop.permute.xlu1 %19869 }
 0x63c   : > { %v19872_v54 = vunpack.i.h.bf16 %v19870_v23  ;;  %v19871_v5 = vunpack.i.l.bf16 %v19870_v23 }
 0x63e   : > { %v10065_v22 = vsel %vm526_vm0, %v19871_v5, %v19872_v54 }
 0x63f   : > { %v19875_v0 = vpop.permute.xlu0 %19874  ;;  %v19880_v39 = vpop.permute.xlu1 %19879 }
 0x640   : > { %v19877_v48 = vunpack.i.h.bf16 %v19875_v0  ;;  %v19876_v14 = vunpack.i.l.bf16 %v19875_v0  ;;  %v19882_v1 = vunpack.i.h.bf16 %v19880_v39  ;;  %v19881_v40 = vunpack.i.l.bf16 %v19880_v39  ;;  %v17633_v39 = vld [vmem:[%s25067_s3 + $0x88] sm:$0xff] }
 0x642   : > { %v18646_v24 = vpack.c.bf16 %v19877_v48, %v19872_v54  ;;  %v10066_v34 = vsel %vm526_vm0, %v19876_v14, %v19877_v48  ;;  %v10287_v51 = vsel %vm1182_vm2, %v19881_v40, %v19882_v1  ;;  %v17632_v48 = vld [vmem:[%s25067_s3 + $0x80] sm:$0xff] }
 0x643   : > { %v18648_v38 = vpack.c.bf16 %v10066_v34, %v10065_v22  ;;  %v19885_v52 = vpop.permute.xlu0 %19884  ;;  %v19890_v27 = vpop.permute.xlu1 %19889 }
 0x644   : > { %v19887_v43 = vunpack.i.h.bf16 %v19885_v52  ;;  %18647 = vmatprep.subr.bf16.mxu0 %v18646_v24  ;;  %v19886_v41 = vunpack.i.l.bf16 %v19885_v52  ;;  %v19892_v60 = vunpack.i.h.bf16 %v19890_v27  ;;  %v19891_v55 = vunpack.i.l.bf16 %v19890_v27 }
 0x645   : > { %18649 = vmatpush1.bf16.msra.mxu0 %v18648_v38  ;;  %v17634_v38 = vld [vmem:[%s25067_s3 + $0x90] sm:$0xff] }
 0x646   : > { %18651 = vmatprep.subr.bf16.mxu0 %v18650_v44  ;;  %v18654_v21 = vpack.c.bf16 %v19887_v43, %v19882_v1  ;;  %v10288_v58 = vsel %vm1182_vm2, %v19886_v41, %v19887_v43  ;;  %v10415_v36 = vsel %vm1539_vm3, %v19891_v55, %v19892_v60  ;;  %v17626_v44 = vld [vmem:[%s25067_s3 + $0x70] sm:$0xff]  ;;  %vm10671_vm2 = vcmask 932864   ;;  %v17640_v41 = vld [vmem:[%s25067_s3 + $0xa0] sm:$0xff] }
 0x647   : > { %v19895_v10 = vpop.permute.xlu0 %19894  ;;  %v18656_v12 = vpack.c.bf16 %v10288_v58, %v10287_v51  ;;  %v19900_v42 = vpop.permute.xlu1 %19899  ;;  %v17641_v58 = vld [vmem:[%s25067_s3 + $0xa8] sm:$0xff] }
 0x648   : > { %17608 = vmatmul.mubr.msk.f32.vlgmr.msra.gmra.mrb[8].mxu0 %vm10071_vm13, %v17604_v19  ;;  %v19897_v4 = vunpack.i.h.bf16 %v19895_v10  ;;  %v19896_v9 = vunpack.i.l.bf16 %v19895_v10  ;;  %v19902_v37 = vunpack.i.h.bf16 %v19900_v42  ;;  %v19901_v13 = vunpack.i.l.bf16 %v19900_v42  ;;  %v17635_v19 = vld [vmem:[%s25067_s3 + $0x98] sm:$0xff] }
 0x649   : > { %18653 = vmatpush1.bf16.msra.mxu0 %v18652_v50  ;;  %10154 = vmatprep.mubr.f32.mxu0 %v25142_v11 }
 0x64a   : > { %18655 = vmatprep.subr.bf16.mxu0 %v18654_v21  ;;  %v18658_v18 = vpack.c.bf16 %v19897_v4, %v19892_v60  ;;  %v10416_v7 = vsel %vm1539_vm3, %v19896_v9, %v19897_v4  ;;  %v10543_v56 = vsel %vm1896_vm4, %v19901_v13, %v19902_v37  ;;  %vm10800_vm3 = vcmask 924672   ;;  %v17642_v4 = vld [vmem:[%s25067_s3 + $0xb0] sm:$0xff]  ;;  %v17643_v60 = vld [vmem:[%s25067_s3 + $0xb8] sm:$0xff]  ;;  %v17648_v9 = vld [vmem:[%s25067_s3 + $0xc0] sm:$0xff] }
 0x64b   : > { %v19905_v15 = vpop.permute.xlu0 %19904  ;;  %v18660_v46 = vpack.c.bf16 %v10416_v7, %v10415_v36  ;;  %v19910_v25 = vpop.permute.xlu1 %19909  ;;  %v17649_v7 = vld [vmem:[%s25067_s3 + $0xc8] sm:$0xff] }
 0x64c   : > { %17609 = vmatmul.mubr.msk.f32.gmra.mrb[10].mxu0 %vm10071_vm13, %v17605_v30  ;;  %v19907_v6 = vunpack.i.h.bf16 %v19905_v15  ;;  %v19906_v57 = vunpack.i.l.bf16 %v19905_v15  ;;  %v19912_v49 = vunpack.i.h.bf16 %v19910_v25  ;;  %v19911_v23 = vunpack.i.l.bf16 %v19910_v25 }
 0x64d   : > { %10160 = vmatprep.mubr.f32.mxu0 %v25142_v11 }
 0x64e   : > { %v18662_v61 = vpack.c.bf16 %v19907_v6, %v19902_v37  ;;  %v10544_v3 = vsel %vm1896_vm4, %v19906_v57, %v19907_v6  ;;  %v10672_v14 = vsel %vm10671_vm2, %v19911_v23, %v19912_v49  ;;  %vm10929_vm4 = vcmask 916480   ;;  %v17650_v6 = vld [vmem:[%s25067_s3 + $0xd0] sm:$0xff]  ;;  %v17651_v37 = vld [vmem:[%s25067_s3 + $0xd8] sm:$0xff]  ;;  %v17656_v57 = vld [vmem:[%s25067_s3 + $0xe0] sm:$0xff] }
 0x64f   : > { %v19915_v29 = vpop.permute.xlu0 %19914  ;;  %v18664_v2 = vpack.c.bf16 %v10544_v3, %v10543_v56  ;;  %v19920_v54 = vpop.permute.xlu1 %19919  ;;  %v17657_v3 = vld [vmem:[%s25067_s3 + $0xe8] sm:$0xff] }
 0x650   : > { %17610 = vmatmul.mubr.msk.f32.gmra.mrb[12].mxu0 %vm10071_vm13, %v17606_v62  ;;  %v19917_v8 = vunpack.i.h.bf16 %v19915_v29  ;;  %v19916_v50 = vunpack.i.l.bf16 %v19915_v29  ;;  %v19922_v22 = vunpack.i.h.bf16 %v19920_v54  ;;  %v19921_v1 = vunpack.i.l.bf16 %v19920_v54 }
 0x651   : > { %10166 = vmatprep.mubr.f32.mxu0 %v25142_v11 }
 0x652   : > { %v18666_v47 = vpack.c.bf16 %v19917_v8, %v19912_v49  ;;  %v10673_v5 = vsel %vm10671_vm2, %v19916_v50, %v19917_v8  ;;  %v10801_v10 = vsel %vm10800_vm3, %v19921_v1, %v19922_v22  ;;  %v17658_v8 = vld [vmem:[%s25067_s3 + $0xf0] sm:$0xff]  ;;  %v17659_v49 = vld [vmem:[%s25067_s3 + $0xf8] sm:$0xff]  ;;  %v17664_v50 = vld [vmem:[%s25067_s3 + $0x100] sm:$0xff] }
 0x653   : > { %v19925_v31 = vpop.permute.xlu0 %19924  ;;  %v18668_v24 = vpack.c.bf16 %v10673_v5, %v10672_v14  ;;  %v19930_v21 = vpop.permute.xlu1 %19929  ;;  %v17665_v5 = vld [vmem:[%s25067_s3 + $0x108] sm:$0xff] }
 0x654   : > { %17611 = vmatmul.mubr.msk.f32.gmra.mrb[14].mxu0 %vm10071_vm13, %v17607_v35  ;;  %v19927_v0 = vunpack.i.h.bf16 %v19925_v31  ;;  %v19926_v52 = vunpack.i.l.bf16 %v19925_v31  ;;  %v19932_v35 = vunpack.i.h.bf16 %v19930_v21 }
 0x655   : > { %10249 = vmatprep.mubr.f32.mxu0 %v25142_v11 }
 0x656   : > { %v18670_v34 = vpack.c.bf16 %v19927_v0, %v19922_v22  ;;  %v10802_v30 = vsel %vm10800_vm3, %v19926_v52, %v19927_v0  ;;  %v17666_v0 = vld [vmem:[%s25067_s3 + $0x110] sm:$0xff]  ;;  %v17667_v22 = vld [vmem:[%s25067_s3 + $0x118] sm:$0xff]  ;;  %v17672_v52 = vld [vmem:[%s25067_s3 + $0x120] sm:$0xff]  ;;  %vm12476_vm3 = vcmask 670720  }
 0x657   : > { %v19935_v43 = vpop.permute.xlu0 %19934  ;;  %v18672_v40 = vpack.c.bf16 %v10802_v30, %v10801_v10  ;;  %v17673_v30 = vld [vmem:[%s25067_s3 + $0x128] sm:$0xff] }
 0x658   : > { %17612 = vmatmul.mubr.msk.f32.vlgmr.msra.gmra.mrb[8].mxu0 %vm10071_vm13, %v10044_v33  ;;  %v19937_v62 = vunpack.i.h.bf16 %v19935_v43  ;;  %v19936_v33 = vunpack.i.l.bf16 %v19935_v43 }
 0x659   : > { %18657 = vmatpush1.bf16.msra.mxu0 %v18656_v12  ;;  %10255 = vmatprep.mubr.f32.mxu0 %v25142_v11  ;;  %v19931_v12 = vunpack.i.l.bf16 %v19930_v21 }
 0x65a   : > { %18659 = vmatprep.subr.bf16.mxu0 %v18658_v18  ;;  %v18674_v27 = vpack.c.bf16 %v19937_v62, %v19932_v35  ;;  %v19940_v18 = vpop.permute.xlu1 %19939 }
 0x65b   : > { %v19945_v51 = vpop.permute.xlu0 %19944  ;;  %v10930_v15 = vsel %vm10929_vm4, %v19931_v12, %v19932_v35  ;;  %v17675_v35 = vld [vmem:[%s25067_s3 + $0x138] sm:$0xff] }
 0x65c   : > { %17613 = vmatmul.mubr.msk.f32.gmra.mrb[10].mxu0 %vm10071_vm13, %v10045_v16  ;;  %v10931_v16 = vsel %vm10929_vm4, %v19936_v33, %v19937_v62  ;;  %v17674_v62 = vld [vmem:[%s25067_s3 + $0x130] sm:$0xff]  ;;  %v17680_v33 = vld [vmem:[%s25067_s3 + $0x140] sm:$0xff] }
 0x65d   : > { %10261 = vmatprep.mubr.f32.mxu0 %v25142_v11  ;;  %v18676_v55 = vpack.c.bf16 %v10931_v16, %v10930_v15  ;;  %v17681_v16 = vld [vmem:[%s25067_s3 + $0x148] sm:$0xff] }
 0x65f   : > { %v19955_v36 = vpop.permute.xlu0 %19954 }
 0x660   : > { %17614 = vmatmul.mubr.msk.f32.gmra.mrb[12].mxu0 %vm10071_vm13, %v10046_v17  ;;  %v19947_v17 = vunpack.i.h.bf16 %v19945_v51 }
 0x661   : > { %10267 = vmatprep.mubr.f32.mxu0 %v25142_v11 }
 0x663   : > { %v19965_v56 = vpop.permute.xlu0 %19964 }
 0x664   : > { %17615 = vmatmul.mubr.msk.f32.gmra.mrb[14].mxu0 %vm10071_vm13, %v10047_v53  ;;  %v19942_v53 = vunpack.i.h.bf16 %v19940_v18 }
 0x665   : > { %10369 = vmatprep.mubr.f32.mxu0 %v25142_v11 }
 0x666   : > { %v18678_v42 = vpack.c.bf16 %v19947_v17, %v19942_v53 }
 0x667   : > { %v19975_v14 = vpop.permute.xlu0 %19974 }
 0x668   : > { %17620 = vmatmul.mubr.msk.f32.vlgmr.msra.gmra.mrb[8].mxu0 %vm10071_vm13, %v17616_v28  ;;  %v19946_v28 = vunpack.i.l.bf16 %v19945_v51 }
 0x669   : > { %18661 = vmatpush1.bf16.msra.mxu0 %v18660_v46  ;;  %10375 = vmatprep.mubr.f32.mxu0 %v25142_v11  ;;  %v19941_v46 = vunpack.i.l.bf16 %v19940_v18 }
 0x66a   : > { %18663 = vmatprep.subr.bf16.mxu0 %v18662_v61  ;;  %v19950_v61 = vpop.permute.xlu1 %19949 }
 0x66b   : > { %v11059_v29 = vsel %vm11058_vm14, %v19941_v46, %v19942_v53  ;;  %v19985_v10 = vpop.permute.xlu0 %19984  ;;  %v17683_v53 = vld [vmem:[%s25067_s3 + $0x158] sm:$0xff] }
 0x66c   : > { %17621 = vmatmul.mubr.msk.f32.gmra.mrb[10].mxu0 %vm10071_vm13, %v17617_v63  ;;  %v11060_v63 = vsel %vm11058_vm14, %v19946_v28, %v19947_v17  ;;  %v17682_v17 = vld [vmem:[%s25067_s3 + $0x150] sm:$0xff]  ;;  %v17688_v28 = vld [vmem:[%s25067_s3 + $0x160] sm:$0xff]  ;;  %vm12605_vm14 = vcmask 588800  }
 0x66d   : > { %10381 = vmatprep.mubr.f32.mxu0 %v25142_v11  ;;  %v18680_v13 = vpack.c.bf16 %v11060_v63, %v11059_v29  ;;  %v17689_v63 = vld [vmem:[%s25067_s3 + $0x168] sm:$0xff] }
 0x66f   : > { %v19995_v15 = vpop.permute.xlu0 %19994 }
 0x670   : > { %17622 = vmatmul.mubr.msk.f32.gmra.mrb[12].mxu0 %vm10071_vm13, %v17618_v26  ;;  %v19957_v26 = vunpack.i.h.bf16 %v19955_v36 }
 0x671   : > { %10387 = vmatprep.mubr.f32.mxu0 %v25142_v11 }
 0x673   : > { %v20005_v29 = vpop.permute.xlu0 %20004 }
 0x674   : > { %17623 = vmatmul.mubr.msk.f32.gmra.mrb[14].mxu0 %vm10071_vm13, %v17619_v20  ;;  %v19952_v20 = vunpack.i.h.bf16 %v19950_v61 }
 0x675   : > { %10497 = vmatprep.mubr.f32.mxu0 %v25142_v11 }
 0x676   : > { %v18682_v25 = vpack.c.bf16 %v19957_v26, %v19952_v20 }
 0x678   : > { %17628 = vmatmul.mubr.msk.f32.vlgmr.msra.gmra.mrb[8].mxu0 %vm10071_vm13, %v17624_v59  ;;  %v19956_v59 = vunpack.i.l.bf16 %v19955_v36 }
 0x679   : > { %18665 = vmatpush1.bf16.msra.mxu0 %v18664_v2  ;;  %10503 = vmatprep.mubr.f32.mxu0 %v25142_v11  ;;  %v19951_v2 = vunpack.i.l.bf16 %v19950_v61 }
 0x67a   : > { %18667 = vmatprep.subr.bf16.mxu0 %v18666_v47  ;;  %v19960_v47 = vpop.permute.xlu1 %19959 }
 0x67b   : > { %v11188_v31 = vsel %vm11187_vm15, %v19951_v2, %v19952_v20  ;;  %v17691_v20 = vld [vmem:[%s25067_s3 + $0x178] sm:$0xff] }
 0x67c   : > { %17629 = vmatmul.mubr.msk.f32.gmra.mrb[10].mxu0 %vm10071_vm13, %v17625_v45  ;;  %v11189_v45 = vsel %vm11187_vm15, %v19956_v59, %v19957_v26  ;;  %v17690_v26 = vld [vmem:[%s25067_s3 + $0x170] sm:$0xff]  ;;  %v17696_v59 = vld [vmem:[%s25067_s3 + $0x180] sm:$0xff]  ;;  %vm12734_vm15 = vcmask 580608  }
 0x67d   : > { %10509 = vmatprep.mubr.f32.mxu0 %v25142_v11  ;;  %v18684_v23 = vpack.c.bf16 %v11189_v45, %v11188_v31  ;;  %v17697_v45 = vld [vmem:[%s25067_s3 + $0x188] sm:$0xff]  ;;  %v20015_v31 = vpop.permute.xlu0 %20014 }
 0x680   : > { %17630 = vmatmul.mubr.msk.f32.gmra.mrb[12].mxu0 %vm10071_vm13, %v17626_v44  ;;  %v19967_v44 = vunpack.i.h.bf16 %v19965_v56 }
 0x681   : > { %10515 = vmatprep.mubr.f32.mxu0 %v25142_v11 }
 0x684   : > { %17631 = vmatmul.mubr.msk.f32.gmra.mrb[14].mxu0 %vm10071_vm13, %v17627_v32  ;;  %v19962_v32 = vunpack.i.h.bf16 %v19960_v47 }
 0x685   : > { %10625 = vmatprep.mubr.f32.mxu0 %v25142_v11 }
 0x686   : > { %v18686_v54 = vpack.c.bf16 %v19967_v44, %v19962_v32 }
 0x688   : > { %17636 = vmatmul.mubr.msk.f32.vlgmr.msra.gmra.mrb[8].mxu0 %vm10071_vm13, %v17632_v48  ;;  %v19966_v48 = vunpack.i.l.bf16 %v19965_v56 }
 0x689   : > { %18669 = vmatpush1.bf16.msra.mxu0 %v18668_v24  ;;  %10631 = vmatprep.mubr.f32.mxu0 %v25142_v11  ;;  %v19961_v24 = vunpack.i.l.bf16 %v19960_v47 }
 0x68a   : > { %18671 = vmatprep.subr.bf16.mxu0 %v18670_v34  ;;  %v19970_v34 = vpop.permute.xlu1 %19969 }
 0x68b   : > { %v11317_v43 = vsel %vm11316_vm6, %v19961_v24, %v19962_v32  ;;  %v17699_v32 = vld [vmem:[%s25067_s3 + $0x198] sm:$0xff] }
 0x68c   : > { %17637 = vmatmul.mubr.msk.f32.gmra.mrb[10].mxu0 %vm10071_vm13, %v17633_v39  ;;  %v11318_v39 = vsel %vm11316_vm6, %v19966_v48, %v19967_v44  ;;  %v17698_v44 = vld [vmem:[%s25067_s3 + $0x190] sm:$0xff]  ;;  %v17704_v48 = vld [vmem:[%s25067_s3 + $0x1a0] sm:$0xff]  ;;  %vm12863_vm6 = vcmask 572416  }
 0x68d   : > { %10637 = vmatprep.mubr.f32.mxu0 %v25142_v11  ;;  %v18688_v1 = vpack.c.bf16 %v11318_v39, %v11317_v43  ;;  %v17705_v39 = vld [vmem:[%s25067_s3 + $0x1a8] sm:$0xff]  ;;  %v20025_v43 = vpop.permute.xlu0 %20024 }
 0x690   : > { %17638 = vmatmul.mubr.msk.f32.gmra.mrb[12].mxu0 %vm10071_vm13, %v17634_v38  ;;  %v19977_v38 = vunpack.i.h.bf16 %v19975_v14 }
 0x691   : > { %10643 = vmatprep.mubr.f32.mxu0 %v25142_v11 }
 0x694   : > { %17639 = vmatmul.mubr.msk.f32.gmra.mrb[14].mxu0 %vm10071_vm13, %v17635_v19  ;;  %v19972_v19 = vunpack.i.h.bf16 %v19970_v34 }
 0x695   : > { %10754 = vmatprep.mubr.f32.mxu0 %v25142_v11 }
 0x696   : > { %v18690_v21 = vpack.c.bf16 %v19977_v38, %v19972_v19 }
 0x698   : > { %17644 = vmatmul.mubr.msk.f32.vlgmr.msra.gmra.mrb[8].mxu0 %vm10071_vm13, %v17640_v41  ;;  %v19976_v41 = vunpack.i.l.bf16 %v19975_v14 }
 0x699   : > { %18673 = vmatpush1.bf16.msra.mxu0 %v18672_v40  ;;  %10760 = vmatprep.mubr.f32.mxu0 %v25142_v11  ;;  %v19971_v40 = vunpack.i.l.bf16 %v19970_v34 }
 0x69a   : > { %18675 = vmatprep.subr.bf16.mxu0 %v18674_v27  ;;  %v19980_v27 = vpop.permute.xlu1 %19979 }
 0x69b   : > { %v11446_v51 = vsel %vm11445_vm7, %v19971_v40, %v19972_v19  ;;  %v17707_v19 = vld [vmem:[%s25067_s3 + $0x1b8] sm:$0xff] }
 0x69c   : > { %17645 = vmatmul.mubr.msk.f32.gmra.mrb[10].mxu0 %vm10071_vm13, %v17641_v58  ;;  %v11447_v58 = vsel %vm11445_vm7, %v19976_v41, %v19977_v38  ;;  %v17706_v38 = vld [vmem:[%s25067_s3 + $0x1b0] sm:$0xff]  ;;  %v17712_v41 = vld [vmem:[%s25067_s3 + $0x1c0] sm:$0xff]  ;;  %vm12992_vm7 = vcmask 564224  }
 0x69d   : > { %10766 = vmatprep.mubr.f32.mxu0 %v25142_v11  ;;  %v18692_v12 = vpack.c.bf16 %v11447_v58, %v11446_v51  ;;  %v17713_v58 = vld [vmem:[%s25067_s3 + $0x1c8] sm:$0xff]  ;;  %v20035_v51 = vpop.permute.xlu0 %20034 }
 0x6a0   : > { %17646 = vmatmul.mubr.msk.f32.gmra.mrb[12].mxu0 %vm10071_vm13, %v17642_v4  ;;  %v19987_v4 = vunpack.i.h.bf16 %v19985_v10 }
 0x6a1   : > { %10772 = vmatprep.mubr.f32.mxu0 %v25142_v11 }
 0x6a4   : > { %17647 = vmatmul.mubr.msk.f32.gmra.mrb[14].mxu0 %vm10071_vm13, %v17643_v60  ;;  %v19982_v60 = vunpack.i.h.bf16 %v19980_v27 }
 0x6a5   : > { %10883 = vmatprep.mubr.f32.mxu0 %v25142_v11 }
 0x6a6   : > { %v18694_v18 = vpack.c.bf16 %v19987_v4, %v19982_v60 }
 0x6a8   : > { %17652 = vmatmul.mubr.msk.f32.vlgmr.msra.gmra.mrb[8].mxu0 %vm10071_vm13, %v17648_v9  ;;  %v19986_v9 = vunpack.i.l.bf16 %v19985_v10 }
 0x6a9   : > { %18677 = vmatpush1.bf16.msra.mxu0 %v18676_v55  ;;  %10889 = vmatprep.mubr.f32.mxu0 %v25142_v11  ;;  %v19981_v55 = vunpack.i.l.bf16 %v19980_v27 }
 0x6aa   : > { %18679 = vmatprep.subr.bf16.mxu0 %v18678_v42  ;;  %v19990_v42 = vpop.permute.xlu1 %19989 }
 0x6ab   : > { %v11575_v36 = vsel %vm11574_vm8, %v19981_v55, %v19982_v60  ;;  %v17715_v60 = vld [vmem:[%s25067_s3 + $0x1d8] sm:$0xff] }
 0x6ac   : > { %17653 = vmatmul.mubr.msk.f32.gmra.mrb[10].mxu0 %vm10071_vm13, %v17649_v7  ;;  %v11576_v7 = vsel %vm11574_vm8, %v19986_v9, %v19987_v4  ;;  %v17714_v4 = vld [vmem:[%s25067_s3 + $0x1d0] sm:$0xff]  ;;  %v17720_v9 = vld [vmem:[%s25067_s3 + $0x1e0] sm:$0xff]  ;;  %vm13121_vm8 = vcmask 556032  }
 0x6ad   : > { %10895 = vmatprep.mubr.f32.mxu0 %v25142_v11  ;;  %v18696_v46 = vpack.c.bf16 %v11576_v7, %v11575_v36  ;;  %v17721_v7 = vld [vmem:[%s25067_s3 + $0x1e8] sm:$0xff]  ;;  %v20045_v36 = vpop.permute.xlu0 %20044 }
 0x6b0   : > { %17654 = vmatmul.mubr.msk.f32.gmra.mrb[12].mxu0 %vm10071_vm13, %v17650_v6  ;;  %v19997_v6 = vunpack.i.h.bf16 %v19995_v15 }
 0x6b1   : > { %10901 = vmatprep.mubr.f32.mxu0 %v25142_v11 }
 0x6b4   : > { %17655 = vmatmul.mubr.msk.f32.gmra.mrb[14].mxu0 %vm10071_vm13, %v17651_v37  ;;  %v19992_v37 = vunpack.i.h.bf16 %v19990_v42 }
 0x6b5   : > { %11012 = vmatprep.mubr.f32.mxu0 %v25142_v11 }
 0x6b6   : > { %v18698_v61 = vpack.c.bf16 %v19997_v6, %v19992_v37 }
 0x6b8   : > { %17660 = vmatmul.mubr.msk.f32.vlgmr.msra.gmra.mrb[8].mxu0 %vm10071_vm13, %v17656_v57  ;;  %v19996_v57 = vunpack.i.l.bf16 %v19995_v15 }
 0x6b9   : > { %18681 = vmatpush1.bf16.msra.mxu0 %v18680_v13  ;;  %11018 = vmatprep.mubr.f32.mxu0 %v25142_v11  ;;  %v19991_v13 = vunpack.i.l.bf16 %v19990_v42 }
 0x6ba   : > { %18683 = vmatprep.subr.bf16.mxu0 %v18682_v25  ;;  %v20000_v25 = vpop.permute.xlu1 %19999 }
 0x6bb   : > { %v11704_v56 = vsel %vm11703_vm9, %v19991_v13, %v19992_v37  ;;  %v17723_v37 = vld [vmem:[%s25067_s3 + $0x1f8] sm:$0xff] }
 0x6bc   : > { %17661 = vmatmul.mubr.msk.f32.gmra.mrb[10].mxu0 %vm10071_vm13, %v17657_v3  ;;  %v11705_v3 = vsel %vm11703_vm9, %v19996_v57, %v19997_v6  ;;  %v17722_v6 = vld [vmem:[%s25067_s3 + $0x1f0] sm:$0xff]  ;;  %v17728_v57 = vld [vmem:[%s25067_s3 + $0x200] sm:$0xff] }
 0x6bd   : > { %11024 = vmatprep.mubr.f32.mxu0 %v25142_v11  ;;  %v18700_v2 = vpack.c.bf16 %v11705_v3, %v11704_v56  ;;  %v17729_v3 = vld [vmem:[%s25067_s3 + $0x208] sm:$0xff]  ;;  %v20055_v56 = vpop.permute.xlu0 %20054 }
 0x6c0   : > { %17662 = vmatmul.mubr.msk.f32.gmra.mrb[12].mxu0 %vm10071_vm13, %v17658_v8  ;;  %v20007_v8 = vunpack.i.h.bf16 %v20005_v29 }
 0x6c1   : > { %11030 = vmatprep.mubr.f32.mxu0 %v25142_v11 }
 0x6c4   : > { %17663 = vmatmul.mubr.msk.f32.gmra.mrb[14].mxu0 %vm10071_vm13, %v17659_v49  ;;  %v20002_v49 = vunpack.i.h.bf16 %v20000_v25 }
 0x6c5   : > { %11141 = vmatprep.mubr.f32.mxu0 %v25142_v11 }
 0x6c6   : > { %v18702_v47 = vpack.c.bf16 %v20007_v8, %v20002_v49 }
 0x6c8   : > { %17668 = vmatmul.mubr.msk.f32.vlgmr.msra.gmra.mrb[8].mxu0 %vm10071_vm13, %v17664_v50  ;;  %v20006_v50 = vunpack.i.l.bf16 %v20005_v29 }
 0x6c9   : > { %18685 = vmatpush1.bf16.msra.mxu0 %v18684_v23  ;;  %11147 = vmatprep.mubr.f32.mxu0 %v25142_v11  ;;  %v20001_v23 = vunpack.i.l.bf16 %v20000_v25 }
 0x6ca   : > { %18687 = vmatprep.subr.bf16.mxu0 %v18686_v54  ;;  %v20010_v54 = vpop.permute.xlu1 %20009 }
 0x6cb   : > { %v11832_v14 = vsel %vm2256_vm5, %v20001_v23, %v20002_v49  ;;  %v17731_v49 = vld [vmem:[%s25067_s3 + $0x218] sm:$0xff] }
 0x6cc   : > { %17669 = vmatmul.mubr.msk.f32.gmra.mrb[10].mxu0 %vm10071_vm13, %v17665_v5  ;;  %v11833_v5 = vsel %vm2256_vm5, %v20006_v50, %v20007_v8  ;;  %vm11960_vm5 = vcmask 703488   ;;  %v17730_v8 = vld [vmem:[%s25067_s3 + $0x210] sm:$0xff]  ;;  %v17736_v50 = vld [vmem:[%s25067_s3 + $0x220] sm:$0xff] }
 0x6cd   : > { %11153 = vmatprep.mubr.f32.mxu0 %v25142_v11  ;;  %v18704_v24 = vpack.c.bf16 %v11833_v5, %v11832_v14  ;;  %v17737_v5 = vld [vmem:[%s25067_s3 + $0x228] sm:$0xff]  ;;  %v20065_v14 = vpop.permute.xlu0 %20064 }
 0x6d0   : > { %17670 = vmatmul.mubr.msk.f32.gmra.mrb[12].mxu0 %vm10071_vm13, %v17666_v0  ;;  %v20017_v0 = vunpack.i.h.bf16 %v20015_v31 }
 0x6d1   : > { %11159 = vmatprep.mubr.f32.mxu0 %v25142_v11 }
 0x6d4   : > { %17671 = vmatmul.mubr.msk.f32.gmra.mrb[14].mxu0 %vm10071_vm13, %v17667_v22  ;;  %v20012_v22 = vunpack.i.h.bf16 %v20010_v54 }
 0x6d5   : > { %11270 = vmatprep.mubr.f32.mxu0 %v25142_v11 }
 0x6d6   : > { %v18706_v34 = vpack.c.bf16 %v20017_v0, %v20012_v22 }
 0x6d8   : > { %17676 = vmatmul.mubr.msk.f32.vlgmr.msra.gmra.mrb[8].mxu0 %vm10071_vm13, %v17672_v52  ;;  %v20016_v52 = vunpack.i.l.bf16 %v20015_v31 }
 0x6d9   : > { %18689 = vmatpush1.bf16.msra.mxu0 %v18688_v1  ;;  %11276 = vmatprep.mubr.f32.mxu0 %v25142_v11  ;;  %v20011_v1 = vunpack.i.l.bf16 %v20010_v54 }
 0x6da   : > { %18691 = vmatprep.subr.bf16.mxu0 %v18690_v21  ;;  %v20020_v21 = vpop.permute.xlu1 %20019 }
 0x6db   : > { %v11961_v10 = vsel %vm11960_vm5, %v20011_v1, %v20012_v22  ;;  %v17739_v22 = vld [vmem:[%s25067_s3 + $0x238] sm:$0xff] }
 0x6dc   : > { %17677 = vmatmul.mubr.msk.f32.gmra.mrb[10].mxu0 %vm10071_vm13, %v17673_v30  ;;  %v11962_v30 = vsel %vm11960_vm5, %v20016_v52, %v20017_v0  ;;  %v17738_v0 = vld [vmem:[%s25067_s3 + $0x230] sm:$0xff]  ;;  %v17744_v52 = vld [vmem:[%s25067_s3 + $0x240] sm:$0xff]  ;;  %vm20223_vm5 = vmmov 0  }
 0x6dd   : > { %11282 = vmatprep.mubr.f32.mxu0 %v25142_v11  ;;  %v18708_v40 = vpack.c.bf16 %v11962_v30, %v11961_v10  ;;  %v17745_v30 = vld [vmem:[%s25067_s3 + $0x248] sm:$0xff]  ;;  %v20075_v10 = vpop.permute.xlu0 %20074 }
 0x6e0   : > { %17678 = vmatmul.mubr.msk.f32.gmra.mrb[12].mxu0 %vm10071_vm13, %v17674_v62  ;;  %v20027_v62 = vunpack.i.h.bf16 %v20025_v43 }
 0x6e1   : > { %11288 = vmatprep.mubr.f32.mxu0 %v25142_v11 }
 0x6e4   : > { %17679 = vmatmul.mubr.msk.f32.gmra.mrb[14].mxu0 %vm10071_vm13, %v17675_v35  ;;  %v20022_v35 = vunpack.i.h.bf16 %v20020_v21 }
 0x6e5   : > { %11399 = vmatprep.mubr.f32.mxu0 %v25142_v11 }
 0x6e6   : > { %v18710_v27 = vpack.c.bf16 %v20027_v62, %v20022_v35 }
 0x6e8   : > { %17684 = vmatmul.mubr.msk.f32.vlgmr.msra.gmra.mrb[8].mxu0 %vm10071_vm13, %v17680_v33  ;;  %v20026_v33 = vunpack.i.l.bf16 %v20025_v43 }
 0x6e9   : > { %18693 = vmatpush1.bf16.msra.mxu0 %v18692_v12  ;;  %11405 = vmatprep.mubr.f32.mxu0 %v25142_v11  ;;  %v20021_v12 = vunpack.i.l.bf16 %v20020_v21 }
 0x6ea   : > { %18695 = vmatprep.subr.bf16.mxu0 %v18694_v18  ;;  %v20030_v18 = vpop.permute.xlu1 %20029 }
 0x6eb   : > { %v12090_v15 = vsel %vm12089_vm1, %v20021_v12, %v20022_v35  ;;  %v17747_v35 = vld [vmem:[%s25067_s3 + $0x258] sm:$0xff] }
 0x6ec   : > { %17685 = vmatmul.mubr.msk.f32.gmra.mrb[10].mxu0 %vm10071_vm13, %v17681_v16  ;;  %v12091_v16 = vsel %vm12089_vm1, %v20026_v33, %v20027_v62  ;;  %v17746_v62 = vld [vmem:[%s25067_s3 + $0x250] sm:$0xff]  ;;  %v17752_v33 = vld [vmem:[%s25067_s3 + $0x260] sm:$0xff]  ;;  %vm17198_vm1 = vcmask 162816  }
 0x6ed   : > { %11411 = vmatprep.mubr.f32.mxu0 %v25142_v11  ;;  %v18712_v55 = vpack.c.bf16 %v12091_v16, %v12090_v15  ;;  %v17753_v16 = vld [vmem:[%s25067_s3 + $0x268] sm:$0xff]  ;;  %v20085_v15 = vpop.permute.xlu0 %20084 }
 0x6f0   : > { %17686 = vmatmul.mubr.msk.f32.gmra.mrb[12].mxu0 %vm10071_vm13, %v17682_v17  ;;  %v20037_v17 = vunpack.i.h.bf16 %v20035_v51 }
 0x6f1   : > { %11417 = vmatprep.mubr.f32.mxu0 %v25142_v11 }
 0x6f4   : > { %17687 = vmatmul.mubr.msk.f32.gmra.mrb[14].mxu0 %vm10071_vm13, %v17683_v53  ;;  %v20032_v53 = vunpack.i.h.bf16 %v20030_v18 }
 0x6f5   : > { %11528 = vmatprep.mubr.f32.mxu0 %v25142_v11 }
 0x6f6   : > { %v18714_v42 = vpack.c.bf16 %v20037_v17, %v20032_v53 }
 0x6f8   : > { %17692 = vmatmul.mubr.msk.f32.vlgmr.msra.gmra.mrb[8].mxu0 %vm10071_vm13, %v17688_v28  ;;  %v20036_v28 = vunpack.i.l.bf16 %v20035_v51 }
 0x6f9   : > { %18697 = vmatpush1.bf16.msra.mxu0 %v18696_v46  ;;  %11534 = vmatprep.mubr.f32.mxu0 %v25142_v11  ;;  %v20031_v46 = vunpack.i.l.bf16 %v20030_v18 }
 0x6fa   : > { %18699 = vmatprep.subr.bf16.mxu0 %v18698_v61  ;;  %v20040_v61 = vpop.permute.xlu1 %20039 }
 0x6fb   : > { %v12219_v29 = vsel %vm12218_vm11, %v20031_v46, %v20032_v53  ;;  %v17755_v53 = vld [vmem:[%s25067_s3 + $0x278] sm:$0xff] }
 0x6fc   : > { %17693 = vmatmul.mubr.msk.f32.gmra.mrb[10].mxu0 %vm10071_vm13, %v17689_v63  ;;  %v12220_v63 = vsel %vm12218_vm11, %v20036_v28, %v20037_v17  ;;  %v17754_v17 = vld [vmem:[%s25067_s3 + $0x270] sm:$0xff]  ;;  %v17760_v28 = vld [vmem:[%s25067_s3 + $0x280] sm:$0xff]  ;;  %vm17276_vm11 = vcmask 73728  }
 0x6fd   : > { %11540 = vmatprep.mubr.f32.mxu0 %v25142_v11  ;;  %v18716_v13 = vpack.c.bf16 %v12220_v63, %v12219_v29  ;;  %v17761_v63 = vld [vmem:[%s25067_s3 + $0x288] sm:$0xff]  ;;  %v20095_v29 = vpop.permute.xlu0 %20094 }
 0x700   : > { %17694 = vmatmul.mubr.msk.f32.gmra.mrb[12].mxu0 %vm10071_vm13, %v17690_v26  ;;  %v20047_v26 = vunpack.i.h.bf16 %v20045_v36 }
 0x701   : > { %11546 = vmatprep.mubr.f32.mxu0 %v25142_v11 }
 0x704   : > { %17695 = vmatmul.mubr.msk.f32.gmra.mrb[14].mxu0 %vm10071_vm13, %v17691_v20  ;;  %v20042_v20 = vunpack.i.h.bf16 %v20040_v61 }
 0x705   : > { %11657 = vmatprep.mubr.f32.mxu0 %v25142_v11 }
 0x706   : > { %v18718_v25 = vpack.c.bf16 %v20047_v26, %v20042_v20 }
 0x708   : > { %17700 = vmatmul.mubr.msk.f32.vlgmr.msra.gmra.mrb[8].mxu0 %vm10071_vm13, %v17696_v59  ;;  %v20046_v59 = vunpack.i.l.bf16 %v20045_v36 }
 0x709   : > { %18701 = vmatpush1.bf16.msra.mxu0 %v18700_v2  ;;  %11663 = vmatprep.mubr.f32.mxu0 %v25142_v11  ;;  %v20041_v2 = vunpack.i.l.bf16 %v20040_v61 }
 0x70a   : > { %18703 = vmatprep.subr.bf16.mxu0 %v18702_v47  ;;  %v20050_v47 = vpop.permute.xlu1 %20049 }
 0x70b   : > { %v12348_v31 = vsel %vm12347_vm12, %v20041_v2, %v20042_v20  ;;  %v17763_v20 = vld [vmem:[%s25067_s3 + $0x298] sm:$0xff] }
 0x70c   : > { %17701 = vmatmul.mubr.msk.f32.gmra.mrb[10].mxu0 %vm10071_vm13, %v17697_v45  ;;  %v12349_v45 = vsel %vm12347_vm12, %v20046_v59, %v20047_v26  ;;  %v17762_v26 = vld [vmem:[%s25067_s3 + $0x290] sm:$0xff]  ;;  %v17768_v59 = vld [vmem:[%s25067_s3 + $0x2a0] sm:$0xff] }
 0x70d   : > { %11669 = vmatprep.mubr.f32.mxu0 %v25142_v11  ;;  %v18720_v23 = vpack.c.bf16 %v12349_v45, %v12348_v31  ;;  %v17769_v45 = vld [vmem:[%s25067_s3 + $0x2a8] sm:$0xff]  ;;  %v20105_v31 = vpop.permute.xlu0 %20104 }
 0x710   : > { %17702 = vmatmul.mubr.msk.f32.gmra.mrb[12].mxu0 %vm10071_vm13, %v17698_v44  ;;  %v20057_v44 = vunpack.i.h.bf16 %v20055_v56 }
 0x711   : > { %11675 = vmatprep.mubr.f32.mxu0 %v25142_v11 }
 0x714   : > { %17703 = vmatmul.mubr.msk.f32.gmra.mrb[14].mxu0 %vm10071_vm13, %v17699_v32  ;;  %v20052_v32 = vunpack.i.h.bf16 %v20050_v47 }
 0x715   : > { %11786 = vmatprep.mubr.f32.mxu0 %v25142_v11 }
 0x716   : > { %v18722_v54 = vpack.c.bf16 %v20057_v44, %v20052_v32 }
 0x718   : > { %17708 = vmatmul.mubr.msk.f32.vlgmr.msra.gmra.mrb[8].mxu0 %vm10071_vm13, %v17704_v48  ;;  %v20056_v48 = vunpack.i.l.bf16 %v20055_v56 }
 0x719   : > { %18705 = vmatpush1.bf16.msra.mxu0 %v18704_v24  ;;  %11792 = vmatprep.mubr.f32.mxu0 %v25142_v11  ;;  %v20051_v24 = vunpack.i.l.bf16 %v20050_v47 }
 0x71a   : > { %18707 = vmatprep.subr.bf16.mxu0 %v18706_v34  ;;  %v20060_v34 = vpop.permute.xlu1 %20059 }
 0x71b   : > { %v12477_v43 = vsel %vm12476_vm3, %v20051_v24, %v20052_v32  ;;  %v17771_v32 = vld [vmem:[%s25067_s3 + $0x2b8] sm:$0xff] }
 0x71c   : > { %17709 = vmatmul.mubr.msk.f32.gmra.mrb[10].mxu0 %vm10071_vm13, %v17705_v39  ;;  %v12478_v39 = vsel %vm12476_vm3, %v20056_v48, %v20057_v44  ;;  %v17770_v44 = vld [vmem:[%s25067_s3 + $0x2b0] sm:$0xff]  ;;  %v17776_v48 = vld [vmem:[%s25067_s3 + $0x2c0] sm:$0xff] }
 0x71d   : > { %11798 = vmatprep.mubr.f32.mxu0 %v25142_v11  ;;  %v18724_v1 = vpack.c.bf16 %v12478_v39, %v12477_v43  ;;  %v17777_v39 = vld [vmem:[%s25067_s3 + $0x2c8] sm:$0xff]  ;;  %v17779_v43 = vld [vmem:[%s25067_s3 + $0x2d8] sm:$0xff] }
 0x720   : > { %17710 = vmatmul.mubr.msk.f32.gmra.mrb[12].mxu0 %vm10071_vm13, %v17706_v38  ;;  %v20067_v38 = vunpack.i.h.bf16 %v20065_v14 }
 0x721   : > { %11804 = vmatprep.mubr.f32.mxu0 %v25142_v11 }
 0x724   : > { %17711 = vmatmul.mubr.msk.f32.gmra.mrb[14].mxu0 %vm10071_vm13, %v17707_v19  ;;  %v20062_v19 = vunpack.i.h.bf16 %v20060_v34 }
 0x725   : > { %11914 = vmatprep.mubr.f32.mxu0 %v25142_v11 }
 0x726   : > { %v18726_v21 = vpack.c.bf16 %v20067_v38, %v20062_v19 }
 0x728   : > { %17716 = vmatmul.mubr.msk.f32.vlgmr.msra.gmra.mrb[8].mxu0 %vm10071_vm13, %v17712_v41  ;;  %v20066_v41 = vunpack.i.l.bf16 %v20065_v14 }
 0x729   : > { %18709 = vmatpush1.bf16.msra.mxu0 %v18708_v40  ;;  %11920 = vmatprep.mubr.f32.mxu0 %v25142_v11  ;;  %v20061_v40 = vunpack.i.l.bf16 %v20060_v34 }
 0x72a   : > { %18711 = vmatprep.subr.bf16.mxu0 %v18710_v27  ;;  %v20070_v27 = vpop.permute.xlu1 %20069 }
 0x72b   : > { %v12606_v51 = vsel %vm12605_vm14, %v20061_v40, %v20062_v19  ;;  %v17792_v40 = vld [vmem:[%s25067_s3 + $0x300] sm:$0xff] }
 0x72c   : > { %17717 = vmatmul.mubr.msk.f32.gmra.mrb[10].mxu0 %vm10071_vm13, %v17713_v58  ;;  %v12607_v58 = vsel %vm12605_vm14, %v20066_v41, %v20067_v38  ;;  %v17778_v38 = vld [vmem:[%s25067_s3 + $0x2d0] sm:$0xff]  ;;  %v17785_v41 = vld [vmem:[%s25067_s3 + $0x2e8] sm:$0xff] }
 0x72d   : > { %11926 = vmatprep.mubr.f32.mxu0 %v25142_v11  ;;  %v18728_v12 = vpack.c.bf16 %v12607_v58, %v12606_v51  ;;  %v17794_v58 = vld [vmem:[%s25067_s3 + $0x310] sm:$0xff] }
 0x730   : > { %17718 = vmatmul.mubr.msk.f32.gmra.mrb[12].mxu0 %vm10071_vm13, %v17714_v4  ;;  %v20077_v4 = vunpack.i.h.bf16 %v20075_v10 }
 0x731   : > { %11932 = vmatprep.mubr.f32.mxu0 %v25142_v11 }
 0x734   : > { %17719 = vmatmul.mubr.msk.f32.gmra.mrb[14].mxu0 %vm10071_vm13, %v17715_v60  ;;  %v20072_v60 = vunpack.i.h.bf16 %v20070_v27 }
 0x735   : > { %12043 = vmatprep.mubr.f32.mxu0 %v25142_v11 }
 0x736   : > { %v18730_v18 = vpack.c.bf16 %v20077_v4, %v20072_v60 }
 0x738   : > { %17724 = vmatmul.mubr.msk.f32.vlgmr.msra.gmra.mrb[8].mxu0 %vm10071_vm13, %v17720_v9  ;;  %v20076_v9 = vunpack.i.l.bf16 %v20075_v10  ;;  %v17786_v10 = vld [vmem:[%s25067_s3 + $0x2f0] sm:$0xff] }
 0x739   : > { %18713 = vmatpush1.bf16.msra.mxu0 %v18712_v55  ;;  %12049 = vmatprep.mubr.f32.mxu0 %v25142_v11  ;;  %v20071_v55 = vunpack.i.l.bf16 %v20070_v27  ;;  %v17793_v27 = vld [vmem:[%s25067_s3 + $0x308] sm:$0xff] }
 0x73a   : > { %18715 = vmatprep.subr.bf16.mxu0 %v18714_v42  ;;  %v20080_v42 = vpop.permute.xlu1 %20079 }
 0x73b   : > { %v12735_v36 = vsel %vm12734_vm15, %v20071_v55, %v20072_v60 }
 0x73c   : > { %17725 = vmatmul.mubr.msk.f32.gmra.mrb[10].mxu0 %vm10071_vm13, %v17721_v7  ;;  %v12736_v7 = vsel %vm12734_vm15, %v20076_v9, %v20077_v4  ;;  %v17795_v4 = vld [vmem:[%s25067_s3 + $0x318] sm:$0xff] }
 0x73d   : > { %12055 = vmatprep.mubr.f32.mxu0 %v25142_v11  ;;  %v18732_v46 = vpack.c.bf16 %v12736_v7, %v12735_v36 }
 0x740   : > { %17726 = vmatmul.mubr.msk.f32.gmra.mrb[12].mxu0 %vm10071_vm13, %v17722_v6  ;;  %v20087_v6 = vunpack.i.h.bf16 %v20085_v15 }
 0x741   : > { %12061 = vmatprep.mubr.f32.mxu0 %v25142_v11 }
 0x744   : > { %17727 = vmatmul.mubr.msk.f32.gmra.mrb[14].mxu0 %vm10071_vm13, %v17723_v37  ;;  %v20082_v37 = vunpack.i.h.bf16 %v20080_v42 }
 0x745   : > { %12172 = vmatprep.mubr.f32.mxu0 %v25142_v11 }
 0x746   : > { %v18734_v61 = vpack.c.bf16 %v20087_v6, %v20082_v37 }
 0x748   : > { %17732 = vmatmul.mubr.msk.f32.vlgmr.msra.gmra.mrb[8].mxu0 %vm10071_vm13, %v17728_v57  ;;  %v20086_v57 = vunpack.i.l.bf16 %v20085_v15 }
 0x749   : > { %18717 = vmatpush1.bf16.msra.mxu0 %v18716_v13  ;;  %12178 = vmatprep.mubr.f32.mxu0 %v25142_v11  ;;  %v20081_v13 = vunpack.i.l.bf16 %v20080_v42 }
 0x74a   : > { %18719 = vmatprep.subr.bf16.mxu0 %v18718_v25  ;;  %v20090_v25 = vpop.permute.xlu1 %20089 }
 0x74b   : > { %v12864_v56 = vsel %vm12863_vm6, %v20081_v13, %v20082_v37  ;;  %v13239_v37 = vld [vmem:[%s25068_s4 + $0x10] sm:$0xff]  ;;  %v13368_v13 = vld [vmem:[%s25070_s6 + $0x18] sm:$0xff] }
 0x74c   : > { %17733 = vmatmul.mubr.msk.f32.gmra.mrb[10].mxu0 %vm10071_vm13, %v17729_v3  ;;  %v12865_v3 = vsel %vm12863_vm6, %v20086_v57, %v20087_v6  ;;  %v13366_v57 = vld [vmem:[%s25070_s6 + $0x8] sm:$0xff] }
 0x74d   : > { %12184 = vmatprep.mubr.f32.mxu0 %v25142_v11  ;;  %v18736_v2 = vpack.c.bf16 %v12865_v3, %v12864_v56  ;;  %v13369_v3 = vld [vmem:[%s25070_s6 + $0x20] sm:$0xff]  ;;  %v13371_v56 = vld [vmem:[%s25070_s6 + $0x30] sm:$0xff] }
 0x750   : > { %17734 = vmatmul.mubr.msk.f32.gmra.mrb[12].mxu0 %vm10071_vm13, %v17730_v8  ;;  %v20097_v8 = vunpack.i.h.bf16 %v20095_v29 }
 0x751   : > { %12190 = vmatprep.mubr.f32.mxu0 %v25142_v11 }
 0x754   : > { %17735 = vmatmul.mubr.msk.f32.gmra.mrb[14].mxu0 %vm10071_vm13, %v17731_v49  ;;  %v20092_v49 = vunpack.i.h.bf16 %v20090_v25 }
 0x755   : > { %12301 = vmatprep.mubr.f32.mxu0 %v25142_v11 }
 0x756   : > { %v18738_v47 = vpack.c.bf16 %v20097_v8, %v20092_v49 }
 0x758   : > { %17740 = vmatmul.mubr.msk.f32.vlgmr.msra.gmra.mrb[8].mxu0 %vm10071_vm13, %v17736_v50  ;;  %v20096_v50 = vunpack.i.l.bf16 %v20095_v29  ;;  %v13367_v29 = vld [vmem:[%s25070_s6 + $0x10] sm:$0xff] }
 0x759   : > { %18721 = vmatpush1.bf16.msra.mxu0 %v18720_v23  ;;  %12307 = vmatprep.mubr.f32.mxu0 %v25142_v11  ;;  %v20091_v23 = vunpack.i.l.bf16 %v20090_v25  ;;  %v18750_v25 = vpack.c.bf16 %v13368_v13, %v13367_v29  ;;  %v13490_v13 = vld [vmem:[%s25071_s7 + $0x30] sm:$0x1] }
 0x75a   : > { %18723 = vmatprep.subr.bf16.mxu0 %v18722_v54  ;;  %v20100_v54 = vpop.permute.xlu1 %20099 }
 0x75b   : > { %v12993_v14 = vsel %vm12992_vm7, %v20091_v23, %v20092_v49  ;;  %v20101_v19 = vunpack.i.l.bf16 %v20100_v54  ;;  %v13372_v49 = vld [vmem:[%s25070_s6 + $0x38] sm:$0xff]  ;;  %v13377_v23 = vld [vmem:[%s25070_s6 + $0x60] sm:$0xff] }
 0x75c   : > { %17741 = vmatmul.mubr.msk.f32.gmra.mrb[10].mxu0 %vm10071_vm13, %v17737_v5  ;;  %v12994_v5 = vsel %vm12992_vm7, %v20096_v50, %v20097_v8  ;;  %v13370_v8 = vld [vmem:[%s25070_s6 + $0x28] sm:$0xff]  ;;  %v13375_v50 = vld [vmem:[%s25070_s6 + $0x50] sm:$0xff] }
 0x75d   : > { %12313 = vmatprep.mubr.f32.mxu0 %v25142_v11  ;;  %v18740_v24 = vpack.c.bf16 %v12994_v5, %v12993_v14  ;;  %v13380_v14 = vld [vmem:[%s25070_s6 + $0x78] sm:$0x1] }
 0x760   : > { %17742 = vmatmul.mubr.msk.f32.gmra.mrb[12].mxu0 %vm10071_vm13, %v17738_v0  ;;  %v20107_v0 = vunpack.i.h.bf16 %v20105_v31 }
 0x761   : > { %12319 = vmatprep.mubr.f32.mxu0 %v25142_v11 }
 0x764   : > { %17743 = vmatmul.mubr.msk.f32.gmra.mrb[14].mxu0 %vm10071_vm13, %v17739_v22  ;;  %v20102_v22 = vunpack.i.h.bf16 %v20100_v54  ;;  %v13378_v54 = vld [vmem:[%s25070_s6 + $0x68] sm:$0xff] }
 0x765   : > { %12430 = vmatprep.mubr.f32.mxu0 %v25142_v11  ;;  %v18770_v5 = vpack.c.bf16 %v13378_v54, %v13377_v23 }
 0x766   : > { %v18742_v34 = vpack.c.bf16 %v20107_v0, %v20102_v22 }
 0x768   : > { %17748 = vmatmul.mubr.msk.f32.vlgmr.msra.gmra.mrb[8].mxu0 %vm10071_vm13, %v17744_v52  ;;  %v20106_v52 = vunpack.i.l.bf16 %v20105_v31  ;;  %v13376_v31 = vld [vmem:[%s25070_s6 + $0x58] sm:$0xff] }
 0x769   : > { %18725 = vmatpush1.bf16.msra.mxu0 %v18724_v1  ;;  %12436 = vmatprep.mubr.f32.mxu0 %v25142_v11 }
 0x76a   : > { %18727 = vmatprep.subr.bf16.mxu0 %v18726_v21  ;;  %v13123_v1 = vsel %vm13121_vm8, %v20106_v52, %v20107_v0  ;;  %v17784_v21 = vld [vmem:[%s25067_s3 + $0x2e0] sm:$0xff] }
 0x76c   : > { %17749 = vmatmul.mubr.msk.f32.gmra.mrb[10].mxu0 %vm10071_vm13, %v17745_v30  ;;  %v13122_v30 = vsel %vm13121_vm8, %v20101_v19, %v20102_v22 }
 0x76d   : > { %12442 = vmatprep.mubr.f32.mxu0 %v25142_v11 }
 0x770   : > { %17750 = vmatmul.mubr.msk.f32.gmra.mrb[12].mxu0 %vm10071_vm13, %v17746_v62  ;;  %v18744_v62 = vpack.c.bf16 %v13123_v1, %v13122_v30 }
 0x771   : > { %12448 = vmatprep.mubr.f32.mxu0 %v25142_v11 }
 0x774   : > { %17751 = vmatmul.mubr.msk.f32.gmra.mrb[14].mxu0 %vm10071_vm13, %v17747_v35  ;;  %v17787_v35 = vld [vmem:[%s25067_s3 + $0x2f8] sm:$0xff] }
 0x775   : > { %12559 = vmatprep.mubr.f32.mxu0 %v25142_v11 }
 0x778   : > { %17756 = vmatmul.mubr.msk.f32.vlgmr.msra.gmra.mrb[8].mxu0 %vm10071_vm13, %v17752_v33  ;;  %v13244_v33 = vpop.permute.xlu1 %13243 }
 0x779   : > { %18729 = vmatpush1.bf16.msra.mxu0 %v18728_v12  ;;  %12565 = vmatprep.mubr.f32.mxu0 %v25142_v11 }
 0x77a   : > { %18731 = vmatprep.subr.bf16.mxu0 %v18730_v18 }
 0x77c   : > { %17757 = vmatmul.mubr.msk.f32.gmra.mrb[10].mxu0 %vm10071_vm13, %v17753_v16 }
 0x77d   : > { %12571 = vmatprep.mubr.f32.mxu0 %v25142_v11 }
 0x780   : > { %17758 = vmatmul.mubr.msk.f32.gmra.mrb[12].mxu0 %vm10071_vm13, %v17754_v17  ;;  %v13249_v17 = vpop.permute.xlu0 %13248 }
 0x781   : > { %12577 = vmatprep.mubr.f32.mxu0 %v25142_v11 }
 0x784   : > { %17759 = vmatmul.mubr.msk.f32.gmra.mrb[14].mxu0 %vm10071_vm13, %v17755_v53 }
 0x785   : > { %12688 = vmatprep.mubr.f32.mxu0 %v25142_v11 }
 0x788   : > { %17764 = vmatmul.mubr.msk.f32.vlgmr.msra.gmra.mrb[8].mxu0 %vm10071_vm13, %v17760_v28 }
 0x789   : > { %18733 = vmatpush1.bf16.msra.mxu0 %v18732_v46  ;;  %12694 = vmatprep.mubr.f32.mxu0 %v25142_v11  ;;  %v13240_v46 = vld [vmem:[%s25068_s4 + $0x18] sm:$0xff] }
 0x78a   : > { %18735 = vmatprep.subr.bf16.mxu0 %v18734_v61 }
 0x78c   : > { %17765 = vmatmul.mubr.msk.f32.gmra.mrb[10].mxu0 %vm10071_vm13, %v17761_v63 }
 0x78d   : > { %12700 = vmatprep.mubr.f32.mxu0 %v25142_v11 }
 0x790   : > { %17766 = vmatmul.mubr.msk.f32.gmra.mrb[12].mxu0 %vm10071_vm13, %v17762_v26  ;;  %v13365_v26 = vld [vmem:[%s25070_s6] sm:$0xff] }
 0x791   : > { %12706 = vmatprep.mubr.f32.mxu0 %v25142_v11 }
 0x794   : > { %17767 = vmatmul.mubr.msk.f32.gmra.mrb[14].mxu0 %vm10071_vm13, %v17763_v20  ;;  %v18746_v20 = vpack.c.bf16 %v13366_v57, %v13365_v26 }
 0x795   : > { %12817 = vmatprep.mubr.f32.mxu0 %v25142_v11 }
 0x796   : > { %18747 = vmatprep.subr.bf16.mxu1 %v18746_v20 }
 0x797   : > { %18749 = vmatpush3.bf16.msra.mxu1 %v18746_v20  ;;  %v13488_v20 = vld [vmem:[%s25071_s7 + $0x20] sm:$0xff] }
 0x798   : > { %17772 = vmatmul.mubr.msk.f32.vlgmr.msra.gmra.mrb[8].mxu0 %vm10071_vm13, %v17768_v59  ;;  %18751 = vmatprep.subr.bf16.mxu1 %v18750_v25  ;;  %v18754_v59 = vpack.c.bf16 %v13370_v8, %v13369_v3 }
 0x799   : > { %18737 = vmatpush1.bf16.msra.mxu0 %v18736_v2  ;;  %12823 = vmatprep.mubr.f32.mxu0 %v25142_v11  ;;  %v18758_v2 = vpack.c.bf16 %v13372_v49, %v13371_v56 }
 0x79a   : > { %18739 = vmatprep.subr.bf16.mxu0 %v18738_v47  ;;  %v13373_v47 = vld [vmem:[%s25070_s6 + $0x40] sm:$0xff] }
 0x79b   : > { %18753 = vmatpush3.bf16.msra.mxu1 %v18750_v25 }
 0x79c   : > { %17773 = vmatmul.mubr.msk.f32.gmra.mrb[10].mxu0 %vm10071_vm13, %v17769_v45  ;;  %18755 = vmatprep.subr.bf16.mxu1 %v18754_v59  ;;  %v13374_v45 = vld [vmem:[%s25070_s6 + $0x48] sm:$0xff] }
 0x79d   : > { %12829 = vmatprep.mubr.f32.mxu0 %v25142_v11 }
 0x79f   : > { %18757 = vmatpush3.bf16.msra.mxu1 %v18754_v59  ;;  %v18787_v59 = vpack.c.bf16 %v13490_v13, %v13488_v20  ;;  %v17830_v20 = vld [vmem:[%s25071_s7 + $0xc0] sm:$0xff]  ;;  %v17832_v13 = vld [vmem:[%s25071_s7 + $0xd0] sm:$0xff] }
 0x7a0   : > { %17774 = vmatmul.mubr.msk.f32.gmra.mrb[12].mxu0 %vm10071_vm13, %v17770_v44  ;;  %18759 = vmatprep.subr.bf16.mxu1 %v18758_v2  ;;  %v18762_v44 = vpack.c.bf16 %v13374_v45, %v13373_v47 }
 0x7a1   : > { %12835 = vmatprep.mubr.f32.mxu0 %v25142_v11 }
 0x7a3   : > { %18761 = vmatpush3.bf16.msra.mxu1 %v18758_v2 }
 0x7a4   : > { %17775 = vmatmul.mubr.msk.f32.gmra.mrb[14].mxu0 %vm10071_vm13, %v17771_v32  ;;  %18763 = vmatprep.subr.bf16.mxu1 %v18762_v44  ;;  %v18766_v32 = vpack.c.bf16 %v13376_v31, %v13375_v50  ;;  %v17811_v50 = vld [vmem:[%s25071_s7 + $0x58] sm:$0xff] }
 0x7a5   : > { %12946 = vmatprep.mubr.f32.mxu0 %v25142_v11 }
 0x7a7   : > { %18765 = vmatpush3.bf16.msra.mxu1 %v18762_v44  ;;  %v17809_v44 = vld [vmem:[%s25071_s7 + $0x48] sm:$0xff] }
 0x7a8   : > { %17780 = vmatmul.mubr.msk.f32.vlgmr.msra.gmra.mrb[8].mxu0 %vm10071_vm13, %v17776_v48  ;;  %18767 = vmatprep.subr.bf16.mxu1 %v18766_v32  ;;  %v13379_v48 = vld [vmem:[%s25070_s6 + $0x70] sm:$0xff]  ;;  %v18790_v31 = vpack.c.bf16 %v17811_v50, %v17809_v44  ;;  %v17844_v44 = vld [vmem:[%s25071_s7 + $0x118] sm:$0xff] }
 0x7a9   : > { %18741 = vmatpush1.bf16.msra.mxu0 %v18740_v24  ;;  %12952 = vmatprep.mubr.f32.mxu0 %v25142_v11  ;;  %v18774_v22 = vpack.c.bf16 %v13380_v14, %v13379_v48 }
 0x7aa   : > { %18743 = vmatprep.subr.bf16.mxu0 %v18742_v34 }
 0x7ab   : > { %18769 = vmatpush3.bf16.msra.mxu1 %v18766_v32 }
 0x7ac   : > { %17781 = vmatmul.mubr.msk.f32.gmra.mrb[10].mxu0 %vm10071_vm13, %v17777_v39  ;;  %18771 = vmatprep.subr.bf16.mxu1 %v18770_v5 }
 0x7ad   : > { %12958 = vmatprep.mubr.f32.mxu0 %v25142_v11 }
 0x7af   : > { %18773 = vmatpush3.bf16.msra.mxu1 %v18770_v5 }
 0x7b0   : > { %17782 = vmatmul.mubr.msk.f32.gmra.mrb[12].mxu0 %vm10071_vm13, %v17778_v38 }
 0x7b1   : > { %12964 = vmatprep.mubr.f32.mxu0 %v25142_v11 }
 0x7b4   : > { %17783 = vmatmul.mubr.msk.f32.gmra.mrb[14].mxu0 %vm10071_vm13, %v17779_v43 }
 0x7b5   : > { %13075 = vmatprep.mubr.f32.mxu0 %v25142_v11 }
 0x7b8   : > { %17788 = vmatmul.mubr.msk.f32.vlgmr.msra.gmra.mrb[8].mxu0 %vm10071_vm13, %v17784_v21 }
 0x7b9   : > { %18745 = vmatpush1.bf16.msra.mxu0 %v18744_v62  ;;  %13081 = vmatprep.mubr.f32.mxu0 %v25142_v11 }
 0x7bc   : > { %17789 = vmatmul.mubr.msk.f32.gmra.mrb[10].mxu0 %vm10071_vm13, %v17785_v41 }
 0x7bd   : > { %13087 = vmatprep.mubr.f32.mxu0 %v25142_v11 }
 0x7c0   : > { %17790 = vmatmul.mubr.msk.f32.gmra.mrb[12].mxu0 %vm10071_vm13, %v17786_v10 }
 0x7c1   : > { %13093 = vmatprep.mubr.f32.mxu0 %v25142_v11 }
 0x7c4   : > { %17791 = vmatmul.mubr.msk.f32.gmra.mrb[14].mxu0 %vm10071_vm13, %v17787_v35 }
 0x7c5   : > { %13204 = vmatprep.mubr.f32.mxu0 %v25142_v11 }
 0x7c8   : > { %17796 = vmatmul.mubr.msk.f32.vlgmr.msra.gmra.mrb[8].mxu0 %vm10071_vm13, %v17792_v40 }
 0x7c9   : > { %13210 = vmatprep.mubr.f32.mxu0 %v25142_v11 }
 0x7cc   : > { %17797 = vmatmul.mubr.msk.f32.gmra.mrb[10].mxu0 %vm10071_vm13, %v17793_v27 }
 0x7cd   : > { %13216 = vmatprep.mubr.f32.mxu0 %v25142_v11 }
 0x7d0   : > { %17798 = vmatmul.mubr.msk.f32.gmra.mrb[12].mxu0 %vm10071_vm13, %v17794_v58 }
 0x7d1   : > { %13222 = vmatprep.mubr.f32.mxu0 %v25142_v11 }
 0x7d4   : > { %17799 = vmatmul.mubr.msk.f32.gmra.mrb[14].mxu0 %vm10071_vm13, %v17795_v4  ;;  %vm13394_vm13 = vcmask 1040384  }
 0x7d5   : > { %16914 = vmatprep.mubr.f32.mxu0 %v25142_v11  ;;  %vm23612_vm9 = vmpackc.low %vm13394_vm13, %vm20201_vm10  ;;  %vm13381_vm10 = vcmask 990208  }
 0x7d6   : > { %18776 = vmatprep.subr.msk.bf16.mxu1 %vm23612_vm9, %v18774_v22 }
 0x7d7   : > { %18779 = vmatpush3.bf16.msk.msra.mxu1 %vm23612_vm9, %v18774_v22 }
 0x89b   : > { %v13206_v51 = vpop.f32.mrb[8].mxu0 }
 0x89c   : > { %v13261_v60 = vadd.f32 %v13244_v33, %v13206_v51  ;;  %v13208_v12 = vpop.f32.mrb[9].mxu0 }
 0x89d   : > { %v23535_v18 = vadd.f32 %v13244_v33, %v13208_v12 }
 0x89e   : > { %v23537_v16 = vmax.f32 %v13261_v60, 0.0 }
 0x89f   : > { %v13270_v9 = vmax.f32 %v23535_v18, 0.0  ;;  %v13212_v15 = vpop.f32.mrb[10].mxu0 }
 0x8a0   : > { %v13263_v53 = vadd.f32 %v13249_v17, %v13212_v15  ;;  %13281 = vrot.lane.b32.xlu1 %v23537_v16, %s25145_s26  ;;  %v13214_v55 = vpop.f32.mrb[11].mxu0 }
 0x8a1   : > { %v23542_v42 = vadd.f32 %v13249_v17, %v13214_v55  ;;  %13301 = vrot.lane.b32.xlu0 %v13270_v9, %s25145_s26 }
 0x8a2   : > { %v23547_v7 = vmax.f32 %v13263_v53, 0.0 }
 0x8a3   : > { %v13272_v6 = vmax.f32 %v23542_v42, 0.0  ;;  %v23550_v28 = vpop.f32.mrb[12].mxu0 }
 0x8a4   : > { %13283 = vrot.lane.b32.xlu1 %v23547_v7, %s25145_s26  ;;  %v23554_v36 = vpop.f32.mrb[13].mxu0 }
 0x8a5   : > { %13303 = vrot.lane.b32.xlu0 %v13272_v6, %s25145_s26 }
 0x8a7   : > { %v23565_v61 = vpop.f32.mrb[14].mxu0 }
 0x8a8   : > { %13253 = vperm.xlu1 %19817, %v13239_v37   ;;  %v23567_v63 = vpop.f32.mrb[15].mxu0  ;;  %v13486_v37 = vld [vmem:[%s25071_s7 + $0x10] sm:$0xff] }
 0x8a9   : > { %13258 = vperm.xlu0 %19816, %v13240_v46   ;;  %v13489_v46 = vld [vmem:[%s25071_s7 + $0x28] sm:$0xff] }
 0x912   : > { %v13282_v24 = vpop.permute.xlu1 %13281 }
 0x913   : > { %v13302_v34 = vpop.permute.xlu0 %13301  ;;  %v13293_v12 = vmax.f32 %v23537_v16, %v13282_v24 }
 0x914   : > { %v13309_v39 = vsel %vm526_vm0, %v13282_v24, %v13302_v34  ;;  %v13322_v38 = vmax.f32 %v13270_v9, %v13302_v34 }
 0x915   : > { %v13321_v52 = vmax.f32 %v23537_v16, %v13309_v39  ;;  %v13485_v16 = vld [vmem:[%s25071_s7 + $0x8] sm:$0xff] }
 0x916   : > { %v13284_v43 = vpop.permute.xlu1 %13283  ;;  %13339 = vrot.lane.b32.xlu0 %v13322_v38, %s20202_s23  ;;  %v17808_v38 = vld [vmem:[%s25071_s7 + $0x40] sm:$0xff] }
 0x917   : > { %13337 = vrot.lane.b32.xlu1 %v13321_v52, %s20202_s23  ;;  %v13304_v19 = vpop.permute.xlu0 %13303  ;;  %v13294_v53 = vmax.f32 %v23547_v7, %v13284_v43  ;;  %v18139_v52 = vld [vmem:[%s25071_s7 + $0x7c8] sm:$0xff] }
 0x918   : > { %v13310_v1 = vsel %vm526_vm0, %v13284_v43, %v13304_v19  ;;  %v13324_v21 = vmax.f32 %v13272_v6, %v13304_v19  ;;  %v18141_v43 = vld [vmem:[%s25071_s7 + $0x7d8] sm:$0xff]  ;;  %v17810_v19 = vld [vmem:[%s25071_s7 + $0x50] sm:$0xff] }
 0x919   : > { %v13323_v30 = vmax.f32 %v23547_v7, %v13310_v1  ;;  %v13484_v7 = vld [vmem:[%s25071_s7] sm:$0xff]  ;;  %v19090_v1 = vpack.c.bf16 %v18141_v43, %v18139_v52 }
 0x91a   : > { %13343 = vrot.lane.b32.xlu0 %v13324_v21, %s20202_s23  ;;  %v18782_v57 = vpack.c.bf16 %v13486_v37, %v13484_v7  ;;  %v18138_v21 = vld [vmem:[%s25071_s7 + $0x7c0] sm:$0xff]  ;;  %v17825_v37 = vld [vmem:[%s25071_s7 + $0xb0] sm:$0x1] }
 0x91b   : > { %13341 = vrot.lane.b32.xlu1 %v13323_v30, %s20202_s23  ;;  %v18140_v30 = vld [vmem:[%s25071_s7 + $0x7d0] sm:$0xff]  ;;  %19091 = vmatprep.subr.bf16.mxu0 %v19090_v1 }
 0x91c   : > { %v17854_v1 = vld [vmem:[%s25071_s7 + $0x150] sm:$0xff] }
 0x927   : > { %v13254_v62 = vpop.permute.xlu1 %13253 }
 0x928   : > { %v13265_v41 = vadd.f32 %v13254_v62, %v23550_v28  ;;  %v13266_v10 = vadd.f32 %v13254_v62, %v23554_v36  ;;  %v13259_v35 = vpop.permute.xlu0 %13258  ;;  %v13487_v28 = vld [vmem:[%s25071_s7 + $0x18] sm:$0xff]  ;;  %v17813_v62 = vld [vmem:[%s25071_s7 + $0x68] sm:$0xff] }
 0x929   : > { %v13267_v58 = vadd.f32 %v13259_v35, %v23565_v61  ;;  %v13268_v4 = vadd.f32 %v13259_v35, %v23567_v63  ;;  %v18780_v36 = vpack.c.bf16 %v13487_v28, %v13485_v16  ;;  %v13491_v61 = vld [vmem:[%s25071_s7 + $0x38] sm:$0x1]  ;;  %v18792_v35 = vpack.c.bf16 %v17810_v19, %v17808_v38  ;;  %v17852_v19 = vld [vmem:[%s25071_s7 + $0x140] sm:$0xff] }
 0x92a   : > { %v13273_v40 = vmax.f32 %v13265_v41, 0.0  ;;  %v13274_v27 = vmax.f32 %v13266_v10, 0.0  ;;  %v18784_v29 = vpack.c.bf16 %v13491_v61, %v13489_v46  ;;  %v17815_v41 = vld [vmem:[%s25071_s7 + $0x78] sm:$0x1]  ;;  %v19092_v10 = vpack.c.bf16 %v18140_v30, %v18138_v21  ;;  %v17831_v46 = vld [vmem:[%s25071_s7 + $0xc8] sm:$0xff] }
 0x92b   : > { %v13275_v33 = vmax.f32 %v13267_v58, 0.0  ;;  %v13276_v51 = vmax.f32 %v13268_v4, 0.0  ;;  %18781 = vmatprep.subr.bf16.mxu1 %v18780_v36  ;;  %v18794_v4 = vpack.c.bf16 %v17815_v41, %v17813_v62  ;;  %v17823_v36 = vld [vmem:[%s25071_s7 + $0xa0] sm:$0xff]  ;;  %v17833_v61 = vld [vmem:[%s25071_s7 + $0xd8] sm:$0xff]  ;;  %v17857_v21 = vld [vmem:[%s25071_s7 + $0x168] sm:$0xff]  ;;  %v18832_v62 = vpack.c.bf16 %v17854_v1, %v17852_v19 }
 0x92c   : > { %13285 = vrot.lane.b32.xlu1 %v13273_v40, %s25145_s26  ;;  %13305 = vrot.lane.b32.xlu0 %v13274_v27, %s25145_s26  ;;  %v17855_v38 = vld [vmem:[%s25071_s7 + $0x158] sm:$0xff] }
 0x92d   : > { %19093 = vmatpush1.bf16.msra.mxu0 %v19092_v10  ;;  %v17859_v30 = vld [vmem:[%s25071_s7 + $0x178] sm:$0x1] }
 0x92e   : > { %v18834_v10 = vpack.c.bf16 %v17859_v30, %v17857_v21  ;;  %v17910_v19 = vld [vmem:[%s25071_s7 + $0x298] sm:$0xff]  ;;  %v17907_v30 = vld [vmem:[%s25071_s7 + $0x280] sm:$0xff] }
 0x930   : > { %13287 = vrot.lane.b32.xlu1 %v13275_v33, %s25145_s26  ;;  %13307 = vrot.lane.b32.xlu0 %v13276_v51, %s25145_s26  ;;  %s18153_s26 = sshll.u32 %s20326_s22, 4  ;;  %s20224_s22 = smov [#allocation2]  }
 0x931   : > { %s25022_s24 = scalar_lea.hbm %s25079_s15, %s18153_s26  ;;  %s20120_s30 = sshll.u32 %s20224_s22, 4  ;;  %s20121_s30 = int_to_ptr.vmem [resolvable:$false] %s20120_s30 }
 0x932   : > { %s20122_s27 = scalar_lea.vmem %s20121_s30, 32  ;;  %p20123_p0 = scmp.lt.s32.totalorder %s25024_s17, %s20121_s30 }
 0x933   : > { %p20124_p1 = scmp.lt.s32.totalorder %s20122_s27, %s20116_s25 }
 0x935   : > { %p20125_p2 = por %p20124_p1, %p20123_p0 }
 0x937   : > { %p20126_p3 = pnand %p20125_p2, %p20119_p13 }
 0x988   : > { %v13340_v60 = vpop.permute.xlu0 %13339 }
 0x989   : > { %v13338_v18 = vpop.permute.xlu1 %13337 }
 0x98a   : > { %v13353_v17 = vsel %vm10671_vm2, %v13338_v18, %v13340_v60  ;;  %v17820_v18 = vld [vmem:[%s25071_s7 + $0x88] sm:$0xff] }
 0x98b   : > { %v13361_v9 = vmax.f32 %v13293_v12, %v13353_v17  ;;  %v17822_v17 = vld [vmem:[%s25071_s7 + $0x98] sm:$0xff] }
 0x98c   : > { %v13344_v15 = vpop.permute.xlu0 %13343 }
 0x98d   : > { %v13342_v55 = vpop.permute.xlu1 %13341  ;;  %18413 = vmatprep.mubr.msk.f32.mxu1 %vm13381_vm10, %v13361_v9 }
 0x98e   : > { %v13354_v42 = vsel %vm10671_vm2, %v13342_v55, %v13344_v15  ;;  %v18800_v15 = vpack.c.bf16 %v17822_v17, %v17820_v18  ;;  %v17821_v55 = vld [vmem:[%s25071_s7 + $0x90] sm:$0xff]  ;;  %v17868_v17 = vld [vmem:[%s25071_s7 + $0x1a8] sm:$0xff] }
 0x98f   : > { %v13362_v6 = vmax.f32 %v13294_v53, %v13354_v42  ;;  %v17819_v53 = vld [vmem:[%s25071_s7 + $0x80] sm:$0xff]  ;;  %v17824_v42 = vld [vmem:[%s25071_s7 + $0xa8] sm:$0xff]  ;;  %v17865_v18 = vld [vmem:[%s25071_s7 + $0x190] sm:$0xff] }
 0x990   : > { %v18802_v16 = vpack.c.bf16 %v17821_v55, %v17819_v53 }
 0x991   : > { %18414 = vmatmul.mubr.msk.f32.vlgmr.msra.gmra.mrb[10].mxu1 %vm13381_vm10, %v13362_v6  ;;  %v17826_v6 = vld [vmem:[%s25071_s7 + $0xb8] sm:$0x1] }
 0x992   : > { %18783 = vmatpush1.bf16.msra.mxu1 %v18782_v57  ;;  %v18804_v7 = vpack.c.bf16 %v17826_v6, %v17824_v42  ;;  %v18144_v57 = vld [vmem:[%s25071_s7 + $0x7f0] sm:$0x1]  ;;  %v17867_v42 = vld [vmem:[%s25071_s7 + $0x1a0] sm:$0xff] }
 0x993   : > { %18786 = vmatprep.subr.msk.bf16.mxu1 %vm23612_vm9, %v18784_v29  ;;  %v18810_v29 = vpack.c.bf16 %v17833_v61, %v17831_v46  ;;  %v17869_v6 = vld [vmem:[%s25071_s7 + $0x1b0] sm:$0x1]  ;;  %v17879_v61 = vld [vmem:[%s25071_s7 + $0x1e8] sm:$0xff] }
 0x994   : > { %v17876_v46 = vld [vmem:[%s25071_s7 + $0x1d0] sm:$0xff] }
 0x996   : > { %18789 = vmatpush1.bf16.msk.msra.mxu1 %vm23612_vm9, %v18787_v59  ;;  %v18812_v59 = vpack.c.bf16 %v17832_v13, %v17830_v20  ;;  %v17878_v20 = vld [vmem:[%s25071_s7 + $0x1e0] sm:$0xff]  ;;  %v17880_v13 = vld [vmem:[%s25071_s7 + $0x1f0] sm:$0x1] }
 0x997   : > { %18791 = vmatprep.subr.bf16.mxu1 %v18790_v31 }
 0x99e   : > { %v13286_v63 = vpop.permute.xlu1 %13285  ;;  %v13306_v26 = vpop.permute.xlu0 %13305 }
 0x99f   : > { %v13311_v25 = vsel %vm526_vm0, %v13286_v63, %v13306_v26  ;;  %v13326_v3 = vmax.f32 %v13274_v27, %v13306_v26  ;;  %v13295_v23 = vmax.f32 %v13273_v40, %v13286_v63  ;;  %v18145_v27 = vld [vmem:[%s25071_s7 + $0x7f8] sm:$0x1]  ;;  %v18807_v63 = vpack.c.bf16 %v17825_v37, %v17823_v36  ;;  %v18142_v26 = vld [vmem:[%s25071_s7 + $0x7e0] sm:$0xff] }
 0x9a0   : > { %v13325_v8 = vmax.f32 %v13273_v40, %v13311_v25  ;;  %v18143_v40 = vld [vmem:[%s25071_s7 + $0x7e8] sm:$0xff]  ;;  %v19097_v25 = vpack.c.bf16 %v18144_v57, %v18142_v26  ;;  %v17874_v37 = vld [vmem:[%s25071_s7 + $0x1c0] sm:$0xff] }
 0x9a1   : > { %13347 = vrot.lane.b32.xlu0 %v13326_v3, %s20202_s23  ;;  %v19094_v60 = vpack.c.bf16 %v18145_v27, %v18143_v40  ;;  %v17835_v3 = vld [vmem:[%s25071_s7 + $0xe8] sm:$0xff]  ;;  %v17858_v40 = vld [vmem:[%s25071_s7 + $0x170] sm:$0x1]  ;;  %v18852_v26 = vpack.c.bf16 %v17876_v46, %v17874_v37  ;;  %v17932_v37 = vld [vmem:[%s25071_s7 + $0x318] sm:$0xff] }
 0x9a2   : > { %13345 = vrot.lane.b32.xlu1 %v13325_v8, %s20202_s23  ;;  %v13288_v56 = vpop.permute.xlu1 %13287  ;;  %v13308_v49 = vpop.permute.xlu0 %13307  ;;  %v17837_v8 = vld [vmem:[%s25071_s7 + $0xf8] sm:$0x1]  ;;  %v17864_v27 = vld [vmem:[%s25071_s7 + $0x188] sm:$0xff] }
 0x9a3   : > { %v13312_v2 = vsel %vm526_vm0, %v13288_v56, %v13308_v49  ;;  %v13328_v47 = vmax.f32 %v13276_v51, %v13308_v49  ;;  %v13296_v22 = vmax.f32 %v13275_v33, %v13288_v56  ;;  %vm13492_vm0 = vcmask 203776   ;;  %v17814_v51 = vld [vmem:[%s25071_s7 + $0x70] sm:$0x1]  ;;  %19096 = vmatprep.subr.msk.bf16.mxu0 %vm23612_vm9, %v19094_v60  ;;  %v17863_v60 = vld [vmem:[%s25071_s7 + $0x180] sm:$0xff] }
 0x9a4   : > { %v13327_v45 = vmax.f32 %v13275_v33, %v13312_v2  ;;  %v17812_v33 = vld [vmem:[%s25071_s7 + $0x60] sm:$0xff]  ;;  %19099 = vmatpush1.bf16.msk.msra.mxu0 %vm23612_vm9, %v19097_v25  ;;  %v18814_v49 = vpack.c.bf16 %v17837_v8, %v17835_v3  ;;  %v17886_v25 = vld [vmem:[%s25071_s7 + $0x208] sm:$0xff]  ;;  %v17888_v3 = vld [vmem:[%s25071_s7 + $0x218] sm:$0xff]  ;;  %v18857_v8 = vpack.c.bf16 %v17880_v13, %v17878_v20 }
 0x9a5   : > { %13351 = vrot.lane.b32.xlu0 %v13328_v47, %s20202_s23  ;;  %v18797_v9 = vpack.c.bf16 %v17814_v51, %v17812_v33  ;;  %v17834_v2 = vld [vmem:[%s25071_s7 + $0xe0] sm:$0xff]  ;;  %v17836_v47 = vld [vmem:[%s25071_s7 + $0xf0] sm:$0x1] }
 0x9a6   : > { %13349 = vrot.lane.b32.xlu1 %v13327_v45, %s20202_s23  ;;  %v17842_v45 = vld [vmem:[%s25071_s7 + $0x108] sm:$0xff]  ;;  %v18817_v50 = vpack.c.bf16 %v17836_v47, %v17834_v2  ;;  %v17892_v47 = vld [vmem:[%s25071_s7 + $0x238] sm:$0x1]  ;;  %s17279_s23 = scalar_lea.sflag [#allocation3], %s485_s29 }
 0x9a7   : > { %v18820_v31 = vpack.c.bf16 %v17844_v44, %v17842_v45  ;;  %v17890_v2 = vld [vmem:[%s25071_s7 + $0x228] sm:$0xff] }
 0xa13   : > { %v13348_v32 = vpop.permute.xlu0 %13347 }
 0xa14   : > { %v13346_v54 = vpop.permute.xlu1 %13345 }
 0xa15   : > { %v13355_v5 = vsel %vm10671_vm2, %v13346_v54, %v13348_v32  ;;  %v17841_v32 = vld [vmem:[%s25071_s7 + $0x100] sm:$0xff]  ;;  %v17846_v54 = vld [vmem:[%s25071_s7 + $0x128] sm:$0xff] }
 0xa16   : > { %v13363_v48 = vmax.f32 %v13295_v23, %v13355_v5  ;;  %v17843_v23 = vld [vmem:[%s25071_s7 + $0x110] sm:$0xff]  ;;  %v17848_v5 = vld [vmem:[%s25071_s7 + $0x138] sm:$0x1] }
 0xa17   : > { %v13352_v14 = vpop.permute.xlu0 %13351 }
 0xa18   : > { %v13350_v24 = vpop.permute.xlu1 %13349  ;;  %18416 = vmatprep.mubr.msk.f32.mxu1 %vm13381_vm10, %v13363_v48  ;;  %v18822_v48 = vpack.c.bf16 %v17843_v23, %v17841_v32  ;;  %v17891_v32 = vld [vmem:[%s25071_s7 + $0x230] sm:$0x1]  ;;  %v17897_v23 = vld [vmem:[%s25071_s7 + $0x248] sm:$0xff] }
 0xa19   : > { %v13356_v34 = vsel %vm10671_vm2, %v13350_v24, %v13352_v14  ;;  %v17845_v24 = vld [vmem:[%s25071_s7 + $0x120] sm:$0xff]  ;;  %vm17120_vm2 = vcmask 326656  }
 0xa1a   : > { %v13364_v39 = vmax.f32 %v13296_v22, %v13356_v34  ;;  %v18824_v22 = vpack.c.bf16 %v17848_v5, %v17846_v54  ;;  %v17847_v34 = vld [vmem:[%s25071_s7 + $0x130] sm:$0x1]  ;;  %v17899_v54 = vld [vmem:[%s25071_s7 + $0x258] sm:$0xff] }
 0xa1b   : > { %v18827_v52 = vpack.c.bf16 %v17847_v34, %v17845_v24  ;;  %v18870_v5 = vpack.c.bf16 %v17899_v54, %v17897_v23  ;;  %v17903_v24 = vld [vmem:[%s25071_s7 + $0x278] sm:$0x1]  ;;  %v17944_v54 = vld [vmem:[%s25071_s7 + $0x360] sm:$0xff] }
 0xa1c   : > { %18417 = vmatmul.mubr.msk.f32.gmra.mrb[12].mxu1 %vm13381_vm10, %v13364_v39  ;;  %v17853_v39 = vld [vmem:[%s25071_s7 + $0x148] sm:$0xff] }
 0xa1d   : > { %13566 = vmatprep.mubr.f32.mxu1 %v25142_v11  ;;  %v18830_v43 = vpack.c.bf16 %v17855_v38, %v17853_v39  ;;  %v17900_v38 = vld [vmem:[%s25071_s7 + $0x260] sm:$0xff] }
 0xa64   : > { %v23727_v58 = vpop.f32.mrb[10].mxu1 }
 0xa65   : > { %v23735_v12 = vpop.f32.mrb[11].mxu1  ;;  %v14681_v13 = vrot.slane %v23727_v58, 3 }
 0xa66   : > { %17807 = vmatmul.mubr.msk.f32.vlgmr.msra.gmra.mrb[14].mxu1 %vm13492_vm0, %v23735_v12  ;;  %v13601_v28 = vrot.slane %v23735_v12, 1  ;;  %v13709_v56 = vrot.slane %v23735_v12, 2  ;;  %v13817_v14 = vrot.slane %v23735_v12, 3  ;;  %v13925_v41 = vrot.slane %v23735_v12, 4 }
 0xa67   : > { %18793 = vmatpush1.bf16.msra.mxu1 %v18792_v35  ;;  %13674 = vmatprep.mubr.f32.mxu1 %v25142_v11  ;;  %v17856_v35 = vld [vmem:[%s25071_s7 + $0x160] sm:$0xff]  ;;  %v14033_v53 = vrot.slane %v23735_v12, 5  ;;  %v14141_v57 = vrot.slane %v23735_v12, 6  ;;  %v14249_v44 = vrot.slane %v23735_v12, 7 }
 0xa68   : > { %18796 = vmatprep.subr.msk.bf16.mxu1 %vm23612_vm9, %v18794_v4  ;;  %v17866_v4 = vld [vmem:[%s25071_s7 + $0x198] sm:$0xff]  ;;  %v18837_v33 = vpack.c.bf16 %v17858_v40, %v17856_v35  ;;  %v14465_v40 = vrot.slane %v23727_v58, 1 }
 0xa69   : > { %v18840_v51 = vpack.c.bf16 %v17866_v4, %v17864_v27  ;;  %v17911_v4 = vld [vmem:[%s25071_s7 + $0x2a0] sm:$0xff] }
 0xa6b   : > { %18799 = vmatpush1.bf16.msk.msra.mxu1 %vm23612_vm9, %v18797_v9  ;;  %v17870_v9 = vld [vmem:[%s25071_s7 + $0x1b8] sm:$0x1] }
 0xa6c   : > { %18801 = vmatprep.subr.bf16.mxu1 %v18800_v15  ;;  %v18842_v15 = vpack.c.bf16 %v17865_v18, %v17863_v60  ;;  %v18844_v55 = vpack.c.bf16 %v17870_v9, %v17868_v17  ;;  %v17921_v60 = vld [vmem:[%s25071_s7 + $0x2d8] sm:$0xff]  ;;  %v17918_v9 = vld [vmem:[%s25071_s7 + $0x2c0] sm:$0xff] }
 0xa6e   : > { %17818 = vmatmul.mubr.msk.f32.vlgmr.msra.gmra.mrb[16].mxu1 %vm13492_vm0, %v13601_v28  ;;  %v17877_v28 = vld [vmem:[%s25071_s7 + $0x1d8] sm:$0xff] }
 0xa6f   : > { %18803 = vmatpush1.bf16.msra.mxu1 %v18802_v16  ;;  %13782 = vmatprep.mubr.f32.mxu1 %v25142_v11  ;;  %v17875_v16 = vld [vmem:[%s25071_s7 + $0x1c8] sm:$0xff] }
 0xa70   : > { %18806 = vmatprep.subr.msk.bf16.mxu1 %vm23612_vm9, %v18804_v7  ;;  %v18847_v7 = vpack.c.bf16 %v17869_v6, %v17867_v42  ;;  %v18850_v36 = vpack.c.bf16 %v17877_v28, %v17875_v16  ;;  %v14573_v6 = vrot.slane %v23727_v58, 2  ;;  %v17922_v28 = vld [vmem:[%s25071_s7 + $0x2e0] sm:$0xff] }
 0xa73   : > { %18809 = vmatpush1.bf16.msk.msra.mxu1 %vm23612_vm9, %v18807_v63  ;;  %v17881_v63 = vld [vmem:[%s25071_s7 + $0x1f8] sm:$0x1] }
 0xa74   : > { %18811 = vmatprep.subr.bf16.mxu1 %v18810_v29  ;;  %v18854_v29 = vpack.c.bf16 %v17881_v63, %v17879_v61  ;;  %v17929_v63 = vld [vmem:[%s25071_s7 + $0x300] sm:$0xff] }
 0xa76   : > { %17829 = vmatmul.mubr.msk.f32.vlgmr.msra.gmra.mrb[18].mxu1 %vm13492_vm0, %v13709_v56  ;;  %v17885_v56 = vld [vmem:[%s25071_s7 + $0x200] sm:$0xff] }
 0xa77   : > { %18813 = vmatpush1.bf16.msra.mxu1 %v18812_v59  ;;  %13890 = vmatprep.mubr.f32.mxu1 %v25142_v11  ;;  %v18860_v59 = vpack.c.bf16 %v17888_v3, %v17886_v25  ;;  %v17933_v3 = vld [vmem:[%s25071_s7 + $0x320] sm:$0xff] }
 0xa78   : > { %18816 = vmatprep.subr.msk.bf16.mxu1 %vm23612_vm9, %v18814_v49  ;;  %v17887_v49 = vld [vmem:[%s25071_s7 + $0x210] sm:$0xff] }
 0xa79   : > { %v18862_v45 = vpack.c.bf16 %v17887_v49, %v17885_v56  ;;  %v17943_v56 = vld [vmem:[%s25071_s7 + $0x358] sm:$0xff] }
 0xa7b   : > { %18819 = vmatpush1.bf16.msk.msra.mxu1 %vm23612_vm9, %v18817_v50  ;;  %v18864_v50 = vpack.c.bf16 %v17892_v47, %v17890_v2  ;;  %v17940_v47 = vld [vmem:[%s25071_s7 + $0x340] sm:$0xff] }
 0xa7c   : > { %18821 = vmatprep.subr.bf16.mxu1 %v18820_v31  ;;  %v17889_v31 = vld [vmem:[%s25071_s7 + $0x220] sm:$0xff] }
 0xa7d   : > { %v18867_v12 = vpack.c.bf16 %v17891_v32, %v17889_v31  ;;  %v14789_v32 = vrot.slane %v23727_v58, 4 }
 0xa7e   : > { %17840 = vmatmul.mubr.msk.f32.vlgmr.msra.gmra.mrb[20].mxu1 %vm13492_vm0, %v13817_v14  ;;  %v17898_v14 = vld [vmem:[%s25071_s7 + $0x250] sm:$0xff] }
 0xa7f   : > { %18823 = vmatpush1.bf16.msra.mxu1 %v18822_v48  ;;  %13998 = vmatprep.mubr.f32.mxu1 %v25142_v11  ;;  %v17896_v48 = vld [vmem:[%s25071_s7 + $0x240] sm:$0xff] }
 0xa80   : > { %18826 = vmatprep.subr.msk.bf16.mxu1 %vm23612_vm9, %v18824_v22  ;;  %v17901_v22 = vld [vmem:[%s25071_s7 + $0x268] sm:$0xff]  ;;  %v18872_v34 = vpack.c.bf16 %v17898_v14, %v17896_v48  ;;  %v17954_v48 = vld [vmem:[%s25071_s7 + $0x398] sm:$0xff] }
 0xa81   : > { %v18874_v39 = vpack.c.bf16 %v17903_v24, %v17901_v22  ;;  %v17951_v24 = vld [vmem:[%s25071_s7 + $0x380] sm:$0xff] }
 0xa83   : > { %18829 = vmatpush1.bf16.msk.msra.mxu1 %vm23612_vm9, %v18827_v52  ;;  %v17902_v52 = vld [vmem:[%s25071_s7 + $0x270] sm:$0x1] }
 0xa84   : > { %18831 = vmatprep.subr.bf16.mxu1 %v18830_v43  ;;  %v17908_v43 = vld [vmem:[%s25071_s7 + $0x288] sm:$0xff]  ;;  %v18877_v1 = vpack.c.bf16 %v17902_v52, %v17900_v38  ;;  %v17958_v38 = vld [vmem:[%s25071_s7 + $0x3b8] sm:$0x1] }
 0xa85   : > { %v18880_v21 = vpack.c.bf16 %v17910_v19, %v17908_v43  ;;  %v14897_v43 = vrot.slane %v23727_v58, 5 }
 0xa86   : > { %17851 = vmatmul.mubr.msk.f32.vlgmr.msra.gmra.mrb[22].mxu1 %vm13492_vm0, %v13925_v41  ;;  %v17912_v41 = vld [vmem:[%s25071_s7 + $0x2a8] sm:$0xff] }
 0xa87   : > { %18833 = vmatpush1.bf16.msra.mxu1 %v18832_v62  ;;  %14106 = vmatprep.mubr.f32.mxu1 %v25142_v11  ;;  %v17909_v62 = vld [vmem:[%s25071_s7 + $0x290] sm:$0xff] }
 0xa88   : > { %18836 = vmatprep.subr.msk.bf16.mxu1 %vm23612_vm9, %v18834_v10  ;;  %v17914_v10 = vld [vmem:[%s25071_s7 + $0x2b8] sm:$0x1]  ;;  %v18882_v35 = vpack.c.bf16 %v17909_v62, %v17907_v30  ;;  %v17963_v30 = vld [vmem:[%s25071_s7 + $0x3c8] sm:$0xff] }
 0xa89   : > { %v18884_v27 = vpack.c.bf16 %v17914_v10, %v17912_v41  ;;  %v17965_v62 = vld [vmem:[%s25071_s7 + $0x3d8] sm:$0xff] }
 0xa8a   : > { %v18930_v10 = vpack.c.bf16 %v17965_v62, %v17963_v30 }
 0xa8b   : > { %18839 = vmatpush1.bf16.msk.msra.mxu1 %vm23612_vm9, %v18837_v33  ;;  %v17913_v33 = vld [vmem:[%s25071_s7 + $0x2b0] sm:$0x1] }
 0xa8c   : > { %18841 = vmatprep.subr.bf16.mxu1 %v18840_v51  ;;  %v17919_v51 = vld [vmem:[%s25071_s7 + $0x2c8] sm:$0xff]  ;;  %v18887_v18 = vpack.c.bf16 %v17913_v33, %v17911_v4  ;;  %v17969_v4 = vld [vmem:[%s25071_s7 + $0x3f8] sm:$0x1] }
 0xa8d   : > { %v18890_v17 = vpack.c.bf16 %v17921_v60, %v17919_v51  ;;  %v15005_v51 = vrot.slane %v23727_v58, 6 }
 0xa8e   : > { %17862 = vmatmul.mubr.msk.f32.vlgmr.msra.gmra.mrb[24].mxu1 %vm13492_vm0, %v14033_v53  ;;  %v17923_v53 = vld [vmem:[%s25071_s7 + $0x2e8] sm:$0xff] }
 0xa8f   : > { %18843 = vmatpush1.bf16.msra.mxu1 %v18842_v15  ;;  %14214 = vmatprep.mubr.f32.mxu1 %v25142_v11  ;;  %v17920_v15 = vld [vmem:[%s25071_s7 + $0x2d0] sm:$0xff] }
 0xa90   : > { %18846 = vmatprep.subr.msk.bf16.mxu1 %vm23612_vm9, %v18844_v55  ;;  %v17925_v55 = vld [vmem:[%s25071_s7 + $0x2f8] sm:$0x1]  ;;  %v18892_v42 = vpack.c.bf16 %v17920_v15, %v17918_v9  ;;  %v17974_v9 = vld [vmem:[%s25071_s7 + $0x408] sm:$0xff] }
 0xa91   : > { %v18894_v16 = vpack.c.bf16 %v17925_v55, %v17923_v53  ;;  %v17976_v15 = vld [vmem:[%s25071_s7 + $0x418] sm:$0xff] }
 0xa92   : > { %v18940_v55 = vpack.c.bf16 %v17976_v15, %v17974_v9 }
 0xa93   : > { %18849 = vmatpush1.bf16.msk.msra.mxu1 %vm23612_vm9, %v18847_v7  ;;  %v17924_v7 = vld [vmem:[%s25071_s7 + $0x2f0] sm:$0x1] }
 0xa94   : > { %18851 = vmatprep.subr.bf16.mxu1 %v18850_v36  ;;  %v17930_v36 = vld [vmem:[%s25071_s7 + $0x308] sm:$0xff]  ;;  %v18897_v46 = vpack.c.bf16 %v17924_v7, %v17922_v28  ;;  %v17980_v28 = vld [vmem:[%s25071_s7 + $0x438] sm:$0x1] }
 0xa95   : > { %v18900_v61 = vpack.c.bf16 %v17932_v37, %v17930_v36  ;;  %v15113_v36 = vrot.slane %v23727_v58, 7 }
 0xa96   : > { %17873 = vmatmul.mubr.msk.f32.vlgmr.msra.gmra.mrb[26].mxu1 %vm13492_vm0, %v14141_v57  ;;  %v17934_v57 = vld [vmem:[%s25071_s7 + $0x328] sm:$0xff] }
 0xa97   : > { %18853 = vmatpush1.bf16.msra.mxu1 %v18852_v26  ;;  %14322 = vmatprep.mubr.f32.mxu1 %v25142_v11  ;;  %v17931_v26 = vld [vmem:[%s25071_s7 + $0x310] sm:$0xff] }
 0xa98   : > { %18856 = vmatprep.subr.msk.bf16.mxu1 %vm23612_vm9, %v18854_v29  ;;  %v17936_v29 = vld [vmem:[%s25071_s7 + $0x338] sm:$0x1]  ;;  %v18902_v20 = vpack.c.bf16 %v17931_v26, %v17929_v63  ;;  %v17985_v63 = vld [vmem:[%s25071_s7 + $0x448] sm:$0xff] }
 0xa99   : > { %v18904_v25 = vpack.c.bf16 %v17936_v29, %v17934_v57  ;;  %v17987_v26 = vld [vmem:[%s25071_s7 + $0x458] sm:$0xff]  ;;  %v17984_v29 = vld [vmem:[%s25071_s7 + $0x440] sm:$0xff] }
 0xa9a   : > { %v18950_v57 = vpack.c.bf16 %v17987_v26, %v17985_v63 }
 0xa9b   : > { %18859 = vmatpush1.bf16.msk.msra.mxu1 %vm23612_vm9, %v18857_v8  ;;  %v17935_v8 = vld [vmem:[%s25071_s7 + $0x330] sm:$0x1] }
 0xa9c   : > { %18861 = vmatprep.subr.bf16.mxu1 %v18860_v59  ;;  %v17941_v59 = vld [vmem:[%s25071_s7 + $0x348] sm:$0xff]  ;;  %v18907_v49 = vpack.c.bf16 %v17935_v8, %v17933_v3 }
 0xa9d   : > { %v18910_v2 = vpack.c.bf16 %v17943_v56, %v17941_v59  ;;  %v17988_v56 = vld [vmem:[%s25071_s7 + $0x460] sm:$0xff] }
 0xa9e   : > { %17884 = vmatmul.mubr.msk.f32.vlgmr.msra.gmra.mrb[28].mxu1 %vm13492_vm0, %v14249_v44  ;;  %v17945_v44 = vld [vmem:[%s25071_s7 + $0x368] sm:$0xff] }
 0xa9f   : > { %18863 = vmatpush1.bf16.msra.mxu1 %v18862_v45  ;;  %14430 = vmatprep.mubr.f32.mxu1 %v25142_v11  ;;  %v17942_v45 = vld [vmem:[%s25071_s7 + $0x350] sm:$0xff] }
 0xaa0   : > { %18866 = vmatprep.subr.msk.bf16.mxu1 %vm23612_vm9, %v18864_v50  ;;  %v17947_v50 = vld [vmem:[%s25071_s7 + $0x378] sm:$0x1]  ;;  %v18912_v31 = vpack.c.bf16 %v17942_v45, %v17940_v47  ;;  %v17996_v45 = vld [vmem:[%s25071_s7 + $0x488] sm:$0xff] }
 0xaa1   : > { %v18914_v23 = vpack.c.bf16 %v17947_v50, %v17945_v44  ;;  %v17998_v44 = vld [vmem:[%s25071_s7 + $0x498] sm:$0xff] }
 0xaa3   : > { %18869 = vmatpush1.bf16.msk.msra.mxu1 %vm23612_vm9, %v18867_v12  ;;  %v17946_v12 = vld [vmem:[%s25071_s7 + $0x370] sm:$0x1] }
 0xaa4   : > { %18871 = vmatprep.subr.bf16.mxu1 %v18870_v5  ;;  %v17952_v5 = vld [vmem:[%s25071_s7 + $0x388] sm:$0xff]  ;;  %v18917_v14 = vpack.c.bf16 %v17946_v12, %v17944_v54  ;;  %v18002_v12 = vld [vmem:[%s25071_s7 + $0x4b8] sm:$0x1] }
 0xaa5   : > { %v18920_v22 = vpack.c.bf16 %v17954_v48, %v17952_v5  ;;  %v18000_v54 = vld [vmem:[%s25071_s7 + $0x4a8] sm:$0xff] }
 0xaa6   : > { %17895 = vmatmul.mubr.msk.f32.vlgmr.msra.gmra.mrb[30].mxu1 %vm13492_vm0, %v23727_v58 }
 0xaa7   : > { %18873 = vmatpush1.bf16.msra.mxu1 %v18872_v34  ;;  %14538 = vmatprep.mubr.f32.mxu1 %v25142_v11  ;;  %v17953_v34 = vld [vmem:[%s25071_s7 + $0x390] sm:$0xff] }
 0xaa8   : > { %18876 = vmatprep.subr.msk.bf16.mxu1 %vm23612_vm9, %v18874_v39  ;;  %v17956_v39 = vld [vmem:[%s25071_s7 + $0x3a8] sm:$0xff]  ;;  %v18922_v52 = vpack.c.bf16 %v17953_v34, %v17951_v24  ;;  %v18001_v24 = vld [vmem:[%s25071_s7 + $0x4b0] sm:$0x1] }
 0xaa9   : > { %v18924_v19 = vpack.c.bf16 %v17958_v38, %v17956_v39  ;;  %v18007_v34 = vld [vmem:[%s25071_s7 + $0x4c8] sm:$0xff]  ;;  %v18009_v39 = vld [vmem:[%s25071_s7 + $0x4d8] sm:$0xff] }
 0xaab   : > { %18879 = vmatpush1.bf16.msk.msra.mxu1 %vm23612_vm9, %v18877_v1  ;;  %v17955_v1 = vld [vmem:[%s25071_s7 + $0x3a0] sm:$0xff] }
 0xaac   : > { %18881 = vmatprep.subr.bf16.mxu1 %v18880_v21  ;;  %v17957_v21 = vld [vmem:[%s25071_s7 + $0x3b0] sm:$0x1] }
 0xaad   : > { %v18927_v41 = vpack.c.bf16 %v17957_v21, %v17955_v1  ;;  %v18011_v1 = vld [vmem:[%s25071_s7 + $0x4e8] sm:$0xff]  ;;  %v18013_v21 = vld [vmem:[%s25071_s7 + $0x4f8] sm:$0x1] }
 0xaae   : > { %17906 = vmatmul.mubr.msk.f32.vlgmr.msra.gmra.mrb[32].mxu1 %vm13492_vm0, %v14465_v40  ;;  %v17964_v40 = vld [vmem:[%s25071_s7 + $0x3d0] sm:$0xff] }
 0xaaf   : > { %18883 = vmatpush1.bf16.msra.mxu1 %v18882_v35  ;;  %14646 = vmatprep.mubr.f32.mxu1 %v25142_v11  ;;  %v17962_v35 = vld [vmem:[%s25071_s7 + $0x3c0] sm:$0xff] }
 0xab0   : > { %18886 = vmatprep.subr.msk.bf16.mxu1 %vm23612_vm9, %v18884_v27  ;;  %v17967_v27 = vld [vmem:[%s25071_s7 + $0x3e8] sm:$0xff]  ;;  %v18932_v33 = vpack.c.bf16 %v17964_v40, %v17962_v35  ;;  %v18012_v35 = vld [vmem:[%s25071_s7 + $0x4f0] sm:$0x1] }
 0xab1   : > { %v18934_v60 = vpack.c.bf16 %v17969_v4, %v17967_v27  ;;  %v18018_v40 = vld [vmem:[%s25071_s7 + $0x508] sm:$0xff]  ;;  %v18020_v27 = vld [vmem:[%s25071_s7 + $0x518] sm:$0xff] }
 0xab3   : > { %18889 = vmatpush1.bf16.msk.msra.mxu1 %vm23612_vm9, %v18887_v18  ;;  %v17966_v18 = vld [vmem:[%s25071_s7 + $0x3e0] sm:$0xff] }
 0xab4   : > { %18891 = vmatprep.subr.bf16.mxu1 %v18890_v17  ;;  %v17968_v17 = vld [vmem:[%s25071_s7 + $0x3f0] sm:$0x1] }
 0xab5   : > { %v18937_v53 = vpack.c.bf16 %v17968_v17, %v17966_v18  ;;  %v18022_v18 = vld [vmem:[%s25071_s7 + $0x528] sm:$0xff]  ;;  %v18024_v17 = vld [vmem:[%s25071_s7 + $0x538] sm:$0x1] }
 0xab6   : > { %17917 = vmatmul.mubr.msk.f32.vlgmr.msra.gmra.mrb[34].mxu1 %vm13492_vm0, %v14573_v6  ;;  %v17975_v6 = vld [vmem:[%s25071_s7 + $0x410] sm:$0xff] }
 0xab7   : > { %18893 = vmatpush1.bf16.msra.mxu1 %v18892_v42  ;;  %14754 = vmatprep.mubr.f32.mxu1 %v25142_v11  ;;  %v17973_v42 = vld [vmem:[%s25071_s7 + $0x400] sm:$0xff] }
 0xab8   : > { %18896 = vmatprep.subr.msk.bf16.mxu1 %vm23612_vm9, %v18894_v16  ;;  %v17978_v16 = vld [vmem:[%s25071_s7 + $0x428] sm:$0xff]  ;;  %v18942_v7 = vpack.c.bf16 %v17975_v6, %v17973_v42  ;;  %v18023_v42 = vld [vmem:[%s25071_s7 + $0x530] sm:$0x1] }
 0xab9   : > { %v18944_v37 = vpack.c.bf16 %v17980_v28, %v17978_v16  ;;  %v18029_v6 = vld [vmem:[%s25071_s7 + $0x548] sm:$0xff]  ;;  %v18031_v16 = vld [vmem:[%s25071_s7 + $0x558] sm:$0xff] }
 0xabb   : > { %18899 = vmatpush1.bf16.msk.msra.mxu1 %vm23612_vm9, %v18897_v46  ;;  %v17977_v46 = vld [vmem:[%s25071_s7 + $0x420] sm:$0xff] }
 0xabc   : > { %18901 = vmatprep.subr.bf16.mxu1 %v18900_v61  ;;  %v17979_v61 = vld [vmem:[%s25071_s7 + $0x430] sm:$0x1] }
 0xabd   : > { %v18947_v58 = vpack.c.bf16 %v17979_v61, %v17977_v46  ;;  %v18033_v46 = vld [vmem:[%s25071_s7 + $0x568] sm:$0xff]  ;;  %v18035_v61 = vld [vmem:[%s25071_s7 + $0x578] sm:$0x1] }
 0xabe   : > { %17928 = vmatmul.mubr.msk.f32.vlgmr.msra.gmra.mrb[36].mxu1 %vm13492_vm0, %v14681_v13  ;;  %v17989_v13 = vld [vmem:[%s25071_s7 + $0x468] sm:$0xff] }
 0xabf   : > { %18903 = vmatpush1.bf16.msra.mxu1 %v18902_v20  ;;  %14862 = vmatprep.mubr.f32.mxu1 %v25142_v11  ;;  %v17986_v20 = vld [vmem:[%s25071_s7 + $0x450] sm:$0xff] }
 0xac0   : > { %18906 = vmatprep.subr.msk.bf16.mxu1 %vm23612_vm9, %v18904_v25  ;;  %v17991_v25 = vld [vmem:[%s25071_s7 + $0x478] sm:$0x1]  ;;  %v18952_v3 = vpack.c.bf16 %v17986_v20, %v17984_v29  ;;  %v18034_v29 = vld [vmem:[%s25071_s7 + $0x570] sm:$0x1]  ;;  %v18040_v20 = vld [vmem:[%s25071_s7 + $0x588] sm:$0xff] }
 0xac1   : > { %v18954_v59 = vpack.c.bf16 %v17991_v25, %v17989_v13  ;;  %v18042_v13 = vld [vmem:[%s25071_s7 + $0x598] sm:$0xff] }
 0xac3   : > { %18909 = vmatpush1.bf16.msk.msra.mxu1 %vm23612_vm9, %v18907_v49  ;;  %v17990_v49 = vld [vmem:[%s25071_s7 + $0x470] sm:$0x1] }
 0xac4   : > { %18911 = vmatprep.subr.bf16.mxu1 %v18910_v2  ;;  %v18957_v50 = vpack.c.bf16 %v17990_v49, %v17988_v56  ;;  %v18041_v56 = vld [vmem:[%s25071_s7 + $0x590] sm:$0xff]  ;;  %v18044_v49 = vld [vmem:[%s25071_s7 + $0x5a8] sm:$0xff] }
 0xac6   : > { %17939 = vmatmul.mubr.msk.f32.vlgmr.msra.gmra.mrb[38].mxu1 %vm13492_vm0, %v14789_v32  ;;  %v17995_v32 = vld [vmem:[%s25071_s7 + $0x480] sm:$0xff] }
 0xac7   : > { %18913 = vmatpush1.bf16.msra.mxu1 %v18912_v31  ;;  %14970 = vmatprep.mubr.f32.mxu1 %v25142_v11  ;;  %v18960_v31 = vpack.c.bf16 %v17998_v44, %v17996_v45 }
 0xac8   : > { %18916 = vmatprep.subr.msk.bf16.mxu1 %vm23612_vm9, %v18914_v23  ;;  %v17997_v23 = vld [vmem:[%s25071_s7 + $0x490] sm:$0xff] }
 0xac9   : > { %v18962_v5 = vpack.c.bf16 %v17997_v23, %v17995_v32  ;;  %v18045_v32 = vld [vmem:[%s25071_s7 + $0x5b0] sm:$0x1]  ;;  %v18051_v23 = vld [vmem:[%s25071_s7 + $0x5c8] sm:$0xff] }
 0xacb   : > { %18919 = vmatpush1.bf16.msk.msra.mxu1 %vm23612_vm9, %v18917_v14  ;;  %v18964_v14 = vpack.c.bf16 %v18002_v12, %v18000_v54  ;;  %v18053_v54 = vld [vmem:[%s25071_s7 + $0x5d8] sm:$0xff] }
 0xacc   : > { %18921 = vmatprep.subr.bf16.mxu1 %v18920_v22  ;;  %v17999_v22 = vld [vmem:[%s25071_s7 + $0x4a0] sm:$0xff] }
 0xacd   : > { %v18967_v38 = vpack.c.bf16 %v18001_v24, %v17999_v22  ;;  %v18055_v22 = vld [vmem:[%s25071_s7 + $0x5e8] sm:$0xff]  ;;  %v18057_v24 = vld [vmem:[%s25071_s7 + $0x5f8] sm:$0x1] }
 0xace   : > { %17950 = vmatmul.mubr.msk.f32.vlgmr.msra.gmra.mrb[40].mxu1 %vm13492_vm0, %v14897_v43  ;;  %v18006_v43 = vld [vmem:[%s25071_s7 + $0x4c0] sm:$0xff] }
 0xacf   : > { %18923 = vmatpush1.bf16.msra.mxu1 %v18922_v52  ;;  %15078 = vmatprep.mubr.f32.mxu1 %v25142_v11  ;;  %v18970_v52 = vpack.c.bf16 %v18009_v39, %v18007_v34 }
 0xad0   : > { %18926 = vmatprep.subr.msk.bf16.mxu1 %vm23612_vm9, %v18924_v19  ;;  %v18008_v19 = vld [vmem:[%s25071_s7 + $0x4d0] sm:$0xff] }
 0xad1   : > { %v18972_v30 = vpack.c.bf16 %v18008_v19, %v18006_v43  ;;  %v18056_v43 = vld [vmem:[%s25071_s7 + $0x5f0] sm:$0x1]  ;;  %v18062_v19 = vld [vmem:[%s25071_s7 + $0x608] sm:$0xff] }
 0xad3   : > { %18929 = vmatpush1.bf16.msk.msra.mxu1 %vm23612_vm9, %v18927_v41  ;;  %v18974_v41 = vpack.c.bf16 %v18013_v21, %v18011_v1  ;;  %v18064_v1 = vld [vmem:[%s25071_s7 + $0x618] sm:$0xff] }
 0xad4   : > { %18931 = vmatprep.subr.bf16.mxu1 %v18930_v10  ;;  %v18010_v10 = vld [vmem:[%s25071_s7 + $0x4e0] sm:$0xff] }
 0xad5   : > { %v18977_v4 = vpack.c.bf16 %v18012_v35, %v18010_v10  ;;  %v18066_v10 = vld [vmem:[%s25071_s7 + $0x628] sm:$0xff]  ;;  %v18068_v35 = vld [vmem:[%s25071_s7 + $0x638] sm:$0x1] }
 0xad6   : > { %17961 = vmatmul.mubr.msk.f32.vlgmr.msra.gmra.mrb[42].mxu1 %vm13492_vm0, %v15005_v51  ;;  %v18017_v51 = vld [vmem:[%s25071_s7 + $0x500] sm:$0xff] }
 0xad7   : > { %18933 = vmatpush1.bf16.msra.mxu1 %v18932_v33  ;;  %15186 = vmatprep.mubr.f32.mxu1 %v25142_v11  ;;  %v18980_v33 = vpack.c.bf16 %v18020_v27, %v18018_v40 }
 0xad8   : > { %18936 = vmatprep.subr.msk.bf16.mxu1 %vm23612_vm9, %v18934_v60  ;;  %v18019_v60 = vld [vmem:[%s25071_s7 + $0x510] sm:$0xff] }
 0xad9   : > { %v18982_v9 = vpack.c.bf16 %v18019_v60, %v18017_v51  ;;  %v18067_v51 = vld [vmem:[%s25071_s7 + $0x630] sm:$0x1]  ;;  %v18073_v60 = vld [vmem:[%s25071_s7 + $0x648] sm:$0xff] }
 0xadb   : > { %18939 = vmatpush1.bf16.msk.msra.mxu1 %vm23612_vm9, %v18937_v53  ;;  %v18984_v53 = vpack.c.bf16 %v18024_v17, %v18022_v18  ;;  %v18075_v18 = vld [vmem:[%s25071_s7 + $0x658] sm:$0xff] }
 0xadc   : > { %18941 = vmatprep.subr.bf16.mxu1 %v18940_v55  ;;  %v18021_v55 = vld [vmem:[%s25071_s7 + $0x520] sm:$0xff]  ;;  %v19030_v17 = vpack.c.bf16 %v18075_v18, %v18073_v60 }
 0xadd   : > { %v18987_v28 = vpack.c.bf16 %v18023_v42, %v18021_v55  ;;  %v18079_v55 = vld [vmem:[%s25071_s7 + $0x678] sm:$0x1] }
 0xade   : > { %17972 = vmatmul.mubr.msk.f32.vlgmr.msra.gmra.mrb[44].mxu1 %vm13492_vm0, %v15113_v36  ;;  %v18028_v36 = vld [vmem:[%s25071_s7 + $0x540] sm:$0xff] }
 0xadf   : > { %18943 = vmatpush1.bf16.msra.mxu1 %v18942_v7  ;;  %15294 = vmatprep.mubr.f32.mxu1 %v25142_v11  ;;  %v18990_v7 = vpack.c.bf16 %v18031_v16, %v18029_v6  ;;  %v18076_v16 = vld [vmem:[%s25071_s7 + $0x660] sm:$0xff] }
 0xae0   : > { %18946 = vmatprep.subr.msk.bf16.mxu1 %vm23612_vm9, %v18944_v37  ;;  %v18030_v37 = vld [vmem:[%s25071_s7 + $0x550] sm:$0xff] }
 0xae1   : > { %v18992_v63 = vpack.c.bf16 %v18030_v37, %v18028_v36  ;;  %v18086_v36 = vld [vmem:[%s25071_s7 + $0x698] sm:$0xff] }
 0xae3   : > { %18949 = vmatpush1.bf16.msk.msra.mxu1 %vm23612_vm9, %v18947_v58  ;;  %v18994_v58 = vpack.c.bf16 %v18035_v61, %v18033_v46  ;;  %v18083_v61 = vld [vmem:[%s25071_s7 + $0x680] sm:$0xff] }
 0xae4   : > { %18951 = vmatprep.subr.bf16.mxu1 %v18950_v57  ;;  %v18032_v57 = vld [vmem:[%s25071_s7 + $0x560] sm:$0xff] }
 0xae5   : > { %v18997_v25 = vpack.c.bf16 %v18034_v29, %v18032_v57  ;;  %v13579_v57 = vlaneseq  ;;  %v18088_v29 = vld [vmem:[%s25071_s7 + $0x6a8] sm:$0xff] }
 0xaef   : > { %v24237_v8 = vpop.f32.mrb[12].mxu1 }
 0xaf0   : > { %v24245_v2 = vpop.f32.mrb[13].mxu1  ;;  %v16841_v47 = vrot.slane %v24237_v8, 7 }
 0xaf1   : > { %17983 = vmatmul.mubr.msk.f32.vlgmr.msra.gmra.mrb[46].mxu1 %vm13492_vm0, %v24245_v2  ;;  %v15329_v48 = vrot.slane %v24245_v2, 1  ;;  %v15437_v62 = vrot.slane %v24245_v2, 2  ;;  %v15545_v15 = vrot.slane %v24245_v2, 3  ;;  %v15653_v26 = vrot.slane %v24245_v2, 4 }
 0xaf2   : > { %18953 = vmatpush1.bf16.msra.mxu1 %v18952_v3  ;;  %18148 = vmatmul.mubr.msk.f32.vlgmr.msra.gmra.mrb[16].mxu0 %vm13492_vm0, %v16841_v47  ;;  %v19000_v3 = vpack.c.bf16 %v18042_v13, %v18040_v20  ;;  %v18046_v47 = vld [vmem:[%s25071_s7 + $0x5b8] sm:$0x1]  ;;  %v15761_v44 = vrot.slane %v24245_v2, 5  ;;  %v15869_v39 = vrot.slane %v24245_v2, 6  ;;  %v15977_v27 = vrot.slane %v24245_v2, 7 }
 0xaf3   : > { %18956 = vmatprep.subr.msk.bf16.mxu1 %vm23612_vm9, %v18954_v59  ;;  %15402 = vmatprep.mubr.f32.mxu1 %v25142_v11  ;;  %v18039_v59 = vld [vmem:[%s25071_s7 + $0x580] sm:$0xff]  ;;  %v18090_v20 = vld [vmem:[%s25071_s7 + $0x6b8] sm:$0x1] }
 0xaf4   : > { %v19002_v45 = vpack.c.bf16 %v18041_v56, %v18039_v59  ;;  %v24523_v59 = vshrl.u32 %v13579_v57, 7  ;;  %v19044_v56 = vpack.c.bf16 %v18090_v20, %v18088_v29 }
 0xaf6   : > { %18959 = vmatpush1.bf16.msk.msra.mxu1 %vm23612_vm9, %v18957_v50  ;;  %v19004_v50 = vpack.c.bf16 %v18046_v47, %v18044_v49  ;;  %v18087_v49 = vld [vmem:[%s25071_s7 + $0x6a0] sm:$0xff]  ;;  %v18089_v47 = vld [vmem:[%s25071_s7 + $0x6b0] sm:$0x1] }
 0xaf7   : > { %18961 = vmatprep.subr.bf16.mxu1 %v18960_v31  ;;  %v18043_v31 = vld [vmem:[%s25071_s7 + $0x5a0] sm:$0xff] }
 0xaf8   : > { %v19007_v12 = vpack.c.bf16 %v18045_v32, %v18043_v31  ;;  %v19047_v32 = vpack.c.bf16 %v18089_v47, %v18087_v49  ;;  %v18128_v49 = vld [vmem:[%s25071_s7 + $0x788] sm:$0xff]  ;;  %v18130_v47 = vld [vmem:[%s25071_s7 + $0x798] sm:$0xff] }
 0xaf9   : > { %17994 = vmatmul.mubr.msk.f32.vlgmr.msra.gmra.mrb[48].mxu1 %vm13492_vm0, %v15329_v48  ;;  %v18050_v48 = vld [vmem:[%s25071_s7 + $0x5c0] sm:$0xff] }
 0xafa   : > { %18963 = vmatpush1.bf16.msra.mxu1 %v18962_v5  ;;  %15510 = vmatprep.mubr.f32.mxu1 %v25142_v11  ;;  %v19010_v5 = vpack.c.bf16 %v18053_v54, %v18051_v23 }
 0xafb   : > { %18966 = vmatprep.subr.msk.bf16.mxu1 %vm23612_vm9, %v18964_v14  ;;  %v18052_v14 = vld [vmem:[%s25071_s7 + $0x5d0] sm:$0xff] }
 0xafc   : > { %v19012_v34 = vpack.c.bf16 %v18052_v14, %v18050_v48  ;;  %v18096_v48 = vld [vmem:[%s25071_s7 + $0x6d0] sm:$0xff]  ;;  %v18099_v14 = vld [vmem:[%s25071_s7 + $0x6e8] sm:$0xff] }
 0xafe   : > { %18969 = vmatpush1.bf16.msk.msra.mxu1 %vm23612_vm9, %v18967_v38  ;;  %v19014_v38 = vpack.c.bf16 %v18057_v24, %v18055_v22  ;;  %v18101_v22 = vld [vmem:[%s25071_s7 + $0x6f8] sm:$0x1] }
 0xaff   : > { %18971 = vmatprep.subr.bf16.mxu1 %v18970_v52  ;;  %v18054_v52 = vld [vmem:[%s25071_s7 + $0x5e0] sm:$0xff] }
 0xb00   : > { %v19017_v21 = vpack.c.bf16 %v18056_v43, %v18054_v52  ;;  %v18098_v52 = vld [vmem:[%s25071_s7 + $0x6e0] sm:$0xff]  ;;  %v18100_v43 = vld [vmem:[%s25071_s7 + $0x6f0] sm:$0x1] }
 0xb01   : > { %18005 = vmatmul.mubr.msk.f32.vlgmr.msra.gmra.mrb[50].mxu1 %vm13492_vm0, %v15437_v62  ;;  %v18061_v62 = vld [vmem:[%s25071_s7 + $0x600] sm:$0xff] }
 0xb02   : > { %18973 = vmatpush1.bf16.msra.mxu1 %v18972_v30  ;;  %15618 = vmatprep.mubr.f32.mxu1 %v25142_v11  ;;  %v19020_v30 = vpack.c.bf16 %v18064_v1, %v18062_v19  ;;  %v18106_v19 = vld [vmem:[%s25071_s7 + $0x708] sm:$0xff]  ;;  %v18108_v1 = vld [vmem:[%s25071_s7 + $0x718] sm:$0xff] }
 0xb03   : > { %18976 = vmatprep.subr.msk.bf16.mxu1 %vm23612_vm9, %v18974_v41  ;;  %v18063_v41 = vld [vmem:[%s25071_s7 + $0x610] sm:$0xff] }
 0xb04   : > { %v19022_v40 = vpack.c.bf16 %v18063_v41, %v18061_v62  ;;  %v19057_v62 = vpack.c.bf16 %v18100_v43, %v18098_v52  ;;  %v18131_v52 = vld [vmem:[%s25071_s7 + $0x7a0] sm:$0xff]  ;;  %v18133_v43 = vld [vmem:[%s25071_s7 + $0x7b0] sm:$0x1] }
 0xb06   : > { %18979 = vmatpush1.bf16.msk.msra.mxu1 %vm23612_vm9, %v18977_v4  ;;  %v19024_v4 = vpack.c.bf16 %v18068_v35, %v18066_v10  ;;  %v19060_v35 = vpack.c.bf16 %v18108_v1, %v18106_v19 }
 0xb07   : > { %18981 = vmatprep.subr.bf16.mxu1 %v18980_v33  ;;  %v18065_v33 = vld [vmem:[%s25071_s7 + $0x620] sm:$0xff] }
 0xb08   : > { %v19027_v2 = vpack.c.bf16 %v18067_v51, %v18065_v33  ;;  %v18110_v33 = vld [vmem:[%s25071_s7 + $0x728] sm:$0xff]  ;;  %v18112_v51 = vld [vmem:[%s25071_s7 + $0x738] sm:$0x1] }
 0xb09   : > { %18016 = vmatmul.mubr.msk.f32.vlgmr.msra.gmra.mrb[52].mxu1 %vm13492_vm0, %v15545_v15  ;;  %v18074_v15 = vld [vmem:[%s25071_s7 + $0x650] sm:$0xff] }
 0xb0a   : > { %18983 = vmatpush1.bf16.msra.mxu1 %v18982_v9  ;;  %15726 = vmatprep.mubr.f32.mxu1 %v25142_v11  ;;  %v18072_v9 = vld [vmem:[%s25071_s7 + $0x640] sm:$0xff] }
 0xb0b   : > { %18986 = vmatprep.subr.msk.bf16.mxu1 %vm23612_vm9, %v18984_v53  ;;  %v18077_v53 = vld [vmem:[%s25071_s7 + $0x668] sm:$0xff]  ;;  %v19032_v42 = vpack.c.bf16 %v18074_v15, %v18072_v9  ;;  %v16409_v9 = vrot.slane %v24237_v8, 3  ;;  %v19064_v15 = vpack.c.bf16 %v18112_v51, %v18110_v33 }
 0xb0c   : > { %v19034_v6 = vpack.c.bf16 %v18079_v55, %v18077_v53  ;;  %v18109_v53 = vld [vmem:[%s25071_s7 + $0x720] sm:$0xff]  ;;  %v18111_v55 = vld [vmem:[%s25071_s7 + $0x730] sm:$0x1] }
 0xb0e   : > { %18989 = vmatpush1.bf16.msk.msra.mxu1 %vm23612_vm9, %v18987_v28  ;;  %v18078_v28 = vld [vmem:[%s25071_s7 + $0x670] sm:$0x1] }
 0xb0f   : > { %18991 = vmatprep.subr.bf16.mxu1 %v18990_v7  ;;  %v18084_v7 = vld [vmem:[%s25071_s7 + $0x688] sm:$0xff]  ;;  %v19037_v37 = vpack.c.bf16 %v18078_v28, %v18076_v16 }
 0xb10   : > { %v19040_v46 = vpack.c.bf16 %v18086_v36, %v18084_v7  ;;  %v19067_v36 = vpack.c.bf16 %v18111_v55, %v18109_v53 }
 0xb11   : > { %18027 = vmatmul.mubr.msk.f32.vlgmr.msra.gmra.mrb[54].mxu1 %vm13492_vm0, %v15653_v26  ;;  %v20221_v26 = vmov 1966171168  }
 0xb12   : > { %18993 = vmatpush1.bf16.msra.mxu1 %v18992_v63  ;;  %15834 = vmatprep.mubr.f32.mxu1 %v25142_v11  ;;  %v18085_v63 = vld [vmem:[%s25071_s7 + $0x690] sm:$0xff] }
 0xb13   : > { %18996 = vmatprep.subr.msk.bf16.mxu1 %vm23612_vm9, %v18994_v58  ;;  %v13577_v58 = vunpack.c.l.s4 %v20221_v26  ;;  %v19042_v13 = vpack.c.bf16 %v18085_v63, %v18083_v61  ;;  %v18116_v61 = vld [vmem:[%s25071_s7 + $0x740] sm:$0xff]  ;;  %v18118_v63 = vld [vmem:[%s25071_s7 + $0x750] sm:$0xff]  ;;  %v18121_v26 = vld [vmem:[%s25071_s7 + $0x768] sm:$0xff] }
 0xb14   : > { %v19072_v29 = vpack.c.bf16 %v18118_v63, %v18116_v61 }
 0xb16   : > { %18999 = vmatpush1.bf16.msk.msra.mxu1 %vm23612_vm9, %v18997_v25  ;;  %v16193_v25 = vrot.slane %v24237_v8, 1 }
 0xb17   : > { %19001 = vmatprep.subr.bf16.mxu1 %v19000_v3  ;;  %v13578_v3 = vunpack.c.0.s8 %v13577_v58  ;;  %v18123_v58 = vld [vmem:[%s25071_s7 + $0x778] sm:$0x1] }
 0xb19   : > { %18038 = vmatmul.mubr.msk.f32.vlgmr.msra.gmra.mrb[56].mxu1 %vm13492_vm0, %v15761_v44  ;;  %v18097_v44 = vld [vmem:[%s25071_s7 + $0x6d8] sm:$0xff]  ;;  %v24540_v54 = vsub.s32 %v13578_v3, %v24523_v59  ;;  %v18120_v3 = vld [vmem:[%s25071_s7 + $0x760] sm:$0xff] }
 0xb1a   : > { %19003 = vmatpush1.bf16.msra.mxu1 %v19002_v45  ;;  %15942 = vmatprep.mubr.f32.mxu1 %v25142_v11  ;;  %v18095_v45 = vld [vmem:[%s25071_s7 + $0x6c8] sm:$0xff] }
 0xb1b   : > { %19006 = vmatprep.subr.msk.bf16.mxu1 %vm23612_vm9, %v19004_v50 }
 0xb1e   : > { %19009 = vmatpush1.bf16.msk.msra.mxu1 %vm23612_vm9, %v19007_v12  ;;  %v19050_v12 = vpack.c.bf16 %v18097_v44, %v18095_v45 }
 0xb1f   : > { %19011 = vmatprep.subr.bf16.mxu1 %v19010_v5  ;;  %v18094_v5 = vld [vmem:[%s25071_s7 + $0x6c0] sm:$0xff] }
 0xb20   : > { %v19052_v24 = vpack.c.bf16 %v18096_v48, %v18094_v5  ;;  %v18129_v5 = vld [vmem:[%s25071_s7 + $0x790] sm:$0xff]  ;;  %v18132_v48 = vld [vmem:[%s25071_s7 + $0x7a8] sm:$0xff] }
 0xb21   : > { %18049 = vmatmul.mubr.msk.f32.vlgmr.msra.gmra.mrb[58].mxu1 %vm13492_vm0, %v15869_v39  ;;  %v16301_v39 = vrot.slane %v24237_v8, 2 }
 0xb22   : > { %19013 = vmatpush1.bf16.msra.mxu1 %v19012_v34  ;;  %16050 = vmatprep.mubr.f32.mxu1 %v25142_v11 }
 0xb23   : > { %19016 = vmatprep.subr.msk.bf16.mxu1 %vm23612_vm9, %v19014_v38  ;;  %v19054_v38 = vpack.c.bf16 %v18101_v22, %v18099_v14  ;;  %v18134_v14 = vld [vmem:[%s25071_s7 + $0x7b8] sm:$0x1] }
 0xb26   : > { %19019 = vmatpush1.bf16.msk.msra.mxu1 %vm23612_vm9, %v19017_v21 }
 0xb27   : > { %19021 = vmatprep.subr.bf16.mxu1 %v19020_v30 }
 0xb29   : > { %18060 = vmatmul.mubr.msk.f32.vlgmr.msra.gmra.mrb[60].mxu1 %vm13492_vm0, %v15977_v27  ;;  %v18107_v27 = vld [vmem:[%s25071_s7 + $0x710] sm:$0xff] }
 0xb2a   : > { %19023 = vmatpush1.bf16.msra.mxu1 %v19022_v40  ;;  %16158 = vmatprep.mubr.f32.mxu1 %v25142_v11  ;;  %v18105_v40 = vld [vmem:[%s25071_s7 + $0x700] sm:$0xff] }
 0xb2b   : > { %19026 = vmatprep.subr.msk.bf16.mxu1 %vm23612_vm9, %v19024_v4  ;;  %v13483_v4 = vld [vmem:[%s25072_s8] sm:$0x3]  ;;  %v19062_v18 = vpack.c.bf16 %v18107_v27, %v18105_v40 }
 0xb2e   : > { %19029 = vmatpush1.bf16.msk.msra.mxu1 %vm23612_vm9, %v19027_v2 }
 0xb2f   : > { %19031 = vmatprep.subr.bf16.mxu1 %v19030_v17 }
 0xb31   : > { %18071 = vmatmul.mubr.msk.f32.vlgmr.msra.gmra.mrb[62].mxu1 %vm13492_vm0, %v24237_v8 }
 0xb32   : > { %19033 = vmatpush1.bf16.msra.mxu1 %v19032_v42  ;;  %16266 = vmatprep.mubr.f32.mxu1 %v25142_v11  ;;  %v18117_v42 = vld [vmem:[%s25071_s7 + $0x748] sm:$0xff] }
 0xb33   : > { %19036 = vmatprep.subr.msk.bf16.mxu1 %vm23612_vm9, %v19034_v6  ;;  %v18119_v6 = vld [vmem:[%s25071_s7 + $0x758] sm:$0xff] }
 0xb36   : > { %19039 = vmatpush1.bf16.msk.msra.mxu1 %vm23612_vm9, %v19037_v37 }
 0xb37   : > { %19041 = vmatprep.subr.bf16.mxu1 %v19040_v46  ;;  %v19070_v46 = vpack.c.bf16 %v18119_v6, %v18117_v42 }
 0xb39   : > { %18082 = vmatmul.mubr.msk.f32.vlgmr.msra.gmra.mrb[64].mxu1 %vm13492_vm0, %v16193_v25  ;;  %v13568_v50 = vpop.f32.mrb[14].mxu1  ;;  %v19074_v25 = vpack.c.bf16 %v18123_v58, %v18121_v26 }
 0xb3a   : > { %19043 = vmatpush1.bf16.msra.mxu1 %v19042_v13  ;;  %v13570_v31 = vpop.f32.mrb[15].mxu1  ;;  %16374 = vmatprep.mubr.f32.mxu1 %v25142_v11  ;;  %v16517_v13 = vrot.slane %v24237_v8, 4 }
 0xb3b   : > { %v13575_v23 = vcombine.low %v13568_v50, %v13570_v31  ;;  %19046 = vmatprep.subr.msk.bf16.mxu1 %vm23612_vm9, %v19044_v56  ;;  %v18122_v56 = vld [vmem:[%s25071_s7 + $0x770] sm:$0x1] }
 0xb3c   : > { %v19077_v31 = vpack.c.bf16 %v18122_v56, %v18120_v3 }
 0xb3d   : > { %v13582_v34 = vrot.slane %v13575_v23, %v24540_v54  ;;  %v19080_v23 = vpack.c.bf16 %v18130_v47, %v18128_v49  ;;  %v16942_v49 = vld [vmem:[%s25073_s9 + $0x8] sm:$0xff]  ;;  %v16944_v47 = vld [vmem:[%s25073_s9 + $0x18] sm:$0xff] }
 0xb3e   : > { %19049 = vmatpush1.bf16.msk.msra.mxu1 %vm23612_vm9, %v19047_v32 }
 0xb3f   : > { %19051 = vmatprep.subr.bf16.mxu1 %v19050_v12  ;;  %v13589_v41 = vrot.slane %v13582_v34, %v24540_v54  ;;  %v18127_v12 = vld [vmem:[%s25071_s7 + $0x780] sm:$0xff] }
 0xb41   : > { %v13676_v21 = vpop.f32.mrb[16].mxu1  ;;  %18093 = vmatmul.mubr.msk.f32.vlgmr.msra.gmra.mrb[66].mxu1 %vm13492_vm0, %v16301_v39  ;;  %v13591_v2 = vadd.f32 %v13589_v41, %v13483_v4  ;;  %v16625_v39 = vrot.slane %v24237_v8, 5 }
 0xb42   : > { %v13678_v30 = vpop.f32.mrb[17].mxu1  ;;  %19053 = vmatpush1.bf16.msra.mxu1 %v19052_v24  ;;  %16482 = vmatprep.mubr.f32.mxu1 %v25142_v11  ;;  %v19082_v24 = vpack.c.bf16 %v18129_v5, %v18127_v12 }
 0xb43   : > { %v13683_v10 = vcombine.low %v13676_v21, %v13678_v30  ;;  %19056 = vmatprep.subr.msk.bf16.mxu1 %vm23612_vm9, %v19054_v38  ;;  %v19084_v38 = vpack.c.bf16 %v18134_v14, %v18132_v48  ;;  %v19087_v30 = vpack.c.bf16 %v18133_v43, %v18131_v52  ;;  %v16947_v52 = vld [vmem:[%s25073_s9 + $0x30] sm:$0xff]  ;;  %v16950_v43 = vld [vmem:[%s25073_s9 + $0x48] sm:$0xff] }
 0xb45   : > { %v13690_v60 = vrot.slane %v13683_v10, %v24540_v54 }
 0xb46   : > { %19059 = vmatpush1.bf16.msk.msra.mxu1 %vm23612_vm9, %v19057_v62 }
 0xb47   : > { %v13697_v17 = vrot.slane %v13690_v60, %v24540_v54  ;;  %19061 = vmatprep.subr.bf16.mxu1 %v19060_v35  ;;  %v16733_v35 = vrot.slane %v24237_v8, 6 }
 0xb49   : > { %v13699_v16 = vadd.f32 %v13697_v17, %v13591_v2  ;;  %v13784_v28 = vpop.f32.mrb[18].mxu1  ;;  %18104 = vmatmul.mubr.msk.f32.vlgmr.msra.gmra.mrb[68].mxu1 %vm13492_vm0, %v16409_v9 }
 0xb4a   : > { %v13786_v7 = vpop.f32.mrb[19].mxu1  ;;  %19063 = vmatpush1.bf16.msra.mxu1 %v19062_v18  ;;  %16590 = vmatprep.mubr.f32.mxu1 %v25142_v11 }
 0xb4b   : > { %v13791_v37 = vcombine.low %v13784_v28, %v13786_v7  ;;  %19066 = vmatprep.subr.msk.bf16.mxu1 %vm23612_vm9, %v19064_v15 }
 0xb4d   : > { %v13798_v57 = vrot.slane %v13791_v37, %v24540_v54 }
 0xb4e   : > { %19069 = vmatpush1.bf16.msk.msra.mxu1 %vm23612_vm9, %v19067_v36 }
 0xb4f   : > { %v13805_v20 = vrot.slane %v13798_v57, %v24540_v54  ;;  %19071 = vmatprep.subr.bf16.mxu1 %v19070_v46 }
 0xb51   : > { %v13807_v45 = vadd.f32 %v13805_v20, %v13699_v16  ;;  %v13892_v44 = vpop.f32.mrb[20].mxu1  ;;  %18115 = vmatmul.mubr.msk.f32.vlgmr.msra.gmra.mrb[70].mxu1 %vm13492_vm0, %v16517_v13 }
 0xb52   : > { %v13894_v50 = vpop.f32.mrb[21].mxu1  ;;  %19073 = vmatpush1.bf16.msra.mxu1 %v19072_v29  ;;  %16698 = vmatprep.mubr.f32.mxu1 %v25142_v11 }
 0xb53   : > { %v13899_v32 = vcombine.low %v13892_v44, %v13894_v50  ;;  %19076 = vmatprep.subr.msk.bf16.mxu1 %vm23612_vm9, %v19074_v25  ;;  %v19100_v50 = vpack.c.bf16 %v16944_v47, %v16942_v49 }
 0xb55   : > { %v13906_v22 = vrot.slane %v13899_v32, %v24540_v54 }
 0xb56   : > { %19079 = vmatpush1.bf16.msk.msra.mxu1 %vm23612_vm9, %v19077_v31  ;;  %v16943_v31 = vld [vmem:[%s25073_s9 + $0x10] sm:$0xff] }
 0xb57   : > { %v13913_v34 = vrot.slane %v13906_v22, %v24540_v54  ;;  %19081 = vmatprep.subr.bf16.mxu1 %v19080_v23  ;;  %v16946_v22 = vld [vmem:[%s25073_s9 + $0x28] sm:$0xff] }
 0xb59   : > { %v13915_v19 = vadd.f32 %v13913_v34, %v13807_v45  ;;  %v14000_v1 = vpop.f32.mrb[22].mxu1  ;;  %18126 = vmatmul.mubr.msk.f32.vlgmr.msra.gmra.mrb[72].mxu1 %vm13492_vm0, %v16625_v39  ;;  %v16941_v45 = vld [vmem:[%s25073_s9] sm:$0xff] }
 0xb5a   : > { %v14002_v21 = vpop.f32.mrb[23].mxu1  ;;  %19083 = vmatpush1.bf16.msra.mxu1 %v19082_v24  ;;  %16806 = vmatprep.mubr.f32.mxu1 %v25142_v11  ;;  %v19102_v32 = vpack.c.bf16 %v16943_v31, %v16941_v45  ;;  %v16948_v24 = vld [vmem:[%s25073_s9 + $0x38] sm:$0xff]  ;;  %v16945_v34 = vld [vmem:[%s25073_s9 + $0x20] sm:$0xff]  ;;  %v16970_v31 = vld [vmem:[%s25073_s9 + $0xe8] sm:$0xff] }
 0xb5b   : > { %v14007_v62 = vcombine.low %v14000_v1, %v14002_v21  ;;  %19086 = vmatprep.subr.msk.bf16.mxu1 %vm23612_vm9, %v19084_v38  ;;  %v19104_v38 = vpack.c.bf16 %v16948_v24, %v16946_v22  ;;  %v19106_v1 = vpack.c.bf16 %v16947_v52, %v16945_v34  ;;  %v16976_v22 = vld [vmem:[%s25073_s9 + $0x118] sm:$0xff] }
 0xb5d   : > { %v14014_v41 = vrot.slane %v14007_v62, %v24540_v54  ;;  %v16951_v62 = vld [vmem:[%s25073_s9 + $0x50] sm:$0xff] }
 0xb5e   : > { %19089 = vmatpush1.bf16.msk.msra.mxu1 %vm23612_vm9, %v19087_v30  ;;  %v16949_v30 = vld [vmem:[%s25073_s9 + $0x40] sm:$0xff] }
 0xb5f   : > { %v14021_v10 = vrot.slane %v14014_v41, %v24540_v54  ;;  %19101 = vmatprep.subr.bf16.mxu1 %v19100_v50 }
 0xb61   : > { %v14023_v40 = vadd.f32 %v14021_v10, %v13915_v19  ;;  %v14108_v27 = vpop.f32.mrb[24].mxu1  ;;  %18137 = vmatmul.mubr.msk.f32.vlgmr.msra.gmra.mrb[74].mxu1 %vm13492_vm0, %v16733_v35  ;;  %v16952_v19 = vld [vmem:[%s25073_s9 + $0x58] sm:$0xff]  ;;  %v19110_v10 = vpack.c.bf16 %v16951_v62, %v16949_v30  ;;  %v16978_v62 = vld [vmem:[%s25073_s9 + $0x128] sm:$0xff] }
 0xb62   : > { %v14110_v4 = vpop.f32.mrb[25].mxu1  ;;  %19103 = vmatpush1.bf16.msra.mxu1 %v19102_v32  ;;  %v19108_v21 = vpack.c.bf16 %v16952_v19, %v16950_v43  ;;  %v16972_v32 = vld [vmem:[%s25073_s9 + $0xf8] sm:$0xff] }
 0xb63   : > { %v14115_v33 = vcombine.low %v14108_v27, %v14110_v4  ;;  %19105 = vmatprep.subr.bf16.mxu1 %v19104_v38  ;;  %v16975_v38 = vld [vmem:[%s25073_s9 + $0x110] sm:$0xff] }
 0xb65   : > { %v14122_v51 = vrot.slane %v14115_v33, %v24540_v54  ;;  %v16954_v33 = vld [vmem:[%s25073_s9 + $0x68] sm:$0xff] }
 0xb66   : > { %19107 = vmatpush1.bf16.msra.mxu1 %v19106_v1 }
 0xb67   : > { %v14129_v60 = vrot.slane %v14122_v51, %v24540_v54  ;;  %19109 = vmatprep.subr.bf16.mxu1 %v19108_v21  ;;  %v16956_v51 = vld [vmem:[%s25073_s9 + $0x78] sm:$0xff] }
 0xb69   : > { %v14131_v18 = vadd.f32 %v14129_v60, %v14023_v40  ;;  %v14216_v2 = vpop.f32.mrb[26].mxu1  ;;  %v16953_v60 = vld [vmem:[%s25073_s9 + $0x60] sm:$0xff] }
 0xb6a   : > { %v14218_v17 = vpop.f32.mrb[27].mxu1  ;;  %19111 = vmatpush1.bf16.msra.mxu1 %v19110_v10  ;;  %v16977_v10 = vld [vmem:[%s25073_s9 + $0x120] sm:$0xff] }
 0xb6b   : > { %v14223_v9 = vcombine.low %v14216_v2, %v14218_v17  ;;  %v19112_v2 = vpack.c.bf16 %v16956_v51, %v16954_v33  ;;  %v16955_v17 = vld [vmem:[%s25073_s9 + $0x70] sm:$0xff]  ;;  %v16984_v33 = vld [vmem:[%s25073_s9 + $0x158] sm:$0xff] }
 0xb6d   : > { %v14230_v0 = vrot.slane %v14223_v9, %v24540_v54  ;;  %v16958_v9 = vld [vmem:[%s25073_s9 + $0x88] sm:$0xff]  ;;  %19113 = vmatprep.subr.bf16.mxu1 %v19112_v2  ;;  %v16983_v2 = vld [vmem:[%s25073_s9 + $0x150] sm:$0xff] }
 0xb6f   : > { %v14237_v15 = vrot.slane %v14230_v0, %v24540_v54  ;;  %v16960_v0 = vld [vmem:[%s25073_s9 + $0x98] sm:$0xff] }
 0xb71   : > { %v14239_v53 = vadd.f32 %v14237_v15, %v14131_v18  ;;  %v14324_v8 = vpop.f32.mrb[28].mxu1  ;;  %v19114_v15 = vpack.c.bf16 %v16955_v17, %v16953_v60 }
 0xb72   : > { %v14326_v55 = vpop.f32.mrb[29].mxu1 }
 0xb73   : > { %v14331_v42 = vcombine.low %v14324_v8, %v14326_v55  ;;  %v16957_v8 = vld [vmem:[%s25073_s9 + $0x80] sm:$0xff]  ;;  %v16959_v55 = vld [vmem:[%s25073_s9 + $0x90] sm:$0xff]  ;;  %19115 = vmatpush1.bf16.msra.mxu1 %v19114_v15  ;;  %v16986_v15 = vld [vmem:[%s25073_s9 + $0x168] sm:$0xff] }
 0xb75   : > { %v14338_v6 = vrot.slane %v14331_v42, %v24540_v54 }
 0xb77   : > { %v14345_v16 = vrot.slane %v14338_v6, %v24540_v54  ;;  %v19118_v6 = vpack.c.bf16 %v16959_v55, %v16957_v8  ;;  %v16985_v55 = vld [vmem:[%s25073_s9 + $0x160] sm:$0xff] }
 0xb79   : > { %v14347_v28 = vadd.f32 %v14345_v16, %v14239_v53  ;;  %v14432_v7 = vpop.f32.mrb[30].mxu1  ;;  %v19116_v53 = vpack.c.bf16 %v16960_v0, %v16958_v9 }
 0xb7a   : > { %v14434_v36 = vpop.f32.mrb[31].mxu1 }
 0xb7b   : > { %v14439_v37 = vcombine.low %v14432_v7, %v14434_v36  ;;  %19117 = vmatprep.subr.bf16.mxu1 %v19116_v53  ;;  %v16988_v53 = vld [vmem:[%s25073_s9 + $0x178] sm:$0xff] }
 0xb7c   : > { %19119 = vmatpush1.bf16.msra.mxu1 %v19118_v6  ;;  %v19144_v8 = vpack.c.bf16 %v16988_v53, %v16986_v15 }
 0xb7d   : > { %v14446_v46 = vrot.slane %v14439_v37, %v24540_v54  ;;  %v16962_v37 = vld [vmem:[%s25073_s9 + $0xa8] sm:$0xff] }
 0xb7f   : > { %v14453_v61 = vrot.slane %v14446_v46, %v24540_v54  ;;  %v16964_v46 = vld [vmem:[%s25073_s9 + $0xb8] sm:$0xff] }
 0xb81   : > { %v14455_v63 = vadd.f32 %v14453_v61, %v14347_v28  ;;  %v14540_v26 = vpop.f32.mrb[32].mxu1  ;;  %v16961_v61 = vld [vmem:[%s25073_s9 + $0xa0] sm:$0xff] }
 0xb82   : > { %v14542_v58 = vpop.f32.mrb[33].mxu1 }
 0xb83   : > { %v14547_v57 = vcombine.low %v14540_v26, %v14542_v58  ;;  %v19120_v26 = vpack.c.bf16 %v16964_v46, %v16962_v37  ;;  %v16963_v58 = vld [vmem:[%s25073_s9 + $0xb0] sm:$0xff]  ;;  %v16994_v46 = vld [vmem:[%s25073_s9 + $0x1a8] sm:$0xff] }
 0xb84   : > { %v16991_v37 = vld [vmem:[%s25073_s9 + $0x190] sm:$0xff] }
 0xb85   : > { %v14554_v29 = vrot.slane %v14547_v57, %v24540_v54  ;;  %v16966_v57 = vld [vmem:[%s25073_s9 + $0xc8] sm:$0xff]  ;;  %19121 = vmatprep.subr.bf16.mxu1 %v19120_v26 }
 0xb87   : > { %v14561_v20 = vrot.slane %v14554_v29, %v24540_v54  ;;  %v16968_v29 = vld [vmem:[%s25073_s9 + $0xd8] sm:$0xff] }
 0xb89   : > { %v14563_v13 = vadd.f32 %v14561_v20, %v14455_v63  ;;  %v14648_v25 = vpop.f32.mrb[34].mxu1  ;;  %v19122_v20 = vpack.c.bf16 %v16963_v58, %v16961_v61  ;;  %v16996_v61 = vld [vmem:[%s25073_s9 + $0x1b8] sm:$0xff]  ;;  %v16993_v58 = vld [vmem:[%s25073_s9 + $0x1a0] sm:$0xff] }
 0xb8a   : > { %v14650_v3 = vpop.f32.mrb[35].mxu1  ;;  %v19152_v26 = vpack.c.bf16 %v16996_v61, %v16994_v46  ;;  %v17113_v46 = vld [vmem:[%s25075_s11 + $0x78] sm:$0xff] }
 0xb8b   : > { %v14655_v56 = vcombine.low %v14648_v25, %v14650_v3  ;;  %v16965_v25 = vld [vmem:[%s25073_s9 + $0xc0] sm:$0xff]  ;;  %v16967_v3 = vld [vmem:[%s25073_s9 + $0xd0] sm:$0xff]  ;;  %19123 = vmatpush1.bf16.msra.mxu1 %v19122_v20  ;;  %v17000_v20 = vld [vmem:[%s25073_s9 + $0x1d8] sm:$0xff] }
 0xb8c   : > { %v19126_v49 = vpack.c.bf16 %v16967_v3, %v16965_v25  ;;  %v16997_v3 = vld [vmem:[%s25073_s9 + $0x1c0] sm:$0xff] }
 0xb8d   : > { %v14662_v44 = vrot.slane %v14655_v56, %v24540_v54 }
 0xb8f   : > { %v14669_v23 = vrot.slane %v14662_v44, %v24540_v54 }
 0xb91   : > { %v14671_v12 = vadd.f32 %v14669_v23, %v14563_v13  ;;  %v14756_v5 = vpop.f32.mrb[36].mxu1  ;;  %v19124_v13 = vpack.c.bf16 %v16968_v29, %v16966_v57  ;;  %v16969_v23 = vld [vmem:[%s25073_s9 + $0xe0] sm:$0xff]  ;;  %v16995_v57 = vld [vmem:[%s25073_s9 + $0x1b0] sm:$0xff]  ;;  %v16998_v29 = vld [vmem:[%s25073_s9 + $0x1c8] sm:$0xff] }
 0xb92   : > { %v14758_v48 = vpop.f32.mrb[37].mxu1  ;;  %v19154_v25 = vpack.c.bf16 %v16995_v57, %v16993_v58  ;;  %v17114_v58 = vld [vmem:[%s25075_s11 + $0x80] sm:$0xff]  ;;  %v17115_v57 = vld [vmem:[%s25075_s11 + $0x88] sm:$0xff] }
 0xb93   : > { %v14763_v14 = vcombine.low %v14756_v5, %v14758_v48  ;;  %19125 = vmatprep.subr.bf16.mxu1 %v19124_v13  ;;  %v19128_v5 = vpack.c.bf16 %v16972_v32, %v16970_v31  ;;  %v16971_v48 = vld [vmem:[%s25073_s9 + $0xf0] sm:$0xff] }
 0xb94   : > { %19127 = vmatpush1.bf16.msra.mxu1 %v19126_v49  ;;  %v19130_v24 = vpack.c.bf16 %v16971_v48, %v16969_v23  ;;  %v17100_v31 = vld [vmem:[%s25075_s11 + $0x10] sm:$0xff]  ;;  %v17101_v48 = vld [vmem:[%s25075_s11 + $0x18] sm:$0xff] }
 0xb95   : > { %v14770_v39 = vrot.slane %v14763_v14, %v24540_v54  ;;  %v16974_v14 = vld [vmem:[%s25073_s9 + $0x108] sm:$0xff]  ;;  %19129 = vmatprep.subr.bf16.mxu1 %v19128_v5 }
 0xb96   : > { %v19132_v34 = vpack.c.bf16 %v16976_v22, %v16974_v14 }
 0xb97   : > { %v14777_v41 = vrot.slane %v14770_v39, %v24540_v54  ;;  %v16973_v39 = vld [vmem:[%s25073_s9 + $0x100] sm:$0xff] }
 0xb98   : > { %19131 = vmatpush1.bf16.msra.mxu1 %v19130_v24  ;;  %v19134_v43 = vpack.c.bf16 %v16975_v38, %v16973_v39  ;;  %v17102_v38 = vld [vmem:[%s25075_s11 + $0x20] sm:$0xff] }
 0xb99   : > { %v14779_v35 = vadd.f32 %v14777_v41, %v14671_v12  ;;  %v14864_v40 = vpop.f32.mrb[38].mxu1  ;;  %19133 = vmatprep.subr.bf16.mxu1 %v19132_v34  ;;  %v16980_v41 = vld [vmem:[%s25073_s9 + $0x138] sm:$0xff]  ;;  %v19164_v34 = vpack.c.bf16 %v17101_v48, %v17100_v31 }
 0xb9a   : > { %v14866_v27 = vpop.f32.mrb[39].mxu1 }
 0xb9b   : > { %v14871_v4 = vcombine.low %v14864_v40, %v14866_v27  ;;  %v19136_v40 = vpack.c.bf16 %v16980_v41, %v16978_v62  ;;  %v16979_v27 = vld [vmem:[%s25073_s9 + $0x130] sm:$0xff] }
 0xb9c   : > { %19135 = vmatpush1.bf16.msra.mxu1 %v19134_v43  ;;  %v19138_v51 = vpack.c.bf16 %v16979_v27, %v16977_v10  ;;  %v17104_v41 = vld [vmem:[%s25075_s11 + $0x30] sm:$0xff]  ;;  %v17105_v10 = vld [vmem:[%s25075_s11 + $0x38] sm:$0xff] }
 0xb9d   : > { %v14878_v18 = vrot.slane %v14871_v4, %v24540_v54  ;;  %v16982_v4 = vld [vmem:[%s25073_s9 + $0x148] sm:$0xff]  ;;  %19137 = vmatprep.subr.bf16.mxu1 %v19136_v40  ;;  %v19170_v27 = vpack.c.bf16 %v17105_v10, %v17104_v41 }
 0xb9e   : > { %v19140_v60 = vpack.c.bf16 %v16984_v33, %v16982_v4  ;;  %v17106_v4 = vld [vmem:[%s25075_s11 + $0x40] sm:$0xff]  ;;  %v17107_v33 = vld [vmem:[%s25075_s11 + $0x48] sm:$0xff] }
 0xb9f   : > { %v14885_v42 = vrot.slane %v14878_v18, %v24540_v54  ;;  %v16981_v18 = vld [vmem:[%s25073_s9 + $0x140] sm:$0xff] }
 0xba0   : > { %19139 = vmatpush1.bf16.msra.mxu1 %v19138_v51  ;;  %v19142_v9 = vpack.c.bf16 %v16983_v2, %v16981_v18  ;;  %v19173_v2 = vpack.c.bf16 %v17107_v33, %v17106_v4 }
 0xba1   : > { %v14887_v16 = vadd.f32 %v14885_v42, %v14779_v35  ;;  %v14972_v28 = vpop.f32.mrb[40].mxu1  ;;  %19141 = vmatprep.subr.bf16.mxu1 %v19140_v60  ;;  %v16987_v42 = vld [vmem:[%s25073_s9 + $0x170] sm:$0xff] }
 0xba2   : > { %v14974_v7 = vpop.f32.mrb[41].mxu1  ;;  %v19146_v6 = vpack.c.bf16 %v16987_v42, %v16985_v55  ;;  %v17110_v55 = vld [vmem:[%s25075_s11 + $0x60] sm:$0xff]  ;;  %v17111_v42 = vld [vmem:[%s25075_s11 + $0x68] sm:$0xff] }
 0xba3   : > { %v14979_v36 = vcombine.low %v14972_v28, %v14974_v7  ;;  %v16992_v28 = vld [vmem:[%s25073_s9 + $0x198] sm:$0xff]  ;;  %v16989_v7 = vld [vmem:[%s25073_s9 + $0x180] sm:$0xff] }
 0xba4   : > { %19143 = vmatpush1.bf16.msra.mxu1 %v19142_v9  ;;  %v17108_v9 = vld [vmem:[%s25075_s11 + $0x50] sm:$0xff] }
 0xba5   : > { %v14986_v63 = vrot.slane %v14979_v36, %v24540_v54  ;;  %19145 = vmatprep.subr.bf16.mxu1 %v19144_v8 }
 0xba7   : > { %v14993_v56 = vrot.slane %v14986_v63, %v24540_v54  ;;  %v19150_v63 = vpack.c.bf16 %v16991_v37, %v16989_v7  ;;  %v19179_v7 = vpack.c.bf16 %v17111_v42, %v17110_v55  ;;  %v17112_v37 = vld [vmem:[%s25075_s11 + $0x70] sm:$0xff] }
 0xba8   : > { %19147 = vmatpush1.bf16.msra.mxu1 %v19146_v6 }
 0xba9   : > { %v14995_v47 = vadd.f32 %v14993_v56, %v14887_v16  ;;  %v15080_v45 = vpop.f32.mrb[42].mxu1  ;;  %v16990_v16 = vld [vmem:[%s25073_s9 + $0x188] sm:$0xff]  ;;  %v16999_v56 = vld [vmem:[%s25073_s9 + $0x1d0] sm:$0xff] }
 0xbaa   : > { %v15082_v44 = vpop.f32.mrb[43].mxu1  ;;  %v19148_v36 = vpack.c.bf16 %v16992_v28, %v16990_v16  ;;  %v19158_v24 = vpack.c.bf16 %v16999_v56, %v16997_v3 }
 0xbab   : > { %v15087_v50 = vcombine.low %v15080_v45, %v15082_v44  ;;  %v19156_v45 = vpack.c.bf16 %v17000_v20, %v16998_v29  ;;  %v17098_v44 = vld [vmem:[%s25075_s11] sm:$0xff] }
 0xbac   : > { %19149 = vmatprep.subr.bf16.mxu1 %v19148_v36 }
 0xbad   : > { %v15094_v12 = vrot.slane %v15087_v50, %v24540_v54  ;;  %19151 = vmatpush1.bf16.msra.mxu1 %v19150_v63  ;;  %v17099_v50 = vld [vmem:[%s25075_s11 + $0x8] sm:$0xff] }
 0xbae   : > { %19153 = vmatprep.subr.bf16.mxu1 %v19152_v26  ;;  %v19161_v5 = vpack.c.bf16 %v17099_v50, %v17098_v44  ;;  %v19182_v26 = vpack.c.bf16 %v17113_v46, %v17112_v37 }
 0xbaf   : > { %v15101_v52 = vrot.slane %v15094_v12, %v24540_v54  ;;  %v20222_v12 = vmov 0.0|0.0  }
 0xbb0   : > { %19160 = vmatprep.subr.bf16.mxu0 %v20222_v12 }
 0xbb1   : > { %v15103_v19 = vadd.f32 %v15101_v52, %v14995_v47  ;;  %v15188_v1 = vpop.f32.mrb[44].mxu1  ;;  %19155 = vmatpush1.bf16.msra.mxu1 %v19154_v25  ;;  %19162 = vmatpush1.bf16.msra.mxu0 %v19161_v5  ;;  %v17103_v52 = vld [vmem:[%s25075_s11 + $0x28] sm:$0xff]  ;;  %v19185_v25 = vpack.c.bf16 %v17115_v57, %v17114_v58 }
 0xbb2   : > { %v15190_v21 = vpop.f32.mrb[45].mxu1  ;;  %19157 = vmatprep.subr.bf16.mxu1 %v19156_v45  ;;  %19163 = vmatprep.subr.bf16.mxu0 %v20222_v12 }
 0xbb3   : > { %v15195_v30 = vcombine.low %v15188_v1, %v15190_v21 }
 0xbb5   : > { %v15202_v35 = vrot.slane %v15195_v30, %v24540_v54  ;;  %19159 = vmatpush1.bf16.msra.mxu1 %v19158_v24  ;;  %19165 = vmatpush1.bf16.msra.mxu0 %v19164_v34  ;;  %v19167_v30 = vpack.c.bf16 %v17103_v52, %v17102_v38 }
 0xbb6   : > { %19166 = vmatprep.subr.bf16.mxu0 %v20222_v12 }
 0xbb7   : > { %v15209_v17 = vrot.slane %v15202_v35, %v24540_v54 }
 0xbb9   : > { %v15211_v0 = vadd.f32 %v15209_v17, %v15103_v19  ;;  %19168 = vmatpush1.bf16.msra.mxu0 %v19167_v30 }
 0xbba   : > { %19169 = vmatprep.subr.bf16.mxu0 %v20222_v12 }
 0xbbd   : > { %19171 = vmatpush1.bf16.msra.mxu0 %v19170_v27 }
 0xbbe   : > { %19172 = vmatprep.subr.bf16.mxu0 %v20222_v12 }
 0xbc1   : > { %19174 = vmatpush1.bf16.msra.mxu0 %v19173_v2 }
 0xbc2   : > { %19175 = vmatprep.subr.bf16.mxu0 %v20222_v12 }
 0xbc4   : > { %v15296_v13 = vpop.f32.mrb[46].mxu1 }
 0xbc5   : > { %v15298_v49 = vpop.f32.mrb[47].mxu1  ;;  %v16916_v47 = vpop.f32.mrb[16].mxu0 }
 0xbc6   : > { %v15303_v32 = vcombine.low %v15296_v13, %v15298_v49  ;;  %v16918_v23 = vpop.f32.mrb[17].mxu0 }
 0xbc7   : > { %v16923_v14 = vcombine.low %v16916_v47, %v16918_v23 }
 0xbc8   : > { %v15310_v22 = vrot.slane %v15303_v32, %v24540_v54 }
 0xbc9   : > { %v24896_v39 = vrot.slane %v16923_v14, %v24540_v54 }
 0xbca   : > { %v15317_v43 = vrot.slane %v15310_v22, %v24540_v54 }
 0xbcb   : > { %v16937_v19 = vrot.slane %v24896_v39, %v24540_v54  ;;  %v17001_v39 = vld [vmem:[%s25074_s10] sm:$0x3] }
 0xbcc   : > { %v15319_v1 = vadd.f32 %v15317_v43, %v15211_v0  ;;  %v15404_v21 = vpop.f32.mrb[48].mxu1  ;;  %v17109_v0 = vld [vmem:[%s25075_s11 + $0x58] sm:$0xff] }
 0xbcd   : > { %v15406_v62 = vpop.f32.mrb[49].mxu1  ;;  %v19176_v8 = vpack.c.bf16 %v17109_v0, %v17108_v9 }
 0xbce   : > { %v15411_v35 = vcombine.low %v15404_v21, %v15406_v62 }
 0xbcf   : > { %19177 = vmatpush1.bf16.msra.mxu0 %v19176_v8 }
 0xbd0   : > { %v15418_v40 = vrot.slane %v15411_v35, %v24540_v54  ;;  %19178 = vmatprep.subr.bf16.mxu0 %v20222_v12 }
 0xbd2   : > { %v15425_v51 = vrot.slane %v15418_v40, %v24540_v54 }
 0xbd3   : > { %19180 = vmatpush1.bf16.msra.mxu0 %v19179_v7 }
 0xbd4   : > { %v15427_v60 = vadd.f32 %v15425_v51, %v15319_v1  ;;  %v15512_v18 = vpop.f32.mrb[50].mxu1  ;;  %19181 = vmatprep.subr.bf16.mxu0 %v20222_v12 }
 0xbd5   : > { %v15514_v17 = vpop.f32.mrb[51].mxu1 }
 0xbd6   : > { %v15519_v15 = vcombine.low %v15512_v18, %v15514_v17 }
 0xbd7   : > { %19183 = vmatpush1.bf16.msra.mxu0 %v19182_v26 }
 0xbd8   : > { %v15526_v53 = vrot.slane %v15519_v15, %v24540_v54  ;;  %19184 = vmatprep.subr.bf16.mxu0 %v20222_v12 }
 0xbda   : > { %v15533_v6 = vrot.slane %v15526_v53, %v24540_v54 }
 0xbdb   : > { %19186 = vmatpush1.bf16.msra.mxu0 %v19185_v25 }
 0xbdc   : > { %v15535_v16 = vadd.f32 %v15533_v6, %v15427_v60  ;;  %v15620_v28 = vpop.f32.mrb[52].mxu1  ;;  %19187 = vmatprep.subr.bf16.mxu0 %v20222_v12 }
 0xbdd   : > { %v15622_v36 = vpop.f32.mrb[53].mxu1 }
 0xbde   : > { %v15627_v61 = vcombine.low %v15620_v28, %v15622_v36 }
 0xbe0   : > { %v15634_v63 = vrot.slane %v15627_v61, %v24540_v54 }
 0xbe2   : > { %v15641_v29 = vrot.slane %v15634_v63, %v24540_v54 }
 0xbe4   : > { %v15643_v20 = vadd.f32 %v15641_v29, %v15535_v16  ;;  %v15728_v13 = vpop.f32.mrb[54].mxu1 }
 0xbe5   : > { %v15730_v3 = vpop.f32.mrb[55].mxu1 }
 0xbe6   : > { %v15735_v56 = vcombine.low %v15728_v13, %v15730_v3 }
 0xbe8   : > { %v15742_v49 = vrot.slane %v15735_v56, %v24540_v54 }
 0xbea   : > { %v15749_v47 = vrot.slane %v15742_v49, %v24540_v54 }
 0xbec   : > { %v15751_v45 = vadd.f32 %v15749_v47, %v15643_v20  ;;  %v15836_v44 = vpop.f32.mrb[56].mxu1 }
 0xbed   : > { %v15838_v50 = vpop.f32.mrb[57].mxu1 }
 0xbee   : > { %v15843_v31 = vcombine.low %v15836_v44, %v15838_v50 }
 0xbf0   : > { %v15850_v32 = vrot.slane %v15843_v31, %v24540_v54 }
 0xbf2   : > { %v15857_v23 = vrot.slane %v15850_v32, %v24540_v54  ;;  %v17009_v32 = vsub.s32 1, %v24523_v59 }
 0xbf4   : > { %v15859_v5 = vadd.f32 %v15857_v23, %v15751_v45  ;;  %v15944_v48 = vpop.f32.mrb[58].mxu1  ;;  %v17005_v23 = vsub.s32 0, %v24523_v59  ;;  %v17118_v59 = vld [vmem:[%s25075_s11 + $0xa0] sm:$0xff] }
 0xbf5   : > { %v15946_v14 = vpop.f32.mrb[59].mxu1 }
 0xbf6   : > { %v15951_v22 = vcombine.low %v15944_v48, %v15946_v14 }
 0xbf8   : > { %v15958_v24 = vrot.slane %v15951_v22, %v24540_v54  ;;  %v17116_v22 = vld [vmem:[%s25075_s11 + $0x90] sm:$0xff] }
 0xbfa   : > { %v15965_v34 = vrot.slane %v15958_v24, %v24540_v54  ;;  %v17117_v24 = vld [vmem:[%s25075_s11 + $0x98] sm:$0xff] }
 0xbfc   : > { %v15967_v38 = vadd.f32 %v15965_v34, %v15859_v5  ;;  %v16052_v52 = vpop.f32.mrb[60].mxu1  ;;  %v17020_v34 = vrot.slane %v17001_v39, %v17009_v32 }
 0xbfd   : > { %v16054_v43 = vpop.f32.mrb[61].mxu1 }
 0xbfe   : > { %v16059_v1 = vcombine.low %v16052_v52, %v16054_v43 }
 0xc00   : > { %v16066_v21 = vrot.slane %v16059_v1, %v24540_v54  ;;  %v17194_v1 = vld [vmem:[%s25077_s13] sm:$0xff] }
 0xc02   : > { %v16073_v30 = vrot.slane %v16066_v21, %v24540_v54  ;;  %v17195_v21 = vld [vmem:[%s25077_s13 + $0x8] sm:$0xff] }
 0xc04   : > { %v16075_v62 = vadd.f32 %v16073_v30, %v15967_v38  ;;  %v16160_v41 = vpop.f32.mrb[62].mxu1 }
 0xc05   : > { %v16162_v10 = vpop.f32.mrb[63].mxu1 }
 0xc06   : > { %v16167_v35 = vcombine.low %v16160_v41, %v16162_v10  ;;  %v17196_v10 = vld [vmem:[%s25077_s13 + $0x10] sm:$0xf] }
 0xc08   : > { %v16174_v40 = vrot.slane %v16167_v35, %v24540_v54  ;;  %v17119_v35 = vld [vmem:[%s25076_s12] sm:$0x1] }
 0xc0a   : > { %v16181_v27 = vrot.slane %v16174_v40, %v24540_v54 }
 0xc0c   : > { %v16183_v4 = vadd.f32 %v16181_v27, %v16075_v62  ;;  %v16268_v33 = vpop.f32.mrb[64].mxu1  ;;  %v19191_v62 = vpack.c.bf16 %v17195_v21, %v17194_v1 }
 0xc0d   : > { %v16270_v51 = vpop.f32.mrb[65].mxu1 }
 0xc0e   : > { %v16275_v60 = vcombine.low %v16268_v33, %v16270_v51  ;;  %v17197_v33 = vld [vmem:[%s25078_s14] sm:$0x1] }
 0xc10   : > { %v16282_v18 = vrot.slane %v16275_v60, %v24540_v54 }
 0xc12   : > { %v16289_v2 = vrot.slane %v16282_v18, %v24540_v54 }
 0xc14   : > { %v16291_v17 = vadd.f32 %v16289_v2, %v16183_v4  ;;  %v16376_v9 = vpop.f32.mrb[66].mxu1 }
 0xc15   : > { %v16378_v0 = vpop.f32.mrb[67].mxu1 }
 0xc16   : > { %v16383_v15 = vcombine.low %v16376_v9, %v16378_v0 }
 0xc18   : > { %v16390_v53 = vrot.slane %v16383_v15, %v24540_v54 }
 0xc1a   : > { %v16397_v8 = vrot.slane %v16390_v53, %v24540_v54 }
 0xc1c   : > { %v16399_v55 = vadd.f32 %v16397_v8, %v16291_v17  ;;  %v16484_v42 = vpop.f32.mrb[68].mxu1 }
 0xc1d   : > { %v16486_v6 = vpop.f32.mrb[69].mxu1 }
 0xc1e   : > { %v16491_v16 = vcombine.low %v16484_v42, %v16486_v6 }
 0xc20   : > { %v16498_v28 = vrot.slane %v16491_v16, %v24540_v54 }
 0xc22   : > { %v16505_v7 = vrot.slane %v16498_v28, %v24540_v54 }
 0xc24   : > { %v16507_v36 = vadd.f32 %v16505_v7, %v16399_v55  ;;  %v16592_v37 = vpop.f32.mrb[70].mxu1 }
 0xc25   : > { %v16594_v46 = vpop.f32.mrb[71].mxu1 }
 0xc26   : > { %v16599_v61 = vcombine.low %v16592_v37, %v16594_v46 }
 0xc28   : > { %v16606_v63 = vrot.slane %v16599_v61, %v24540_v54 }
 0xc2a   : > { %v16613_v26 = vrot.slane %v16606_v63, %v24540_v54 }
 0xc2c   : > { %v16615_v58 = vadd.f32 %v16613_v26, %v16507_v36  ;;  %v16700_v57 = vpop.f32.mrb[72].mxu1 }
 0xc2d   : > { %v16702_v29 = vpop.f32.mrb[73].mxu1 }
 0xc2e   : > { %v16707_v20 = vcombine.low %v16700_v57, %v16702_v29 }
 0xc30   : > { %v16714_v13 = vrot.slane %v16707_v20, %v24540_v54 }
 0xc32   : > { %v16721_v25 = vrot.slane %v16714_v13, %v24540_v54 }
 0xc34   : > { %v16723_v3 = vadd.f32 %v16721_v25, %v16615_v58  ;;  %v16808_v56 = vpop.f32.mrb[74].mxu1 }
 0xc35   : > { %v16810_v49 = vpop.f32.mrb[75].mxu1 }
 0xc36   : > { %v16815_v47 = vcombine.low %v16808_v56, %v16810_v49 }
 0xc38   : > { %v16822_v45 = vrot.slane %v16815_v47, %v24540_v54 }
 0xc3a   : > { %v16829_v44 = vrot.slane %v16822_v45, %v24540_v54  ;;  %v19188_v54 = vpack.c.bf16 %v17117_v24, %v17116_v22 }
 0xc3c   : > { %v16831_v50 = vadd.f32 %v16829_v44, %v16723_v3  ;;  %19189 = vmatpush1.bf16.msra.mxu0 %v19188_v54 }
 0xc3d   : > { %17164 = vmatprep.subr.mxu0 %v25142_v11 }
 0xc3e   : > { %v16939_v31 = vadd.f32 %v16937_v19, %v16831_v50  ;;  %v17016_v19 = vrot.slane %v17001_v39, %v17005_v23 }
 0xc40   : > { %v16940_v5 = vmax.f32 %v16939_v31, 0.0  ;;  %17165 = vmatpush1.msra.mxu0 %v17118_v59 }
 0xc41   : > { %19190 = vmatprep.subr.bf16.mxu0 %v20222_v12 }
 0xc42   : > { %v17010_v48 = vrot.slane %v16940_v5, %v17009_v32  ;;  %v17006_v14 = vrot.slane %v16940_v5, %v17005_v23 }
 0xc44   : > { %18149 = vmatprep.mubr.msk.f32.mxu1 %vm10929_vm4, %v17010_v48  ;;  %vm17202_vm4 = vcmask 1043456  }
 0xc45   : > { %17090 = vmatmul.mubr.f32.vlgmr.msra.gmra.mrb[76].mxu1 %v17006_v14 }
 0xd18   : > { %v17091_v38 = vpop.f32.mrb[76].mxu1 }
 0xd19   : > { %v17092_v52 = vadd.f32 %v17091_v38, %v17016_v19  ;;  %v17093_v43 = vpop.f32.mrb[77].mxu1 }
 0xd1a   : > { %v17094_v30 = vadd.f32 %v17093_v43, %v17020_v34 }
 0xd1b   : > { %v17096_v41 = vmax.f32 %v17092_v52, 0.0 }
 0xd1c   : > { %v17097_v12 = vmax.f32 %v17094_v30, 0.0 }
 0xd1e   : > { %18150 = vmatprep.mubr.msk.f32.mxu0 %vm17120_vm2, %v17097_v12 }
 0xd1f   : > { %17189 = vmatmul.mubr.f32.vlgmr.msra.gmra.mrb[18].mxu0 %v17096_v41 }
 0xd20   : > { %19192 = vmatpush3.bf16.msra.mxu0 %v19191_v62  ;;  %18425 = vmatprep.mubr.msk.f32.mxu0 %vm20223_vm5, %v25142_v11 }
 0xd21   : > { %18423 = vmatprep.subr.mxu0 %v25142_v11 }
 0xd24   : > { %18424 = vmatpush3.msk.msra.mxu0 %vm17202_vm4, %v17196_v10 }
 0xdf2   : > { %v17190_v40 = vpop.f32.mrb[18].mxu0 }
 0xdf3   : > { %v17191_v27 = vadd.f32 %v17190_v40, %v17119_v35  ;;  %v17192_v4 = vpop.f32.mrb[19].mxu0 }
 0xdf5   : > { %18426 = vmatmul.mubr.msk.f32.vlgmr.msra.gmra.mrb[20].mxu0 %vm17198_vm1, %v17191_v27 }
 0xec8   : > { %v17272_v51 = vpop.f32.mrb[20].mxu0 }
 0xec9   : > { %v17273_v11 = vadd.f32 %v17272_v51, %v17197_v33  ;;  %v18427_v60 = vpop.f32.mrb[21].mxu0 }
 0xecb   : > { %17277 = vst.msk [vmem:[%s486_s0] sm:$0x1] %vm17276_vm11, %v17273_v11 }
 0xecc   : > { %20129 = shalt.err (!%p20126_p3)
}
 0xecd   : > { %s20130_s1 = scalar_lea.hbm %s25022_s24, 16  ;;  %s20134_s21 = scalar_lea.hbm %s25079_s15, 32 }
 0xece   : > { %p20131_p4 = scmp.ne.s32.totalorder %s25022_s24, %s20130_s1  ;;  %p20135_p9 = scmp.lt.u32.totalorder %s25022_s24, %s25079_s15 }
 0xecf   : > { %p20136_p10 = scmp.lt.u32.totalorder %s20134_s21, %s20130_s1  ;;  %p20138_p12 = scmp.lt.u32.totalorder %s20130_s1, %s25022_s24 }
 0xed0   : > { %p20132_p7 = pnand %p20131_p4, %p20343_p5 }
 0xed1   : > { %p20137_p11 = por %p20136_p10, %p20135_p9 }
 0xed2   : > { %p20133_p8 = pneg %p20132_p7 }
 0xed3   : > { %p20139_p13 = por %p20138_p12, %p20137_p11 }
 0xed5   : > { %p20140_p0 = pnand %p20139_p13, %p20133_p8 }
 0xed7   : > { %20143 = shalt.err (!%p20140_p0)
}
 0xed8   : > { %19733 = dma.vmem_to_hbm [thread:$0]  (%p20343_p5), %s25024_s17, 16, %s25022_s24, %s17279_s23  }
 0xed9 PF: > { %s25156_s0 = sld [smem:[#allocation7_spill]]  ;;  %s25157_s18 = sld [smem:[#allocation5_spill]] }
 0xedf   : > { %p19739_p1 = scmp.ge.s32.totalorder %s25156_s0, 2  ;;  %s17303_s25 = sand.u32 1, %s25157_s18  }
 0xee0   : > { %s17304_s22 = scalar_lea.sflag [#allocation3], %s17303_s25 }
 0xee1   : > { %p19736_p2 = pnand %p19739_p1, %p20347_p6 }
 0xee3   : > { %20161 = dma.done.wait (!%p19736_p2), %s17304_s22, 16  }
 0xee4   : > { %20163 = vsyncadd (!%p19736_p2), %s17304_s22, 4294967280  ;;  %s25159_s21 = sld [smem:[#allocation8_spill]]  ;;  %s25160_s30 = sld [smem:[#allocation6_spill]] }
 0xee5   : > { %s25161_s20 = sld [smem:[#allocation9_spill]]  ;;  %s25162_s18 = smov %s20170_s19 }
 0xeea   : > { %p25_p3 = scmp.ge.s32.totalorder %s25159_s21, 4   ;;  %s25163_s19 = smov %s25160_s30 }
 0xeec   :  { %27 = sbr.rel (!%p25_p3) target bundleno = 7 (0x7), region = 194 }
 0xef3   :  { %17308 = vsyncpa [#allocation3], 1 }
 0xef4   :  { %17310 = vsyncpa [#allocation3 + $0x1], 1 }

</bundles_post_ra>
